<compile_context>
chip_gen: v6e
topology: v6e:2x2x1
jax: 0.10.0
libtpu: 0.0.40
codegen_flags: <defaults>
</compile_context>

<pallas_src>
import functools

import numpy as np
import jax
import jax.numpy as jnp
from jax.experimental import pallas as pl
from jax.experimental.pallas import tpu as pltpu


# ------------------------------- fused kernel ---------------------------------

def _fused_kernel(x_ref, cw1_ref, cwr_ref, cb_ref, sw_ref, sb_ref,
                  wih_ref, whh_ref, lb_ref, o_ref, hs_ref):
    """Whole RewardPredictor forward for a (B, 65*64) flattened 64x64 input.

    Layout invariant: every conv activation is stored flattened per image as
    (B, (rows + 1) * row_lanes) with row 0 an all-zero top-padding row
    (row_lanes = 64 for the input image, 128 for every later layer).  Output
    row io of a stride-2 conv reads only input rows 2io-1..2io+1, i.e. the
    contiguous lane slice [2*io*row_lanes, 2*io*row_lanes + 3*row_lanes).
    """
    f32, bf16 = jnp.float32, jnp.bfloat16
    B = x_ref.shape[0]
    num_heads = o_ref.shape[1]

    # ---- conv 1: 64x64x1 -> 32x32x4 (row-band matmuls, 64-lane input rows) ----
    x = x_ref[...]                                        # (B, 65*64) bf16
    w1, b1 = cw1_ref[...], cb_ref[0]
    rows = [jnp.zeros((B, 128), bf16)]                    # zero pad row for conv 2
    for io in range(32):
        xin = x[:, io * 128: io * 128 + 192]              # input rows 2io..2io+2
        y = jnp.dot(xin, w1, preferred_element_type=f32) + b1
        rows.append(jnp.maximum(y, 0.0).astype(bf16))
    act = jnp.concatenate(rows, axis=1)                   # (B, 33*128)

    # ---- conv 2..5 (every row is 128 lanes, bands are (384, 128)) -------------
    n_rows = 16
    for l in range(4):
        wl, bl = cwr_ref[l], cb_ref[l + 1]
        rows = [jnp.zeros((B, 128), bf16)]
        for io in range(n_rows):
            xin = act[:, 2 * io * 128: 2 * io * 128 + 384]
            y = jnp.dot(xin, wl, preferred_element_type=f32) + bl
            rows.append(jnp.maximum(y, 0.0).astype(bf16))
        act = jnp.concatenate(rows, axis=1)
        n_rows //= 2

    # ---- conv 6: 2x2x64 -> 1x1x128 == flattened encoder conv features --------
    feat = jnp.maximum(
        jnp.dot(act[:, 0:384], cwr_ref[4], preferred_element_type=f32) + cb_ref[5],
        0.0)                                               # (B, 128) f32

    # ---- encoder.fc -> MLP (activations carried 128-lane zero-padded) --------
    def dense(h, k, relu):
        y = jnp.dot(h.astype(bf16), sw_ref[k], preferred_element_type=f32) + sb_ref[k]
        return jnp.maximum(y, 0.0) if relu else y

    h = dense(feat, 0, False)      # encoder.fc
    h = dense(h, 1, True)          # mlp Linear + ReLU
    h = dense(h, 2, True)          # mlp Linear + ReLU
    h = dense(h, 3, False)         # mlp Linear           (B, 128), lanes >= 64 are 0

    # ---- LSTM (PyTorch treats the 2-D input as (seq = B, feat)) ---------------
    # Input projection hoisted out of the recurrence; hidden lane-padded to 128.
    # Padded-lane invariant: wih/whh/lb are zero in the padded gate columns and
    # whh is zero in the padded hidden rows, so the padded lanes of c_t / h_t stay
    # exactly 0 and never leak into the heads (hw1's padded rows are also zero).
    Hp = 128
    gates_x = jnp.dot(h.astype(bf16), wih_ref[...],
                      preferred_element_type=f32) + lb_ref[...]      # (B, 4*Hp)
    whh = whh_ref[...]
    h_t = jnp.zeros((1, Hp), f32)
    c_t = jnp.zeros((1, Hp), f32)
    for t in range(B):             # short fixed trip count: fully unrolled
        g = gates_x[t:t + 1, :] + jnp.dot(h_t.astype(bf16), whh,
                                          preferred_element_type=f32)
        i_g = jax.nn.sigmoid(g[:, 0:Hp])
        f_g = jax.nn.sigmoid(g[:, Hp:2 * Hp])
        g_g = jnp.tanh(g[:, 2 * Hp:3 * Hp])
        o_g = jax.nn.sigmoid(g[:, 3 * Hp:4 * Hp])
        c_t = f_g * c_t + i_g * g_g
        h_t = o_g * jnp.tanh(c_t)
        hs_ref[t:t + 1, :] = h_t                           # VMEM scratch row store

    # ---- reward heads (all heads batched into lane-dense matmuls) ------------
    z = dense(hs_ref[...], 4, True)    # heads layer 1 (outputs concatenated)
    z = dense(z, 5, True)              # heads layer 2 (block-diagonal)
    z = dense(z, 6, False)             # heads layer 3 (block-diagonal)
    o_ref[...] = z[:, 0:num_heads]


@functools.partial(jax.jit, static_argnames=("num_heads",))
def reward_predictor_forward(prepared, x, *, num_heads):
    """x: (B, 1, 64, 64) NCHW.  Returns (num_heads, B) like the PyTorch module."""
    B, _, Hs, Ws = x.shape
    x2 = x.reshape(B, Hs * Ws).astype(jnp.bfloat16)
    x2 = jnp.pad(x2, ((0, 0), (Ws, 0)))                    # prepend one zero pad row
    out = pl.pallas_call(
        _fused_kernel,
        out_shape=jax.ShapeDtypeStruct((B, num_heads), jnp.float32),
        scratch_shapes=[pltpu.VMEM((B, 128), jnp.float32)],   # LSTM hidden states
    )(x2, prepared["cw1"], prepared["cwr"], prepared["cb"],
      prepared["sw"], prepared["sb"],
      prepared["wih"], prepared["whh"], prepared["lb"])
    return out.T


# ------------------- parameter preparation (done once, on host) ----------------

def prepare_params(params):
    bf16, f32 = jnp.bfloat16, jnp.float32
    asnp = lambda a: np.asarray(a, np.float32)

    # ---- conv layers as banded row matrices -----------------------------------
    # band[(ki, w_in, ci), (jo, co)] = W[co, ci, ki, kj] with w_in = 2*jo + kj - 1
    def band_matrix(w, S):
        cout, cin = w.shape[0], w.shape[1]
        wout, rl = S // 2, S * cin
        band = np.zeros((3 * rl, wout * cout), np.float32)
        for ki in range(3):
            for kj in range(3):
                for jo in range(wout):
                    wi = 2 * jo + kj - 1
                    if 0 <= wi < S:
                        band[ki * rl + wi * cin: ki * rl + (wi + 1) * cin,
                             jo * cout:(jo + 1) * cout] = w[:, :, ki, kj].T
        return band

    spatial = [64, 32, 16, 8, 4, 2]
    conv_ws = [asnp(w) for (w, _) in params["conv"]]
    conv_bs = [asnp(b) for (_, b) in params["conv"]]
    bands = [band_matrix(w, s) for w, s in zip(conv_ws, spatial)]
    cw1 = jnp.asarray(bands[0], bf16)                              # (192, 128)
    cwr = jnp.asarray(np.stack(bands[1:]), bf16)                   # (5, 384, 128)
    cb = jnp.asarray(np.stack([np.tile(b, s // 2)[None, :]
                               for b, s in zip(conv_bs, spatial)]), f32)  # (6,1,128)

    # ---- tail: fc + MLP + heads packed as 128x128 slabs ------------------------
    def pad2(m):
        out = np.zeros((128, 128), np.float32)
        m = np.asarray(m, np.float32)
        out[:m.shape[0], :m.shape[1]] = m
        return out

    def pad1(v):
        out = np.zeros((1, 128), np.float32)
        v = np.asarray(v, np.float32).reshape(-1)
        out[0, :v.shape[0]] = v
        return out

    fc_w, fc_b = params["fc"]
    (m1w, m1b), (m2w, m2b), (m3w, m3b) = params["mlp"]

    nh = len(params["heads"])
    assert nh * 32 <= 128, "head batching assumes num_heads <= 4"
    hw1 = np.concatenate([asnp(h[0][0]).T for h in params["heads"]], axis=1)
    hb1 = np.concatenate([asnp(h[0][1]) for h in params["heads"]])
    hw2 = np.zeros((32 * nh, 32 * nh), np.float32)
    hw3 = np.zeros((32 * nh, nh), np.float32)
    for n, head in enumerate(params["heads"]):
        hw2[32 * n:32 * n + 32, 32 * n:32 * n + 32] = asnp(head[1][0]).T
        hw3[32 * n:32 * n + 32, n:n + 1] = asnp(head[2][0]).T
    hb2 = np.concatenate([asnp(h[1][1]) for h in params["heads"]])
    hb3 = np.concatenate([asnp(h[2][1]) for h in params["heads"]])

    sw = jnp.asarray(np.stack([pad2(asnp(fc_w).T), pad2(asnp(m1w).T),
                               pad2(asnp(m2w).T), pad2(asnp(m3w).T),
                               pad2(hw1), pad2(hw2), pad2(hw3)]), bf16)   # (7,128,128)
    sb = jnp.asarray(np.stack([pad1(fc_b), pad1(m1b), pad1(m2b), pad1(m3b),
                               pad1(hb1), pad1(hb2), pad1(hb3)]), f32)    # (7,1,128)

    # ---- LSTM: gate columns padded to 128 each, input/hidden rows padded to 128
    w_ih, w_hh, b_ih, b_hh = params["lstm"]
    H, Hp = int(w_hh.shape[1]), 128
    assert H <= Hp

    def pad_gate_cols(m):          # (rows, 4H) -> (rows, 4*Hp), zero padding
        m = np.asarray(m, np.float32)
        parts = [np.pad(m[:, g * H:(g + 1) * H], ((0, 0), (0, Hp - H)))
                 for g in range(4)]
        return np.concatenate(parts, axis=1)

    wih = pad_gate_cols(asnp(w_ih).T)
    wih = np.pad(wih, ((0, Hp - wih.shape[0]), (0, 0)))            # (128, 512)
    whh = np.pad(pad_gate_cols(asnp(w_hh).T), ((0, Hp - H), (0, 0)))  # (128, 512)
    lb = pad_gate_cols((asnp(b_ih) + asnp(b_hh)).reshape(1, 4 * H))   # (1, 512)

    return {"cw1": cw1, "cwr": cwr, "cb": cb, "sw": sw, "sb": sb,
            "wih": jnp.asarray(wih, bf16), "whh": jnp.asarray(whh, bf16),
            "lb": jnp.asarray(lb, f32)}


# -------------------------- deterministic parameters ---------------------------

def init_params(key, hidden_dim=64, num_heads=1):
    chans = [1, 4, 8, 16, 32, 64, 128]
    keys = iter(jax.random.split(key, 64))

    def kaiming(k, shape, fan_in):
        return jax.random.normal(k, shape, jnp.float32) * jnp.sqrt(2.0 / fan_in)

    params = {"conv": [], "mlp": [], "heads": []}
    for cin, cout in zip(chans[:-1], chans[1:]):
        params["conv"].append((kaiming(next(keys), (cout, cin, 3, 3), cin * 9),
                               jnp.zeros((cout,), jnp.float32)))
    params["fc"] = (kaiming(next(keys), (hidden_dim, 128), 128),
                    jnp.zeros((hidden_dim,), jnp.float32))
    for din, dout in [(hidden_dim, 32), (32, 32), (32, hidden_dim)]:
        params["mlp"].append((kaiming(next(keys), (dout, din), din),
                              jnp.zeros((dout,), jnp.float32)))
    H = hidden_dim
    s = 1.0 / jnp.sqrt(jnp.float32(H))
    params["lstm"] = (
        jax.random.uniform(next(keys), (4 * H, hidden_dim), jnp.float32, -s, s),
        jax.random.uniform(next(keys), (4 * H, H), jnp.float32, -s, s),
        jax.random.uniform(next(keys), (4 * H,), jnp.float32, -s, s),
        jax.random.uniform(next(keys), (4 * H,), jnp.float32, -s, s),
    )
    for _ in range(num_heads):
        head = []
        for din, dout in [(hidden_dim, 32), (32, 32), (32, 1)]:
            head.append((kaiming(next(keys), (dout, din), din),
                         jnp.zeros((dout,), jnp.float32)))
        params["heads"].append(head)
    return params


# ------------------------------ pure-JAX reference ------------------------------

def reference_forward(params, x):
    h = x
    for (w, b) in params["conv"]:
        h = jax.lax.conv_general_dilated(h, w, window_strides=(2, 2),
                                         padding=((1, 1), (1, 1)),
                                         dimension_numbers=("NCHW", "OIHW", "NCHW"))
        h = jnp.maximum(h + b.reshape(1, -1, 1, 1), 0.0)
    h = h.reshape(h.shape[0], -1)
    fc_w, fc_b = params["fc"]
    h = h @ fc_w.T + fc_b
    for i, (w, b) in enumerate(params["mlp"]):
        h = h @ w.T + b
        if i < 2:
            h = jnp.maximum(h, 0.0)
    w_ih, w_hh, b_ih, b_hh = params["lstm"]
    H = w_hh.shape[1]

    def step(carry, x_t):
        hh, cc = carry
        g = x_t @ w_ih.T + hh @ w_hh.T + b_ih + b_hh
        i = jax.nn.sigmoid(g[0:H]); f = jax.nn.sigmoid(g[H:2 * H])
        gg = jnp.tanh(g[2 * H:3 * H]); o = jax.nn.sigmoid(g[3 * H:4 * H])
        cc = f * cc + i * gg
        hh = o * jnp.tanh(cc)
        return (hh, cc), hh

    _, hs = jax.lax.scan(step, (jnp.zeros(H), jnp.zeros(H)), h)
    h = hs
    outs = []
    for head in params["heads"]:
        z = h
        for i, (w, b) in enumerate(head):
            z = z @ w.T + b
            if i < 2:
                z = jnp.maximum(z, 0.0)
        outs.append(z)
    return jnp.stack(outs).squeeze(-1)


# ----------------------------------- main ---------------------------------------

if __name__ == "__main__":
    key = jax.random.PRNGKey(0)
    pkey, xkey = jax.random.split(key)
    hidden_dim, num_heads = 64, 1
    params = init_params(pkey, hidden_dim=hidden_dim, num_heads=num_heads)
    prepared = prepare_params(params)

    # encoder.fc expects 128 flattened features -> spatial must be 64x64
    # (six stride-2 convs: 64 -> 1).  Small batch; PyTorch-style NCHW input.
    B = 4
    x = jax.random.normal(xkey, (B, 1, 64, 64), jnp.float32)

    out = jax.block_until_ready(
        reward_predictor_forward(prepared, x, num_heads=num_heads))
    ref = jax.block_until_ready(reference_forward(params, x))

    assert out.shape == (num_heads, B), out.shape
    # tolerance accounts for bf16 MXU inputs (image, conv bands, tail weights)
    assert jnp.allclose(out, ref, rtol=3e-2, atol=3e-2), (out, ref)
    print("KERNEL_OK")
</pallas_src>

<mosaic_0001>
module attributes {stable_mosaic.version = 11 : i64} {
  func.func @_fused_kernel(%arg0: memref<4x4160xbf16, #tpu.memory_space<vmem>>, %arg1: memref<192x128xbf16, #tpu.memory_space<vmem>>, %arg2: memref<5x384x128xbf16, #tpu.memory_space<vmem>>, %arg3: memref<6x1x128xf32, #tpu.memory_space<vmem>>, %arg4: memref<7x128x128xbf16, #tpu.memory_space<vmem>>, %arg5: memref<7x1x128xf32, #tpu.memory_space<vmem>>, %arg6: memref<128x512xbf16, #tpu.memory_space<vmem>>, %arg7: memref<128x512xbf16, #tpu.memory_space<vmem>>, %arg8: memref<1x512xf32, #tpu.memory_space<vmem>>, %arg9: memref<4x1xf32, #tpu.memory_space<vmem>>, %arg10: memref<4x128xf32, #tpu.memory_space<vmem>>) attributes {dimension_semantics = [], scalar_prefetch = 0 : i64, scratch_operands = 1 : i64, tpu.core_type = #tpu.core_type<tc>} {
    %c0 = arith.constant 0 : index
    %c0_0 = arith.constant 0 : index
    %0 = vector.load %arg0[%c0, %c0_0] : memref<4x4160xbf16, #tpu.memory_space<vmem>>, vector<4x4160xbf16>
    %c0_1 = arith.constant 0 : index
    %c0_2 = arith.constant 0 : index
    %1 = vector.load %arg1[%c0_1, %c0_2] : memref<192x128xbf16, #tpu.memory_space<vmem>>, vector<192x128xbf16>
    %c0_3 = arith.constant 0 : index
    %c0_4 = arith.constant 0 : index
    %c0_5 = arith.constant 0 : index
    %2 = vector.load %arg3[%c0_3, %c0_4, %c0_5] : memref<6x1x128xf32, #tpu.memory_space<vmem>>, vector<1x1x128xf32>
    %3 = vector.shape_cast %2 : vector<1x1x128xf32> to vector<1x128xf32>
    %cst = arith.constant 0.000000e+00 : bf16
    %4 = vector.broadcast %cst : bf16 to vector<4x128xbf16>
    %5 = vector.extract_strided_slice %0 {offsets = [0, 0], sizes = [4, 192], strides = [1, 1]} : vector<4x4160xbf16> to vector<4x192xbf16>
    %cst_6 = arith.constant dense<0.000000e+00> : vector<4x128xf32>
    %6 = tpu.matmul %5, %1, %cst_6 {dimension_numbers = #tpu.dot_dimension_numbers<[1], [0], [0], [1], [0, 0, 1, 1], [], []>} : vector<4x192xbf16>, vector<192x128xbf16>, vector<4x128xf32> -> vector<4x128xf32>
    %7 = vector.broadcast %3 : vector<1x128xf32> to vector<4x128xf32>
    %8 = arith.addf %6, %7 : vector<4x128xf32>
    %cst_7 = arith.constant 0.000000e+00 : f32
    %9 = vector.broadcast %cst_7 : f32 to vector<4x128xf32>
    %10 = arith.maximumf %8, %9 : vector<4x128xf32>
    %11 = arith.truncf %10 : vector<4x128xf32> to vector<4x128xbf16>
    %12 = vector.extract_strided_slice %0 {offsets = [0, 128], sizes = [4, 192], strides = [1, 1]} : vector<4x4160xbf16> to vector<4x192xbf16>
    %cst_8 = arith.constant dense<0.000000e+00> : vector<4x128xf32>
    %13 = tpu.matmul %12, %1, %cst_8 {dimension_numbers = #tpu.dot_dimension_numbers<[1], [0], [0], [1], [0, 0, 1, 1], [], []>} : vector<4x192xbf16>, vector<192x128xbf16>, vector<4x128xf32> -> vector<4x128xf32>
    %14 = vector.broadcast %3 : vector<1x128xf32> to vector<4x128xf32>
    %15 = arith.addf %13, %14 : vector<4x128xf32>
    %cst_9 = arith.constant 0.000000e+00 : f32
    %16 = vector.broadcast %cst_9 : f32 to vector<4x128xf32>
    %17 = arith.maximumf %15, %16 : vector<4x128xf32>
    %18 = arith.truncf %17 : vector<4x128xf32> to vector<4x128xbf16>
    %19 = vector.extract_strided_slice %0 {offsets = [0, 256], sizes = [4, 192], strides = [1, 1]} : vector<4x4160xbf16> to vector<4x192xbf16>
    %cst_10 = arith.constant dense<0.000000e+00> : vector<4x128xf32>
    %20 = tpu.matmul %19, %1, %cst_10 {dimension_numbers = #tpu.dot_dimension_numbers<[1], [0], [0], [1], [0, 0, 1, 1], [], []>} : vector<4x192xbf16>, vector<192x128xbf16>, vector<4x128xf32> -> vector<4x128xf32>
    %21 = vector.broadcast %3 : vector<1x128xf32> to vector<4x128xf32>
    %22 = arith.addf %20, %21 : vector<4x128xf32>
    %cst_11 = arith.constant 0.000000e+00 : f32
    %23 = vector.broadcast %cst_11 : f32 to vector<4x128xf32>
    %24 = arith.maximumf %22, %23 : vector<4x128xf32>
    %25 = arith.truncf %24 : vector<4x128xf32> to vector<4x128xbf16>
    %26 = vector.extract_strided_slice %0 {offsets = [0, 384], sizes = [4, 192], strides = [1, 1]} : vector<4x4160xbf16> to vector<4x192xbf16>
    %cst_12 = arith.constant dense<0.000000e+00> : vector<4x128xf32>
    %27 = tpu.matmul %26, %1, %cst_12 {dimension_numbers = #tpu.dot_dimension_numbers<[1], [0], [0], [1], [0, 0, 1, 1], [], []>} : vector<4x192xbf16>, vector<192x128xbf16>, vector<4x128xf32> -> vector<4x128xf32>
    %28 = vector.broadcast %3 : vector<1x128xf32> to vector<4x128xf32>
    %29 = arith.addf %27, %28 : vector<4x128xf32>
    %cst_13 = arith.constant 0.000000e+00 : f32
    %30 = vector.broadcast %cst_13 : f32 to vector<4x128xf32>
    %31 = arith.maximumf %29, %30 : vector<4x128xf32>
    %32 = arith.truncf %31 : vector<4x128xf32> to vector<4x128xbf16>
    %33 = vector.extract_strided_slice %0 {offsets = [0, 512], sizes = [4, 192], strides = [1, 1]} : vector<4x4160xbf16> to vector<4x192xbf16>
    %cst_14 = arith.constant dense<0.000000e+00> : vector<4x128xf32>
    %34 = tpu.matmul %33, %1, %cst_14 {dimension_numbers = #tpu.dot_dimension_numbers<[1], [0], [0], [1], [0, 0, 1, 1], [], []>} : vector<4x192xbf16>, vector<192x128xbf16>, vector<4x128xf32> -> vector<4x128xf32>
    %35 = vector.broadcast %3 : vector<1x128xf32> to vector<4x128xf32>
    %36 = arith.addf %34, %35 : vector<4x128xf32>
    %cst_15 = arith.constant 0.000000e+00 : f32
    %37 = vector.broadcast %cst_15 : f32 to vector<4x128xf32>
    %38 = arith.maximumf %36, %37 : vector<4x128xf32>
    %39 = arith.truncf %38 : vector<4x128xf32> to vector<4x128xbf16>
    %40 = vector.extract_strided_slice %0 {offsets = [0, 640], sizes = [4, 192], strides = [1, 1]} : vector<4x4160xbf16> to vector<4x192xbf16>
    %cst_16 = arith.constant dense<0.000000e+00> : vector<4x128xf32>
    %41 = tpu.matmul %40, %1, %cst_16 {dimension_numbers = #tpu.dot_dimension_numbers<[1], [0], [0], [1], [0, 0, 1, 1], [], []>} : vector<4x192xbf16>, vector<192x128xbf16>, vector<4x128xf32> -> vector<4x128xf32>
    %42 = vector.broadcast %3 : vector<1x128xf32> to vector<4x128xf32>
    %43 = arith.addf %41, %42 : vector<4x128xf32>
    %cst_17 = arith.constant 0.000000e+00 : f32
    %44 = vector.broadcast %cst_17 : f32 to vector<4x128xf32>
    %45 = arith.maximumf %43, %44 : vector<4x128xf32>
    %46 = arith.truncf %45 : vector<4x128xf32> to vector<4x128xbf16>
    %47 = vector.extract_strided_slice %0 {offsets = [0, 768], sizes = [4, 192], strides = [1, 1]} : vector<4x4160xbf16> to vector<4x192xbf16>
    %cst_18 = arith.constant dense<0.000000e+00> : vector<4x128xf32>
    %48 = tpu.matmul %47, %1, %cst_18 {dimension_numbers = #tpu.dot_dimension_numbers<[1], [0], [0], [1], [0, 0, 1, 1], [], []>} : vector<4x192xbf16>, vector<192x128xbf16>, vector<4x128xf32> -> vector<4x128xf32>
    %49 = vector.broadcast %3 : vector<1x128xf32> to vector<4x128xf32>
    %50 = arith.addf %48, %49 : vector<4x128xf32>
    %cst_19 = arith.constant 0.000000e+00 : f32
    %51 = vector.broadcast %cst_19 : f32 to vector<4x128xf32>
    %52 = arith.maximumf %50, %51 : vector<4x128xf32>
    %53 = arith.truncf %52 : vector<4x128xf32> to vector<4x128xbf16>
    %54 = vector.extract_strided_slice %0 {offsets = [0, 896], sizes = [4, 192], strides = [1, 1]} : vector<4x4160xbf16> to vector<4x192xbf16>
    %cst_20 = arith.constant dense<0.000000e+00> : vector<4x128xf32>
    %55 = tpu.matmul %54, %1, %cst_20 {dimension_numbers = #tpu.dot_dimension_numbers<[1], [0], [0], [1], [0, 0, 1, 1], [], []>} : vector<4x192xbf16>, vector<192x128xbf16>, vector<4x128xf32> -> vector<4x128xf32>
    %56 = vector.broadcast %3 : vector<1x128xf32> to vector<4x128xf32>
    %57 = arith.addf %55, %56 : vector<4x128xf32>
    %cst_21 = arith.constant 0.000000e+00 : f32
    %58 = vector.broadcast %cst_21 : f32 to vector<4x128xf32>
    %59 = arith.maximumf %57, %58 : vector<4x128xf32>
    %60 = arith.truncf %59 : vector<4x128xf32> to vector<4x128xbf16>
    %61 = vector.extract_strided_slice %0 {offsets = [0, 1024], sizes = [4, 192], strides = [1, 1]} : vector<4x4160xbf16> to vector<4x192xbf16>
    %cst_22 = arith.constant dense<0.000000e+00> : vector<4x128xf32>
    %62 = tpu.matmul %61, %1, %cst_22 {dimension_numbers = #tpu.dot_dimension_numbers<[1], [0], [0], [1], [0, 0, 1, 1], [], []>} : vector<4x192xbf16>, vector<192x128xbf16>, vector<4x128xf32> -> vector<4x128xf32>
    %63 = vector.broadcast %3 : vector<1x128xf32> to vector<4x128xf32>
    %64 = arith.addf %62, %63 : vector<4x128xf32>
    %cst_23 = arith.constant 0.000000e+00 : f32
    %65 = vector.broadcast %cst_23 : f32 to vector<4x128xf32>
    %66 = arith.maximumf %64, %65 : vector<4x128xf32>
    %67 = arith.truncf %66 : vector<4x128xf32> to vector<4x128xbf16>
    %68 = vector.extract_strided_slice %0 {offsets = [0, 1152], sizes = [4, 192], strides = [1, 1]} : vector<4x4160xbf16> to vector<4x192xbf16>
    %cst_24 = arith.constant dense<0.000000e+00> : vector<4x128xf32>
    %69 = tpu.matmul %68, %1, %cst_24 {dimension_numbers = #tpu.dot_dimension_numbers<[1], [0], [0], [1], [0, 0, 1, 1], [], []>} : vector<4x192xbf16>, vector<192x128xbf16>, vector<4x128xf32> -> vector<4x128xf32>
    %70 = vector.broadcast %3 : vector<1x128xf32> to vector<4x128xf32>
    %71 = arith.addf %69, %70 : vector<4x128xf32>
    %cst_25 = arith.constant 0.000000e+00 : f32
    %72 = vector.broadcast %cst_25 : f32 to vector<4x128xf32>
    %73 = arith.maximumf %71, %72 : vector<4x128xf32>
    %74 = arith.truncf %73 : vector<4x128xf32> to vector<4x128xbf16>
    %75 = vector.extract_strided_slice %0 {offsets = [0, 1280], sizes = [4, 192], strides = [1, 1]} : vector<4x4160xbf16> to vector<4x192xbf16>
    %cst_26 = arith.constant dense<0.000000e+00> : vector<4x128xf32>
    %76 = tpu.matmul %75, %1, %cst_26 {dimension_numbers = #tpu.dot_dimension_numbers<[1], [0], [0], [1], [0, 0, 1, 1], [], []>} : vector<4x192xbf16>, vector<192x128xbf16>, vector<4x128xf32> -> vector<4x128xf32>
    %77 = vector.broadcast %3 : vector<1x128xf32> to vector<4x128xf32>
    %78 = arith.addf %76, %77 : vector<4x128xf32>
    %cst_27 = arith.constant 0.000000e+00 : f32
    %79 = vector.broadcast %cst_27 : f32 to vector<4x128xf32>
    %80 = arith.maximumf %78, %79 : vector<4x128xf32>
    %81 = arith.truncf %80 : vector<4x128xf32> to vector<4x128xbf16>
    %82 = vector.extract_strided_slice %0 {offsets = [0, 1408], sizes = [4, 192], strides = [1, 1]} : vector<4x4160xbf16> to vector<4x192xbf16>
    %cst_28 = arith.constant dense<0.000000e+00> : vector<4x128xf32>
    %83 = tpu.matmul %82, %1, %cst_28 {dimension_numbers = #tpu.dot_dimension_numbers<[1], [0], [0], [1], [0, 0, 1, 1], [], []>} : vector<4x192xbf16>, vector<192x128xbf16>, vector<4x128xf32> -> vector<4x128xf32>
    %84 = vector.broadcast %3 : vector<1x128xf32> to vector<4x128xf32>
    %85 = arith.addf %83, %84 : vector<4x128xf32>
    %cst_29 = arith.constant 0.000000e+00 : f32
    %86 = vector.broadcast %cst_29 : f32 to vector<4x128xf32>
    %87 = arith.maximumf %85, %86 : vector<4x128xf32>
    %88 = arith.truncf %87 : vector<4x128xf32> to vector<4x128xbf16>
    %89 = vector.extract_strided_slice %0 {offsets = [0, 1536], sizes = [4, 192], strides = [1, 1]} : vector<4x4160xbf16> to vector<4x192xbf16>
    %cst_30 = arith.constant dense<0.000000e+00> : vector<4x128xf32>
    %90 = tpu.matmul %89, %1, %cst_30 {dimension_numbers = #tpu.dot_dimension_numbers<[1], [0], [0], [1], [0, 0, 1, 1], [], []>} : vector<4x192xbf16>, vector<192x128xbf16>, vector<4x128xf32> -> vector<4x128xf32>
    %91 = vector.broadcast %3 : vector<1x128xf32> to vector<4x128xf32>
    %92 = arith.addf %90, %91 : vector<4x128xf32>
    %cst_31 = arith.constant 0.000000e+00 : f32
    %93 = vector.broadcast %cst_31 : f32 to vector<4x128xf32>
    %94 = arith.maximumf %92, %93 : vector<4x128xf32>
    %95 = arith.truncf %94 : vector<4x128xf32> to vector<4x128xbf16>
    %96 = vector.extract_strided_slice %0 {offsets = [0, 1664], sizes = [4, 192], strides = [1, 1]} : vector<4x4160xbf16> to vector<4x192xbf16>
    %cst_32 = arith.constant dense<0.000000e+00> : vector<4x128xf32>
    %97 = tpu.matmul %96, %1, %cst_32 {dimension_numbers = #tpu.dot_dimension_numbers<[1], [0], [0], [1], [0, 0, 1, 1], [], []>} : vector<4x192xbf16>, vector<192x128xbf16>, vector<4x128xf32> -> vector<4x128xf32>
    %98 = vector.broadcast %3 : vector<1x128xf32> to vector<4x128xf32>
    %99 = arith.addf %97, %98 : vector<4x128xf32>
    %cst_33 = arith.constant 0.000000e+00 : f32
    %100 = vector.broadcast %cst_33 : f32 to vector<4x128xf32>
    %101 = arith.maximumf %99, %100 : vector<4x128xf32>
    %102 = arith.truncf %101 : vector<4x128xf32> to vector<4x128xbf16>
    %103 = vector.extract_strided_slice %0 {offsets = [0, 1792], sizes = [4, 192], strides = [1, 1]} : vector<4x4160xbf16> to vector<4x192xbf16>
    %cst_34 = arith.constant dense<0.000000e+00> : vector<4x128xf32>
    %104 = tpu.matmul %103, %1, %cst_34 {dimension_numbers = #tpu.dot_dimension_numbers<[1], [0], [0], [1], [0, 0, 1, 1], [], []>} : vector<4x192xbf16>, vector<192x128xbf16>, vector<4x128xf32> -> vector<4x128xf32>
    %105 = vector.broadcast %3 : vector<1x128xf32> to vector<4x128xf32>
    %106 = arith.addf %104, %105 : vector<4x128xf32>
    %cst_35 = arith.constant 0.000000e+00 : f32
    %107 = vector.broadcast %cst_35 : f32 to vector<4x128xf32>
    %108 = arith.maximumf %106, %107 : vector<4x128xf32>
    %109 = arith.truncf %108 : vector<4x128xf32> to vector<4x128xbf16>
    %110 = vector.extract_strided_slice %0 {offsets = [0, 1920], sizes = [4, 192], strides = [1, 1]} : vector<4x4160xbf16> to vector<4x192xbf16>
    %cst_36 = arith.constant dense<0.000000e+00> : vector<4x128xf32>
    %111 = tpu.matmul %110, %1, %cst_36 {dimension_numbers = #tpu.dot_dimension_numbers<[1], [0], [0], [1], [0, 0, 1, 1], [], []>} : vector<4x192xbf16>, vector<192x128xbf16>, vector<4x128xf32> -> vector<4x128xf32>
    %112 = vector.broadcast %3 : vector<1x128xf32> to vector<4x128xf32>
    %113 = arith.addf %111, %112 : vector<4x128xf32>
    %cst_37 = arith.constant 0.000000e+00 : f32
    %114 = vector.broadcast %cst_37 : f32 to vector<4x128xf32>
    %115 = arith.maximumf %113, %114 : vector<4x128xf32>
    %116 = arith.truncf %115 : vector<4x128xf32> to vector<4x128xbf16>
    %117 = vector.extract_strided_slice %0 {offsets = [0, 2048], sizes = [4, 192], strides = [1, 1]} : vector<4x4160xbf16> to vector<4x192xbf16>
    %cst_38 = arith.constant dense<0.000000e+00> : vector<4x128xf32>
    %118 = tpu.matmul %117, %1, %cst_38 {dimension_numbers = #tpu.dot_dimension_numbers<[1], [0], [0], [1], [0, 0, 1, 1], [], []>} : vector<4x192xbf16>, vector<192x128xbf16>, vector<4x128xf32> -> vector<4x128xf32>
    %119 = vector.broadcast %3 : vector<1x128xf32> to vector<4x128xf32>
    %120 = arith.addf %118, %119 : vector<4x128xf32>
    %cst_39 = arith.constant 0.000000e+00 : f32
    %121 = vector.broadcast %cst_39 : f32 to vector<4x128xf32>
    %122 = arith.maximumf %120, %121 : vector<4x128xf32>
    %123 = arith.truncf %122 : vector<4x128xf32> to vector<4x128xbf16>
    %124 = vector.extract_strided_slice %0 {offsets = [0, 2176], sizes = [4, 192], strides = [1, 1]} : vector<4x4160xbf16> to vector<4x192xbf16>
    %cst_40 = arith.constant dense<0.000000e+00> : vector<4x128xf32>
    %125 = tpu.matmul %124, %1, %cst_40 {dimension_numbers = #tpu.dot_dimension_numbers<[1], [0], [0], [1], [0, 0, 1, 1], [], []>} : vector<4x192xbf16>, vector<192x128xbf16>, vector<4x128xf32> -> vector<4x128xf32>
    %126 = vector.broadcast %3 : vector<1x128xf32> to vector<4x128xf32>
    %127 = arith.addf %125, %126 : vector<4x128xf32>
    %cst_41 = arith.constant 0.000000e+00 : f32
    %128 = vector.broadcast %cst_41 : f32 to vector<4x128xf32>
    %129 = arith.maximumf %127, %128 : vector<4x128xf32>
    %130 = arith.truncf %129 : vector<4x128xf32> to vector<4x128xbf16>
    %131 = vector.extract_strided_slice %0 {offsets = [0, 2304], sizes = [4, 192], strides = [1, 1]} : vector<4x4160xbf16> to vector<4x192xbf16>
    %cst_42 = arith.constant dense<0.000000e+00> : vector<4x128xf32>
    %132 = tpu.matmul %131, %1, %cst_42 {dimension_numbers = #tpu.dot_dimension_numbers<[1], [0], [0], [1], [0, 0, 1, 1], [], []>} : vector<4x192xbf16>, vector<192x128xbf16>, vector<4x128xf32> -> vector<4x128xf32>
    %133 = vector.broadcast %3 : vector<1x128xf32> to vector<4x128xf32>
    %134 = arith.addf %132, %133 : vector<4x128xf32>
    %cst_43 = arith.constant 0.000000e+00 : f32
    %135 = vector.broadcast %cst_43 : f32 to vector<4x128xf32>
    %136 = arith.maximumf %134, %135 : vector<4x128xf32>
    %137 = arith.truncf %136 : vector<4x128xf32> to vector<4x128xbf16>
    %138 = vector.extract_strided_slice %0 {offsets = [0, 2432], sizes = [4, 192], strides = [1, 1]} : vector<4x4160xbf16> to vector<4x192xbf16>
    %cst_44 = arith.constant dense<0.000000e+00> : vector<4x128xf32>
    %139 = tpu.matmul %138, %1, %cst_44 {dimension_numbers = #tpu.dot_dimension_numbers<[1], [0], [0], [1], [0, 0, 1, 1], [], []>} : vector<4x192xbf16>, vector<192x128xbf16>, vector<4x128xf32> -> vector<4x128xf32>
    %140 = vector.broadcast %3 : vector<1x128xf32> to vector<4x128xf32>
    %141 = arith.addf %139, %140 : vector<4x128xf32>
    %cst_45 = arith.constant 0.000000e+00 : f32
    %142 = vector.broadcast %cst_45 : f32 to vector<4x128xf32>
    %143 = arith.maximumf %141, %142 : vector<4x128xf32>
    %144 = arith.truncf %143 : vector<4x128xf32> to vector<4x128xbf16>
    %145 = vector.extract_strided_slice %0 {offsets = [0, 2560], sizes = [4, 192], strides = [1, 1]} : vector<4x4160xbf16> to vector<4x192xbf16>
    %cst_46 = arith.constant dense<0.000000e+00> : vector<4x128xf32>
    %146 = tpu.matmul %145, %1, %cst_46 {dimension_numbers = #tpu.dot_dimension_numbers<[1], [0], [0], [1], [0, 0, 1, 1], [], []>} : vector<4x192xbf16>, vector<192x128xbf16>, vector<4x128xf32> -> vector<4x128xf32>
    %147 = vector.broadcast %3 : vector<1x128xf32> to vector<4x128xf32>
    %148 = arith.addf %146, %147 : vector<4x128xf32>
    %cst_47 = arith.constant 0.000000e+00 : f32
    %149 = vector.broadcast %cst_47 : f32 to vector<4x128xf32>
    %150 = arith.maximumf %148, %149 : vector<4x128xf32>
    %151 = arith.truncf %150 : vector<4x128xf32> to vector<4x128xbf16>
    %152 = vector.extract_strided_slice %0 {offsets = [0, 2688], sizes = [4, 192], strides = [1, 1]} : vector<4x4160xbf16> to vector<4x192xbf16>
    %cst_48 = arith.constant dense<0.000000e+00> : vector<4x128xf32>
    %153 = tpu.matmul %152, %1, %cst_48 {dimension_numbers = #tpu.dot_dimension_numbers<[1], [0], [0], [1], [0, 0, 1, 1], [], []>} : vector<4x192xbf16>, vector<192x128xbf16>, vector<4x128xf32> -> vector<4x128xf32>
    %154 = vector.broadcast %3 : vector<1x128xf32> to vector<4x128xf32>
    %155 = arith.addf %153, %154 : vector<4x128xf32>
    %cst_49 = arith.constant 0.000000e+00 : f32
    %156 = vector.broadcast %cst_49 : f32 to vector<4x128xf32>
    %157 = arith.maximumf %155, %156 : vector<4x128xf32>
    %158 = arith.truncf %157 : vector<4x128xf32> to vector<4x128xbf16>
    %159 = vector.extract_strided_slice %0 {offsets = [0, 2816], sizes = [4, 192], strides = [1, 1]} : vector<4x4160xbf16> to vector<4x192xbf16>
    %cst_50 = arith.constant dense<0.000000e+00> : vector<4x128xf32>
    %160 = tpu.matmul %159, %1, %cst_50 {dimension_numbers = #tpu.dot_dimension_numbers<[1], [0], [0], [1], [0, 0, 1, 1], [], []>} : vector<4x192xbf16>, vector<192x128xbf16>, vector<4x128xf32> -> vector<4x128xf32>
    %161 = vector.broadcast %3 : vector<1x128xf32> to vector<4x128xf32>
    %162 = arith.addf %160, %161 : vector<4x128xf32>
    %cst_51 = arith.constant 0.000000e+00 : f32
    %163 = vector.broadcast %cst_51 : f32 to vector<4x128xf32>
    %164 = arith.maximumf %162, %163 : vector<4x128xf32>
    %165 = arith.truncf %164 : vector<4x128xf32> to vector<4x128xbf16>
    %166 = vector.extract_strided_slice %0 {offsets = [0, 2944], sizes = [4, 192], strides = [1, 1]} : vector<4x4160xbf16> to vector<4x192xbf16>
    %cst_52 = arith.constant dense<0.000000e+00> : vector<4x128xf32>
    %167 = tpu.matmul %166, %1, %cst_52 {dimension_numbers = #tpu.dot_dimension_numbers<[1], [0], [0], [1], [0, 0, 1, 1], [], []>} : vector<4x192xbf16>, vector<192x128xbf16>, vector<4x128xf32> -> vector<4x128xf32>
    %168 = vector.broadcast %3 : vector<1x128xf32> to vector<4x128xf32>
    %169 = arith.addf %167, %168 : vector<4x128xf32>
    %cst_53 = arith.constant 0.000000e+00 : f32
    %170 = vector.broadcast %cst_53 : f32 to vector<4x128xf32>
    %171 = arith.maximumf %169, %170 : vector<4x128xf32>
    %172 = arith.truncf %171 : vector<4x128xf32> to vector<4x128xbf16>
    %173 = vector.extract_strided_slice %0 {offsets = [0, 3072], sizes = [4, 192], strides = [1, 1]} : vector<4x4160xbf16> to vector<4x192xbf16>
    %cst_54 = arith.constant dense<0.000000e+00> : vector<4x128xf32>
    %174 = tpu.matmul %173, %1, %cst_54 {dimension_numbers = #tpu.dot_dimension_numbers<[1], [0], [0], [1], [0, 0, 1, 1], [], []>} : vector<4x192xbf16>, vector<192x128xbf16>, vector<4x128xf32> -> vector<4x128xf32>
    %175 = vector.broadcast %3 : vector<1x128xf32> to vector<4x128xf32>
    %176 = arith.addf %174, %175 : vector<4x128xf32>
    %cst_55 = arith.constant 0.000000e+00 : f32
    %177 = vector.broadcast %cst_55 : f32 to vector<4x128xf32>
    %178 = arith.maximumf %176, %177 : vector<4x128xf32>
    %179 = arith.truncf %178 : vector<4x128xf32> to vector<4x128xbf16>
    %180 = vector.extract_strided_slice %0 {offsets = [0, 3200], sizes = [4, 192], strides = [1, 1]} : vector<4x4160xbf16> to vector<4x192xbf16>
    %cst_56 = arith.constant dense<0.000000e+00> : vector<4x128xf32>
    %181 = tpu.matmul %180, %1, %cst_56 {dimension_numbers = #tpu.dot_dimension_numbers<[1], [0], [0], [1], [0, 0, 1, 1], [], []>} : vector<4x192xbf16>, vector<192x128xbf16>, vector<4x128xf32> -> vector<4x128xf32>
    %182 = vector.broadcast %3 : vector<1x128xf32> to vector<4x128xf32>
    %183 = arith.addf %181, %182 : vector<4x128xf32>
    %cst_57 = arith.constant 0.000000e+00 : f32
    %184 = vector.broadcast %cst_57 : f32 to vector<4x128xf32>
    %185 = arith.maximumf %183, %184 : vector<4x128xf32>
    %186 = arith.truncf %185 : vector<4x128xf32> to vector<4x128xbf16>
    %187 = vector.extract_strided_slice %0 {offsets = [0, 3328], sizes = [4, 192], strides = [1, 1]} : vector<4x4160xbf16> to vector<4x192xbf16>
    %cst_58 = arith.constant dense<0.000000e+00> : vector<4x128xf32>
    %188 = tpu.matmul %187, %1, %cst_58 {dimension_numbers = #tpu.dot_dimension_numbers<[1], [0], [0], [1], [0, 0, 1, 1], [], []>} : vector<4x192xbf16>, vector<192x128xbf16>, vector<4x128xf32> -> vector<4x128xf32>
    %189 = vector.broadcast %3 : vector<1x128xf32> to vector<4x128xf32>
    %190 = arith.addf %188, %189 : vector<4x128xf32>
    %cst_59 = arith.constant 0.000000e+00 : f32
    %191 = vector.broadcast %cst_59 : f32 to vector<4x128xf32>
    %192 = arith.maximumf %190, %191 : vector<4x128xf32>
    %193 = arith.truncf %192 : vector<4x128xf32> to vector<4x128xbf16>
    %194 = vector.extract_strided_slice %0 {offsets = [0, 3456], sizes = [4, 192], strides = [1, 1]} : vector<4x4160xbf16> to vector<4x192xbf16>
    %cst_60 = arith.constant dense<0.000000e+00> : vector<4x128xf32>
    %195 = tpu.matmul %194, %1, %cst_60 {dimension_numbers = #tpu.dot_dimension_numbers<[1], [0], [0], [1], [0, 0, 1, 1], [], []>} : vector<4x192xbf16>, vector<192x128xbf16>, vector<4x128xf32> -> vector<4x128xf32>
    %196 = vector.broadcast %3 : vector<1x128xf32> to vector<4x128xf32>
    %197 = arith.addf %195, %196 : vector<4x128xf32>
    %cst_61 = arith.constant 0.000000e+00 : f32
    %198 = vector.broadcast %cst_61 : f32 to vector<4x128xf32>
    %199 = arith.maximumf %197, %198 : vector<4x128xf32>
    %200 = arith.truncf %199 : vector<4x128xf32> to vector<4x128xbf16>
    %201 = vector.extract_strided_slice %0 {offsets = [0, 3584], sizes = [4, 192], strides = [1, 1]} : vector<4x4160xbf16> to vector<4x192xbf16>
    %cst_62 = arith.constant dense<0.000000e+00> : vector<4x128xf32>
    %202 = tpu.matmul %201, %1, %cst_62 {dimension_numbers = #tpu.dot_dimension_numbers<[1], [0], [0], [1], [0, 0, 1, 1], [], []>} : vector<4x192xbf16>, vector<192x128xbf16>, vector<4x128xf32> -> vector<4x128xf32>
    %203 = vector.broadcast %3 : vector<1x128xf32> to vector<4x128xf32>
    %204 = arith.addf %202, %203 : vector<4x128xf32>
    %cst_63 = arith.constant 0.000000e+00 : f32
    %205 = vector.broadcast %cst_63 : f32 to vector<4x128xf32>
    %206 = arith.maximumf %204, %205 : vector<4x128xf32>
    %207 = arith.truncf %206 : vector<4x128xf32> to vector<4x128xbf16>
    %208 = vector.extract_strided_slice %0 {offsets = [0, 3712], sizes = [4, 192], strides = [1, 1]} : vector<4x4160xbf16> to vector<4x192xbf16>
    %cst_64 = arith.constant dense<0.000000e+00> : vector<4x128xf32>
    %209 = tpu.matmul %208, %1, %cst_64 {dimension_numbers = #tpu.dot_dimension_numbers<[1], [0], [0], [1], [0, 0, 1, 1], [], []>} : vector<4x192xbf16>, vector<192x128xbf16>, vector<4x128xf32> -> vector<4x128xf32>
    %210 = vector.broadcast %3 : vector<1x128xf32> to vector<4x128xf32>
    %211 = arith.addf %209, %210 : vector<4x128xf32>
    %cst_65 = arith.constant 0.000000e+00 : f32
    %212 = vector.broadcast %cst_65 : f32 to vector<4x128xf32>
    %213 = arith.maximumf %211, %212 : vector<4x128xf32>
    %214 = arith.truncf %213 : vector<4x128xf32> to vector<4x128xbf16>
    %215 = vector.extract_strided_slice %0 {offsets = [0, 3840], sizes = [4, 192], strides = [1, 1]} : vector<4x4160xbf16> to vector<4x192xbf16>
    %cst_66 = arith.constant dense<0.000000e+00> : vector<4x128xf32>
    %216 = tpu.matmul %215, %1, %cst_66 {dimension_numbers = #tpu.dot_dimension_numbers<[1], [0], [0], [1], [0, 0, 1, 1], [], []>} : vector<4x192xbf16>, vector<192x128xbf16>, vector<4x128xf32> -> vector<4x128xf32>
    %217 = vector.broadcast %3 : vector<1x128xf32> to vector<4x128xf32>
    %218 = arith.addf %216, %217 : vector<4x128xf32>
    %cst_67 = arith.constant 0.000000e+00 : f32
    %219 = vector.broadcast %cst_67 : f32 to vector<4x128xf32>
    %220 = arith.maximumf %218, %219 : vector<4x128xf32>
    %221 = arith.truncf %220 : vector<4x128xf32> to vector<4x128xbf16>
    %222 = vector.extract_strided_slice %0 {offsets = [0, 3968], sizes = [4, 192], strides = [1, 1]} : vector<4x4160xbf16> to vector<4x192xbf16>
    %cst_68 = arith.constant dense<0.000000e+00> : vector<4x128xf32>
    %223 = tpu.matmul %222, %1, %cst_68 {dimension_numbers = #tpu.dot_dimension_numbers<[1], [0], [0], [1], [0, 0, 1, 1], [], []>} : vector<4x192xbf16>, vector<192x128xbf16>, vector<4x128xf32> -> vector<4x128xf32>
    %224 = vector.broadcast %3 : vector<1x128xf32> to vector<4x128xf32>
    %225 = arith.addf %223, %224 : vector<4x128xf32>
    %cst_69 = arith.constant 0.000000e+00 : f32
    %226 = vector.broadcast %cst_69 : f32 to vector<4x128xf32>
    %227 = arith.maximumf %225, %226 : vector<4x128xf32>
    %228 = arith.truncf %227 : vector<4x128xf32> to vector<4x128xbf16>
    %229 = tpu.concatenate %4, %11, %18, %25, %32, %39, %46, %53, %60, %67, %74, %81, %88, %95, %102, %109 in 1 : vector<4x128xbf16>, vector<4x128xbf16>, vector<4x128xbf16>, vector<4x128xbf16>, vector<4x128xbf16>, vector<4x128xbf16>, vector<4x128xbf16>, vector<4x128xbf16>, vector<4x128xbf16>, vector<4x128xbf16>, vector<4x128xbf16>, vector<4x128xbf16>, vector<4x128xbf16>, vector<4x128xbf16>, vector<4x128xbf16>, vector<4x128xbf16> -> vector<4x2048xbf16>
    %230 = tpu.concatenate %116, %123, %130, %137, %144, %151, %158, %165, %172, %179, %186, %193, %200, %207, %214, %221 in 1 : vector<4x128xbf16>, vector<4x128xbf16>, vector<4x128xbf16>, vector<4x128xbf16>, vector<4x128xbf16>, vector<4x128xbf16>, vector<4x128xbf16>, vector<4x128xbf16>, vector<4x128xbf16>, vector<4x128xbf16>, vector<4x128xbf16>, vector<4x128xbf16>, vector<4x128xbf16>, vector<4x128xbf16>, vector<4x128xbf16>, vector<4x128xbf16> -> vector<4x2048xbf16>
    %231 = tpu.concatenate %229, %230, %228 in 1 : vector<4x2048xbf16>, vector<4x2048xbf16>, vector<4x128xbf16> -> vector<4x4224xbf16>
    %c0_70 = arith.constant 0 : index
    %c0_71 = arith.constant 0 : index
    %c0_72 = arith.constant 0 : index
    %232 = vector.load %arg2[%c0_70, %c0_71, %c0_72] : memref<5x384x128xbf16, #tpu.memory_space<vmem>>, vector<1x384x128xbf16>
    %233 = vector.shape_cast %232 : vector<1x384x128xbf16> to vector<384x128xbf16>
    %c1 = arith.constant 1 : index
    %c0_73 = arith.constant 0 : index
    %c0_74 = arith.constant 0 : index
    %234 = vector.load %arg3[%c1, %c0_73, %c0_74] : memref<6x1x128xf32, #tpu.memory_space<vmem>>, vector<1x1x128xf32>
    %235 = vector.shape_cast %234 : vector<1x1x128xf32> to vector<1x128xf32>
    %cst_75 = arith.constant 0.000000e+00 : bf16
    %236 = vector.broadcast %cst_75 : bf16 to vector<4x128xbf16>
    %237 = vector.extract_strided_slice %231 {offsets = [0, 0], sizes = [4, 384], strides = [1, 1]} : vector<4x4224xbf16> to vector<4x384xbf16>
    %cst_76 = arith.constant dense<0.000000e+00> : vector<4x128xf32>
    %238 = tpu.matmul %237, %233, %cst_76 {dimension_numbers = #tpu.dot_dimension_numbers<[1], [0], [0], [1], [0, 0, 1, 1], [], []>} : vector<4x384xbf16>, vector<384x128xbf16>, vector<4x128xf32> -> vector<4x128xf32>
    %239 = vector.broadcast %235 : vector<1x128xf32> to vector<4x128xf32>
    %240 = arith.addf %238, %239 : vector<4x128xf32>
    %cst_77 = arith.constant 0.000000e+00 : f32
    %241 = vector.broadcast %cst_77 : f32 to vector<4x128xf32>
    %242 = arith.maximumf %240, %241 : vector<4x128xf32>
    %243 = arith.truncf %242 : vector<4x128xf32> to vector<4x128xbf16>
    %244 = vector.extract_strided_slice %231 {offsets = [0, 256], sizes = [4, 384], strides = [1, 1]} : vector<4x4224xbf16> to vector<4x384xbf16>
    %cst_78 = arith.constant dense<0.000000e+00> : vector<4x128xf32>
    %245 = tpu.matmul %244, %233, %cst_78 {dimension_numbers = #tpu.dot_dimension_numbers<[1], [0], [0], [1], [0, 0, 1, 1], [], []>} : vector<4x384xbf16>, vector<384x128xbf16>, vector<4x128xf32> -> vector<4x128xf32>
    %246 = vector.broadcast %235 : vector<1x128xf32> to vector<4x128xf32>
    %247 = arith.addf %245, %246 : vector<4x128xf32>
    %cst_79 = arith.constant 0.000000e+00 : f32
    %248 = vector.broadcast %cst_79 : f32 to vector<4x128xf32>
    %249 = arith.maximumf %247, %248 : vector<4x128xf32>
    %250 = arith.truncf %249 : vector<4x128xf32> to vector<4x128xbf16>
    %251 = vector.extract_strided_slice %231 {offsets = [0, 512], sizes = [4, 384], strides = [1, 1]} : vector<4x4224xbf16> to vector<4x384xbf16>
    %cst_80 = arith.constant dense<0.000000e+00> : vector<4x128xf32>
    %252 = tpu.matmul %251, %233, %cst_80 {dimension_numbers = #tpu.dot_dimension_numbers<[1], [0], [0], [1], [0, 0, 1, 1], [], []>} : vector<4x384xbf16>, vector<384x128xbf16>, vector<4x128xf32> -> vector<4x128xf32>
    %253 = vector.broadcast %235 : vector<1x128xf32> to vector<4x128xf32>
    %254 = arith.addf %252, %253 : vector<4x128xf32>
    %cst_81 = arith.constant 0.000000e+00 : f32
    %255 = vector.broadcast %cst_81 : f32 to vector<4x128xf32>
    %256 = arith.maximumf %254, %255 : vector<4x128xf32>
    %257 = arith.truncf %256 : vector<4x128xf32> to vector<4x128xbf16>
    %258 = vector.extract_strided_slice %231 {offsets = [0, 768], sizes = [4, 384], strides = [1, 1]} : vector<4x4224xbf16> to vector<4x384xbf16>
    %cst_82 = arith.constant dense<0.000000e+00> : vector<4x128xf32>
    %259 = tpu.matmul %258, %233, %cst_82 {dimension_numbers = #tpu.dot_dimension_numbers<[1], [0], [0], [1], [0, 0, 1, 1], [], []>} : vector<4x384xbf16>, vector<384x128xbf16>, vector<4x128xf32> -> vector<4x128xf32>
    %260 = vector.broadcast %235 : vector<1x128xf32> to vector<4x128xf32>
    %261 = arith.addf %259, %260 : vector<4x128xf32>
    %cst_83 = arith.constant 0.000000e+00 : f32
    %262 = vector.broadcast %cst_83 : f32 to vector<4x128xf32>
    %263 = arith.maximumf %261, %262 : vector<4x128xf32>
    %264 = arith.truncf %263 : vector<4x128xf32> to vector<4x128xbf16>
    %265 = vector.extract_strided_slice %231 {offsets = [0, 1024], sizes = [4, 384], strides = [1, 1]} : vector<4x4224xbf16> to vector<4x384xbf16>
    %cst_84 = arith.constant dense<0.000000e+00> : vector<4x128xf32>
    %266 = tpu.matmul %265, %233, %cst_84 {dimension_numbers = #tpu.dot_dimension_numbers<[1], [0], [0], [1], [0, 0, 1, 1], [], []>} : vector<4x384xbf16>, vector<384x128xbf16>, vector<4x128xf32> -> vector<4x128xf32>
    %267 = vector.broadcast %235 : vector<1x128xf32> to vector<4x128xf32>
    %268 = arith.addf %266, %267 : vector<4x128xf32>
    %cst_85 = arith.constant 0.000000e+00 : f32
    %269 = vector.broadcast %cst_85 : f32 to vector<4x128xf32>
    %270 = arith.maximumf %268, %269 : vector<4x128xf32>
    %271 = arith.truncf %270 : vector<4x128xf32> to vector<4x128xbf16>
    %272 = vector.extract_strided_slice %231 {offsets = [0, 1280], sizes = [4, 384], strides = [1, 1]} : vector<4x4224xbf16> to vector<4x384xbf16>
    %cst_86 = arith.constant dense<0.000000e+00> : vector<4x128xf32>
    %273 = tpu.matmul %272, %233, %cst_86 {dimension_numbers = #tpu.dot_dimension_numbers<[1], [0], [0], [1], [0, 0, 1, 1], [], []>} : vector<4x384xbf16>, vector<384x128xbf16>, vector<4x128xf32> -> vector<4x128xf32>
    %274 = vector.broadcast %235 : vector<1x128xf32> to vector<4x128xf32>
    %275 = arith.addf %273, %274 : vector<4x128xf32>
    %cst_87 = arith.constant 0.000000e+00 : f32
    %276 = vector.broadcast %cst_87 : f32 to vector<4x128xf32>
    %277 = arith.maximumf %275, %276 : vector<4x128xf32>
    %278 = arith.truncf %277 : vector<4x128xf32> to vector<4x128xbf16>
    %279 = vector.extract_strided_slice %231 {offsets = [0, 1536], sizes = [4, 384], strides = [1, 1]} : vector<4x4224xbf16> to vector<4x384xbf16>
    %cst_88 = arith.constant dense<0.000000e+00> : vector<4x128xf32>
    %280 = tpu.matmul %279, %233, %cst_88 {dimension_numbers = #tpu.dot_dimension_numbers<[1], [0], [0], [1], [0, 0, 1, 1], [], []>} : vector<4x384xbf16>, vector<384x128xbf16>, vector<4x128xf32> -> vector<4x128xf32>
    %281 = vector.broadcast %235 : vector<1x128xf32> to vector<4x128xf32>
    %282 = arith.addf %280, %281 : vector<4x128xf32>
    %cst_89 = arith.constant 0.000000e+00 : f32
    %283 = vector.broadcast %cst_89 : f32 to vector<4x128xf32>
    %284 = arith.maximumf %282, %283 : vector<4x128xf32>
    %285 = arith.truncf %284 : vector<4x128xf32> to vector<4x128xbf16>
    %286 = vector.extract_strided_slice %231 {offsets = [0, 1792], sizes = [4, 384], strides = [1, 1]} : vector<4x4224xbf16> to vector<4x384xbf16>
    %cst_90 = arith.constant dense<0.000000e+00> : vector<4x128xf32>
    %287 = tpu.matmul %286, %233, %cst_90 {dimension_numbers = #tpu.dot_dimension_numbers<[1], [0], [0], [1], [0, 0, 1, 1], [], []>} : vector<4x384xbf16>, vector<384x128xbf16>, vector<4x128xf32> -> vector<4x128xf32>
    %288 = vector.broadcast %235 : vector<1x128xf32> to vector<4x128xf32>
    %289 = arith.addf %287, %288 : vector<4x128xf32>
    %cst_91 = arith.constant 0.000000e+00 : f32
    %290 = vector.broadcast %cst_91 : f32 to vector<4x128xf32>
    %291 = arith.maximumf %289, %290 : vector<4x128xf32>
    %292 = arith.truncf %291 : vector<4x128xf32> to vector<4x128xbf16>
    %293 = vector.extract_strided_slice %231 {offsets = [0, 2048], sizes = [4, 384], strides = [1, 1]} : vector<4x4224xbf16> to vector<4x384xbf16>
    %cst_92 = arith.constant dense<0.000000e+00> : vector<4x128xf32>
    %294 = tpu.matmul %293, %233, %cst_92 {dimension_numbers = #tpu.dot_dimension_numbers<[1], [0], [0], [1], [0, 0, 1, 1], [], []>} : vector<4x384xbf16>, vector<384x128xbf16>, vector<4x128xf32> -> vector<4x128xf32>
    %295 = vector.broadcast %235 : vector<1x128xf32> to vector<4x128xf32>
    %296 = arith.addf %294, %295 : vector<4x128xf32>
    %cst_93 = arith.constant 0.000000e+00 : f32
    %297 = vector.broadcast %cst_93 : f32 to vector<4x128xf32>
    %298 = arith.maximumf %296, %297 : vector<4x128xf32>
    %299 = arith.truncf %298 : vector<4x128xf32> to vector<4x128xbf16>
    %300 = vector.extract_strided_slice %231 {offsets = [0, 2304], sizes = [4, 384], strides = [1, 1]} : vector<4x4224xbf16> to vector<4x384xbf16>
    %cst_94 = arith.constant dense<0.000000e+00> : vector<4x128xf32>
    %301 = tpu.matmul %300, %233, %cst_94 {dimension_numbers = #tpu.dot_dimension_numbers<[1], [0], [0], [1], [0, 0, 1, 1], [], []>} : vector<4x384xbf16>, vector<384x128xbf16>, vector<4x128xf32> -> vector<4x128xf32>
    %302 = vector.broadcast %235 : vector<1x128xf32> to vector<4x128xf32>
    %303 = arith.addf %301, %302 : vector<4x128xf32>
    %cst_95 = arith.constant 0.000000e+00 : f32
    %304 = vector.broadcast %cst_95 : f32 to vector<4x128xf32>
    %305 = arith.maximumf %303, %304 : vector<4x128xf32>
    %306 = arith.truncf %305 : vector<4x128xf32> to vector<4x128xbf16>
    %307 = vector.extract_strided_slice %231 {offsets = [0, 2560], sizes = [4, 384], strides = [1, 1]} : vector<4x4224xbf16> to vector<4x384xbf16>
    %cst_96 = arith.constant dense<0.000000e+00> : vector<4x128xf32>
    %308 = tpu.matmul %307, %233, %cst_96 {dimension_numbers = #tpu.dot_dimension_numbers<[1], [0], [0], [1], [0, 0, 1, 1], [], []>} : vector<4x384xbf16>, vector<384x128xbf16>, vector<4x128xf32> -> vector<4x128xf32>
    %309 = vector.broadcast %235 : vector<1x128xf32> to vector<4x128xf32>
    %310 = arith.addf %308, %309 : vector<4x128xf32>
    %cst_97 = arith.constant 0.000000e+00 : f32
    %311 = vector.broadcast %cst_97 : f32 to vector<4x128xf32>
    %312 = arith.maximumf %310, %311 : vector<4x128xf32>
    %313 = arith.truncf %312 : vector<4x128xf32> to vector<4x128xbf16>
    %314 = vector.extract_strided_slice %231 {offsets = [0, 2816], sizes = [4, 384], strides = [1, 1]} : vector<4x4224xbf16> to vector<4x384xbf16>
    %cst_98 = arith.constant dense<0.000000e+00> : vector<4x128xf32>
    %315 = tpu.matmul %314, %233, %cst_98 {dimension_numbers = #tpu.dot_dimension_numbers<[1], [0], [0], [1], [0, 0, 1, 1], [], []>} : vector<4x384xbf16>, vector<384x128xbf16>, vector<4x128xf32> -> vector<4x128xf32>
    %316 = vector.broadcast %235 : vector<1x128xf32> to vector<4x128xf32>
    %317 = arith.addf %315, %316 : vector<4x128xf32>
    %cst_99 = arith.constant 0.000000e+00 : f32
    %318 = vector.broadcast %cst_99 : f32 to vector<4x128xf32>
    %319 = arith.maximumf %317, %318 : vector<4x128xf32>
    %320 = arith.truncf %319 : vector<4x128xf32> to vector<4x128xbf16>
    %321 = vector.extract_strided_slice %231 {offsets = [0, 3072], sizes = [4, 384], strides = [1, 1]} : vector<4x4224xbf16> to vector<4x384xbf16>
    %cst_100 = arith.constant dense<0.000000e+00> : vector<4x128xf32>
    %322 = tpu.matmul %321, %233, %cst_100 {dimension_numbers = #tpu.dot_dimension_numbers<[1], [0], [0], [1], [0, 0, 1, 1], [], []>} : vector<4x384xbf16>, vector<384x128xbf16>, vector<4x128xf32> -> vector<4x128xf32>
    %323 = vector.broadcast %235 : vector<1x128xf32> to vector<4x128xf32>
    %324 = arith.addf %322, %323 : vector<4x128xf32>
    %cst_101 = arith.constant 0.000000e+00 : f32
    %325 = vector.broadcast %cst_101 : f32 to vector<4x128xf32>
    %326 = arith.maximumf %324, %325 : vector<4x128xf32>
    %327 = arith.truncf %326 : vector<4x128xf32> to vector<4x128xbf16>
    %328 = vector.extract_strided_slice %231 {offsets = [0, 3328], sizes = [4, 384], strides = [1, 1]} : vector<4x4224xbf16> to vector<4x384xbf16>
    %cst_102 = arith.constant dense<0.000000e+00> : vector<4x128xf32>
    %329 = tpu.matmul %328, %233, %cst_102 {dimension_numbers = #tpu.dot_dimension_numbers<[1], [0], [0], [1], [0, 0, 1, 1], [], []>} : vector<4x384xbf16>, vector<384x128xbf16>, vector<4x128xf32> -> vector<4x128xf32>
    %330 = vector.broadcast %235 : vector<1x128xf32> to vector<4x128xf32>
    %331 = arith.addf %329, %330 : vector<4x128xf32>
    %cst_103 = arith.constant 0.000000e+00 : f32
    %332 = vector.broadcast %cst_103 : f32 to vector<4x128xf32>
    %333 = arith.maximumf %331, %332 : vector<4x128xf32>
    %334 = arith.truncf %333 : vector<4x128xf32> to vector<4x128xbf16>
    %335 = vector.extract_strided_slice %231 {offsets = [0, 3584], sizes = [4, 384], strides = [1, 1]} : vector<4x4224xbf16> to vector<4x384xbf16>
    %cst_104 = arith.constant dense<0.000000e+00> : vector<4x128xf32>
    %336 = tpu.matmul %335, %233, %cst_104 {dimension_numbers = #tpu.dot_dimension_numbers<[1], [0], [0], [1], [0, 0, 1, 1], [], []>} : vector<4x384xbf16>, vector<384x128xbf16>, vector<4x128xf32> -> vector<4x128xf32>
    %337 = vector.broadcast %235 : vector<1x128xf32> to vector<4x128xf32>
    %338 = arith.addf %336, %337 : vector<4x128xf32>
    %cst_105 = arith.constant 0.000000e+00 : f32
    %339 = vector.broadcast %cst_105 : f32 to vector<4x128xf32>
    %340 = arith.maximumf %338, %339 : vector<4x128xf32>
    %341 = arith.truncf %340 : vector<4x128xf32> to vector<4x128xbf16>
    %342 = vector.extract_strided_slice %231 {offsets = [0, 3840], sizes = [4, 384], strides = [1, 1]} : vector<4x4224xbf16> to vector<4x384xbf16>
    %cst_106 = arith.constant dense<0.000000e+00> : vector<4x128xf32>
    %343 = tpu.matmul %342, %233, %cst_106 {dimension_numbers = #tpu.dot_dimension_numbers<[1], [0], [0], [1], [0, 0, 1, 1], [], []>} : vector<4x384xbf16>, vector<384x128xbf16>, vector<4x128xf32> -> vector<4x128xf32>
    %344 = vector.broadcast %235 : vector<1x128xf32> to vector<4x128xf32>
    %345 = arith.addf %343, %344 : vector<4x128xf32>
    %cst_107 = arith.constant 0.000000e+00 : f32
    %346 = vector.broadcast %cst_107 : f32 to vector<4x128xf32>
    %347 = arith.maximumf %345, %346 : vector<4x128xf32>
    %348 = arith.truncf %347 : vector<4x128xf32> to vector<4x128xbf16>
    %349 = tpu.concatenate %236, %243, %250, %257, %264, %271, %278, %285, %292, %299, %306, %313, %320, %327, %334, %341 in 1 : vector<4x128xbf16>, vector<4x128xbf16>, vector<4x128xbf16>, vector<4x128xbf16>, vector<4x128xbf16>, vector<4x128xbf16>, vector<4x128xbf16>, vector<4x128xbf16>, vector<4x128xbf16>, vector<4x128xbf16>, vector<4x128xbf16>, vector<4x128xbf16>, vector<4x128xbf16>, vector<4x128xbf16>, vector<4x128xbf16>, vector<4x128xbf16> -> vector<4x2048xbf16>
    %350 = tpu.concatenate %349, %348 in 1 : vector<4x2048xbf16>, vector<4x128xbf16> -> vector<4x2176xbf16>
    %c1_108 = arith.constant 1 : index
    %c0_109 = arith.constant 0 : index
    %c0_110 = arith.constant 0 : index
    %351 = vector.load %arg2[%c1_108, %c0_109, %c0_110] : memref<5x384x128xbf16, #tpu.memory_space<vmem>>, vector<1x384x128xbf16>
    %352 = vector.shape_cast %351 : vector<1x384x128xbf16> to vector<384x128xbf16>
    %c2 = arith.constant 2 : index
    %c0_111 = arith.constant 0 : index
    %c0_112 = arith.constant 0 : index
    %353 = vector.load %arg3[%c2, %c0_111, %c0_112] : memref<6x1x128xf32, #tpu.memory_space<vmem>>, vector<1x1x128xf32>
    %354 = vector.shape_cast %353 : vector<1x1x128xf32> to vector<1x128xf32>
    %cst_113 = arith.constant 0.000000e+00 : bf16
    %355 = vector.broadcast %cst_113 : bf16 to vector<4x128xbf16>
    %356 = vector.extract_strided_slice %350 {offsets = [0, 0], sizes = [4, 384], strides = [1, 1]} : vector<4x2176xbf16> to vector<4x384xbf16>
    %cst_114 = arith.constant dense<0.000000e+00> : vector<4x128xf32>
    %357 = tpu.matmul %356, %352, %cst_114 {dimension_numbers = #tpu.dot_dimension_numbers<[1], [0], [0], [1], [0, 0, 1, 1], [], []>} : vector<4x384xbf16>, vector<384x128xbf16>, vector<4x128xf32> -> vector<4x128xf32>
    %358 = vector.broadcast %354 : vector<1x128xf32> to vector<4x128xf32>
    %359 = arith.addf %357, %358 : vector<4x128xf32>
    %cst_115 = arith.constant 0.000000e+00 : f32
    %360 = vector.broadcast %cst_115 : f32 to vector<4x128xf32>
    %361 = arith.maximumf %359, %360 : vector<4x128xf32>
    %362 = arith.truncf %361 : vector<4x128xf32> to vector<4x128xbf16>
    %363 = vector.extract_strided_slice %350 {offsets = [0, 256], sizes = [4, 384], strides = [1, 1]} : vector<4x2176xbf16> to vector<4x384xbf16>
    %cst_116 = arith.constant dense<0.000000e+00> : vector<4x128xf32>
    %364 = tpu.matmul %363, %352, %cst_116 {dimension_numbers = #tpu.dot_dimension_numbers<[1], [0], [0], [1], [0, 0, 1, 1], [], []>} : vector<4x384xbf16>, vector<384x128xbf16>, vector<4x128xf32> -> vector<4x128xf32>
    %365 = vector.broadcast %354 : vector<1x128xf32> to vector<4x128xf32>
    %366 = arith.addf %364, %365 : vector<4x128xf32>
    %cst_117 = arith.constant 0.000000e+00 : f32
    %367 = vector.broadcast %cst_117 : f32 to vector<4x128xf32>
    %368 = arith.maximumf %366, %367 : vector<4x128xf32>
    %369 = arith.truncf %368 : vector<4x128xf32> to vector<4x128xbf16>
    %370 = vector.extract_strided_slice %350 {offsets = [0, 512], sizes = [4, 384], strides = [1, 1]} : vector<4x2176xbf16> to vector<4x384xbf16>
    %cst_118 = arith.constant dense<0.000000e+00> : vector<4x128xf32>
    %371 = tpu.matmul %370, %352, %cst_118 {dimension_numbers = #tpu.dot_dimension_numbers<[1], [0], [0], [1], [0, 0, 1, 1], [], []>} : vector<4x384xbf16>, vector<384x128xbf16>, vector<4x128xf32> -> vector<4x128xf32>
    %372 = vector.broadcast %354 : vector<1x128xf32> to vector<4x128xf32>
    %373 = arith.addf %371, %372 : vector<4x128xf32>
    %cst_119 = arith.constant 0.000000e+00 : f32
    %374 = vector.broadcast %cst_119 : f32 to vector<4x128xf32>
    %375 = arith.maximumf %373, %374 : vector<4x128xf32>
    %376 = arith.truncf %375 : vector<4x128xf32> to vector<4x128xbf16>
    %377 = vector.extract_strided_slice %350 {offsets = [0, 768], sizes = [4, 384], strides = [1, 1]} : vector<4x2176xbf16> to vector<4x384xbf16>
    %cst_120 = arith.constant dense<0.000000e+00> : vector<4x128xf32>
    %378 = tpu.matmul %377, %352, %cst_120 {dimension_numbers = #tpu.dot_dimension_numbers<[1], [0], [0], [1], [0, 0, 1, 1], [], []>} : vector<4x384xbf16>, vector<384x128xbf16>, vector<4x128xf32> -> vector<4x128xf32>
    %379 = vector.broadcast %354 : vector<1x128xf32> to vector<4x128xf32>
    %380 = arith.addf %378, %379 : vector<4x128xf32>
    %cst_121 = arith.constant 0.000000e+00 : f32
    %381 = vector.broadcast %cst_121 : f32 to vector<4x128xf32>
    %382 = arith.maximumf %380, %381 : vector<4x128xf32>
    %383 = arith.truncf %382 : vector<4x128xf32> to vector<4x128xbf16>
    %384 = vector.extract_strided_slice %350 {offsets = [0, 1024], sizes = [4, 384], strides = [1, 1]} : vector<4x2176xbf16> to vector<4x384xbf16>
    %cst_122 = arith.constant dense<0.000000e+00> : vector<4x128xf32>
    %385 = tpu.matmul %384, %352, %cst_122 {dimension_numbers = #tpu.dot_dimension_numbers<[1], [0], [0], [1], [0, 0, 1, 1], [], []>} : vector<4x384xbf16>, vector<384x128xbf16>, vector<4x128xf32> -> vector<4x128xf32>
    %386 = vector.broadcast %354 : vector<1x128xf32> to vector<4x128xf32>
    %387 = arith.addf %385, %386 : vector<4x128xf32>
    %cst_123 = arith.constant 0.000000e+00 : f32
    %388 = vector.broadcast %cst_123 : f32 to vector<4x128xf32>
    %389 = arith.maximumf %387, %388 : vector<4x128xf32>
    %390 = arith.truncf %389 : vector<4x128xf32> to vector<4x128xbf16>
    %391 = vector.extract_strided_slice %350 {offsets = [0, 1280], sizes = [4, 384], strides = [1, 1]} : vector<4x2176xbf16> to vector<4x384xbf16>
    %cst_124 = arith.constant dense<0.000000e+00> : vector<4x128xf32>
    %392 = tpu.matmul %391, %352, %cst_124 {dimension_numbers = #tpu.dot_dimension_numbers<[1], [0], [0], [1], [0, 0, 1, 1], [], []>} : vector<4x384xbf16>, vector<384x128xbf16>, vector<4x128xf32> -> vector<4x128xf32>
    %393 = vector.broadcast %354 : vector<1x128xf32> to vector<4x128xf32>
    %394 = arith.addf %392, %393 : vector<4x128xf32>
    %cst_125 = arith.constant 0.000000e+00 : f32
    %395 = vector.broadcast %cst_125 : f32 to vector<4x128xf32>
    %396 = arith.maximumf %394, %395 : vector<4x128xf32>
    %397 = arith.truncf %396 : vector<4x128xf32> to vector<4x128xbf16>
    %398 = vector.extract_strided_slice %350 {offsets = [0, 1536], sizes = [4, 384], strides = [1, 1]} : vector<4x2176xbf16> to vector<4x384xbf16>
    %cst_126 = arith.constant dense<0.000000e+00> : vector<4x128xf32>
    %399 = tpu.matmul %398, %352, %cst_126 {dimension_numbers = #tpu.dot_dimension_numbers<[1], [0], [0], [1], [0, 0, 1, 1], [], []>} : vector<4x384xbf16>, vector<384x128xbf16>, vector<4x128xf32> -> vector<4x128xf32>
    %400 = vector.broadcast %354 : vector<1x128xf32> to vector<4x128xf32>
    %401 = arith.addf %399, %400 : vector<4x128xf32>
    %cst_127 = arith.constant 0.000000e+00 : f32
    %402 = vector.broadcast %cst_127 : f32 to vector<4x128xf32>
    %403 = arith.maximumf %401, %402 : vector<4x128xf32>
    %404 = arith.truncf %403 : vector<4x128xf32> to vector<4x128xbf16>
    %405 = vector.extract_strided_slice %350 {offsets = [0, 1792], sizes = [4, 384], strides = [1, 1]} : vector<4x2176xbf16> to vector<4x384xbf16>
    %cst_128 = arith.constant dense<0.000000e+00> : vector<4x128xf32>
    %406 = tpu.matmul %405, %352, %cst_128 {dimension_numbers = #tpu.dot_dimension_numbers<[1], [0], [0], [1], [0, 0, 1, 1], [], []>} : vector<4x384xbf16>, vector<384x128xbf16>, vector<4x128xf32> -> vector<4x128xf32>
    %407 = vector.broadcast %354 : vector<1x128xf32> to vector<4x128xf32>
    %408 = arith.addf %406, %407 : vector<4x128xf32>
    %cst_129 = arith.constant 0.000000e+00 : f32
    %409 = vector.broadcast %cst_129 : f32 to vector<4x128xf32>
    %410 = arith.maximumf %408, %409 : vector<4x128xf32>
    %411 = arith.truncf %410 : vector<4x128xf32> to vector<4x128xbf16>
    %412 = tpu.concatenate %355, %362, %369, %376, %383, %390, %397, %404, %411 in 1 : vector<4x128xbf16>, vector<4x128xbf16>, vector<4x128xbf16>, vector<4x128xbf16>, vector<4x128xbf16>, vector<4x128xbf16>, vector<4x128xbf16>, vector<4x128xbf16>, vector<4x128xbf16> -> vector<4x1152xbf16>
    %c2_130 = arith.constant 2 : index
    %c0_131 = arith.constant 0 : index
    %c0_132 = arith.constant 0 : index
    %413 = vector.load %arg2[%c2_130, %c0_131, %c0_132] : memref<5x384x128xbf16, #tpu.memory_space<vmem>>, vector<1x384x128xbf16>
    %414 = vector.shape_cast %413 : vector<1x384x128xbf16> to vector<384x128xbf16>
    %c3 = arith.constant 3 : index
    %c0_133 = arith.constant 0 : index
    %c0_134 = arith.constant 0 : index
    %415 = vector.load %arg3[%c3, %c0_133, %c0_134] : memref<6x1x128xf32, #tpu.memory_space<vmem>>, vector<1x1x128xf32>
    %416 = vector.shape_cast %415 : vector<1x1x128xf32> to vector<1x128xf32>
    %cst_135 = arith.constant 0.000000e+00 : bf16
    %417 = vector.broadcast %cst_135 : bf16 to vector<4x128xbf16>
    %418 = vector.extract_strided_slice %412 {offsets = [0, 0], sizes = [4, 384], strides = [1, 1]} : vector<4x1152xbf16> to vector<4x384xbf16>
    %cst_136 = arith.constant dense<0.000000e+00> : vector<4x128xf32>
    %419 = tpu.matmul %418, %414, %cst_136 {dimension_numbers = #tpu.dot_dimension_numbers<[1], [0], [0], [1], [0, 0, 1, 1], [], []>} : vector<4x384xbf16>, vector<384x128xbf16>, vector<4x128xf32> -> vector<4x128xf32>
    %420 = vector.broadcast %416 : vector<1x128xf32> to vector<4x128xf32>
    %421 = arith.addf %419, %420 : vector<4x128xf32>
    %cst_137 = arith.constant 0.000000e+00 : f32
    %422 = vector.broadcast %cst_137 : f32 to vector<4x128xf32>
    %423 = arith.maximumf %421, %422 : vector<4x128xf32>
    %424 = arith.truncf %423 : vector<4x128xf32> to vector<4x128xbf16>
    %425 = vector.extract_strided_slice %412 {offsets = [0, 256], sizes = [4, 384], strides = [1, 1]} : vector<4x1152xbf16> to vector<4x384xbf16>
    %cst_138 = arith.constant dense<0.000000e+00> : vector<4x128xf32>
    %426 = tpu.matmul %425, %414, %cst_138 {dimension_numbers = #tpu.dot_dimension_numbers<[1], [0], [0], [1], [0, 0, 1, 1], [], []>} : vector<4x384xbf16>, vector<384x128xbf16>, vector<4x128xf32> -> vector<4x128xf32>
    %427 = vector.broadcast %416 : vector<1x128xf32> to vector<4x128xf32>
    %428 = arith.addf %426, %427 : vector<4x128xf32>
    %cst_139 = arith.constant 0.000000e+00 : f32
    %429 = vector.broadcast %cst_139 : f32 to vector<4x128xf32>
    %430 = arith.maximumf %428, %429 : vector<4x128xf32>
    %431 = arith.truncf %430 : vector<4x128xf32> to vector<4x128xbf16>
    %432 = vector.extract_strided_slice %412 {offsets = [0, 512], sizes = [4, 384], strides = [1, 1]} : vector<4x1152xbf16> to vector<4x384xbf16>
    %cst_140 = arith.constant dense<0.000000e+00> : vector<4x128xf32>
    %433 = tpu.matmul %432, %414, %cst_140 {dimension_numbers = #tpu.dot_dimension_numbers<[1], [0], [0], [1], [0, 0, 1, 1], [], []>} : vector<4x384xbf16>, vector<384x128xbf16>, vector<4x128xf32> -> vector<4x128xf32>
    %434 = vector.broadcast %416 : vector<1x128xf32> to vector<4x128xf32>
    %435 = arith.addf %433, %434 : vector<4x128xf32>
    %cst_141 = arith.constant 0.000000e+00 : f32
    %436 = vector.broadcast %cst_141 : f32 to vector<4x128xf32>
    %437 = arith.maximumf %435, %436 : vector<4x128xf32>
    %438 = arith.truncf %437 : vector<4x128xf32> to vector<4x128xbf16>
    %439 = vector.extract_strided_slice %412 {offsets = [0, 768], sizes = [4, 384], strides = [1, 1]} : vector<4x1152xbf16> to vector<4x384xbf16>
    %cst_142 = arith.constant dense<0.000000e+00> : vector<4x128xf32>
    %440 = tpu.matmul %439, %414, %cst_142 {dimension_numbers = #tpu.dot_dimension_numbers<[1], [0], [0], [1], [0, 0, 1, 1], [], []>} : vector<4x384xbf16>, vector<384x128xbf16>, vector<4x128xf32> -> vector<4x128xf32>
    %441 = vector.broadcast %416 : vector<1x128xf32> to vector<4x128xf32>
    %442 = arith.addf %440, %441 : vector<4x128xf32>
    %cst_143 = arith.constant 0.000000e+00 : f32
    %443 = vector.broadcast %cst_143 : f32 to vector<4x128xf32>
    %444 = arith.maximumf %442, %443 : vector<4x128xf32>
    %445 = arith.truncf %444 : vector<4x128xf32> to vector<4x128xbf16>
    %446 = tpu.concatenate %417, %424, %431, %438, %445 in 1 : vector<4x128xbf16>, vector<4x128xbf16>, vector<4x128xbf16>, vector<4x128xbf16>, vector<4x128xbf16> -> vector<4x640xbf16>
    %c3_144 = arith.constant 3 : index
    %c0_145 = arith.constant 0 : index
    %c0_146 = arith.constant 0 : index
    %447 = vector.load %arg2[%c3_144, %c0_145, %c0_146] : memref<5x384x128xbf16, #tpu.memory_space<vmem>>, vector<1x384x128xbf16>
    %448 = vector.shape_cast %447 : vector<1x384x128xbf16> to vector<384x128xbf16>
    %c4 = arith.constant 4 : index
    %c0_147 = arith.constant 0 : index
    %c0_148 = arith.constant 0 : index
    %449 = vector.load %arg3[%c4, %c0_147, %c0_148] : memref<6x1x128xf32, #tpu.memory_space<vmem>>, vector<1x1x128xf32>
    %450 = vector.shape_cast %449 : vector<1x1x128xf32> to vector<1x128xf32>
    %cst_149 = arith.constant 0.000000e+00 : bf16
    %451 = vector.broadcast %cst_149 : bf16 to vector<4x128xbf16>
    %452 = vector.extract_strided_slice %446 {offsets = [0, 0], sizes = [4, 384], strides = [1, 1]} : vector<4x640xbf16> to vector<4x384xbf16>
    %cst_150 = arith.constant dense<0.000000e+00> : vector<4x128xf32>
    %453 = tpu.matmul %452, %448, %cst_150 {dimension_numbers = #tpu.dot_dimension_numbers<[1], [0], [0], [1], [0, 0, 1, 1], [], []>} : vector<4x384xbf16>, vector<384x128xbf16>, vector<4x128xf32> -> vector<4x128xf32>
    %454 = vector.broadcast %450 : vector<1x128xf32> to vector<4x128xf32>
    %455 = arith.addf %453, %454 : vector<4x128xf32>
    %cst_151 = arith.constant 0.000000e+00 : f32
    %456 = vector.broadcast %cst_151 : f32 to vector<4x128xf32>
    %457 = arith.maximumf %455, %456 : vector<4x128xf32>
    %458 = arith.truncf %457 : vector<4x128xf32> to vector<4x128xbf16>
    %459 = vector.extract_strided_slice %446 {offsets = [0, 256], sizes = [4, 384], strides = [1, 1]} : vector<4x640xbf16> to vector<4x384xbf16>
    %cst_152 = arith.constant dense<0.000000e+00> : vector<4x128xf32>
    %460 = tpu.matmul %459, %448, %cst_152 {dimension_numbers = #tpu.dot_dimension_numbers<[1], [0], [0], [1], [0, 0, 1, 1], [], []>} : vector<4x384xbf16>, vector<384x128xbf16>, vector<4x128xf32> -> vector<4x128xf32>
    %461 = vector.broadcast %450 : vector<1x128xf32> to vector<4x128xf32>
    %462 = arith.addf %460, %461 : vector<4x128xf32>
    %cst_153 = arith.constant 0.000000e+00 : f32
    %463 = vector.broadcast %cst_153 : f32 to vector<4x128xf32>
    %464 = arith.maximumf %462, %463 : vector<4x128xf32>
    %465 = arith.truncf %464 : vector<4x128xf32> to vector<4x128xbf16>
    %466 = tpu.concatenate %451, %458, %465 in 1 : vector<4x128xbf16>, vector<4x128xbf16>, vector<4x128xbf16> -> vector<4x384xbf16>
    %c4_154 = arith.constant 4 : index
    %c0_155 = arith.constant 0 : index
    %c0_156 = arith.constant 0 : index
    %467 = vector.load %arg2[%c4_154, %c0_155, %c0_156] : memref<5x384x128xbf16, #tpu.memory_space<vmem>>, vector<1x384x128xbf16>
    %468 = vector.shape_cast %467 : vector<1x384x128xbf16> to vector<384x128xbf16>
    %cst_157 = arith.constant dense<0.000000e+00> : vector<4x128xf32>
    %469 = tpu.matmul %466, %468, %cst_157 {dimension_numbers = #tpu.dot_dimension_numbers<[1], [0], [0], [1], [0, 0, 1, 1], [], []>} : vector<4x384xbf16>, vector<384x128xbf16>, vector<4x128xf32> -> vector<4x128xf32>
    %c5 = arith.constant 5 : index
    %c0_158 = arith.constant 0 : index
    %c0_159 = arith.constant 0 : index
    %470 = vector.load %arg3[%c5, %c0_158, %c0_159] : memref<6x1x128xf32, #tpu.memory_space<vmem>>, vector<1x1x128xf32>
    %471 = vector.shape_cast %470 : vector<1x1x128xf32> to vector<1x128xf32>
    %472 = vector.broadcast %471 : vector<1x128xf32> to vector<4x128xf32>
    %473 = arith.addf %469, %472 : vector<4x128xf32>
    %cst_160 = arith.constant 0.000000e+00 : f32
    %474 = vector.broadcast %cst_160 : f32 to vector<4x128xf32>
    %475 = arith.maximumf %473, %474 : vector<4x128xf32>
    %476 = arith.truncf %475 : vector<4x128xf32> to vector<4x128xbf16>
    %c0_161 = arith.constant 0 : index
    %c0_162 = arith.constant 0 : index
    %c0_163 = arith.constant 0 : index
    %477 = vector.load %arg4[%c0_161, %c0_162, %c0_163] : memref<7x128x128xbf16, #tpu.memory_space<vmem>>, vector<1x128x128xbf16>
    %478 = vector.shape_cast %477 : vector<1x128x128xbf16> to vector<128x128xbf16>
    %cst_164 = arith.constant dense<0.000000e+00> : vector<4x128xf32>
    %479 = tpu.matmul %476, %478, %cst_164 {dimension_numbers = #tpu.dot_dimension_numbers<[1], [0], [0], [1], [0, 0, 1, 1], [], []>} : vector<4x128xbf16>, vector<128x128xbf16>, vector<4x128xf32> -> vector<4x128xf32>
    %c0_165 = arith.constant 0 : index
    %c0_166 = arith.constant 0 : index
    %c0_167 = arith.constant 0 : index
    %480 = vector.load %arg5[%c0_165, %c0_166, %c0_167] : memref<7x1x128xf32, #tpu.memory_space<vmem>>, vector<1x1x128xf32>
    %481 = vector.shape_cast %480 : vector<1x1x128xf32> to vector<1x128xf32>
    %482 = vector.broadcast %481 : vector<1x128xf32> to vector<4x128xf32>
    %483 = arith.addf %479, %482 : vector<4x128xf32>
    %484 = arith.truncf %483 : vector<4x128xf32> to vector<4x128xbf16>
    %c1_168 = arith.constant 1 : index
    %c0_169 = arith.constant 0 : index
    %c0_170 = arith.constant 0 : index
    %485 = vector.load %arg4[%c1_168, %c0_169, %c0_170] : memref<7x128x128xbf16, #tpu.memory_space<vmem>>, vector<1x128x128xbf16>
    %486 = vector.shape_cast %485 : vector<1x128x128xbf16> to vector<128x128xbf16>
    %cst_171 = arith.constant dense<0.000000e+00> : vector<4x128xf32>
    %487 = tpu.matmul %484, %486, %cst_171 {dimension_numbers = #tpu.dot_dimension_numbers<[1], [0], [0], [1], [0, 0, 1, 1], [], []>} : vector<4x128xbf16>, vector<128x128xbf16>, vector<4x128xf32> -> vector<4x128xf32>
    %c1_172 = arith.constant 1 : index
    %c0_173 = arith.constant 0 : index
    %c0_174 = arith.constant 0 : index
    %488 = vector.load %arg5[%c1_172, %c0_173, %c0_174] : memref<7x1x128xf32, #tpu.memory_space<vmem>>, vector<1x1x128xf32>
    %489 = vector.shape_cast %488 : vector<1x1x128xf32> to vector<1x128xf32>
    %490 = vector.broadcast %489 : vector<1x128xf32> to vector<4x128xf32>
    %491 = arith.addf %487, %490 : vector<4x128xf32>
    %cst_175 = arith.constant 0.000000e+00 : f32
    %492 = vector.broadcast %cst_175 : f32 to vector<4x128xf32>
    %493 = arith.maximumf %491, %492 : vector<4x128xf32>
    %494 = arith.truncf %493 : vector<4x128xf32> to vector<4x128xbf16>
    %c2_176 = arith.constant 2 : index
    %c0_177 = arith.constant 0 : index
    %c0_178 = arith.constant 0 : index
    %495 = vector.load %arg4[%c2_176, %c0_177, %c0_178] : memref<7x128x128xbf16, #tpu.memory_space<vmem>>, vector<1x128x128xbf16>
    %496 = vector.shape_cast %495 : vector<1x128x128xbf16> to vector<128x128xbf16>
    %cst_179 = arith.constant dense<0.000000e+00> : vector<4x128xf32>
    %497 = tpu.matmul %494, %496, %cst_179 {dimension_numbers = #tpu.dot_dimension_numbers<[1], [0], [0], [1], [0, 0, 1, 1], [], []>} : vector<4x128xbf16>, vector<128x128xbf16>, vector<4x128xf32> -> vector<4x128xf32>
    %c2_180 = arith.constant 2 : index
    %c0_181 = arith.constant 0 : index
    %c0_182 = arith.constant 0 : index
    %498 = vector.load %arg5[%c2_180, %c0_181, %c0_182] : memref<7x1x128xf32, #tpu.memory_space<vmem>>, vector<1x1x128xf32>
    %499 = vector.shape_cast %498 : vector<1x1x128xf32> to vector<1x128xf32>
    %500 = vector.broadcast %499 : vector<1x128xf32> to vector<4x128xf32>
    %501 = arith.addf %497, %500 : vector<4x128xf32>
    %cst_183 = arith.constant 0.000000e+00 : f32
    %502 = vector.broadcast %cst_183 : f32 to vector<4x128xf32>
    %503 = arith.maximumf %501, %502 : vector<4x128xf32>
    %504 = arith.truncf %503 : vector<4x128xf32> to vector<4x128xbf16>
    %c3_184 = arith.constant 3 : index
    %c0_185 = arith.constant 0 : index
    %c0_186 = arith.constant 0 : index
    %505 = vector.load %arg4[%c3_184, %c0_185, %c0_186] : memref<7x128x128xbf16, #tpu.memory_space<vmem>>, vector<1x128x128xbf16>
    %506 = vector.shape_cast %505 : vector<1x128x128xbf16> to vector<128x128xbf16>
    %cst_187 = arith.constant dense<0.000000e+00> : vector<4x128xf32>
    %507 = tpu.matmul %504, %506, %cst_187 {dimension_numbers = #tpu.dot_dimension_numbers<[1], [0], [0], [1], [0, 0, 1, 1], [], []>} : vector<4x128xbf16>, vector<128x128xbf16>, vector<4x128xf32> -> vector<4x128xf32>
    %c3_188 = arith.constant 3 : index
    %c0_189 = arith.constant 0 : index
    %c0_190 = arith.constant 0 : index
    %508 = vector.load %arg5[%c3_188, %c0_189, %c0_190] : memref<7x1x128xf32, #tpu.memory_space<vmem>>, vector<1x1x128xf32>
    %509 = vector.shape_cast %508 : vector<1x1x128xf32> to vector<1x128xf32>
    %510 = vector.broadcast %509 : vector<1x128xf32> to vector<4x128xf32>
    %511 = arith.addf %507, %510 : vector<4x128xf32>
    %512 = arith.truncf %511 : vector<4x128xf32> to vector<4x128xbf16>
    %c0_191 = arith.constant 0 : index
    %c0_192 = arith.constant 0 : index
    %513 = vector.load %arg6[%c0_191, %c0_192] : memref<128x512xbf16, #tpu.memory_space<vmem>>, vector<128x512xbf16>
    %cst_193 = arith.constant dense<0.000000e+00> : vector<4x512xf32>
    %514 = tpu.matmul %512, %513, %cst_193 {dimension_numbers = #tpu.dot_dimension_numbers<[1], [0], [0], [1], [0, 0, 1, 1], [], []>} : vector<4x128xbf16>, vector<128x512xbf16>, vector<4x512xf32> -> vector<4x512xf32>
    %c0_194 = arith.constant 0 : index
    %c0_195 = arith.constant 0 : index
    %515 = vector.load %arg8[%c0_194, %c0_195] : memref<1x512xf32, #tpu.memory_space<vmem>>, vector<1x512xf32>
    %516 = vector.broadcast %515 : vector<1x512xf32> to vector<4x512xf32>
    %517 = arith.addf %514, %516 : vector<4x512xf32>
    %c0_196 = arith.constant 0 : index
    %c0_197 = arith.constant 0 : index
    %518 = vector.load %arg7[%c0_196, %c0_197] : memref<128x512xbf16, #tpu.memory_space<vmem>>, vector<128x512xbf16>
    %cst_198 = arith.constant 0.000000e+00 : f32
    %519 = vector.broadcast %cst_198 : f32 to vector<1x128xf32>
    %cst_199 = arith.constant 0.000000e+00 : f32
    %520 = vector.broadcast %cst_199 : f32 to vector<1x128xf32>
    %521 = vector.extract_strided_slice %517 {offsets = [0, 0], sizes = [1, 512], strides = [1, 1]} : vector<4x512xf32> to vector<1x512xf32>
    %522 = arith.truncf %519 : vector<1x128xf32> to vector<1x128xbf16>
    %cst_200 = arith.constant dense<0.000000e+00> : vector<1x512xf32>
    %523 = tpu.matmul %522, %518, %cst_200 {dimension_numbers = #tpu.dot_dimension_numbers<[1], [0], [0], [1], [0, 0, 1, 1], [], []>} : vector<1x128xbf16>, vector<128x512xbf16>, vector<1x512xf32> -> vector<1x512xf32>
    %524 = arith.addf %521, %523 : vector<1x512xf32>
    %525 = vector.extract_strided_slice %524 {offsets = [0, 0], sizes = [1, 128], strides = [1, 1]} : vector<1x512xf32> to vector<1x128xf32>
    %526 = arith.negf %525 : vector<1x128xf32>
    %527 = math.exp %526 : vector<1x128xf32>
    %cst_201 = arith.constant 1.000000e+00 : f32
    %528 = vector.broadcast %cst_201 : f32 to vector<1x128xf32>
    %529 = arith.addf %528, %527 : vector<1x128xf32>
    %530 = arith.divf %528, %529 : vector<1x128xf32>
    %531 = vector.extract_strided_slice %524 {offsets = [0, 128], sizes = [1, 128], strides = [1, 1]} : vector<1x512xf32> to vector<1x128xf32>
    %532 = arith.negf %531 : vector<1x128xf32>
    %533 = math.exp %532 : vector<1x128xf32>
    %cst_202 = arith.constant 1.000000e+00 : f32
    %534 = vector.broadcast %cst_202 : f32 to vector<1x128xf32>
    %535 = arith.addf %534, %533 : vector<1x128xf32>
    %536 = arith.divf %534, %535 : vector<1x128xf32>
    %537 = vector.extract_strided_slice %524 {offsets = [0, 256], sizes = [1, 128], strides = [1, 1]} : vector<1x512xf32> to vector<1x128xf32>
    %538 = math.tanh %537 : vector<1x128xf32>
    %539 = vector.extract_strided_slice %524 {offsets = [0, 384], sizes = [1, 128], strides = [1, 1]} : vector<1x512xf32> to vector<1x128xf32>
    %540 = arith.negf %539 : vector<1x128xf32>
    %541 = math.exp %540 : vector<1x128xf32>
    %cst_203 = arith.constant 1.000000e+00 : f32
    %542 = vector.broadcast %cst_203 : f32 to vector<1x128xf32>
    %543 = arith.addf %542, %541 : vector<1x128xf32>
    %544 = arith.divf %542, %543 : vector<1x128xf32>
    %545 = arith.mulf %536, %520 : vector<1x128xf32>
    %546 = arith.mulf %530, %538 : vector<1x128xf32>
    %547 = arith.addf %545, %546 : vector<1x128xf32>
    %548 = math.tanh %547 : vector<1x128xf32>
    %549 = arith.mulf %544, %548 : vector<1x128xf32>
    %c0_204 = arith.constant 0 : index
    %c0_205 = arith.constant 0 : index
    %550 = vector.load %arg10[%c0_204, %c0_205] : memref<4x128xf32, #tpu.memory_space<vmem>>, vector<1x128xf32>
    tpu.vector_store %arg10[%c0_204, %c0_205], %549 {strides = array<i32>} : memref<4x128xf32, #tpu.memory_space<vmem>>, vector<1x128xf32>,
    %551 = vector.extract_strided_slice %517 {offsets = [1, 0], sizes = [1, 512], strides = [1, 1]} : vector<4x512xf32> to vector<1x512xf32>
    %552 = arith.truncf %549 : vector<1x128xf32> to vector<1x128xbf16>
    %cst_206 = arith.constant dense<0.000000e+00> : vector<1x512xf32>
    %553 = tpu.matmul %552, %518, %cst_206 {dimension_numbers = #tpu.dot_dimension_numbers<[1], [0], [0], [1], [0, 0, 1, 1], [], []>} : vector<1x128xbf16>, vector<128x512xbf16>, vector<1x512xf32> -> vector<1x512xf32>
    %554 = arith.addf %551, %553 : vector<1x512xf32>
    %555 = vector.extract_strided_slice %554 {offsets = [0, 0], sizes = [1, 128], strides = [1, 1]} : vector<1x512xf32> to vector<1x128xf32>
    %556 = arith.negf %555 : vector<1x128xf32>
    %557 = math.exp %556 : vector<1x128xf32>
    %cst_207 = arith.constant 1.000000e+00 : f32
    %558 = vector.broadcast %cst_207 : f32 to vector<1x128xf32>
    %559 = arith.addf %558, %557 : vector<1x128xf32>
    %560 = arith.divf %558, %559 : vector<1x128xf32>
    %561 = vector.extract_strided_slice %554 {offsets = [0, 128], sizes = [1, 128], strides = [1, 1]} : vector<1x512xf32> to vector<1x128xf32>
    %562 = arith.negf %561 : vector<1x128xf32>
    %563 = math.exp %562 : vector<1x128xf32>
    %cst_208 = arith.constant 1.000000e+00 : f32
    %564 = vector.broadcast %cst_208 : f32 to vector<1x128xf32>
    %565 = arith.addf %564, %563 : vector<1x128xf32>
    %566 = arith.divf %564, %565 : vector<1x128xf32>
    %567 = vector.extract_strided_slice %554 {offsets = [0, 256], sizes = [1, 128], strides = [1, 1]} : vector<1x512xf32> to vector<1x128xf32>
    %568 = math.tanh %567 : vector<1x128xf32>
    %569 = vector.extract_strided_slice %554 {offsets = [0, 384], sizes = [1, 128], strides = [1, 1]} : vector<1x512xf32> to vector<1x128xf32>
    %570 = arith.negf %569 : vector<1x128xf32>
    %571 = math.exp %570 : vector<1x128xf32>
    %cst_209 = arith.constant 1.000000e+00 : f32
    %572 = vector.broadcast %cst_209 : f32 to vector<1x128xf32>
    %573 = arith.addf %572, %571 : vector<1x128xf32>
    %574 = arith.divf %572, %573 : vector<1x128xf32>
    %575 = arith.mulf %566, %547 : vector<1x128xf32>
    %576 = arith.mulf %560, %568 : vector<1x128xf32>
    %577 = arith.addf %575, %576 : vector<1x128xf32>
    %578 = math.tanh %577 : vector<1x128xf32>
    %579 = arith.mulf %574, %578 : vector<1x128xf32>
    %c1_210 = arith.constant 1 : index
    %c0_211 = arith.constant 0 : index
    %580 = vector.load %arg10[%c1_210, %c0_211] : memref<4x128xf32, #tpu.memory_space<vmem>>, vector<1x128xf32>
    tpu.vector_store %arg10[%c1_210, %c0_211], %579 {strides = array<i32>} : memref<4x128xf32, #tpu.memory_space<vmem>>, vector<1x128xf32>,
    %581 = vector.extract_strided_slice %517 {offsets = [2, 0], sizes = [1, 512], strides = [1, 1]} : vector<4x512xf32> to vector<1x512xf32>
    %582 = arith.truncf %579 : vector<1x128xf32> to vector<1x128xbf16>
    %cst_212 = arith.constant dense<0.000000e+00> : vector<1x512xf32>
    %583 = tpu.matmul %582, %518, %cst_212 {dimension_numbers = #tpu.dot_dimension_numbers<[1], [0], [0], [1], [0, 0, 1, 1], [], []>} : vector<1x128xbf16>, vector<128x512xbf16>, vector<1x512xf32> -> vector<1x512xf32>
    %584 = arith.addf %581, %583 : vector<1x512xf32>
    %585 = vector.extract_strided_slice %584 {offsets = [0, 0], sizes = [1, 128], strides = [1, 1]} : vector<1x512xf32> to vector<1x128xf32>
    %586 = arith.negf %585 : vector<1x128xf32>
    %587 = math.exp %586 : vector<1x128xf32>
    %cst_213 = arith.constant 1.000000e+00 : f32
    %588 = vector.broadcast %cst_213 : f32 to vector<1x128xf32>
    %589 = arith.addf %588, %587 : vector<1x128xf32>
    %590 = arith.divf %588, %589 : vector<1x128xf32>
    %591 = vector.extract_strided_slice %584 {offsets = [0, 128], sizes = [1, 128], strides = [1, 1]} : vector<1x512xf32> to vector<1x128xf32>
    %592 = arith.negf %591 : vector<1x128xf32>
    %593 = math.exp %592 : vector<1x128xf32>
    %cst_214 = arith.constant 1.000000e+00 : f32
    %594 = vector.broadcast %cst_214 : f32 to vector<1x128xf32>
    %595 = arith.addf %594, %593 : vector<1x128xf32>
    %596 = arith.divf %594, %595 : vector<1x128xf32>
    %597 = vector.extract_strided_slice %584 {offsets = [0, 256], sizes = [1, 128], strides = [1, 1]} : vector<1x512xf32> to vector<1x128xf32>
    %598 = math.tanh %597 : vector<1x128xf32>
    %599 = vector.extract_strided_slice %584 {offsets = [0, 384], sizes = [1, 128], strides = [1, 1]} : vector<1x512xf32> to vector<1x128xf32>
    %600 = arith.negf %599 : vector<1x128xf32>
    %601 = math.exp %600 : vector<1x128xf32>
    %cst_215 = arith.constant 1.000000e+00 : f32
    %602 = vector.broadcast %cst_215 : f32 to vector<1x128xf32>
    %603 = arith.addf %602, %601 : vector<1x128xf32>
    %604 = arith.divf %602, %603 : vector<1x128xf32>
    %605 = arith.mulf %596, %577 : vector<1x128xf32>
    %606 = arith.mulf %590, %598 : vector<1x128xf32>
    %607 = arith.addf %605, %606 : vector<1x128xf32>
    %608 = math.tanh %607 : vector<1x128xf32>
    %609 = arith.mulf %604, %608 : vector<1x128xf32>
    %c2_216 = arith.constant 2 : index
    %c0_217 = arith.constant 0 : index
    %610 = vector.load %arg10[%c2_216, %c0_217] : memref<4x128xf32, #tpu.memory_space<vmem>>, vector<1x128xf32>
    tpu.vector_store %arg10[%c2_216, %c0_217], %609 {strides = array<i32>} : memref<4x128xf32, #tpu.memory_space<vmem>>, vector<1x128xf32>,
    %611 = vector.extract_strided_slice %517 {offsets = [3, 0], sizes = [1, 512], strides = [1, 1]} : vector<4x512xf32> to vector<1x512xf32>
    %612 = arith.truncf %609 : vector<1x128xf32> to vector<1x128xbf16>
    %cst_218 = arith.constant dense<0.000000e+00> : vector<1x512xf32>
    %613 = tpu.matmul %612, %518, %cst_218 {dimension_numbers = #tpu.dot_dimension_numbers<[1], [0], [0], [1], [0, 0, 1, 1], [], []>} : vector<1x128xbf16>, vector<128x512xbf16>, vector<1x512xf32> -> vector<1x512xf32>
    %614 = arith.addf %611, %613 : vector<1x512xf32>
    %615 = vector.extract_strided_slice %614 {offsets = [0, 0], sizes = [1, 128], strides = [1, 1]} : vector<1x512xf32> to vector<1x128xf32>
    %616 = arith.negf %615 : vector<1x128xf32>
    %617 = math.exp %616 : vector<1x128xf32>
    %cst_219 = arith.constant 1.000000e+00 : f32
    %618 = vector.broadcast %cst_219 : f32 to vector<1x128xf32>
    %619 = arith.addf %618, %617 : vector<1x128xf32>
    %620 = arith.divf %618, %619 : vector<1x128xf32>
    %621 = vector.extract_strided_slice %614 {offsets = [0, 128], sizes = [1, 128], strides = [1, 1]} : vector<1x512xf32> to vector<1x128xf32>
    %622 = arith.negf %621 : vector<1x128xf32>
    %623 = math.exp %622 : vector<1x128xf32>
    %cst_220 = arith.constant 1.000000e+00 : f32
    %624 = vector.broadcast %cst_220 : f32 to vector<1x128xf32>
    %625 = arith.addf %624, %623 : vector<1x128xf32>
    %626 = arith.divf %624, %625 : vector<1x128xf32>
    %627 = vector.extract_strided_slice %614 {offsets = [0, 256], sizes = [1, 128], strides = [1, 1]} : vector<1x512xf32> to vector<1x128xf32>
    %628 = math.tanh %627 : vector<1x128xf32>
    %629 = vector.extract_strided_slice %614 {offsets = [0, 384], sizes = [1, 128], strides = [1, 1]} : vector<1x512xf32> to vector<1x128xf32>
    %630 = arith.negf %629 : vector<1x128xf32>
    %631 = math.exp %630 : vector<1x128xf32>
    %cst_221 = arith.constant 1.000000e+00 : f32
    %632 = vector.broadcast %cst_221 : f32 to vector<1x128xf32>
    %633 = arith.addf %632, %631 : vector<1x128xf32>
    %634 = arith.divf %632, %633 : vector<1x128xf32>
    %635 = arith.mulf %626, %607 : vector<1x128xf32>
    %636 = arith.mulf %620, %628 : vector<1x128xf32>
    %637 = arith.addf %635, %636 : vector<1x128xf32>
    %638 = math.tanh %637 : vector<1x128xf32>
    %639 = arith.mulf %634, %638 : vector<1x128xf32>
    %c3_222 = arith.constant 3 : index
    %c0_223 = arith.constant 0 : index
    %640 = vector.load %arg10[%c3_222, %c0_223] : memref<4x128xf32, #tpu.memory_space<vmem>>, vector<1x128xf32>
    tpu.vector_store %arg10[%c3_222, %c0_223], %639 {strides = array<i32>} : memref<4x128xf32, #tpu.memory_space<vmem>>, vector<1x128xf32>,
    %c0_224 = arith.constant 0 : index
    %c0_225 = arith.constant 0 : index
    %641 = vector.load %arg10[%c0_224, %c0_225] : memref<4x128xf32, #tpu.memory_space<vmem>>, vector<4x128xf32>
    %642 = arith.truncf %641 : vector<4x128xf32> to vector<4x128xbf16>
    %c4_226 = arith.constant 4 : index
    %c0_227 = arith.constant 0 : index
    %c0_228 = arith.constant 0 : index
    %643 = vector.load %arg4[%c4_226, %c0_227, %c0_228] : memref<7x128x128xbf16, #tpu.memory_space<vmem>>, vector<1x128x128xbf16>
    %644 = vector.shape_cast %643 : vector<1x128x128xbf16> to vector<128x128xbf16>
    %cst_229 = arith.constant dense<0.000000e+00> : vector<4x128xf32>
    %645 = tpu.matmul %642, %644, %cst_229 {dimension_numbers = #tpu.dot_dimension_numbers<[1], [0], [0], [1], [0, 0, 1, 1], [], []>} : vector<4x128xbf16>, vector<128x128xbf16>, vector<4x128xf32> -> vector<4x128xf32>
    %c4_230 = arith.constant 4 : index
    %c0_231 = arith.constant 0 : index
    %c0_232 = arith.constant 0 : index
    %646 = vector.load %arg5[%c4_230, %c0_231, %c0_232] : memref<7x1x128xf32, #tpu.memory_space<vmem>>, vector<1x1x128xf32>
    %647 = vector.shape_cast %646 : vector<1x1x128xf32> to vector<1x128xf32>
    %648 = vector.broadcast %647 : vector<1x128xf32> to vector<4x128xf32>
    %649 = arith.addf %645, %648 : vector<4x128xf32>
    %cst_233 = arith.constant 0.000000e+00 : f32
    %650 = vector.broadcast %cst_233 : f32 to vector<4x128xf32>
    %651 = arith.maximumf %649, %650 : vector<4x128xf32>
    %652 = arith.truncf %651 : vector<4x128xf32> to vector<4x128xbf16>
    %c5_234 = arith.constant 5 : index
    %c0_235 = arith.constant 0 : index
    %c0_236 = arith.constant 0 : index
    %653 = vector.load %arg4[%c5_234, %c0_235, %c0_236] : memref<7x128x128xbf16, #tpu.memory_space<vmem>>, vector<1x128x128xbf16>
    %654 = vector.shape_cast %653 : vector<1x128x128xbf16> to vector<128x128xbf16>
    %cst_237 = arith.constant dense<0.000000e+00> : vector<4x128xf32>
    %655 = tpu.matmul %652, %654, %cst_237 {dimension_numbers = #tpu.dot_dimension_numbers<[1], [0], [0], [1], [0, 0, 1, 1], [], []>} : vector<4x128xbf16>, vector<128x128xbf16>, vector<4x128xf32> -> vector<4x128xf32>
    %c5_238 = arith.constant 5 : index
    %c0_239 = arith.constant 0 : index
    %c0_240 = arith.constant 0 : index
    %656 = vector.load %arg5[%c5_238, %c0_239, %c0_240] : memref<7x1x128xf32, #tpu.memory_space<vmem>>, vector<1x1x128xf32>
    %657 = vector.shape_cast %656 : vector<1x1x128xf32> to vector<1x128xf32>
    %658 = vector.broadcast %657 : vector<1x128xf32> to vector<4x128xf32>
    %659 = arith.addf %655, %658 : vector<4x128xf32>
    %cst_241 = arith.constant 0.000000e+00 : f32
    %660 = vector.broadcast %cst_241 : f32 to vector<4x128xf32>
    %661 = arith.maximumf %659, %660 : vector<4x128xf32>
    %662 = arith.truncf %661 : vector<4x128xf32> to vector<4x128xbf16>
    %c6 = arith.constant 6 : index
    %c0_242 = arith.constant 0 : index
    %c0_243 = arith.constant 0 : index
    %663 = vector.load %arg4[%c6, %c0_242, %c0_243] : memref<7x128x128xbf16, #tpu.memory_space<vmem>>, vector<1x128x128xbf16>
    %664 = vector.shape_cast %663 : vector<1x128x128xbf16> to vector<128x128xbf16>
    %cst_244 = arith.constant dense<0.000000e+00> : vector<4x128xf32>
    %665 = tpu.matmul %662, %664, %cst_244 {dimension_numbers = #tpu.dot_dimension_numbers<[1], [0], [0], [1], [0, 0, 1, 1], [], []>} : vector<4x128xbf16>, vector<128x128xbf16>, vector<4x128xf32> -> vector<4x128xf32>
    %c6_245 = arith.constant 6 : index
    %c0_246 = arith.constant 0 : index
    %c0_247 = arith.constant 0 : index
    %666 = vector.load %arg5[%c6_245, %c0_246, %c0_247] : memref<7x1x128xf32, #tpu.memory_space<vmem>>, vector<1x1x128xf32>
    %667 = vector.shape_cast %666 : vector<1x1x128xf32> to vector<1x128xf32>
    %668 = vector.broadcast %667 : vector<1x128xf32> to vector<4x128xf32>
    %669 = arith.addf %665, %668 : vector<4x128xf32>
    %670 = vector.extract_strided_slice %669 {offsets = [0, 0], sizes = [4, 1], strides = [1, 1]} : vector<4x128xf32> to vector<4x1xf32>
    %c0_248 = arith.constant 0 : index
    %c0_249 = arith.constant 0 : index
    %671 = vector.load %arg9[%c0_248, %c0_249] : memref<4x1xf32, #tpu.memory_space<vmem>>, vector<4x1xf32>
    tpu.vector_store %arg9[%c0_248, %c0_249], %670 {strides = array<i32>} : memref<4x1xf32, #tpu.memory_space<vmem>>, vector<4x1xf32>,
    return
  }
}

</mosaic_0001>

<bundles_post_ra>
// kernel: reward_predictor_forward.1
= control target key start
LH: loop header
LB: loop body
LE: loop exit
PB: predicated region body
PF: predicated region fallthrough
CT: control target
= control target key end

     0   :  { %14 = vsyncpa [#allocation4], 0  ;;  %s13140_s0 = inlined_call_operand.vmem [shape: bf16[4,4160], index: 0, kind: input, shape index: {}]   ;;  %s13141_s1 = inlined_call_operand.hbm [shape: bf16[192,128], index: 1, kind: input, shape index: {}]   ;;  %s13142_s2 = inlined_call_operand.hbm [shape: bf16[5,384,128], index: 2, kind: input, shape index: {}]   ;;  %s13143_s3 = inlined_call_operand.hbm [shape: f32[6,1,128], index: 3, kind: input, shape index: {}]   ;;  %s13144_s4 = inlined_call_operand.vmem [shape: bf16[7,128,128], index: 4, kind: input, shape index: {}]   ;;  %s13145_s5 = inlined_call_operand.vmem [shape: f32[7,1,128], index: 5, kind: input, shape index: {}]   ;;  %s13146_s6 = inlined_call_operand.vmem [shape: bf16[128,512], index: 6, kind: input, shape index: {}]   ;;  %s13147_s7 = inlined_call_operand.hbm [shape: bf16[128,512], index: 7, kind: input, shape index: {}]   ;;  %s13148_s8 = inlined_call_operand.vmem [shape: f32[1,512], index: 8, kind: input, shape index: {}]   ;;  %s13149_s9 = inlined_call_operand.vmem [shape: f32[4,1], index: 9, kind: output, shape index: {}]  }
   0x1   :  { %15 = vsyncpa [#allocation6], 0 }
   0x2   :  { %16 = vsyncpa [#allocation9], 0  ;;  %s9869_s30 = smov [#allocation5]   ;;  %s9870_s11 = smov [#allocation3]  }
   0x3   :  { %s36_s10 = sshll.u32 %s9869_s30, 4  ;;  %s24_s12 = sshll.u32 %s9870_s11, 4  ;;  %s37_s10 = int_to_ptr.vmem [resolvable:$true] %s36_s10  ;;  %s25_s12 = int_to_ptr.vmem [resolvable:$true] %s24_s12 }
   0x4   :  { %s9791_s13 = scalar_lea.vmem %s37_s10, 15360  ;;  %p9796_p1 = scmp.lt.s32.totalorder %s37_s10, %s37_s10 }
   0x5   :  { %p9792_p0 = scmp.ne.s32.totalorder %s37_s10, %s9791_s13  ;;  %p9797_p2 = scmp.lt.s32.totalorder %s9791_s13, %s9791_s13 }
   0x7   :  { %p9798_p3 = por %p9797_p2, %p9796_p1 }
   0x9   :  { %p9799_p4 = pnand %p9798_p3, %p9792_p0 }
   0xb   :  { %9802 = shalt.err (!%p9799_p4)
}
   0xc   :  { %s9871_s14 = smov 64   ;;  %s9872_s15 = smov 4  }
   0xd   :  { %42 = dma.hbm_to_vmem [thread:$0]  %s13142_s2, 15360, %s37_s10, [#allocation6], %s9871_s14, %s9871_s14, %s9872_s15  }
   0xe   :  { %s9811_s18 = scalar_lea.vmem %s25_s12, 1536  ;;  %p9816_p6 = scmp.lt.s32.totalorder %s25_s12, %s25_s12 }
   0xf   :  { %p9812_p5 = scmp.ne.s32.totalorder %s25_s12, %s9811_s18  ;;  %p9817_p7 = scmp.lt.s32.totalorder %s9811_s18, %s9811_s18 }
  0x11   :  { %p9818_p8 = por %p9817_p7, %p9816_p6 }
  0x13   :  { %p9819_p9 = pnand %p9818_p8, %p9812_p5 }
  0x15   :  { %9822 = shalt.err (!%p9819_p9)
}
  0x16   :  { %30 = dma.hbm_to_vmem [thread:$0]  %s13141_s1, 1536, %s25_s12, [#allocation4], %s9871_s14, %s9871_s14, %s9872_s15  }
  0x17   :  { %s9873_s21 = smov [#allocation7]  }
  0x18   :  { %s48_s22 = sshll.u32 %s9873_s21, 4  ;;  %s49_s22 = int_to_ptr.vmem [resolvable:$true] %s48_s22 }
  0x19   :  { %s9831_s23 = scalar_lea.vmem %s49_s22, 96  ;;  %p9836_p11 = scmp.lt.s32.totalorder %s49_s22, %s49_s22 }
  0x1a   :  { %p9832_p10 = scmp.ne.s32.totalorder %s49_s22, %s9831_s23  ;;  %p9837_p12 = scmp.lt.s32.totalorder %s9831_s23, %s9831_s23 }
  0x1c   :  { %p9838_p13 = por %p9837_p12, %p9836_p11 }
  0x1e   :  { %p9839_p0 = pnand %p9838_p13, %p9832_p10 }
  0x20   :  { %9842 = shalt.err (!%p9839_p0)
}
  0x21   :  { %s9874_s2 = smov 16   ;;  %s9875_s24 = smov 1  }
  0x22   :  { %54 = dma.hbm_to_vmem [thread:$0]  %s13143_s3, 96, %s49_s22, [#allocation6], %s9874_s2, %s9874_s2, %s9875_s24  }
  0x23   :  { %s9876_s27 = smov [#allocation8]  }
  0x24   :  { %s66_s28 = sshll.u32 %s9876_s27, 4  ;;  %s67_s28 = int_to_ptr.vmem [resolvable:$true] %s66_s28 }
  0x25   :  { %s9851_s1 = scalar_lea.vmem %s67_s28, 4096  ;;  %p9856_p2 = scmp.lt.s32.totalorder %s67_s28, %s67_s28 }
  0x26   :  { %p9852_p1 = scmp.ne.s32.totalorder %s67_s28, %s9851_s1  ;;  %p9857_p3 = scmp.lt.s32.totalorder %s9851_s1, %s9851_s1 }
  0x28   :  { %p9858_p4 = por %p9857_p3, %p9856_p2 }
  0x2a   :  { %p9859_p5 = pnand %p9858_p4, %p9852_p1 }
  0x2c   :  { %9862 = shalt.err (!%p9859_p5)
}
  0x2d   :  { %s9877_s29 = smov 256  }
  0x2e   :  { %72 = dma.hbm_to_vmem [thread:$0]  %s13147_s7, 4096, %s67_s28, [#allocation9], %s9877_s29, %s9877_s29, %s9874_s2  }
  0x2f   :  { %9863 = dma.done.wait [#allocation4], 1536  }
  0x30   :  { %9864 = vsyncadd [#allocation4], 4294965760 }
  0x31   :  { %9865 = dma.done.wait [#allocation6], 15456  }
  0x32   :  { %9866 = vsyncadd [#allocation6], 4294951840 }
  0x33   :  { %9867 = dma.done.wait [#allocation9], 4096  }
  0x34   :  { %9868 = vsyncadd [#allocation9], 4294963200  ;;  %v9878_v0 = vmov 0   ;;  %v9946_v1 = vld [vmem:[#allocation3 + $0x38] sm:$0xff]   ;;  %v9879_v2 = vmov 1983009808   ;;  %v132_v4 = vlaneseq }
  0x35   :  { %214 = vmatprep.subr.bf16.mxu0 %v9878_v0  ;;  %268 = vmatprep.subr.bf16.mxu1 %v9878_v0  ;;  %v130_v3 = vunpack.c.l.s4 %v9879_v2  ;;  %v9950_v5 = vld [vmem:[#allocation3 + $0x30] sm:$0xff]   ;;  %v9958_v8 = vld [vmem:[#allocation3 + $0x28] sm:$0xff]   ;;  %v9967_v10 = vld [vmem:[#allocation3 + $0x20] sm:$0xff]   ;;  %vm210_vm0 = vcmask 523264   ;;  %vm9881_vm1 = vmmov 0   ;;  %vm7159_vm2 = vcmask 3072  }
  0x36   :  { %215 = vmatpush1.bf16.msra.mxu0 %v9946_v1  ;;  %269 = vmatpush1.bf16.msra.mxu1 %v9946_v1  ;;  %v9954_v7 = vshrl.u32 %v132_v4, 7  ;;  %v9971_v11 = vld [vmem:[#allocation3 + $0x18] sm:$0xff]   ;;  %v9984_v17 = vld [vmem:[#allocation3 + $0x10] sm:$0xff]   ;;  %v9993_v18 = vld [vmem:[#allocation3 + $0x8] sm:$0xff]  }
  0x37   :  { %216 = vmatprep.subr.bf16.mxu0 %v9878_v0  ;;  %270 = vmatprep.subr.bf16.mxu1 %v9878_v0  ;;  %v131_v6 = vunpack.c.0.s8 %v130_v3  ;;  %v88_v12 = vld [vmem:[%s13140_s0] sm:$0xff]  ;;  %v10011_v21 = vld [vmem:[#allocation3 + $0x50] sm:$0xff]   ;;  %v10017_v22 = vld [vmem:[#allocation3 + $0x48] sm:$0xff]  }
  0x38   :  { %v256_v14 = vcombine.high %v88_v12, %v88_v12  ;;  %v9999_v19 = vld [vmem:[#allocation3] sm:$0xff]   ;;  %v10005_v20 = vld [vmem:[#allocation3 + $0x58] sm:$0xff]   ;;  %v10148_v30 = vld [vmem:[%s13140_s0 + $0x10] sm:$0xff] }
  0x39   :  { %v9963_v9 = vsub.s32 %v131_v6, %v9954_v7  ;;  %v10023_v23 = vld [vmem:[#allocation3 + $0x40] sm:$0xff]   ;;  %v10163_v33 = vld [vmem:[#allocation3 + $0x38] sm:$0xff]   ;;  %v10173_v34 = vld [vmem:[#allocation3 + $0x30] sm:$0xff]   ;;  %v660_v44 = vcombine.high %v10148_v30, %v10148_v30 }
  0x3a   :  { %217 = vmatpush1.bf16.msra.mxu0 %v9950_v5  ;;  %271 = vmatpush1.bf16.msra.mxu1 %v9950_v5  ;;  %v89_v24 = vld [vmem:[%s13140_s0 + $0x8] sm:$0xff]  ;;  %v10191_v37 = vld [vmem:[#allocation3 + $0x18] sm:$0xff]   ;;  %v10197_v38 = vld [vmem:[#allocation3 + $0x10] sm:$0xff]  }
  0x3b   :  { %218 = vmatprep.subr.bf16.mxu0 %v9878_v0  ;;  %272 = vmatprep.subr.bf16.mxu1 %v9878_v0  ;;  %v135_v13 = vrot.slane %v88_v12, %v9963_v9  ;;  %v9982_v16 = vrot.slane %v256_v14, %v9963_v9  ;;  %v10039_v26 = vrot.slane %v89_v24, %v9963_v9  ;;  %v10179_v35 = vld [vmem:[#allocation3 + $0x28] sm:$0xff]   ;;  %v10185_v36 = vld [vmem:[#allocation3 + $0x20] sm:$0xff]   ;;  %v10215_v41 = vld [vmem:[#allocation3 + $0x58] sm:$0xff]  }
  0x3c   :  { %v458_v27 = vcombine.high %v89_v24, %v89_v24  ;;  %v10160_v32 = vrot.slane %v10148_v30, %v9963_v9  ;;  %v10203_v39 = vld [vmem:[#allocation3 + $0x8] sm:$0xff]   ;;  %v10209_v40 = vld [vmem:[#allocation3] sm:$0xff]   ;;  %v10221_v42 = vld [vmem:[#allocation3 + $0x50] sm:$0xff]   ;;  %v10242_v46 = vrot.slane %v660_v44, %v9963_v9 }
  0x3d   :  { %v136_v15 = vcombine.high %v135_v13, %v135_v13  ;;  %7182 = vmatprep.mubr.msk.bf16.mxu1 %vm210_vm0, %v9982_v16  ;;  %v310_v25 = vcombine.high %v9982_v16, %v9982_v16  ;;  %v411_v28 = vcombine.high %v10039_v26, %v10039_v26  ;;  %v10227_v43 = vld [vmem:[#allocation3 + $0x48] sm:$0xff]   ;;  %v10296_v47 = vld [vmem:[%s13140_s0 + $0x18] sm:$0xff]  ;;  %v10298_v48 = vld [vmem:[#allocation3 + $0x40] sm:$0xff]  }
  0x3e   :  { %219 = vmatpush1.bf16.msra.mxu0 %v9958_v8  ;;  %273 = vmatpush1.bf16.msra.mxu1 %v9958_v8  ;;  %v10095_v29 = vrot.slane %v458_v27, %v9963_v9  ;;  %v613_v45 = vcombine.high %v10160_v32, %v10160_v32  ;;  %v10306_v49 = vcombine.high %v10242_v46, %v10242_v46 }
  0x3f   :  { %220 = vmatprep.subr.bf16.mxu0 %v9878_v0  ;;  %274 = vmatprep.subr.bf16.mxu1 %v9878_v0  ;;  %v10310_v50 = vrot.slane %v10296_v47, %v9963_v9  ;;  %v862_v59 = vcombine.high %v10296_v47, %v10296_v47 }
  0x40   :  { %7181 = vmatprep.mubr.msk.bf16.mxu0 %vm210_vm0, %v136_v15  ;;  %v10156_v31 = vcombine.high %v10095_v29, %v10095_v29 }
  0x41   :  { %v10373_v60 = vcombine.high %v10310_v50, %v10310_v50  ;;  %v10376_v61 = vrot.slane %v862_v59, %v9963_v9 }
  0x42   :  { %221 = vmatpush1.bf16.msra.mxu0 %v9967_v10  ;;  %275 = vmatpush1.bf16.msra.mxu1 %v9967_v10 }
  0x43   :  { %222 = vmatprep.subr.bf16.mxu0 %v9878_v0  ;;  %276 = vmatprep.subr.bf16.mxu1 %v9878_v0 }
  0x46   :  { %223 = vmatpush1.bf16.msra.mxu0 %v9971_v11  ;;  %277 = vmatpush1.bf16.msra.mxu1 %v9971_v11 }
  0x47   :  { %224 = vmatprep.subr.bf16.mxu0 %v9878_v0  ;;  %278 = vmatprep.subr.bf16.mxu1 %v9878_v0 }
  0x4a   :  { %225 = vmatpush1.bf16.msra.mxu0 %v9984_v17  ;;  %279 = vmatpush1.bf16.msra.mxu1 %v9984_v17 }
  0x4b   :  { %226 = vmatprep.subr.bf16.mxu0 %v9878_v0  ;;  %280 = vmatprep.subr.bf16.mxu1 %v9878_v0 }
  0x4e   :  { %227 = vmatpush1.bf16.msra.mxu0 %v9993_v18  ;;  %281 = vmatpush1.bf16.msra.mxu1 %v9993_v18 }
  0x4f   :  { %228 = vmatprep.subr.bf16.mxu0 %v9878_v0  ;;  %282 = vmatprep.subr.bf16.mxu1 %v9878_v0 }
  0x52   :  { %229 = vmatpush1.bf16.msra.mxu0 %v9999_v19  ;;  %283 = vmatpush1.bf16.msra.mxu1 %v9999_v19 }
  0x53   :  { %238 = vmatprep.subr.bf16.mxu0 %v9878_v0  ;;  %292 = vmatprep.subr.bf16.mxu1 %v9878_v0 }
  0x56   :  { %239 = vmatpush2.bf16.msra.mxu0 %v10005_v20  ;;  %293 = vmatpush2.bf16.msra.mxu1 %v10005_v20 }
  0x57   :  { %240 = vmatprep.subr.bf16.mxu0 %v9878_v0  ;;  %294 = vmatprep.subr.bf16.mxu1 %v9878_v0 }
  0x5a   :  { %241 = vmatpush2.bf16.msra.mxu0 %v10011_v21  ;;  %295 = vmatpush2.bf16.msra.mxu1 %v10011_v21 }
  0x5b   :  { %242 = vmatprep.subr.bf16.mxu0 %v9878_v0  ;;  %296 = vmatprep.subr.bf16.mxu1 %v9878_v0 }
  0x5e   :  { %243 = vmatpush2.bf16.msra.mxu0 %v10017_v22  ;;  %297 = vmatpush2.bf16.msra.mxu1 %v10017_v22 }
  0x5f   :  { %244 = vmatprep.subr.bf16.mxu0 %v9878_v0  ;;  %298 = vmatprep.subr.bf16.mxu1 %v9878_v0 }
  0x62   :  { %245 = vmatpush2.bf16.msra.mxu0 %v10023_v23  ;;  %299 = vmatpush2.bf16.msra.mxu1 %v10023_v23 }
  0x63   :  { %315 = vmatprep.subr.bf16.mxu0 %v9878_v0  ;;  %369 = vmatprep.subr.bf16.mxu1 %v9878_v0 }
  0x65   :  { %247 = vmatmul.mubr.bf16.vlgmr.msra.gmra.mxu0 %v135_v13  ;;  %301 = vmatmul.mubr.bf16.vlgmr.msra.gmra.mxu1 %v136_v15 }
  0x66   :  { %316 = vmatpush1.bf16.msra.mxu0 %v9946_v1  ;;  %370 = vmatpush1.bf16.msra.mxu1 %v9946_v1 }
  0x67   :  { %317 = vmatprep.subr.bf16.mxu0 %v9878_v0  ;;  %371 = vmatprep.subr.bf16.mxu1 %v9878_v0 }
  0x68   :  { %7183 = vmatprep.mubr.msk.bf16.mxu0 %vm210_vm0, %v310_v25  ;;  %7184 = vmatprep.mubr.msk.bf16.mxu1 %vm210_vm0, %v10039_v26 }
  0x6a   :  { %318 = vmatpush1.bf16.msra.mxu0 %v9950_v5  ;;  %372 = vmatpush1.bf16.msra.mxu1 %v9950_v5 }
  0x6b   :  { %319 = vmatprep.subr.bf16.mxu0 %v9878_v0  ;;  %373 = vmatprep.subr.bf16.mxu1 %v9878_v0 }
  0x6e   :  { %320 = vmatpush1.bf16.msra.mxu0 %v9958_v8  ;;  %374 = vmatpush1.bf16.msra.mxu1 %v9958_v8 }
  0x6f   :  { %321 = vmatprep.subr.bf16.mxu0 %v9878_v0  ;;  %375 = vmatprep.subr.bf16.mxu1 %v9878_v0 }
  0x72   :  { %322 = vmatpush1.bf16.msra.mxu0 %v9967_v10  ;;  %376 = vmatpush1.bf16.msra.mxu1 %v9967_v10 }
  0x73   :  { %323 = vmatprep.subr.bf16.mxu0 %v9878_v0  ;;  %377 = vmatprep.subr.bf16.mxu1 %v9878_v0 }
  0x76   :  { %324 = vmatpush1.bf16.msra.mxu0 %v9971_v11  ;;  %378 = vmatpush1.bf16.msra.mxu1 %v9971_v11 }
  0x77   :  { %325 = vmatprep.subr.bf16.mxu0 %v9878_v0  ;;  %379 = vmatprep.subr.bf16.mxu1 %v9878_v0 }
  0x7a   :  { %326 = vmatpush1.bf16.msra.mxu0 %v9984_v17  ;;  %380 = vmatpush1.bf16.msra.mxu1 %v9984_v17 }
  0x7b   :  { %327 = vmatprep.subr.bf16.mxu0 %v9878_v0  ;;  %381 = vmatprep.subr.bf16.mxu1 %v9878_v0 }
  0x7e   :  { %328 = vmatpush1.bf16.msra.mxu0 %v9993_v18  ;;  %382 = vmatpush1.bf16.msra.mxu1 %v9993_v18 }
  0x7f   :  { %329 = vmatprep.subr.bf16.mxu0 %v9878_v0  ;;  %383 = vmatprep.subr.bf16.mxu1 %v9878_v0 }
  0x82   :  { %330 = vmatpush1.bf16.msra.mxu0 %v9999_v19  ;;  %384 = vmatpush1.bf16.msra.mxu1 %v9999_v19 }
  0x83   :  { %339 = vmatprep.subr.bf16.mxu0 %v9878_v0  ;;  %393 = vmatprep.subr.bf16.mxu1 %v9878_v0 }
  0x86   :  { %340 = vmatpush2.bf16.msra.mxu0 %v10005_v20  ;;  %394 = vmatpush2.bf16.msra.mxu1 %v10005_v20 }
  0x87   :  { %341 = vmatprep.subr.bf16.mxu0 %v9878_v0  ;;  %395 = vmatprep.subr.bf16.mxu1 %v9878_v0 }
  0x8a   :  { %342 = vmatpush2.bf16.msra.mxu0 %v10011_v21  ;;  %396 = vmatpush2.bf16.msra.mxu1 %v10011_v21 }
  0x8b   :  { %343 = vmatprep.subr.bf16.mxu0 %v9878_v0  ;;  %397 = vmatprep.subr.bf16.mxu1 %v9878_v0 }
  0x8e   :  { %344 = vmatpush2.bf16.msra.mxu0 %v10017_v22  ;;  %398 = vmatpush2.bf16.msra.mxu1 %v10017_v22 }
  0x8f   :  { %345 = vmatprep.subr.bf16.mxu0 %v9878_v0  ;;  %399 = vmatprep.subr.bf16.mxu1 %v9878_v0 }
  0x92   :  { %346 = vmatpush2.bf16.msra.mxu0 %v10023_v23  ;;  %400 = vmatpush2.bf16.msra.mxu1 %v10023_v23 }
  0x93   :  { %416 = vmatprep.subr.bf16.mxu0 %v9878_v0  ;;  %470 = vmatprep.subr.bf16.mxu1 %v9878_v0 }
  0x95   :  { %348 = vmatmul.mubr.bf16.vlgmr.msra.gmra.mxu0 %v9982_v16  ;;  %402 = vmatmul.mubr.bf16.vlgmr.msra.gmra.mxu1 %v310_v25 }
  0x96   :  { %417 = vmatpush1.bf16.msra.mxu0 %v9946_v1  ;;  %471 = vmatpush1.bf16.msra.mxu1 %v9946_v1 }
  0x97   :  { %418 = vmatprep.subr.bf16.mxu0 %v9878_v0  ;;  %472 = vmatprep.subr.bf16.mxu1 %v9878_v0 }
  0x98   :  { %7185 = vmatprep.mubr.msk.bf16.mxu0 %vm210_vm0, %v411_v28  ;;  %7186 = vmatprep.mubr.msk.bf16.mxu1 %vm210_vm0, %v10095_v29 }
  0x9a   :  { %419 = vmatpush1.bf16.msra.mxu0 %v9950_v5  ;;  %473 = vmatpush1.bf16.msra.mxu1 %v9950_v5 }
  0x9b   :  { %420 = vmatprep.subr.bf16.mxu0 %v9878_v0  ;;  %474 = vmatprep.subr.bf16.mxu1 %v9878_v0 }
  0x9e   :  { %421 = vmatpush1.bf16.msra.mxu0 %v9958_v8  ;;  %475 = vmatpush1.bf16.msra.mxu1 %v9958_v8  ;;  %v10435_v8 = vld [vmem:[%s13140_s0 + $0x20] sm:$0xff] }
  0x9f   :  { %422 = vmatprep.subr.bf16.mxu0 %v9878_v0  ;;  %476 = vmatprep.subr.bf16.mxu1 %v9878_v0 }
  0xa2   :  { %423 = vmatpush1.bf16.msra.mxu0 %v9967_v10  ;;  %477 = vmatpush1.bf16.msra.mxu1 %v9967_v10  ;;  %v10443_v10 = vcombine.high %v10376_v61, %v10376_v61 }
  0xa3   :  { %424 = vmatprep.subr.bf16.mxu0 %v9878_v0  ;;  %478 = vmatprep.subr.bf16.mxu1 %v9878_v0 }
  0xa6   :  { %425 = vmatpush1.bf16.msra.mxu0 %v9971_v11  ;;  %479 = vmatpush1.bf16.msra.mxu1 %v9971_v11  ;;  %v10447_v11 = vrot.slane %v10435_v8, %v9963_v9 }
  0xa7   :  { %426 = vmatprep.subr.bf16.mxu0 %v9878_v0  ;;  %480 = vmatprep.subr.bf16.mxu1 %v9878_v0 }
  0xaa   :  { %427 = vmatpush1.bf16.msra.mxu0 %v9984_v17  ;;  %481 = vmatpush1.bf16.msra.mxu1 %v9984_v17 }
  0xab   :  { %428 = vmatprep.subr.bf16.mxu0 %v9878_v0  ;;  %482 = vmatprep.subr.bf16.mxu1 %v9878_v0 }
  0xae   :  { %429 = vmatpush1.bf16.msra.mxu0 %v9993_v18  ;;  %483 = vmatpush1.bf16.msra.mxu1 %v9993_v18 }
  0xaf   :  { %430 = vmatprep.subr.bf16.mxu0 %v9878_v0  ;;  %484 = vmatprep.subr.bf16.mxu1 %v9878_v0 }
  0xb2   :  { %431 = vmatpush1.bf16.msra.mxu0 %v9999_v19  ;;  %485 = vmatpush1.bf16.msra.mxu1 %v9999_v19 }
  0xb3   :  { %440 = vmatprep.subr.bf16.mxu0 %v9878_v0  ;;  %494 = vmatprep.subr.bf16.mxu1 %v9878_v0 }
  0xb6   :  { %441 = vmatpush2.bf16.msra.mxu0 %v10005_v20  ;;  %495 = vmatpush2.bf16.msra.mxu1 %v10005_v20  ;;  %v1064_v20 = vcombine.high %v10435_v8, %v10435_v8 }
  0xb7   :  { %442 = vmatprep.subr.bf16.mxu0 %v9878_v0  ;;  %496 = vmatprep.subr.bf16.mxu1 %v9878_v0 }
  0xba   :  { %443 = vmatpush2.bf16.msra.mxu0 %v10011_v21  ;;  %497 = vmatpush2.bf16.msra.mxu1 %v10011_v21  ;;  %v10511_v21 = vcombine.high %v10447_v11, %v10447_v11 }
  0xbb   :  { %444 = vmatprep.subr.bf16.mxu0 %v9878_v0  ;;  %498 = vmatprep.subr.bf16.mxu1 %v9878_v0 }
  0xbe   :  { %445 = vmatpush2.bf16.msra.mxu0 %v10017_v22  ;;  %499 = vmatpush2.bf16.msra.mxu1 %v10017_v22  ;;  %v10514_v22 = vrot.slane %v1064_v20, %v9963_v9  ;;  %v10808_v20 = vld [vmem:[#allocation3 + $0x30] sm:$0xff]  }
  0xbf   :  { %446 = vmatprep.subr.bf16.mxu0 %v9878_v0  ;;  %500 = vmatprep.subr.bf16.mxu1 %v9878_v0 }
  0xc2   :  { %447 = vmatpush2.bf16.msra.mxu0 %v10023_v23  ;;  %501 = vmatpush2.bf16.msra.mxu1 %v10023_v23 }
  0xc3   :  { %517 = vmatprep.subr.bf16.mxu0 %v9878_v0  ;;  %571 = vmatprep.subr.bf16.mxu1 %v9878_v0 }
  0xc5   :  { %449 = vmatmul.mubr.bf16.vlgmr.msra.gmra.mxu0 %v10039_v26  ;;  %503 = vmatmul.mubr.bf16.vlgmr.msra.gmra.mxu1 %v411_v28 }
  0xc6   :  { %518 = vmatpush1.bf16.msra.mxu0 %v10163_v33  ;;  %572 = vmatpush1.bf16.msra.mxu1 %v10163_v33 }
  0xc7   :  { %519 = vmatprep.subr.bf16.mxu0 %v9878_v0  ;;  %573 = vmatprep.subr.bf16.mxu1 %v9878_v0 }
  0xc8   :  { %7187 = vmatprep.mubr.msk.bf16.mxu0 %vm210_vm0, %v10156_v31  ;;  %7188 = vmatprep.mubr.msk.bf16.mxu1 %vm210_vm0, %v10160_v32 }
  0xca   :  { %520 = vmatpush1.bf16.msra.mxu0 %v10173_v34  ;;  %574 = vmatpush1.bf16.msra.mxu1 %v10173_v34 }
  0xcb   :  { %521 = vmatprep.subr.bf16.mxu0 %v9878_v0  ;;  %575 = vmatprep.subr.bf16.mxu1 %v9878_v0 }
  0xce   :  { %522 = vmatpush1.bf16.msra.mxu0 %v10179_v35  ;;  %576 = vmatpush1.bf16.msra.mxu1 %v10179_v35 }
  0xcf   :  { %523 = vmatprep.subr.bf16.mxu0 %v9878_v0  ;;  %577 = vmatprep.subr.bf16.mxu1 %v9878_v0 }
  0xd2   :  { %524 = vmatpush1.bf16.msra.mxu0 %v10185_v36  ;;  %578 = vmatpush1.bf16.msra.mxu1 %v10185_v36 }
  0xd3   :  { %525 = vmatprep.subr.bf16.mxu0 %v9878_v0  ;;  %579 = vmatprep.subr.bf16.mxu1 %v9878_v0 }
  0xd6   :  { %526 = vmatpush1.bf16.msra.mxu0 %v10191_v37  ;;  %580 = vmatpush1.bf16.msra.mxu1 %v10191_v37 }
  0xd7   :  { %527 = vmatprep.subr.bf16.mxu0 %v9878_v0  ;;  %581 = vmatprep.subr.bf16.mxu1 %v9878_v0 }
  0xda   :  { %528 = vmatpush1.bf16.msra.mxu0 %v10197_v38  ;;  %582 = vmatpush1.bf16.msra.mxu1 %v10197_v38 }
  0xdb   :  { %529 = vmatprep.subr.bf16.mxu0 %v9878_v0  ;;  %583 = vmatprep.subr.bf16.mxu1 %v9878_v0 }
  0xde   :  { %530 = vmatpush1.bf16.msra.mxu0 %v10203_v39  ;;  %584 = vmatpush1.bf16.msra.mxu1 %v10203_v39 }
  0xdf   :  { %531 = vmatprep.subr.bf16.mxu0 %v9878_v0  ;;  %585 = vmatprep.subr.bf16.mxu1 %v9878_v0 }
  0xe2   :  { %532 = vmatpush1.bf16.msra.mxu0 %v10209_v40  ;;  %586 = vmatpush1.bf16.msra.mxu1 %v10209_v40 }
  0xe3   :  { %541 = vmatprep.subr.bf16.mxu0 %v9878_v0  ;;  %595 = vmatprep.subr.bf16.mxu1 %v9878_v0 }
  0xe6   :  { %542 = vmatpush2.bf16.msra.mxu0 %v10215_v41  ;;  %596 = vmatpush2.bf16.msra.mxu1 %v10215_v41 }
  0xe7   :  { %543 = vmatprep.subr.bf16.mxu0 %v9878_v0  ;;  %597 = vmatprep.subr.bf16.mxu1 %v9878_v0 }
  0xea   :  { %544 = vmatpush2.bf16.msra.mxu0 %v10221_v42  ;;  %598 = vmatpush2.bf16.msra.mxu1 %v10221_v42 }
  0xeb   :  { %545 = vmatprep.subr.bf16.mxu0 %v9878_v0  ;;  %599 = vmatprep.subr.bf16.mxu1 %v9878_v0 }
  0xee   :  { %546 = vmatpush2.bf16.msra.mxu0 %v10227_v43  ;;  %600 = vmatpush2.bf16.msra.mxu1 %v10227_v43 }
  0xef   :  { %547 = vmatprep.subr.bf16.mxu0 %v9878_v0  ;;  %601 = vmatprep.subr.bf16.mxu1 %v9878_v0 }
  0xf2   :  { %548 = vmatpush2.bf16.msra.mxu0 %v10023_v23  ;;  %602 = vmatpush2.bf16.msra.mxu1 %v10023_v23 }
  0xf3   :  { %618 = vmatprep.subr.bf16.mxu0 %v9878_v0  ;;  %672 = vmatprep.subr.bf16.mxu1 %v9878_v0 }
  0xf5   :  { %550 = vmatmul.mubr.bf16.vlgmr.msra.gmra.mxu0 %v10095_v29  ;;  %604 = vmatmul.mubr.bf16.vlgmr.msra.gmra.mxu1 %v10156_v31  ;;  %v10573_v31 = vld [vmem:[%s13140_s0 + $0x28] sm:$0xff] }
  0xf6   :  { %619 = vmatpush1.bf16.msra.mxu0 %v10163_v33  ;;  %673 = vmatpush1.bf16.msra.mxu1 %v10163_v33  ;;  %v10585_v44 = vrot.slane %v10573_v31, %v9963_v9 }
  0xf7   :  { %620 = vmatprep.subr.bf16.mxu0 %v9878_v0  ;;  %674 = vmatprep.subr.bf16.mxu1 %v9878_v0 }
  0xf8   :  { %7189 = vmatprep.mubr.msk.bf16.mxu0 %vm210_vm0, %v613_v45  ;;  %7190 = vmatprep.mubr.msk.bf16.mxu1 %vm210_vm0, %v10242_v46 }
  0xfa   :  { %621 = vmatpush1.bf16.msra.mxu0 %v10173_v34  ;;  %675 = vmatpush1.bf16.msra.mxu1 %v10173_v34 }
  0xfb   :  { %622 = vmatprep.subr.bf16.mxu0 %v9878_v0  ;;  %676 = vmatprep.subr.bf16.mxu1 %v9878_v0 }
  0xfe   :  { %623 = vmatpush1.bf16.msra.mxu0 %v10179_v35  ;;  %677 = vmatpush1.bf16.msra.mxu1 %v10179_v35 }
  0xff   :  { %624 = vmatprep.subr.bf16.mxu0 %v9878_v0  ;;  %678 = vmatprep.subr.bf16.mxu1 %v9878_v0 }
 0x102   :  { %625 = vmatpush1.bf16.msra.mxu0 %v10185_v36  ;;  %679 = vmatpush1.bf16.msra.mxu1 %v10185_v36 }
 0x103   :  { %626 = vmatprep.subr.bf16.mxu0 %v9878_v0  ;;  %680 = vmatprep.subr.bf16.mxu1 %v9878_v0 }
 0x106   :  { %627 = vmatpush1.bf16.msra.mxu0 %v10191_v37  ;;  %681 = vmatpush1.bf16.msra.mxu1 %v10191_v37 }
 0x107   :  { %628 = vmatprep.subr.bf16.mxu0 %v9878_v0  ;;  %682 = vmatprep.subr.bf16.mxu1 %v9878_v0 }
 0x10a   :  { %629 = vmatpush1.bf16.msra.mxu0 %v10197_v38  ;;  %683 = vmatpush1.bf16.msra.mxu1 %v10197_v38 }
 0x10b   :  { %630 = vmatprep.subr.bf16.mxu0 %v9878_v0  ;;  %684 = vmatprep.subr.bf16.mxu1 %v9878_v0 }
 0x10e   :  { %631 = vmatpush1.bf16.msra.mxu0 %v10203_v39  ;;  %685 = vmatpush1.bf16.msra.mxu1 %v10203_v39 }
 0x10f   :  { %632 = vmatprep.subr.bf16.mxu0 %v9878_v0  ;;  %686 = vmatprep.subr.bf16.mxu1 %v9878_v0 }
 0x112   :  { %633 = vmatpush1.bf16.msra.mxu0 %v10209_v40  ;;  %687 = vmatpush1.bf16.msra.mxu1 %v10209_v40 }
 0x113   :  { %642 = vmatprep.subr.bf16.mxu0 %v9878_v0  ;;  %696 = vmatprep.subr.bf16.mxu1 %v9878_v0 }
 0x116   :  { %643 = vmatpush2.bf16.msra.mxu0 %v10215_v41  ;;  %697 = vmatpush2.bf16.msra.mxu1 %v10215_v41 }
 0x117   :  { %644 = vmatprep.subr.bf16.mxu0 %v9878_v0  ;;  %698 = vmatprep.subr.bf16.mxu1 %v9878_v0 }
 0x11a   :  { %645 = vmatpush2.bf16.msra.mxu0 %v10221_v42  ;;  %699 = vmatpush2.bf16.msra.mxu1 %v10221_v42 }
 0x11b   :  { %646 = vmatprep.subr.bf16.mxu0 %v9878_v0  ;;  %700 = vmatprep.subr.bf16.mxu1 %v9878_v0 }
 0x11e   :  { %647 = vmatpush2.bf16.msra.mxu0 %v10227_v43  ;;  %701 = vmatpush2.bf16.msra.mxu1 %v10227_v43 }
 0x11f   :  { %648 = vmatprep.subr.bf16.mxu0 %v9878_v0  ;;  %702 = vmatprep.subr.bf16.mxu1 %v9878_v0 }
 0x122   :  { %649 = vmatpush2.bf16.msra.mxu0 %v10298_v48  ;;  %703 = vmatpush2.bf16.msra.mxu1 %v10298_v48 }
 0x123   :  { %719 = vmatprep.subr.bf16.mxu0 %v9878_v0  ;;  %773 = vmatprep.subr.bf16.mxu1 %v9878_v0 }
 0x125   :  { %v10312_v51 = vpop.f32.mrf.mxu0  ;;  %651 = vmatmul.mubr.bf16.vlgmr.msra.gmra.mxu0 %v10160_v32  ;;  %v10315_v52 = vpop.f32.mrf.mxu1  ;;  %705 = vmatmul.mubr.bf16.vlgmr.msra.gmra.mxu1 %v613_v45  ;;  %v10581_v32 = vcombine.high %v10514_v22, %v10514_v22 }
 0x126   :  { %720 = vmatpush1.bf16.msra.mxu0 %v10163_v33  ;;  %774 = vmatpush1.bf16.msra.mxu1 %v10163_v33 }
 0x127   :  { %v250_v53 = vpop.f32.mrf.mxu0  ;;  %v304_v54 = vpop.f32.mrf.mxu1  ;;  %721 = vmatprep.subr.bf16.mxu0 %v9878_v0  ;;  %775 = vmatprep.subr.bf16.mxu1 %v9878_v0 }
 0x128   :  { %7191 = vmatprep.mubr.msk.bf16.mxu0 %vm210_vm0, %v10306_v49  ;;  %7192 = vmatprep.mubr.msk.bf16.mxu1 %vm210_vm0, %v10310_v50 }
 0x129   :  { %v251_v55 = vpop.f32.mrf.mxu0  ;;  %v305_v56 = vpop.f32.mrf.mxu1 }
 0x12a   :  { %722 = vmatpush1.bf16.msra.mxu0 %v10173_v34  ;;  %776 = vmatpush1.bf16.msra.mxu1 %v10173_v34  ;;  %v1266_v56 = vcombine.high %v10573_v31, %v10573_v31  ;;  %v10850_v31 = vld [vmem:[#allocation3 + $0x58] sm:$0xff]  }
 0x12b   :  { %v252_v57 = vpop.f32.mrf.mxu0  ;;  %v306_v58 = vpop.f32.mrf.mxu1  ;;  %723 = vmatprep.subr.bf16.mxu0 %v9878_v0  ;;  %777 = vmatprep.subr.bf16.mxu1 %v9878_v0 }
 0x12c   :  { %v10649_v57 = vcombine.high %v10585_v44, %v10585_v44  ;;  %v10652_v58 = vrot.slane %v1266_v56, %v9963_v9 }
 0x12e   :  { %724 = vmatpush1.bf16.msra.mxu0 %v10179_v35  ;;  %778 = vmatpush1.bf16.msra.mxu1 %v10179_v35  ;;  %v10719_v8 = vcombine.high %v10652_v58, %v10652_v58 }
 0x12f   :  { %725 = vmatprep.subr.bf16.mxu0 %v9878_v0  ;;  %779 = vmatprep.subr.bf16.mxu1 %v9878_v0 }
 0x132   :  { %726 = vmatpush1.bf16.msra.mxu0 %v10185_v36  ;;  %780 = vmatpush1.bf16.msra.mxu1 %v10185_v36 }
 0x133   :  { %727 = vmatprep.subr.bf16.mxu0 %v9878_v0  ;;  %781 = vmatprep.subr.bf16.mxu1 %v9878_v0 }
 0x136   :  { %728 = vmatpush1.bf16.msra.mxu0 %v10191_v37  ;;  %782 = vmatpush1.bf16.msra.mxu1 %v10191_v37 }
 0x137   :  { %729 = vmatprep.subr.bf16.mxu0 %v9878_v0  ;;  %783 = vmatprep.subr.bf16.mxu1 %v9878_v0 }
 0x13a   :  { %730 = vmatpush1.bf16.msra.mxu0 %v10197_v38  ;;  %784 = vmatpush1.bf16.msra.mxu1 %v10197_v38 }
 0x13b   :  { %731 = vmatprep.subr.bf16.mxu0 %v9878_v0  ;;  %785 = vmatprep.subr.bf16.mxu1 %v9878_v0 }
 0x13e   :  { %732 = vmatpush1.bf16.msra.mxu0 %v10203_v39  ;;  %786 = vmatpush1.bf16.msra.mxu1 %v10203_v39 }
 0x13f   :  { %733 = vmatprep.subr.bf16.mxu0 %v9878_v0  ;;  %787 = vmatprep.subr.bf16.mxu1 %v9878_v0 }
 0x142   :  { %734 = vmatpush1.bf16.msra.mxu0 %v10209_v40  ;;  %788 = vmatpush1.bf16.msra.mxu1 %v10209_v40 }
 0x143   :  { %743 = vmatprep.subr.bf16.mxu0 %v9878_v0  ;;  %797 = vmatprep.subr.bf16.mxu1 %v9878_v0 }
 0x146   :  { %744 = vmatpush2.bf16.msra.mxu0 %v10215_v41  ;;  %798 = vmatpush2.bf16.msra.mxu1 %v10215_v41 }
 0x147   :  { %745 = vmatprep.subr.bf16.mxu0 %v9878_v0  ;;  %799 = vmatprep.subr.bf16.mxu1 %v9878_v0 }
 0x14a   :  { %746 = vmatpush2.bf16.msra.mxu0 %v10221_v42  ;;  %800 = vmatpush2.bf16.msra.mxu1 %v10221_v42 }
 0x14b   :  { %747 = vmatprep.subr.bf16.mxu0 %v9878_v0  ;;  %801 = vmatprep.subr.bf16.mxu1 %v9878_v0 }
 0x14e   :  { %748 = vmatpush2.bf16.msra.mxu0 %v10227_v43  ;;  %802 = vmatpush2.bf16.msra.mxu1 %v10227_v43 }
 0x14f   :  { %749 = vmatprep.subr.bf16.mxu0 %v9878_v0  ;;  %803 = vmatprep.subr.bf16.mxu1 %v9878_v0 }
 0x152   :  { %750 = vmatpush2.bf16.msra.mxu0 %v10298_v48  ;;  %804 = vmatpush2.bf16.msra.mxu1 %v10298_v48 }
 0x153   :  { %820 = vmatprep.subr.bf16.mxu0 %v9878_v0  ;;  %874 = vmatprep.subr.bf16.mxu1 %v9878_v0 }
 0x155   :  { %v10378_v62 = vpop.f32.mrf.mxu0  ;;  %752 = vmatmul.mubr.bf16.vlgmr.msra.gmra.mxu0 %v10242_v46  ;;  %v10381_v63 = vpop.f32.mrf.mxu1  ;;  %806 = vmatmul.mubr.bf16.vlgmr.msra.gmra.mxu1 %v10306_v49 }
 0x156   :  { %821 = vmatpush1.bf16.msra.mxu0 %v10163_v33  ;;  %875 = vmatpush1.bf16.msra.mxu1 %v10163_v33 }
 0x157   :  { %v351_v1 = vpop.f32.mrf.mxu0  ;;  %v405_v2 = vpop.f32.mrf.mxu1  ;;  %822 = vmatprep.subr.bf16.mxu0 %v9878_v0  ;;  %876 = vmatprep.subr.bf16.mxu1 %v9878_v0 }
 0x158   :  { %7193 = vmatprep.mubr.msk.bf16.mxu0 %vm210_vm0, %v10373_v60  ;;  %7194 = vmatprep.mubr.msk.bf16.mxu1 %vm210_vm0, %v10376_v61 }
 0x159   :  { %v352_v3 = vpop.f32.mrf.mxu0  ;;  %v406_v4 = vpop.f32.mrf.mxu1 }
 0x15a   :  { %823 = vmatpush1.bf16.msra.mxu0 %v10173_v34  ;;  %877 = vmatpush1.bf16.msra.mxu1 %v10173_v34 }
 0x15b   :  { %v353_v5 = vpop.f32.mrf.mxu0  ;;  %v407_v6 = vpop.f32.mrf.mxu1  ;;  %824 = vmatprep.subr.bf16.mxu0 %v9878_v0  ;;  %878 = vmatprep.subr.bf16.mxu1 %v9878_v0 }
 0x15c   :  { %v10711_v6 = vld [vmem:[%s13140_s0 + $0x30] sm:$0xff] }
 0x15e   :  { %825 = vmatpush1.bf16.msra.mxu0 %v10179_v35  ;;  %879 = vmatpush1.bf16.msra.mxu1 %v10179_v35 }
 0x15f   :  { %826 = vmatprep.subr.bf16.mxu0 %v9878_v0  ;;  %880 = vmatprep.subr.bf16.mxu1 %v9878_v0 }
 0x162   :  { %827 = vmatpush1.bf16.msra.mxu0 %v10185_v36  ;;  %881 = vmatpush1.bf16.msra.mxu1 %v10185_v36 }
 0x163   :  { %828 = vmatprep.subr.bf16.mxu0 %v9878_v0  ;;  %882 = vmatprep.subr.bf16.mxu1 %v9878_v0 }
 0x166   :  { %829 = vmatpush1.bf16.msra.mxu0 %v10191_v37  ;;  %883 = vmatpush1.bf16.msra.mxu1 %v10191_v37 }
 0x167   :  { %830 = vmatprep.subr.bf16.mxu0 %v9878_v0  ;;  %884 = vmatprep.subr.bf16.mxu1 %v9878_v0 }
 0x16a   :  { %831 = vmatpush1.bf16.msra.mxu0 %v10197_v38  ;;  %885 = vmatpush1.bf16.msra.mxu1 %v10197_v38 }
 0x16b   :  { %832 = vmatprep.subr.bf16.mxu0 %v9878_v0  ;;  %886 = vmatprep.subr.bf16.mxu1 %v9878_v0 }
 0x16e   :  { %833 = vmatpush1.bf16.msra.mxu0 %v10203_v39  ;;  %887 = vmatpush1.bf16.msra.mxu1 %v10203_v39 }
 0x16f   :  { %834 = vmatprep.subr.bf16.mxu0 %v9878_v0  ;;  %888 = vmatprep.subr.bf16.mxu1 %v9878_v0 }
 0x172   :  { %835 = vmatpush1.bf16.msra.mxu0 %v10209_v40  ;;  %889 = vmatpush1.bf16.msra.mxu1 %v10209_v40 }
 0x173   :  { %844 = vmatprep.subr.bf16.mxu0 %v9878_v0  ;;  %898 = vmatprep.subr.bf16.mxu1 %v9878_v0 }
 0x176   :  { %845 = vmatpush2.bf16.msra.mxu0 %v10215_v41  ;;  %899 = vmatpush2.bf16.msra.mxu1 %v10215_v41 }
 0x177   :  { %846 = vmatprep.subr.bf16.mxu0 %v9878_v0  ;;  %900 = vmatprep.subr.bf16.mxu1 %v9878_v0 }
 0x17a   :  { %847 = vmatpush2.bf16.msra.mxu0 %v10221_v42  ;;  %901 = vmatpush2.bf16.msra.mxu1 %v10221_v42 }
 0x17b   :  { %848 = vmatprep.subr.bf16.mxu0 %v9878_v0  ;;  %902 = vmatprep.subr.bf16.mxu1 %v9878_v0 }
 0x17e   :  { %849 = vmatpush2.bf16.msra.mxu0 %v10227_v43  ;;  %903 = vmatpush2.bf16.msra.mxu1 %v10227_v43 }
 0x17f   :  { %850 = vmatprep.subr.bf16.mxu0 %v9878_v0  ;;  %904 = vmatprep.subr.bf16.mxu1 %v9878_v0 }
 0x182   :  { %851 = vmatpush2.bf16.msra.mxu0 %v10298_v48  ;;  %905 = vmatpush2.bf16.msra.mxu1 %v10298_v48 }
 0x183   :  { %921 = vmatprep.subr.bf16.mxu0 %v9878_v0  ;;  %975 = vmatprep.subr.bf16.mxu1 %v9878_v0 }
 0x185   :  { %v10449_v12 = vpop.f32.mrf.mxu0  ;;  %853 = vmatmul.mubr.bf16.vlgmr.msra.gmra.mxu0 %v10310_v50  ;;  %v10452_v13 = vpop.f32.mrf.mxu1  ;;  %907 = vmatmul.mubr.bf16.vlgmr.msra.gmra.mxu1 %v10373_v60 }
 0x186   :  { %922 = vmatpush1.bf16.msra.mxu0 %v10163_v33  ;;  %976 = vmatpush1.bf16.msra.mxu1 %v10163_v33 }
 0x187   :  { %v452_v14 = vpop.f32.mrf.mxu0  ;;  %v506_v15 = vpop.f32.mrf.mxu1  ;;  %923 = vmatprep.subr.bf16.mxu0 %v9878_v0  ;;  %977 = vmatprep.subr.bf16.mxu1 %v9878_v0 }
 0x188   :  { %7195 = vmatprep.mubr.msk.bf16.mxu0 %vm210_vm0, %v10443_v10  ;;  %7196 = vmatprep.mubr.msk.bf16.mxu1 %vm210_vm0, %v10447_v11 }
 0x189   :  { %v453_v16 = vpop.f32.mrf.mxu0  ;;  %v507_v17 = vpop.f32.mrf.mxu1 }
 0x18a   :  { %924 = vmatpush1.bf16.msra.mxu0 %v10173_v34  ;;  %978 = vmatpush1.bf16.msra.mxu1 %v10173_v34 }
 0x18b   :  { %v454_v18 = vpop.f32.mrf.mxu0  ;;  %v508_v19 = vpop.f32.mrf.mxu1  ;;  %925 = vmatprep.subr.bf16.mxu0 %v9878_v0  ;;  %979 = vmatprep.subr.bf16.mxu1 %v9878_v0 }
 0x18e   :  { %926 = vmatpush1.bf16.msra.mxu0 %v10179_v35  ;;  %980 = vmatpush1.bf16.msra.mxu1 %v10179_v35 }
 0x18f   :  { %927 = vmatprep.subr.bf16.mxu0 %v9878_v0  ;;  %981 = vmatprep.subr.bf16.mxu1 %v9878_v0 }
 0x192   :  { %928 = vmatpush1.bf16.msra.mxu0 %v10185_v36  ;;  %982 = vmatpush1.bf16.msra.mxu1 %v10185_v36 }
 0x193   :  { %929 = vmatprep.subr.bf16.mxu0 %v9878_v0  ;;  %983 = vmatprep.subr.bf16.mxu1 %v9878_v0 }
 0x196   :  { %930 = vmatpush1.bf16.msra.mxu0 %v10191_v37  ;;  %984 = vmatpush1.bf16.msra.mxu1 %v10191_v37 }
 0x197   :  { %931 = vmatprep.subr.bf16.mxu0 %v9878_v0  ;;  %985 = vmatprep.subr.bf16.mxu1 %v9878_v0 }
 0x19a   :  { %932 = vmatpush1.bf16.msra.mxu0 %v10197_v38  ;;  %986 = vmatpush1.bf16.msra.mxu1 %v10197_v38 }
 0x19b   :  { %933 = vmatprep.subr.bf16.mxu0 %v9878_v0  ;;  %987 = vmatprep.subr.bf16.mxu1 %v9878_v0 }
 0x19e   :  { %934 = vmatpush1.bf16.msra.mxu0 %v10203_v39  ;;  %988 = vmatpush1.bf16.msra.mxu1 %v10203_v39 }
 0x19f   :  { %935 = vmatprep.subr.bf16.mxu0 %v9878_v0  ;;  %989 = vmatprep.subr.bf16.mxu1 %v9878_v0 }
 0x1a2   :  { %936 = vmatpush1.bf16.msra.mxu0 %v10209_v40  ;;  %990 = vmatpush1.bf16.msra.mxu1 %v10209_v40 }
 0x1a3   :  { %945 = vmatprep.subr.bf16.mxu0 %v9878_v0  ;;  %999 = vmatprep.subr.bf16.mxu1 %v9878_v0 }
 0x1a6   :  { %946 = vmatpush2.bf16.msra.mxu0 %v10215_v41  ;;  %1000 = vmatpush2.bf16.msra.mxu1 %v10215_v41 }
 0x1a7   :  { %947 = vmatprep.subr.bf16.mxu0 %v9878_v0  ;;  %1001 = vmatprep.subr.bf16.mxu1 %v9878_v0 }
 0x1aa   :  { %948 = vmatpush2.bf16.msra.mxu0 %v10221_v42  ;;  %1002 = vmatpush2.bf16.msra.mxu1 %v10221_v42 }
 0x1ab   :  { %949 = vmatprep.subr.bf16.mxu0 %v9878_v0  ;;  %1003 = vmatprep.subr.bf16.mxu1 %v9878_v0 }
 0x1ae   :  { %950 = vmatpush2.bf16.msra.mxu0 %v10227_v43  ;;  %1004 = vmatpush2.bf16.msra.mxu1 %v10227_v43 }
 0x1af   :  { %951 = vmatprep.subr.bf16.mxu0 %v9878_v0  ;;  %1005 = vmatprep.subr.bf16.mxu1 %v9878_v0 }
 0x1b2   :  { %952 = vmatpush2.bf16.msra.mxu0 %v10298_v48  ;;  %1006 = vmatpush2.bf16.msra.mxu1 %v10298_v48 }
 0x1b3   :  { %1022 = vmatprep.subr.bf16.mxu0 %v9878_v0  ;;  %1076 = vmatprep.subr.bf16.mxu1 %v9878_v0 }
 0x1b5   :  { %v10516_v23 = vpop.f32.mrf.mxu0  ;;  %954 = vmatmul.mubr.bf16.vlgmr.msra.gmra.mxu0 %v10376_v61  ;;  %v10519_v24 = vpop.f32.mrf.mxu1  ;;  %1008 = vmatmul.mubr.bf16.vlgmr.msra.gmra.mxu1 %v10443_v10  ;;  %v10723_v10 = vrot.slane %v10711_v6, %v9963_v9 }
 0x1b6   :  { %1023 = vmatpush1.bf16.msra.mxu0 %v10163_v33  ;;  %1077 = vmatpush1.bf16.msra.mxu1 %v10163_v33 }
 0x1b7   :  { %v553_v25 = vpop.f32.mrf.mxu0  ;;  %v607_v26 = vpop.f32.mrf.mxu1  ;;  %1024 = vmatprep.subr.bf16.mxu0 %v9878_v0  ;;  %1078 = vmatprep.subr.bf16.mxu1 %v9878_v0 }
 0x1b8   :  { %7197 = vmatprep.mubr.msk.bf16.mxu0 %vm210_vm0, %v10511_v21  ;;  %7198 = vmatprep.mubr.msk.bf16.mxu1 %vm210_vm0, %v10514_v22  ;;  %v10814_v25 = vld [vmem:[#allocation3 + $0x28] sm:$0xff]   ;;  %v10820_v26 = vld [vmem:[#allocation3 + $0x20] sm:$0xff]  }
 0x1b9   :  { %v554_v27 = vpop.f32.mrf.mxu0  ;;  %v608_v28 = vpop.f32.mrf.mxu1 }
 0x1ba   :  { %1025 = vmatpush1.bf16.msra.mxu0 %v10173_v34  ;;  %1079 = vmatpush1.bf16.msra.mxu1 %v10173_v34  ;;  %v10826_v27 = vld [vmem:[#allocation3 + $0x18] sm:$0xff]   ;;  %v10832_v28 = vld [vmem:[#allocation3 + $0x10] sm:$0xff]  }
 0x1bb   :  { %v555_v29 = vpop.f32.mrf.mxu0  ;;  %v609_v30 = vpop.f32.mrf.mxu1  ;;  %1026 = vmatprep.subr.bf16.mxu0 %v9878_v0  ;;  %1080 = vmatprep.subr.bf16.mxu1 %v9878_v0 }
 0x1bc   :  { %v10838_v29 = vld [vmem:[#allocation3 + $0x8] sm:$0xff]   ;;  %v10844_v30 = vld [vmem:[#allocation3] sm:$0xff]  }
 0x1be   :  { %1027 = vmatpush1.bf16.msra.mxu0 %v10179_v35  ;;  %1081 = vmatpush1.bf16.msra.mxu1 %v10179_v35 }
 0x1bf   :  { %1028 = vmatprep.subr.bf16.mxu0 %v9878_v0  ;;  %1082 = vmatprep.subr.bf16.mxu1 %v9878_v0 }
 0x1c2   :  { %1029 = vmatpush1.bf16.msra.mxu0 %v10185_v36  ;;  %1083 = vmatpush1.bf16.msra.mxu1 %v10185_v36 }
 0x1c3   :  { %1030 = vmatprep.subr.bf16.mxu0 %v9878_v0  ;;  %1084 = vmatprep.subr.bf16.mxu1 %v9878_v0 }
 0x1c6   :  { %1031 = vmatpush1.bf16.msra.mxu0 %v10191_v37  ;;  %1085 = vmatpush1.bf16.msra.mxu1 %v10191_v37 }
 0x1c7   :  { %1032 = vmatprep.subr.bf16.mxu0 %v9878_v0  ;;  %1086 = vmatprep.subr.bf16.mxu1 %v9878_v0 }
 0x1ca   :  { %1033 = vmatpush1.bf16.msra.mxu0 %v10197_v38  ;;  %1087 = vmatpush1.bf16.msra.mxu1 %v10197_v38 }
 0x1cb   :  { %1034 = vmatprep.subr.bf16.mxu0 %v9878_v0  ;;  %1088 = vmatprep.subr.bf16.mxu1 %v9878_v0 }
 0x1ce   :  { %1035 = vmatpush1.bf16.msra.mxu0 %v10203_v39  ;;  %1089 = vmatpush1.bf16.msra.mxu1 %v10203_v39 }
 0x1cf   :  { %1036 = vmatprep.subr.bf16.mxu0 %v9878_v0  ;;  %1090 = vmatprep.subr.bf16.mxu1 %v9878_v0 }
 0x1d2   :  { %1037 = vmatpush1.bf16.msra.mxu0 %v10209_v40  ;;  %1091 = vmatpush1.bf16.msra.mxu1 %v10209_v40 }
 0x1d3   :  { %1046 = vmatprep.subr.bf16.mxu0 %v9878_v0  ;;  %1100 = vmatprep.subr.bf16.mxu1 %v9878_v0 }
 0x1d6   :  { %1047 = vmatpush2.bf16.msra.mxu0 %v10215_v41  ;;  %1101 = vmatpush2.bf16.msra.mxu1 %v10215_v41 }
 0x1d7   :  { %1048 = vmatprep.subr.bf16.mxu0 %v9878_v0  ;;  %1102 = vmatprep.subr.bf16.mxu1 %v9878_v0 }
 0x1da   :  { %1049 = vmatpush2.bf16.msra.mxu0 %v10221_v42  ;;  %1103 = vmatpush2.bf16.msra.mxu1 %v10221_v42 }
 0x1db   :  { %1050 = vmatprep.subr.bf16.mxu0 %v9878_v0  ;;  %1104 = vmatprep.subr.bf16.mxu1 %v9878_v0 }
 0x1de   :  { %1051 = vmatpush2.bf16.msra.mxu0 %v10227_v43  ;;  %1105 = vmatpush2.bf16.msra.mxu1 %v10227_v43 }
 0x1df   :  { %1052 = vmatprep.subr.bf16.mxu0 %v9878_v0  ;;  %1106 = vmatprep.subr.bf16.mxu1 %v9878_v0 }
 0x1e2   :  { %1053 = vmatpush2.bf16.msra.mxu0 %v10298_v48  ;;  %1107 = vmatpush2.bf16.msra.mxu1 %v10298_v48 }
 0x1e3   :  { %1123 = vmatprep.subr.bf16.mxu0 %v9878_v0  ;;  %1177 = vmatprep.subr.bf16.mxu1 %v9878_v0 }
 0x1e5   :  { %v10587_v45 = vpop.f32.mrf.mxu0  ;;  %1055 = vmatmul.mubr.bf16.vlgmr.msra.gmra.mxu0 %v10447_v11  ;;  %v10590_v46 = vpop.f32.mrf.mxu1  ;;  %1109 = vmatmul.mubr.bf16.vlgmr.msra.gmra.mxu1 %v10511_v21 }
 0x1e6   :  { %1124 = vmatpush1.bf16.msra.mxu0 %v10163_v33  ;;  %1178 = vmatpush1.bf16.msra.mxu1 %v10163_v33 }
 0x1e7   :  { %v654_v47 = vpop.f32.mrf.mxu0  ;;  %v708_v49 = vpop.f32.mrf.mxu1  ;;  %1125 = vmatprep.subr.bf16.mxu0 %v9878_v0  ;;  %1179 = vmatprep.subr.bf16.mxu1 %v9878_v0 }
 0x1e8   :  { %7199 = vmatprep.mubr.msk.bf16.mxu0 %vm210_vm0, %v10581_v32  ;;  %7200 = vmatprep.mubr.msk.bf16.mxu1 %vm210_vm0, %v10585_v44  ;;  %v10871_v47 = vld [vmem:[%s13140_s0 + $0x38] sm:$0xff] }
 0x1e9   :  { %v655_v50 = vpop.f32.mrf.mxu0  ;;  %v709_v53 = vpop.f32.mrf.mxu1 }
 0x1ea   :  { %1126 = vmatpush1.bf16.msra.mxu0 %v10173_v34  ;;  %1180 = vmatpush1.bf16.msra.mxu1 %v10173_v34  ;;  %v10883_v50 = vrot.slane %v10871_v47, %v9963_v9 }
 0x1eb   :  { %v656_v54 = vpop.f32.mrf.mxu0  ;;  %v710_v55 = vpop.f32.mrf.mxu1  ;;  %1127 = vmatprep.subr.bf16.mxu0 %v9878_v0  ;;  %1181 = vmatprep.subr.bf16.mxu1 %v9878_v0 }
 0x1ee   :  { %1128 = vmatpush1.bf16.msra.mxu0 %v10179_v35  ;;  %1182 = vmatpush1.bf16.msra.mxu1 %v10179_v35 }
 0x1ef   :  { %1129 = vmatprep.subr.bf16.mxu0 %v9878_v0  ;;  %1183 = vmatprep.subr.bf16.mxu1 %v9878_v0 }
 0x1f2   :  { %1130 = vmatpush1.bf16.msra.mxu0 %v10185_v36  ;;  %1184 = vmatpush1.bf16.msra.mxu1 %v10185_v36 }
 0x1f3   :  { %1131 = vmatprep.subr.bf16.mxu0 %v9878_v0  ;;  %1185 = vmatprep.subr.bf16.mxu1 %v9878_v0 }
 0x1f6   :  { %1132 = vmatpush1.bf16.msra.mxu0 %v10191_v37  ;;  %1186 = vmatpush1.bf16.msra.mxu1 %v10191_v37 }
 0x1f7   :  { %1133 = vmatprep.subr.bf16.mxu0 %v9878_v0  ;;  %1187 = vmatprep.subr.bf16.mxu1 %v9878_v0 }
 0x1fa   :  { %1134 = vmatpush1.bf16.msra.mxu0 %v10197_v38  ;;  %1188 = vmatpush1.bf16.msra.mxu1 %v10197_v38 }
 0x1fb   :  { %1135 = vmatprep.subr.bf16.mxu0 %v9878_v0  ;;  %1189 = vmatprep.subr.bf16.mxu1 %v9878_v0 }
 0x1fe   :  { %1136 = vmatpush1.bf16.msra.mxu0 %v10203_v39  ;;  %1190 = vmatpush1.bf16.msra.mxu1 %v10203_v39 }
 0x1ff   :  { %1137 = vmatprep.subr.bf16.mxu0 %v9878_v0  ;;  %1191 = vmatprep.subr.bf16.mxu1 %v9878_v0 }
 0x202   :  { %1138 = vmatpush1.bf16.msra.mxu0 %v10209_v40  ;;  %1192 = vmatpush1.bf16.msra.mxu1 %v10209_v40 }
 0x203   :  { %1147 = vmatprep.subr.bf16.mxu0 %v9878_v0  ;;  %1201 = vmatprep.subr.bf16.mxu1 %v9878_v0 }
 0x206   :  { %1148 = vmatpush2.bf16.msra.mxu0 %v10215_v41  ;;  %1202 = vmatpush2.bf16.msra.mxu1 %v10215_v41 }
 0x207   :  { %1149 = vmatprep.subr.bf16.mxu0 %v9878_v0  ;;  %1203 = vmatprep.subr.bf16.mxu1 %v9878_v0 }
 0x20a   :  { %1150 = vmatpush2.bf16.msra.mxu0 %v10221_v42  ;;  %1204 = vmatpush2.bf16.msra.mxu1 %v10221_v42 }
 0x20b   :  { %1151 = vmatprep.subr.bf16.mxu0 %v9878_v0  ;;  %1205 = vmatprep.subr.bf16.mxu1 %v9878_v0 }
 0x20e   :  { %1152 = vmatpush2.bf16.msra.mxu0 %v10227_v43  ;;  %1206 = vmatpush2.bf16.msra.mxu1 %v10227_v43 }
 0x20f   :  { %1153 = vmatprep.subr.bf16.mxu0 %v9878_v0  ;;  %1207 = vmatprep.subr.bf16.mxu1 %v9878_v0 }
 0x212   :  { %1154 = vmatpush2.bf16.msra.mxu0 %v10298_v48  ;;  %1208 = vmatpush2.bf16.msra.mxu1 %v10298_v48 }
 0x213   :  { %1224 = vmatprep.subr.bf16.mxu0 %v9878_v0  ;;  %1278 = vmatprep.subr.bf16.mxu1 %v9878_v0 }
 0x215   :  { %v10654_v59 = vpop.f32.mrf.mxu0  ;;  %1156 = vmatmul.mubr.bf16.vlgmr.msra.gmra.mxu0 %v10514_v22  ;;  %v10657_v60 = vpop.f32.mrf.mxu1  ;;  %1210 = vmatmul.mubr.bf16.vlgmr.msra.gmra.mxu1 %v10581_v32  ;;  %v10856_v32 = vld [vmem:[#allocation3 + $0x50] sm:$0xff]  }
 0x216   :  { %1225 = vmatpush1.bf16.msra.mxu0 %v10163_v33  ;;  %1279 = vmatpush1.bf16.msra.mxu1 %v10163_v33 }
 0x217   :  { %v755_v61 = vpop.f32.mrf.mxu0  ;;  %v809_v1 = vpop.f32.mrf.mxu1  ;;  %1226 = vmatprep.subr.bf16.mxu0 %v9878_v0  ;;  %1280 = vmatprep.subr.bf16.mxu1 %v9878_v0 }
 0x218   :  { %7201 = vmatprep.mubr.msk.bf16.mxu0 %vm210_vm0, %v10649_v57  ;;  %7202 = vmatprep.mubr.msk.bf16.mxu1 %vm210_vm0, %v10652_v58  ;;  %v1670_v1 = vcombine.high %v10871_v47, %v10871_v47  ;;  %v11099_v47 = vld [vmem:[#allocation5 + $0xb0] sm:$0xff]  }
 0x219   :  { %v756_v2 = vpop.f32.mrf.mxu0  ;;  %v810_v3 = vpop.f32.mrf.mxu1 }
 0x21a   :  { %1227 = vmatpush1.bf16.msra.mxu0 %v10173_v34  ;;  %1281 = vmatpush1.bf16.msra.mxu1 %v10173_v34  ;;  %v10941_v2 = vld [vmem:[#allocation3 + $0x40] sm:$0xff]   ;;  %v10949_v3 = vcombine.high %v10883_v50, %v10883_v50 }
 0x21b   :  { %v757_v4 = vpop.f32.mrf.mxu0  ;;  %v811_v5 = vpop.f32.mrf.mxu1  ;;  %1228 = vmatprep.subr.bf16.mxu0 %v9878_v0  ;;  %1282 = vmatprep.subr.bf16.mxu1 %v9878_v0 }
 0x21c   :  { %v10952_v4 = vrot.slane %v1670_v1, %v9963_v9  ;;  %v11117_v1 = vld [vmem:[#allocation5 + $0x20] sm:$0xff]  }
 0x21e   :  { %1229 = vmatpush1.bf16.msra.mxu0 %v10179_v35  ;;  %1283 = vmatpush1.bf16.msra.mxu1 %v10179_v35 }
 0x21f   :  { %1230 = vmatprep.subr.bf16.mxu0 %v9878_v0  ;;  %1284 = vmatprep.subr.bf16.mxu1 %v9878_v0 }
 0x222   :  { %1231 = vmatpush1.bf16.msra.mxu0 %v10185_v36  ;;  %1285 = vmatpush1.bf16.msra.mxu1 %v10185_v36 }
 0x223   :  { %1232 = vmatprep.subr.bf16.mxu0 %v9878_v0  ;;  %1286 = vmatprep.subr.bf16.mxu1 %v9878_v0 }
 0x226   :  { %1233 = vmatpush1.bf16.msra.mxu0 %v10191_v37  ;;  %1287 = vmatpush1.bf16.msra.mxu1 %v10191_v37 }
 0x227   :  { %1234 = vmatprep.subr.bf16.mxu0 %v9878_v0  ;;  %1288 = vmatprep.subr.bf16.mxu1 %v9878_v0 }
 0x22a   :  { %1235 = vmatpush1.bf16.msra.mxu0 %v10197_v38  ;;  %1289 = vmatpush1.bf16.msra.mxu1 %v10197_v38 }
 0x22b   :  { %1236 = vmatprep.subr.bf16.mxu0 %v9878_v0  ;;  %1290 = vmatprep.subr.bf16.mxu1 %v9878_v0 }
 0x22e   :  { %1237 = vmatpush1.bf16.msra.mxu0 %v10203_v39  ;;  %1291 = vmatpush1.bf16.msra.mxu1 %v10203_v39 }
 0x22f   :  { %1238 = vmatprep.subr.bf16.mxu0 %v9878_v0  ;;  %1292 = vmatprep.subr.bf16.mxu1 %v9878_v0 }
 0x232   :  { %1239 = vmatpush1.bf16.msra.mxu0 %v10209_v40  ;;  %1293 = vmatpush1.bf16.msra.mxu1 %v10209_v40 }
 0x233   :  { %1248 = vmatprep.subr.bf16.mxu0 %v9878_v0  ;;  %1302 = vmatprep.subr.bf16.mxu1 %v9878_v0 }
 0x236   :  { %1249 = vmatpush2.bf16.msra.mxu0 %v10215_v41  ;;  %1303 = vmatpush2.bf16.msra.mxu1 %v10215_v41 }
 0x237   :  { %1250 = vmatprep.subr.bf16.mxu0 %v9878_v0  ;;  %1304 = vmatprep.subr.bf16.mxu1 %v9878_v0 }
 0x23a   :  { %1251 = vmatpush2.bf16.msra.mxu0 %v10221_v42  ;;  %1305 = vmatpush2.bf16.msra.mxu1 %v10221_v42 }
 0x23b   :  { %1252 = vmatprep.subr.bf16.mxu0 %v9878_v0  ;;  %1306 = vmatprep.subr.bf16.mxu1 %v9878_v0 }
 0x23e   :  { %1253 = vmatpush2.bf16.msra.mxu0 %v10227_v43  ;;  %1307 = vmatpush2.bf16.msra.mxu1 %v10227_v43 }
 0x23f   :  { %1254 = vmatprep.subr.bf16.mxu0 %v9878_v0  ;;  %1308 = vmatprep.subr.bf16.mxu1 %v9878_v0 }
 0x242   :  { %1255 = vmatpush2.bf16.msra.mxu0 %v10298_v48  ;;  %1309 = vmatpush2.bf16.msra.mxu1 %v10298_v48 }
 0x243   :  { %1325 = vmatprep.subr.bf16.mxu0 %v9878_v0  ;;  %1379 = vmatprep.subr.bf16.mxu1 %v9878_v0 }
 0x245   :  { %v10725_v11 = vpop.f32.mrf.mxu0  ;;  %1257 = vmatmul.mubr.bf16.vlgmr.msra.gmra.mxu0 %v10585_v44  ;;  %v10728_v14 = vpop.f32.mrf.mxu1  ;;  %1311 = vmatmul.mubr.bf16.vlgmr.msra.gmra.mxu1 %v10649_v57  ;;  %v10862_v44 = vld [vmem:[#allocation3 + $0x48] sm:$0xff]  }
 0x246   :  { %1326 = vmatpush1.bf16.msra.mxu0 %v10163_v33  ;;  %1380 = vmatpush1.bf16.msra.mxu1 %v10163_v33 }
 0x247   :  { %v856_v15 = vpop.f32.mrf.mxu0  ;;  %v910_v16 = vpop.f32.mrf.mxu1  ;;  %1327 = vmatprep.subr.bf16.mxu0 %v9878_v0  ;;  %1381 = vmatprep.subr.bf16.mxu1 %v9878_v0 }
 0x248   :  { %7203 = vmatprep.mubr.msk.bf16.mxu0 %vm210_vm0, %v10719_v8  ;;  %7204 = vmatprep.mubr.msk.bf16.mxu1 %vm210_vm0, %v10723_v10 }
 0x249   :  { %v857_v17 = vpop.f32.mrf.mxu0  ;;  %v911_v18 = vpop.f32.mrf.mxu1 }
 0x24a   :  { %1328 = vmatpush1.bf16.msra.mxu0 %v10173_v34  ;;  %1382 = vmatpush1.bf16.msra.mxu1 %v10173_v34  ;;  %v1468_v34 = vcombine.high %v10711_v6, %v10711_v6  ;;  %v11014_v18 = vcombine.high %v10952_v4, %v10952_v4 }
 0x24b   :  { %v858_v19 = vpop.f32.mrf.mxu0  ;;  %v912_v33 = vpop.f32.mrf.mxu1  ;;  %1329 = vmatprep.subr.bf16.mxu0 %v9878_v0  ;;  %1383 = vmatprep.subr.bf16.mxu1 %v9878_v0 }
 0x24e   :  { %1330 = vmatpush1.bf16.msra.mxu0 %v10179_v35  ;;  %1384 = vmatpush1.bf16.msra.mxu1 %v10179_v35  ;;  %v10787_v35 = vcombine.high %v10723_v10, %v10723_v10 }
 0x24f   :  { %1331 = vmatprep.subr.bf16.mxu0 %v9878_v0  ;;  %1385 = vmatprep.subr.bf16.mxu1 %v9878_v0 }
 0x252   :  { %1332 = vmatpush1.bf16.msra.mxu0 %v10185_v36  ;;  %1386 = vmatpush1.bf16.msra.mxu1 %v10185_v36  ;;  %v10790_v36 = vrot.slane %v1468_v34, %v9963_v9  ;;  %v7212_v34 = vld.sshfl [vmem:[%s13140_s0 + $0x40] sm:$0x3 pattern:$0x76325410] }
 0x253   :  { %1333 = vmatprep.subr.bf16.mxu0 %v9878_v0  ;;  %1387 = vmatprep.subr.bf16.mxu1 %v9878_v0 }
 0x254   :  { %v10879_v49 = vcombine.high %v10790_v36, %v10790_v36 }
 0x256   :  { %1334 = vmatpush1.bf16.msra.mxu0 %v10191_v37  ;;  %1388 = vmatpush1.bf16.msra.mxu1 %v10191_v37 }
 0x257   :  { %1335 = vmatprep.subr.bf16.mxu0 %v9878_v0  ;;  %1389 = vmatprep.subr.bf16.mxu1 %v9878_v0 }
 0x25a   :  { %1336 = vmatpush1.bf16.msra.mxu0 %v10197_v38  ;;  %1390 = vmatpush1.bf16.msra.mxu1 %v10197_v38 }
 0x25b   :  { %1337 = vmatprep.subr.bf16.mxu0 %v9878_v0  ;;  %1391 = vmatprep.subr.bf16.mxu1 %v9878_v0 }
 0x25e   :  { %1338 = vmatpush1.bf16.msra.mxu0 %v10203_v39  ;;  %1392 = vmatpush1.bf16.msra.mxu1 %v10203_v39  ;;  %v10798_v39 = vld [vmem:[#allocation3 + $0x38] sm:$0xff]  }
 0x25f   :  { %1339 = vmatprep.subr.bf16.mxu0 %v9878_v0  ;;  %1393 = vmatprep.subr.bf16.mxu1 %v9878_v0 }
 0x262   :  { %1340 = vmatpush1.bf16.msra.mxu0 %v10209_v40  ;;  %1394 = vmatpush1.bf16.msra.mxu1 %v10209_v40 }
 0x263   :  { %1349 = vmatprep.subr.bf16.mxu0 %v9878_v0  ;;  %1403 = vmatprep.subr.bf16.mxu1 %v9878_v0 }
 0x266   :  { %1350 = vmatpush2.bf16.msra.mxu0 %v10215_v41  ;;  %1404 = vmatpush2.bf16.msra.mxu1 %v10215_v41 }
 0x267   :  { %1351 = vmatprep.subr.bf16.mxu0 %v9878_v0  ;;  %1405 = vmatprep.subr.bf16.mxu1 %v9878_v0 }
 0x26a   :  { %1352 = vmatpush2.bf16.msra.mxu0 %v10221_v42  ;;  %1406 = vmatpush2.bf16.msra.mxu1 %v10221_v42 }
 0x26b   :  { %1353 = vmatprep.subr.bf16.mxu0 %v9878_v0  ;;  %1407 = vmatprep.subr.bf16.mxu1 %v9878_v0 }
 0x26e   :  { %1354 = vmatpush2.bf16.msra.mxu0 %v10227_v43  ;;  %1408 = vmatpush2.bf16.msra.mxu1 %v10227_v43 }
 0x26f   :  { %1355 = vmatprep.subr.bf16.mxu0 %v9878_v0  ;;  %1409 = vmatprep.subr.bf16.mxu1 %v9878_v0 }
 0x272   :  { %1356 = vmatpush2.bf16.msra.mxu0 %v10298_v48  ;;  %1410 = vmatpush2.bf16.msra.mxu1 %v10298_v48 }
 0x273   :  { %1426 = vmatprep.subr.bf16.mxu0 %v9878_v0  ;;  %1480 = vmatprep.subr.bf16.mxu1 %v9878_v0 }
 0x275   :  { %v10792_v37 = vpop.f32.mrf.mxu0  ;;  %1358 = vmatmul.mubr.bf16.vlgmr.msra.gmra.mxu0 %v10652_v58  ;;  %v10795_v38 = vpop.f32.mrf.mxu1  ;;  %1412 = vmatmul.mubr.bf16.vlgmr.msra.gmra.mxu1 %v10719_v8 }
 0x276   :  { %1427 = vmatpush1.bf16.msra.mxu0 %v10798_v39  ;;  %1481 = vmatpush1.bf16.msra.mxu1 %v10798_v39 }
 0x277   :  { %v957_v40 = vpop.f32.mrf.mxu0  ;;  %v1011_v41 = vpop.f32.mrf.mxu1  ;;  %1428 = vmatprep.subr.bf16.mxu0 %v9878_v0  ;;  %1482 = vmatprep.subr.bf16.mxu1 %v9878_v0 }
 0x278   :  { %7205 = vmatprep.mubr.msk.bf16.mxu0 %vm210_vm0, %v10787_v35  ;;  %7206 = vmatprep.mubr.msk.bf16.mxu1 %vm210_vm0, %v10790_v36 }
 0x279   :  { %v958_v42 = vpop.f32.mrf.mxu0  ;;  %v1012_v43 = vpop.f32.mrf.mxu1 }
 0x27a   :  { %1429 = vmatpush1.bf16.msra.mxu0 %v10808_v20  ;;  %1483 = vmatpush1.bf16.msra.mxu1 %v10808_v20 }
 0x27b   :  { %v959_v21 = vpop.f32.mrf.mxu0  ;;  %v1013_v22 = vpop.f32.mrf.mxu1  ;;  %1430 = vmatprep.subr.bf16.mxu0 %v9878_v0  ;;  %1484 = vmatprep.subr.bf16.mxu1 %v9878_v0 }
 0x27c   :  { %v11076_v21 = vld [vmem:[#allocation5 + $0x78] sm:$0xff]  }
 0x27e   :  { %1431 = vmatpush1.bf16.msra.mxu0 %v10814_v25  ;;  %1485 = vmatpush1.bf16.msra.mxu1 %v10814_v25 }
 0x27f   :  { %1432 = vmatprep.subr.bf16.mxu0 %v9878_v0  ;;  %1486 = vmatprep.subr.bf16.mxu1 %v9878_v0 }
 0x282   :  { %1433 = vmatpush1.bf16.msra.mxu0 %v10820_v26  ;;  %1487 = vmatpush1.bf16.msra.mxu1 %v10820_v26 }
 0x283   :  { %1434 = vmatprep.subr.bf16.mxu0 %v9878_v0  ;;  %1488 = vmatprep.subr.bf16.mxu1 %v9878_v0 }
 0x286   :  { %1435 = vmatpush1.bf16.msra.mxu0 %v10826_v27  ;;  %1489 = vmatpush1.bf16.msra.mxu1 %v10826_v27 }
 0x287   :  { %1436 = vmatprep.subr.bf16.mxu0 %v9878_v0  ;;  %1490 = vmatprep.subr.bf16.mxu1 %v9878_v0 }
 0x28a   :  { %1437 = vmatpush1.bf16.msra.mxu0 %v10832_v28  ;;  %1491 = vmatpush1.bf16.msra.mxu1 %v10832_v28 }
 0x28b   :  { %1438 = vmatprep.subr.bf16.mxu0 %v9878_v0  ;;  %1492 = vmatprep.subr.bf16.mxu1 %v9878_v0 }
 0x28e   :  { %1439 = vmatpush1.bf16.msra.mxu0 %v10838_v29  ;;  %1493 = vmatpush1.bf16.msra.mxu1 %v10838_v29 }
 0x28f   :  { %1440 = vmatprep.subr.bf16.mxu0 %v9878_v0  ;;  %1494 = vmatprep.subr.bf16.mxu1 %v9878_v0 }
 0x292   :  { %1441 = vmatpush1.bf16.msra.mxu0 %v10844_v30  ;;  %1495 = vmatpush1.bf16.msra.mxu1 %v10844_v30 }
 0x293   :  { %1450 = vmatprep.subr.bf16.mxu0 %v9878_v0  ;;  %1504 = vmatprep.subr.bf16.mxu1 %v9878_v0 }
 0x296   :  { %1451 = vmatpush2.bf16.msra.mxu0 %v10850_v31  ;;  %1505 = vmatpush2.bf16.msra.mxu1 %v10850_v31 }
 0x297   :  { %1452 = vmatprep.subr.bf16.mxu0 %v9878_v0  ;;  %1506 = vmatprep.subr.bf16.mxu1 %v9878_v0 }
 0x29a   :  { %1453 = vmatpush2.bf16.msra.mxu0 %v10856_v32  ;;  %1507 = vmatpush2.bf16.msra.mxu1 %v10856_v32 }
 0x29b   :  { %1454 = vmatprep.subr.bf16.mxu0 %v9878_v0  ;;  %1508 = vmatprep.subr.bf16.mxu1 %v9878_v0 }
 0x29e   :  { %1455 = vmatpush2.bf16.msra.mxu0 %v10862_v44  ;;  %1509 = vmatpush2.bf16.msra.mxu1 %v10862_v44 }
 0x29f   :  { %1456 = vmatprep.subr.bf16.mxu0 %v9878_v0  ;;  %1510 = vmatprep.subr.bf16.mxu1 %v9878_v0 }
 0x2a2   :  { %1457 = vmatpush2.bf16.msra.mxu0 %v10298_v48  ;;  %1511 = vmatpush2.bf16.msra.mxu1 %v10298_v48 }
 0x2a3   :  { %1527 = vmatprep.subr.bf16.mxu0 %v9878_v0  ;;  %1581 = vmatprep.subr.bf16.mxu1 %v9878_v0 }
 0x2a5   :  { %v10885_v53 = vpop.f32.mrf.mxu0  ;;  %1459 = vmatmul.mubr.bf16.vlgmr.msra.gmra.mxu0 %v10723_v10  ;;  %v10888_v54 = vpop.f32.mrf.mxu1  ;;  %1513 = vmatmul.mubr.bf16.vlgmr.msra.gmra.mxu1 %v10787_v35 }
 0x2a6   :  { %1528 = vmatpush1.bf16.msra.mxu0 %v10798_v39  ;;  %1582 = vmatpush1.bf16.msra.mxu1 %v10798_v39 }
 0x2a7   :  { %v1058_v48 = vpop.f32.mrf.mxu0  ;;  %v1112_v55 = vpop.f32.mrf.mxu1  ;;  %1529 = vmatprep.subr.bf16.mxu0 %v9878_v0  ;;  %1583 = vmatprep.subr.bf16.mxu1 %v9878_v0 }
 0x2a8   :  { %7207 = vmatprep.mubr.msk.bf16.mxu0 %vm210_vm0, %v10879_v49  ;;  %7208 = vmatprep.mubr.msk.bf16.mxu1 %vm210_vm0, %v10883_v50  ;;  %v11107_v55 = vld [vmem:[#allocation5 + $0x28] sm:$0xff]  }
 0x2a9   :  { %v1059_v56 = vpop.f32.mrf.mxu0  ;;  %v1113_v57 = vpop.f32.mrf.mxu1 }
 0x2aa   :  { %1530 = vmatpush1.bf16.msra.mxu0 %v10808_v20  ;;  %1584 = vmatpush1.bf16.msra.mxu1 %v10808_v20 }
 0x2ab   :  { %v1060_v58 = vpop.f32.mrf.mxu0  ;;  %v1114_v61 = vpop.f32.mrf.mxu1  ;;  %1531 = vmatprep.subr.bf16.mxu0 %v9878_v0  ;;  %1585 = vmatprep.subr.bf16.mxu1 %v9878_v0 }
 0x2ac   :  { %v11111_v58 = vld [vmem:[#allocation5 + $0xa8] sm:$0xff]   ;;  %v11113_v61 = vld [vmem:[#allocation5 + $0x60] sm:$0xff]  }
 0x2ae   :  { %1532 = vmatpush1.bf16.msra.mxu0 %v10814_v25  ;;  %1586 = vmatpush1.bf16.msra.mxu1 %v10814_v25 }
 0x2af   :  { %1533 = vmatprep.subr.bf16.mxu0 %v9878_v0  ;;  %1587 = vmatprep.subr.bf16.mxu1 %v9878_v0 }
 0x2b2   :  { %1534 = vmatpush1.bf16.msra.mxu0 %v10820_v26  ;;  %1588 = vmatpush1.bf16.msra.mxu1 %v10820_v26 }
 0x2b3   :  { %1535 = vmatprep.subr.bf16.mxu0 %v9878_v0  ;;  %1589 = vmatprep.subr.bf16.mxu1 %v9878_v0 }
 0x2b6   :  { %1536 = vmatpush1.bf16.msra.mxu0 %v10826_v27  ;;  %1590 = vmatpush1.bf16.msra.mxu1 %v10826_v27 }
 0x2b7   :  { %1537 = vmatprep.subr.bf16.mxu0 %v9878_v0  ;;  %1591 = vmatprep.subr.bf16.mxu1 %v9878_v0 }
 0x2ba   :  { %1538 = vmatpush1.bf16.msra.mxu0 %v10832_v28  ;;  %1592 = vmatpush1.bf16.msra.mxu1 %v10832_v28 }
 0x2bb   :  { %1539 = vmatprep.subr.bf16.mxu0 %v9878_v0  ;;  %1593 = vmatprep.subr.bf16.mxu1 %v9878_v0 }
 0x2be   :  { %1540 = vmatpush1.bf16.msra.mxu0 %v10838_v29  ;;  %1594 = vmatpush1.bf16.msra.mxu1 %v10838_v29 }
 0x2bf   :  { %1541 = vmatprep.subr.bf16.mxu0 %v9878_v0  ;;  %1595 = vmatprep.subr.bf16.mxu1 %v9878_v0 }
 0x2c2   :  { %1542 = vmatpush1.bf16.msra.mxu0 %v10844_v30  ;;  %1596 = vmatpush1.bf16.msra.mxu1 %v10844_v30 }
 0x2c3   :  { %1551 = vmatprep.subr.bf16.mxu0 %v9878_v0  ;;  %1605 = vmatprep.subr.bf16.mxu1 %v9878_v0 }
 0x2c6   :  { %1552 = vmatpush2.bf16.msra.mxu0 %v10850_v31  ;;  %1606 = vmatpush2.bf16.msra.mxu1 %v10850_v31 }
 0x2c7   :  { %1553 = vmatprep.subr.bf16.mxu0 %v9878_v0  ;;  %1607 = vmatprep.subr.bf16.mxu1 %v9878_v0 }
 0x2ca   :  { %1554 = vmatpush2.bf16.msra.mxu0 %v10856_v32  ;;  %1608 = vmatpush2.bf16.msra.mxu1 %v10856_v32 }
 0x2cb   :  { %1555 = vmatprep.subr.bf16.mxu0 %v9878_v0  ;;  %1609 = vmatprep.subr.bf16.mxu1 %v9878_v0 }
 0x2ce   :  { %1556 = vmatpush2.bf16.msra.mxu0 %v10862_v44  ;;  %1610 = vmatpush2.bf16.msra.mxu1 %v10862_v44 }
 0x2cf   :  { %1557 = vmatprep.subr.bf16.mxu0 %v9878_v0  ;;  %1611 = vmatprep.subr.bf16.mxu1 %v9878_v0 }
 0x2d2   :  { %1558 = vmatpush2.bf16.msra.mxu0 %v10941_v2  ;;  %1612 = vmatpush2.bf16.msra.mxu1 %v10941_v2 }
 0x2d3   :  { %1628 = vmatprep.subr.bf16.mxu0 %v9878_v0  ;;  %1682 = vmatprep.subr.bf16.mxu1 %v9878_v0 }
 0x2d5   :  { %v10954_v5 = vpop.f32.mrf.mxu0  ;;  %1560 = vmatmul.mubr.bf16.vlgmr.msra.gmra.mxu0 %v10790_v36  ;;  %v10957_v6 = vpop.f32.mrf.mxu1  ;;  %1614 = vmatmul.mubr.bf16.vlgmr.msra.gmra.mxu1 %v10879_v49  ;;  %v11101_v49 = vld [vmem:[#allocation5 + $0x68] sm:$0xff]  }
 0x2d6   :  { %1629 = vmatpush1.bf16.msra.mxu0 %v10798_v39  ;;  %1683 = vmatpush1.bf16.msra.mxu1 %v10798_v39 }
 0x2d7   :  { %v1159_v8 = vpop.f32.mrf.mxu0  ;;  %v1213_v10 = vpop.f32.mrf.mxu1  ;;  %1630 = vmatprep.subr.bf16.mxu0 %v9878_v0  ;;  %1684 = vmatprep.subr.bf16.mxu1 %v9878_v0 }
 0x2d8   :  { %7209 = vmatprep.mubr.msk.bf16.mxu0 %vm210_vm0, %v10949_v3  ;;  %7210 = vmatprep.mubr.msk.bf16.mxu1 %vm210_vm0, %v10952_v4  ;;  %v11131_v8 = vld [vmem:[#allocation5 + $0x98] sm:$0xff]   ;;  %v11133_v10 = vld [vmem:[#allocation5 + $0x50] sm:$0xff]  }
 0x2d9   :  { %v1160_v9 = vpop.f32.mrf.mxu0  ;;  %v1214_v15 = vpop.f32.mrf.mxu1 }
 0x2da   :  { %1631 = vmatpush1.bf16.msra.mxu0 %v10808_v20  ;;  %1685 = vmatpush1.bf16.msra.mxu1 %v10808_v20  ;;  %v11137_v9 = vld [vmem:[#allocation5 + $0x10] sm:$0xff]  }
 0x2db   :  { %v1161_v16 = vpop.f32.mrf.mxu0  ;;  %v1215_v17 = vpop.f32.mrf.mxu1  ;;  %1632 = vmatprep.subr.bf16.mxu0 %v9878_v0  ;;  %1686 = vmatprep.subr.bf16.mxu1 %v9878_v0  ;;  %v11141_v15 = vld [vmem:[#allocation5 + $0x90] sm:$0xff]  }
 0x2dc   :  { %v11143_v16 = vld [vmem:[#allocation5 + $0x48] sm:$0xff]  }
 0x2dd   :  { %v11147_v17 = vld [vmem:[#allocation5 + $0x8] sm:$0xff]  }
 0x2de   :  { %1633 = vmatpush1.bf16.msra.mxu0 %v10814_v25  ;;  %1687 = vmatpush1.bf16.msra.mxu1 %v10814_v25 }
 0x2df   :  { %1634 = vmatprep.subr.bf16.mxu0 %v9878_v0  ;;  %1688 = vmatprep.subr.bf16.mxu1 %v9878_v0 }
 0x2e2   :  { %1635 = vmatpush1.bf16.msra.mxu0 %v10820_v26  ;;  %1689 = vmatpush1.bf16.msra.mxu1 %v10820_v26 }
 0x2e3   :  { %1636 = vmatprep.subr.bf16.mxu0 %v9878_v0  ;;  %1690 = vmatprep.subr.bf16.mxu1 %v9878_v0 }
 0x2e6   :  { %1637 = vmatpush1.bf16.msra.mxu0 %v10826_v27  ;;  %1691 = vmatpush1.bf16.msra.mxu1 %v10826_v27 }
 0x2e7   :  { %1638 = vmatprep.subr.bf16.mxu0 %v9878_v0  ;;  %1692 = vmatprep.subr.bf16.mxu1 %v9878_v0 }
 0x2ea   :  { %1639 = vmatpush1.bf16.msra.mxu0 %v10832_v28  ;;  %1693 = vmatpush1.bf16.msra.mxu1 %v10832_v28 }
 0x2eb   :  { %1640 = vmatprep.subr.bf16.mxu0 %v9878_v0  ;;  %1694 = vmatprep.subr.bf16.mxu1 %v9878_v0 }
 0x2ee   :  { %1641 = vmatpush1.bf16.msra.mxu0 %v10838_v29  ;;  %1695 = vmatpush1.bf16.msra.mxu1 %v10838_v29 }
 0x2ef   :  { %1642 = vmatprep.subr.bf16.mxu0 %v9878_v0  ;;  %1696 = vmatprep.subr.bf16.mxu1 %v9878_v0 }
 0x2f2   :  { %1643 = vmatpush1.bf16.msra.mxu0 %v10844_v30  ;;  %1697 = vmatpush1.bf16.msra.mxu1 %v10844_v30 }
 0x2f3   :  { %1652 = vmatprep.subr.bf16.mxu0 %v9878_v0  ;;  %1706 = vmatprep.subr.bf16.mxu1 %v9878_v0 }
 0x2f6   :  { %1653 = vmatpush2.bf16.msra.mxu0 %v10850_v31  ;;  %1707 = vmatpush2.bf16.msra.mxu1 %v10850_v31 }
 0x2f7   :  { %1654 = vmatprep.subr.bf16.mxu0 %v9878_v0  ;;  %1708 = vmatprep.subr.bf16.mxu1 %v9878_v0 }
 0x2fa   :  { %1655 = vmatpush2.bf16.msra.mxu0 %v10856_v32  ;;  %1709 = vmatpush2.bf16.msra.mxu1 %v10856_v32 }
 0x2fb   :  { %1656 = vmatprep.subr.bf16.mxu0 %v9878_v0  ;;  %1710 = vmatprep.subr.bf16.mxu1 %v9878_v0 }
 0x2fe   :  { %1657 = vmatpush2.bf16.msra.mxu0 %v10862_v44  ;;  %1711 = vmatpush2.bf16.msra.mxu1 %v10862_v44 }
 0x2ff   :  { %1658 = vmatprep.subr.bf16.mxu0 %v9878_v0  ;;  %1712 = vmatprep.subr.bf16.mxu1 %v9878_v0 }
 0x302   :  { %1659 = vmatpush2.bf16.msra.mxu0 %v10941_v2  ;;  %1713 = vmatpush2.bf16.msra.mxu1 %v10941_v2 }
 0x303   :  { %1729 = vmatprep.subr.bf16.mxu0 %v9878_v0  ;;  %1783 = vmatprep.subr.bf16.mxu1 %v9878_v0 }
 0x305   :  { %v11016_v19 = vpop.f32.mrf.mxu0  ;;  %1661 = vmatmul.mubr.bf16.vlgmr.msra.gmra.mxu0 %v10883_v50  ;;  %v11019_v33 = vpop.f32.mrf.mxu1  ;;  %1715 = vmatmul.mubr.bf16.vlgmr.msra.gmra.mxu1 %v10949_v3  ;;  %v11123_v3 = vld [vmem:[#allocation5 + $0x58] sm:$0xff]  }
 0x306   :  { %1730 = vmatpush1.bf16.msra.mxu0 %v10798_v39  ;;  %1784 = vmatpush1.bf16.msra.mxu1 %v10798_v39  ;;  %v11064_v39 = vld [vmem:[#allocation7] ss:$0 sm:$0xff] }
 0x307   :  { %v1260_v35 = vpop.f32.mrf.mxu0  ;;  %v1314_v36 = vpop.f32.mrf.mxu1  ;;  %1731 = vmatprep.subr.bf16.mxu0 %v9878_v0  ;;  %1785 = vmatprep.subr.bf16.mxu1 %v9878_v0 }
 0x308   :  { %7211 = vmatprep.mubr.msk.bf16.mxu0 %vm210_vm0, %v11014_v18  ;;  %7213 = vmatprep.mubr.msk.bf16.mxu1 %vm210_vm0, %v7212_v34  ;;  %v11153_v34 = vld [vmem:[#allocation5 + $0x40] sm:$0xff]   ;;  %v303_v35 = vadd.f32 %v11064_v39, %v10315_v52  ;;  %v350_v36 = vadd.f32 %v11064_v39, %v10378_v62 }
 0x309   :  { %v1261_v40 = vpop.f32.mrf.mxu0  ;;  %v1315_v41 = vpop.f32.mrf.mxu1 }
 0x30a   :  { %1732 = vmatpush1.bf16.msra.mxu0 %v10808_v20  ;;  %1786 = vmatpush1.bf16.msra.mxu1 %v10808_v20  ;;  %v249_v20 = vadd.f32 %v11064_v39, %v10312_v51  ;;  %v9880_v51 = vmov 0.0   ;;  %v11161_v40 = vld [vmem:[#allocation5] sm:$0xff]  }
 0x30b   :  { %v1262_v42 = vpop.f32.mrf.mxu0  ;;  %v1316_v43 = vpop.f32.mrf.mxu1  ;;  %1733 = vmatprep.subr.bf16.mxu0 %v9878_v0  ;;  %1787 = vmatprep.subr.bf16.mxu1 %v9878_v0  ;;  %v11165_v41 = vld [vmem:[#allocation5 + $0x80] sm:$0xff]  }
 0x30c   :  { %v254_v22 = vmax.f32 %v249_v20, 0.0  ;;  %v308_v42 = vmax.f32 %v303_v35, 0.0  ;;  %v355_v43 = vmax.f32 %v350_v36, 0.0  ;;  %v451_v35 = vadd.f32 %v11064_v39, %v10449_v12 }
 0x30e   :  { %1734 = vmatpush1.bf16.msra.mxu0 %v10814_v25  ;;  %1788 = vmatpush1.bf16.msra.mxu1 %v10814_v25  ;;  %v11080_v25 = vld [vmem:[#allocation5 + $0x38] sm:$0xff]   ;;  %v309_v52 = vpack.c.bf16 %v308_v42, %v308_v42  ;;  %v356_v62 = vpack.c.bf16 %v355_v43, %v355_v43  ;;  %v456_v42 = vmax.f32 %v451_v35, 0.0  ;;  %v505_v43 = vadd.f32 %v11064_v39, %v10452_v13 }
 0x30f   :  { %1735 = vmatprep.subr.bf16.mxu0 %v9878_v0  ;;  %1789 = vmatprep.subr.bf16.mxu1 %v9878_v0 }
 0x310   :  { %v457_v12 = vpack.c.bf16 %v456_v42, %v456_v42  ;;  %v606_v42 = vadd.f32 %v11064_v39, %v10519_v24 }
 0x312   :  { %1736 = vmatpush1.bf16.msra.mxu0 %v10820_v26  ;;  %1790 = vmatpush1.bf16.msra.mxu1 %v10820_v26  ;;  %v11084_v26 = vld [vmem:[#allocation5 + $0xb8] sm:$0xff]  }
 0x313   :  { %1737 = vmatprep.subr.bf16.mxu0 %v9878_v0  ;;  %1791 = vmatprep.subr.bf16.mxu1 %v9878_v0 }
 0x316   :  { %1738 = vmatpush1.bf16.msra.mxu0 %v10826_v27  ;;  %1792 = vmatpush1.bf16.msra.mxu1 %v10826_v27  ;;  %v11086_v27 = vld [vmem:[#allocation5 + $0x70] sm:$0xff]  }
 0x317   :  { %1739 = vmatprep.subr.bf16.mxu0 %v9878_v0  ;;  %1793 = vmatprep.subr.bf16.mxu1 %v9878_v0 }
 0x31a   :  { %1740 = vmatpush1.bf16.msra.mxu0 %v10832_v28  ;;  %1794 = vmatpush1.bf16.msra.mxu1 %v10832_v28  ;;  %v255_v28 = vpack.c.bf16 %v254_v22, %v254_v22 }
 0x31b   :  { %1741 = vmatprep.subr.bf16.mxu0 %v9878_v0  ;;  %1795 = vmatprep.subr.bf16.mxu1 %v9878_v0 }
 0x31e   :  { %1742 = vmatpush1.bf16.msra.mxu0 %v10838_v29  ;;  %1796 = vmatpush1.bf16.msra.mxu1 %v10838_v29 }
 0x31f   :  { %1743 = vmatprep.subr.bf16.mxu0 %v9878_v0  ;;  %1797 = vmatprep.subr.bf16.mxu1 %v9878_v0 }
 0x322   :  { %1744 = vmatpush1.bf16.msra.mxu0 %v10844_v30  ;;  %1798 = vmatpush1.bf16.msra.mxu1 %v10844_v30 }
 0x323   :  { %1753 = vmatprep.subr.bf16.mxu0 %v9878_v0  ;;  %1807 = vmatprep.subr.bf16.mxu1 %v9878_v0 }
 0x326   :  { %1754 = vmatpush2.bf16.msra.mxu0 %v10850_v31  ;;  %1808 = vmatpush2.bf16.msra.mxu1 %v10850_v31  ;;  %v11095_v31 = vld [vmem:[#allocation5 + $0x30] sm:$0xff]  }
 0x327   :  { %1755 = vmatprep.subr.bf16.mxu0 %v9878_v0  ;;  %1809 = vmatprep.subr.bf16.mxu1 %v9878_v0 }
 0x32a   :  { %1756 = vmatpush2.bf16.msra.mxu0 %v10856_v32  ;;  %1810 = vmatpush2.bf16.msra.mxu1 %v10856_v32 }
 0x32b   :  { %1757 = vmatprep.subr.bf16.mxu0 %v9878_v0  ;;  %1811 = vmatprep.subr.bf16.mxu1 %v9878_v0 }
 0x32e   :  { %1758 = vmatpush2.bf16.msra.mxu0 %v10862_v44  ;;  %1812 = vmatpush2.bf16.msra.mxu1 %v10862_v44 }
 0x32f   :  { %1759 = vmatprep.subr.bf16.mxu0 %v9878_v0  ;;  %1813 = vmatprep.subr.bf16.mxu1 %v9878_v0 }
 0x332   :  { %1760 = vmatpush2.bf16.msra.mxu0 %v10941_v2  ;;  %1814 = vmatpush2.bf16.msra.mxu1 %v10941_v2  ;;  %v11121_v2 = vld [vmem:[#allocation5 + $0xa0] sm:$0xff]  }
 0x333   :  { %7580 = vmatprep.subr.bf16.mxu0 %v11076_v21  ;;  %8604 = vmatprep.subr.bf16.mxu1 %v9880_v51 }
 0x335   :  { %v11088_v29 = vpop.f32.mrf.mxu0  ;;  %1762 = vmatmul.mubr.bf16.vlgmr.msra.gmra.mxu0 %v10952_v4  ;;  %v11091_v30 = vpop.f32.mrf.mxu1  ;;  %1816 = vmatmul.mubr.bf16.vlgmr.msra.gmra.mxu1 %v11014_v18  ;;  %v11127_v4 = vld [vmem:[#allocation5 + $0x18] sm:$0xff]   ;;  %v11151_v18 = vld [vmem:[#allocation5 + $0x88] sm:$0xff]  }
 0x336   :  { %7581 = vmatpush3.bf16.msra.mxu0 %v11080_v25  ;;  %2057 = vmatprep.mubr.bf16.mxu0 %v255_v28 }
 0x337   :  { %8605 = vmatpush3.bf16.msra.mxu1 %v11084_v26  ;;  %v1361_v32 = vpop.f32.mrf.mxu0  ;;  %v1415_v44 = vpop.f32.mrf.mxu1  ;;  %7582 = vmatprep.subr.bf16.mxu0 %v11086_v27 }
 0x338   :  { %8606 = vmatprep.subr.bf16.mxu1 %v9880_v51  ;;  %8620 = vmatprep.mubr.msk.bf16.mxu1 %vm9881_vm1, %v9880_v51 }
 0x339   :  { %v1362_v50 = vpop.f32.mrf.mxu0  ;;  %v1416_v48 = vpop.f32.mrf.mxu1 }
 0x33a   :  { %7583 = vmatpush3.bf16.msra.mxu0 %v11095_v31 }
 0x33b   :  { %8607 = vmatpush3.bf16.msra.mxu1 %v11099_v47  ;;  %v1363_v56 = vpop.f32.mrf.mxu0  ;;  %v1417_v57 = vpop.f32.mrf.mxu1  ;;  %7584 = vmatprep.subr.bf16.mxu0 %v11101_v49 }
 0x33c   :  { %8608 = vmatprep.subr.bf16.mxu1 %v9880_v51  ;;  %v404_v57 = vadd.f32 %v11064_v39, %v10381_v63 }
 0x33e   :  { %7585 = vmatpush3.bf16.msra.mxu0 %v11107_v55  ;;  %v409_v36 = vmax.f32 %v404_v57, 0.0 }
 0x33f   :  { %8609 = vmatpush3.bf16.msra.mxu1 %v11111_v58  ;;  %7586 = vmatprep.subr.bf16.mxu0 %v11113_v61 }
 0x340   :  { %8610 = vmatprep.subr.bf16.mxu1 %v9880_v51  ;;  %v410_v63 = vpack.c.bf16 %v409_v36, %v409_v36 }
 0x342   :  { %7587 = vmatpush3.bf16.msra.mxu0 %v11117_v1 }
 0x343   :  { %8611 = vmatpush3.bf16.msra.mxu1 %v11121_v2  ;;  %7588 = vmatprep.subr.bf16.mxu0 %v11123_v3 }
 0x344   :  { %8612 = vmatprep.subr.bf16.mxu1 %v9880_v51 }
 0x346   :  { %7589 = vmatpush3.bf16.msra.mxu0 %v11127_v4 }
 0x347   :  { %8613 = vmatpush3.bf16.msra.mxu1 %v11131_v8  ;;  %7590 = vmatprep.subr.bf16.mxu0 %v11133_v10 }
 0x348   :  { %8614 = vmatprep.subr.bf16.mxu1 %v9880_v51 }
 0x34a   :  { %7591 = vmatpush3.bf16.msra.mxu0 %v11137_v9 }
 0x34b   :  { %8615 = vmatpush3.bf16.msra.mxu1 %v11141_v15  ;;  %7592 = vmatprep.subr.bf16.mxu0 %v11143_v16 }
 0x34c   :  { %8616 = vmatprep.subr.bf16.mxu1 %v9880_v51 }
 0x34e   :  { %7593 = vmatpush3.bf16.msra.mxu0 %v11147_v17 }
 0x34f   :  { %8617 = vmatpush3.bf16.msra.mxu1 %v11151_v18  ;;  %7594 = vmatprep.subr.bf16.mxu0 %v11153_v34 }
 0x350   :  { %8618 = vmatprep.subr.bf16.mxu1 %v9880_v51 }
 0x352   :  { %7595 = vmatpush3.bf16.msra.mxu0 %v11161_v40 }
 0x353   :  { %8619 = vmatpush3.bf16.msra.mxu1 %v11165_v41  ;;  %7611 = vmatprep.subr.bf16.mxu0 %v11076_v21 }
 0x354   :  { %8624 = vmatprep.subr.bf16.mxu1 %v9880_v51 }
 0x355   :  { %2058 = vmatmul.mubr.bf16.vlgmr.msra.gmra.mxu0 %v9878_v0 }
 0x356   :  { %8621 = vmatmul.mubr.bf16.vlgmr.msra.gmra.mxu1 %v309_v52  ;;  %7612 = vmatpush3.bf16.msra.mxu0 %v11080_v25 }
 0x357   :  { %2139 = vmatprep.mubr.bf16.mxu0 %v356_v62  ;;  %8625 = vmatpush3.bf16.msra.mxu1 %v11084_v26  ;;  %v510_v62 = vmax.f32 %v505_v43, 0.0 }
 0x358   :  { %7613 = vmatprep.subr.bf16.mxu0 %v11086_v27  ;;  %8626 = vmatprep.subr.bf16.mxu1 %v9880_v51 }
 0x359   :  { %8640 = vmatprep.mubr.msk.bf16.mxu1 %vm9881_vm1, %v9880_v51  ;;  %v511_v13 = vpack.c.bf16 %v510_v62, %v510_v62 }
 0x35a   :  { %7614 = vmatpush3.bf16.msra.mxu0 %v11095_v31 }
 0x35b   :  { %8627 = vmatpush3.bf16.msra.mxu1 %v11099_v47  ;;  %7615 = vmatprep.subr.bf16.mxu0 %v11101_v49 }
 0x35c   :  { %8628 = vmatprep.subr.bf16.mxu1 %v9880_v51 }
 0x35e   :  { %7616 = vmatpush3.bf16.msra.mxu0 %v11107_v55 }
 0x35f   :  { %8629 = vmatpush3.bf16.msra.mxu1 %v11111_v58  ;;  %7617 = vmatprep.subr.bf16.mxu0 %v11113_v61 }
 0x360   :  { %8630 = vmatprep.subr.bf16.mxu1 %v9880_v51 }
 0x362   :  { %7618 = vmatpush3.bf16.msra.mxu0 %v11117_v1 }
 0x363   :  { %8631 = vmatpush3.bf16.msra.mxu1 %v11121_v2  ;;  %7619 = vmatprep.subr.bf16.mxu0 %v11123_v3 }
 0x364   :  { %8632 = vmatprep.subr.bf16.mxu1 %v9880_v51 }
 0x365   :  { %v11191_v20 = vpop.f32.mrf.mxu0  ;;  %v11193_v22 = vpop.f32.mrf.mxu1 }
 0x366   :  { %7620 = vmatpush3.bf16.msra.mxu0 %v11127_v4 }
 0x367   :  { %8633 = vmatpush3.bf16.msra.mxu1 %v11131_v8  ;;  %v1462_v28 = vpop.f32.mrf.mxu0  ;;  %v1516_v32 = vpop.f32.mrf.mxu1  ;;  %7621 = vmatprep.subr.bf16.mxu0 %v11133_v10 }
 0x368   :  { %8634 = vmatprep.subr.bf16.mxu1 %v9880_v51 }
 0x369   :  { %v1463_v44 = vpop.f32.mrf.mxu0  ;;  %v1517_v50 = vpop.f32.mrf.mxu1 }
 0x36a   :  { %7622 = vmatpush3.bf16.msra.mxu0 %v11137_v9 }
 0x36b   :  { %8635 = vmatpush3.bf16.msra.mxu1 %v11141_v15  ;;  %v1464_v48 = vpop.f32.mrf.mxu0  ;;  %v1518_v56 = vpop.f32.mrf.mxu1  ;;  %7623 = vmatprep.subr.bf16.mxu0 %v11143_v16 }
 0x36c   :  { %8636 = vmatprep.subr.bf16.mxu1 %v9880_v51 }
 0x36e   :  { %7624 = vmatpush3.bf16.msra.mxu0 %v11147_v17 }
 0x36f   :  { %8637 = vmatpush3.bf16.msra.mxu1 %v11151_v18  ;;  %7625 = vmatprep.subr.bf16.mxu0 %v11153_v34 }
 0x370   :  { %8638 = vmatprep.subr.bf16.mxu1 %v9880_v51 }
 0x372   :  { %7626 = vmatpush3.bf16.msra.mxu0 %v11161_v40 }
 0x373   :  { %8639 = vmatpush3.bf16.msra.mxu1 %v11165_v41  ;;  %7642 = vmatprep.subr.bf16.mxu0 %v11076_v21 }
 0x374   :  { %8644 = vmatprep.subr.bf16.mxu1 %v9880_v51 }
 0x375   :  { %2140 = vmatmul.mubr.bf16.vlgmr.msra.gmra.mxu0 %v309_v52  ;;  %v552_v52 = vadd.f32 %v11064_v39, %v10516_v23 }
 0x376   :  { %8641 = vmatmul.mubr.bf16.vlgmr.msra.gmra.mxu1 %v410_v63  ;;  %7643 = vmatpush3.bf16.msra.mxu0 %v11080_v25 }
 0x377   :  { %2221 = vmatprep.mubr.bf16.mxu0 %v457_v12  ;;  %8645 = vmatpush3.bf16.msra.mxu1 %v11084_v26  ;;  %v557_v28 = vmax.f32 %v552_v52, 0.0  ;;  %v611_v12 = vmax.f32 %v606_v42, 0.0 }
 0x378   :  { %7644 = vmatprep.subr.bf16.mxu0 %v11086_v27  ;;  %8646 = vmatprep.subr.bf16.mxu1 %v9880_v51 }
 0x379   :  { %8660 = vmatprep.mubr.msk.bf16.mxu1 %vm9881_vm1, %v9880_v51  ;;  %v558_v23 = vpack.c.bf16 %v557_v28, %v557_v28  ;;  %v612_v24 = vpack.c.bf16 %v611_v12, %v611_v12  ;;  %v855_v12 = vadd.f32 %v11064_v39, %v10725_v11 }
 0x37a   :  { %7645 = vmatpush3.bf16.msra.mxu0 %v11095_v31 }
 0x37b   :  { %8647 = vmatpush3.bf16.msra.mxu1 %v11099_v47  ;;  %7646 = vmatprep.subr.bf16.mxu0 %v11101_v49 }
 0x37c   :  { %8648 = vmatprep.subr.bf16.mxu1 %v9880_v51 }
 0x37e   :  { %7647 = vmatpush3.bf16.msra.mxu0 %v11107_v55 }
 0x37f   :  { %8649 = vmatpush3.bf16.msra.mxu1 %v11111_v58  ;;  %7648 = vmatprep.subr.bf16.mxu0 %v11113_v61 }
 0x380   :  { %8650 = vmatprep.subr.bf16.mxu1 %v9880_v51 }
 0x382   :  { %7649 = vmatpush3.bf16.msra.mxu0 %v11117_v1 }
 0x383   :  { %8651 = vmatpush3.bf16.msra.mxu1 %v11121_v2  ;;  %7650 = vmatprep.subr.bf16.mxu0 %v11123_v3 }
 0x384   :  { %8652 = vmatprep.subr.bf16.mxu1 %v9880_v51 }
 0x386   :  { %7651 = vmatpush3.bf16.msra.mxu0 %v11127_v4 }
 0x387   :  { %8653 = vmatpush3.bf16.msra.mxu1 %v11131_v8  ;;  %7652 = vmatprep.subr.bf16.mxu0 %v11133_v10 }
 0x388   :  { %8654 = vmatprep.subr.bf16.mxu1 %v9880_v51 }
 0x38a   :  { %7653 = vmatpush3.bf16.msra.mxu0 %v11137_v9 }
 0x38b   :  { %8655 = vmatpush3.bf16.msra.mxu1 %v11141_v15  ;;  %7654 = vmatprep.subr.bf16.mxu0 %v11143_v16 }
 0x38c   :  { %8656 = vmatprep.subr.bf16.mxu1 %v9880_v51 }
 0x38e   :  { %7655 = vmatpush3.bf16.msra.mxu0 %v11147_v17 }
 0x38f   :  { %8657 = vmatpush3.bf16.msra.mxu1 %v11151_v18  ;;  %7656 = vmatprep.subr.bf16.mxu0 %v11153_v34 }
 0x390   :  { %8658 = vmatprep.subr.bf16.mxu1 %v9880_v51 }
 0x392   :  { %7657 = vmatpush3.bf16.msra.mxu0 %v11161_v40 }
 0x393   :  { %8659 = vmatpush3.bf16.msra.mxu1 %v11165_v41  ;;  %7673 = vmatprep.subr.bf16.mxu0 %v11076_v21 }
 0x394   :  { %8664 = vmatprep.subr.bf16.mxu1 %v9880_v51 }
 0x395   :  { %v11253_v32 = vpop.f32.mrf.mxu0  ;;  %2222 = vmatmul.mubr.bf16.vlgmr.msra.gmra.mxu0 %v410_v63  ;;  %v11255_v44 = vpop.f32.mrf.mxu1  ;;  %v653_v63 = vadd.f32 %v11064_v39, %v10587_v45 }
 0x396   :  { %8661 = vmatmul.mubr.bf16.vlgmr.msra.gmra.mxu1 %v511_v13  ;;  %7674 = vmatpush3.bf16.msra.mxu0 %v11080_v25 }
 0x397   :  { %2303 = vmatprep.mubr.bf16.mxu0 %v558_v23  ;;  %8665 = vmatpush3.bf16.msra.mxu1 %v11084_v26  ;;  %v1563_v50 = vpop.f32.mrf.mxu0  ;;  %v1617_v48 = vpop.f32.mrf.mxu1  ;;  %v658_v43 = vmax.f32 %v653_v63, 0.0  ;;  %v808_v63 = vadd.f32 %v11064_v39, %v10657_v60 }
 0x398   :  { %7675 = vmatprep.subr.bf16.mxu0 %v11086_v27  ;;  %8666 = vmatprep.subr.bf16.mxu1 %v9880_v51 }
 0x399   :  { %v1564_v56 = vpop.f32.mrf.mxu0  ;;  %v1618_v57 = vpop.f32.mrf.mxu1  ;;  %8680 = vmatprep.mubr.msk.bf16.mxu1 %vm9881_vm1, %v9880_v51  ;;  %v659_v45 = vpack.c.bf16 %v658_v43, %v658_v43  ;;  %v813_v43 = vmax.f32 %v808_v63, 0.0 }
 0x39a   :  { %7676 = vmatpush3.bf16.msra.mxu0 %v11095_v31  ;;  %v707_v57 = vadd.f32 %v11064_v39, %v10590_v46 }
 0x39b   :  { %8667 = vmatpush3.bf16.msra.mxu1 %v11099_v47  ;;  %v1565_v35 = vpop.f32.mrf.mxu0  ;;  %v1619_v36 = vpop.f32.mrf.mxu1  ;;  %7677 = vmatprep.subr.bf16.mxu0 %v11101_v49  ;;  %v814_v60 = vpack.c.bf16 %v813_v43, %v813_v43 }
 0x39c   :  { %8668 = vmatprep.subr.bf16.mxu1 %v9880_v51  ;;  %v754_v35 = vadd.f32 %v11064_v39, %v10654_v59  ;;  %v712_v36 = vmax.f32 %v707_v57, 0.0 }
 0x39e   :  { %7678 = vmatpush3.bf16.msra.mxu0 %v11107_v55  ;;  %v759_v42 = vmax.f32 %v754_v35, 0.0  ;;  %v713_v46 = vpack.c.bf16 %v712_v36, %v712_v36  ;;  %v909_v35 = vadd.f32 %v11064_v39, %v10728_v14  ;;  %v956_v36 = vadd.f32 %v11064_v39, %v10792_v37 }
 0x39f   :  { %8669 = vmatpush3.bf16.msra.mxu1 %v11111_v58  ;;  %7679 = vmatprep.subr.bf16.mxu0 %v11113_v61 }
 0x3a0   :  { %8670 = vmatprep.subr.bf16.mxu1 %v9880_v51  ;;  %v760_v59 = vpack.c.bf16 %v759_v42, %v759_v42  ;;  %v914_v42 = vmax.f32 %v909_v35, 0.0  ;;  %v1057_v35 = vadd.f32 %v11064_v39, %v10885_v53 }
 0x3a2   :  { %7680 = vmatpush3.bf16.msra.mxu0 %v11117_v1  ;;  %v915_v14 = vpack.c.bf16 %v914_v42, %v914_v42  ;;  %v1062_v42 = vmax.f32 %v1057_v35, 0.0 }
 0x3a3   :  { %8671 = vmatpush3.bf16.msra.mxu1 %v11121_v2  ;;  %7681 = vmatprep.subr.bf16.mxu0 %v11123_v3 }
 0x3a4   :  { %8672 = vmatprep.subr.bf16.mxu1 %v9880_v51  ;;  %v1063_v53 = vpack.c.bf16 %v1062_v42, %v1062_v42 }
 0x3a6   :  { %7682 = vmatpush3.bf16.msra.mxu0 %v11127_v4 }
 0x3a7   :  { %8673 = vmatpush3.bf16.msra.mxu1 %v11131_v8  ;;  %7683 = vmatprep.subr.bf16.mxu0 %v11133_v10 }
 0x3a8   :  { %8674 = vmatprep.subr.bf16.mxu1 %v9880_v51 }
 0x3aa   :  { %7684 = vmatpush3.bf16.msra.mxu0 %v11137_v9 }
 0x3ab   :  { %8675 = vmatpush3.bf16.msra.mxu1 %v11141_v15  ;;  %7685 = vmatprep.subr.bf16.mxu0 %v11143_v16 }
 0x3ac   :  { %8676 = vmatprep.subr.bf16.mxu1 %v9880_v51 }
 0x3ae   :  { %7686 = vmatpush3.bf16.msra.mxu0 %v11147_v17 }
 0x3af   :  { %8677 = vmatpush3.bf16.msra.mxu1 %v11151_v18  ;;  %7687 = vmatprep.subr.bf16.mxu0 %v11153_v34 }
 0x3b0   :  { %8678 = vmatprep.subr.bf16.mxu1 %v9880_v51 }
 0x3b2   :  { %7688 = vmatpush3.bf16.msra.mxu0 %v11161_v40 }
 0x3b3   :  { %8679 = vmatpush3.bf16.msra.mxu1 %v11165_v41  ;;  %7704 = vmatprep.subr.bf16.mxu0 %v11076_v21 }
 0x3b4   :  { %8684 = vmatprep.subr.bf16.mxu1 %v9880_v51 }
 0x3b5   :  { %2304 = vmatmul.mubr.bf16.vlgmr.msra.gmra.mxu0 %v511_v13 }
 0x3b6   :  { %8681 = vmatmul.mubr.bf16.vlgmr.msra.gmra.mxu1 %v612_v24  ;;  %7705 = vmatpush3.bf16.msra.mxu0 %v11080_v25 }
 0x3b7   :  { %2385 = vmatprep.mubr.bf16.mxu0 %v659_v45  ;;  %8685 = vmatpush3.bf16.msra.mxu1 %v11084_v26 }
 0x3b8   :  { %7706 = vmatprep.subr.bf16.mxu0 %v11086_v27  ;;  %8686 = vmatprep.subr.bf16.mxu1 %v9880_v51 }
 0x3b9   :  { %8700 = vmatprep.mubr.msk.bf16.mxu1 %vm9881_vm1, %v9880_v51 }
 0x3ba   :  { %7707 = vmatpush3.bf16.msra.mxu0 %v11095_v31 }
 0x3bb   :  { %8687 = vmatpush3.bf16.msra.mxu1 %v11099_v47  ;;  %7708 = vmatprep.subr.bf16.mxu0 %v11101_v49 }
 0x3bc   :  { %8688 = vmatprep.subr.bf16.mxu1 %v9880_v51 }
 0x3be   :  { %7709 = vmatpush3.bf16.msra.mxu0 %v11107_v55 }
 0x3bf   :  { %8689 = vmatpush3.bf16.msra.mxu1 %v11111_v58  ;;  %7710 = vmatprep.subr.bf16.mxu0 %v11113_v61 }
 0x3c0   :  { %8690 = vmatprep.subr.bf16.mxu1 %v9880_v51 }
 0x3c2   :  { %7711 = vmatpush3.bf16.msra.mxu0 %v11117_v1 }
 0x3c3   :  { %8691 = vmatpush3.bf16.msra.mxu1 %v11121_v2  ;;  %7712 = vmatprep.subr.bf16.mxu0 %v11123_v3 }
 0x3c4   :  { %8692 = vmatprep.subr.bf16.mxu1 %v9880_v51 }
 0x3c5   :  { %v11313_v52 = vpop.f32.mrf.mxu0  ;;  %v11315_v62 = vpop.f32.mrf.mxu1 }
 0x3c6   :  { %7713 = vmatpush3.bf16.msra.mxu0 %v11127_v4 }
 0x3c7   :  { %8693 = vmatpush3.bf16.msra.mxu1 %v11131_v8  ;;  %v1664_v28 = vpop.f32.mrf.mxu0  ;;  %v1718_v13 = vpop.f32.mrf.mxu1  ;;  %7714 = vmatprep.subr.bf16.mxu0 %v11133_v10 }
 0x3c8   :  { %8694 = vmatprep.subr.bf16.mxu1 %v9880_v51 }
 0x3c9   :  { %v1665_v23 = vpop.f32.mrf.mxu0  ;;  %v1719_v50 = vpop.f32.mrf.mxu1 }
 0x3ca   :  { %7715 = vmatpush3.bf16.msra.mxu0 %v11137_v9 }
 0x3cb   :  { %8695 = vmatpush3.bf16.msra.mxu1 %v11141_v15  ;;  %v1666_v48 = vpop.f32.mrf.mxu0  ;;  %v1720_v56 = vpop.f32.mrf.mxu1  ;;  %7716 = vmatprep.subr.bf16.mxu0 %v11143_v16 }
 0x3cc   :  { %8696 = vmatprep.subr.bf16.mxu1 %v9880_v51 }
 0x3ce   :  { %7717 = vmatpush3.bf16.msra.mxu0 %v11147_v17 }
 0x3cf   :  { %8697 = vmatpush3.bf16.msra.mxu1 %v11151_v18  ;;  %7718 = vmatprep.subr.bf16.mxu0 %v11153_v34 }
 0x3d0   :  { %8698 = vmatprep.subr.bf16.mxu1 %v9880_v51 }
 0x3d2   :  { %7719 = vmatpush3.bf16.msra.mxu0 %v11161_v40 }
 0x3d3   :  { %8699 = vmatpush3.bf16.msra.mxu1 %v11165_v41  ;;  %7735 = vmatprep.subr.bf16.mxu0 %v11076_v21 }
 0x3d4   :  { %8704 = vmatprep.subr.bf16.mxu1 %v9880_v51 }
 0x3d5   :  { %2386 = vmatmul.mubr.bf16.vlgmr.msra.gmra.mxu0 %v612_v24  ;;  %v860_v24 = vmax.f32 %v855_v12, 0.0  ;;  %v11419_v12 = vld [vmem:[#allocation7 + $0x1] ss:$0 sm:$0xff] }
 0x3d6   :  { %8701 = vmatmul.mubr.bf16.vlgmr.msra.gmra.mxu1 %v713_v46  ;;  %7736 = vmatpush3.bf16.msra.mxu0 %v11080_v25 }
 0x3d7   :  { %2467 = vmatprep.mubr.bf16.mxu0 %v760_v59  ;;  %8705 = vmatpush3.bf16.msra.mxu1 %v11084_v26  ;;  %v861_v11 = vpack.c.bf16 %v860_v24, %v860_v24 }
 0x3d8   :  { %7737 = vmatprep.subr.bf16.mxu0 %v11086_v27  ;;  %8706 = vmatprep.subr.bf16.mxu1 %v9880_v51 }
 0x3d9   :  { %8720 = vmatprep.mubr.msk.bf16.mxu1 %vm9881_vm1, %v9880_v51 }
 0x3da   :  { %7738 = vmatpush3.bf16.msra.mxu0 %v11095_v31 }
 0x3db   :  { %8707 = vmatpush3.bf16.msra.mxu1 %v11099_v47  ;;  %7739 = vmatprep.subr.bf16.mxu0 %v11101_v49 }
 0x3dc   :  { %8708 = vmatprep.subr.bf16.mxu1 %v9880_v51 }
 0x3de   :  { %7740 = vmatpush3.bf16.msra.mxu0 %v11107_v55 }
 0x3df   :  { %8709 = vmatpush3.bf16.msra.mxu1 %v11111_v58  ;;  %7741 = vmatprep.subr.bf16.mxu0 %v11113_v61 }
 0x3e0   :  { %8710 = vmatprep.subr.bf16.mxu1 %v9880_v51 }
 0x3e2   :  { %7742 = vmatpush3.bf16.msra.mxu0 %v11117_v1 }
 0x3e3   :  { %8711 = vmatpush3.bf16.msra.mxu1 %v11121_v2  ;;  %7743 = vmatprep.subr.bf16.mxu0 %v11123_v3 }
 0x3e4   :  { %8712 = vmatprep.subr.bf16.mxu1 %v9880_v51 }
 0x3e6   :  { %7744 = vmatpush3.bf16.msra.mxu0 %v11127_v4 }
 0x3e7   :  { %8713 = vmatpush3.bf16.msra.mxu1 %v11131_v8  ;;  %7745 = vmatprep.subr.bf16.mxu0 %v11133_v10 }
 0x3e8   :  { %8714 = vmatprep.subr.bf16.mxu1 %v9880_v51 }
 0x3ea   :  { %7746 = vmatpush3.bf16.msra.mxu0 %v11137_v9 }
 0x3eb   :  { %8715 = vmatpush3.bf16.msra.mxu1 %v11141_v15  ;;  %7747 = vmatprep.subr.bf16.mxu0 %v11143_v16 }
 0x3ec   :  { %8716 = vmatprep.subr.bf16.mxu1 %v9880_v51 }
 0x3ee   :  { %7748 = vmatpush3.bf16.msra.mxu0 %v11147_v17 }
 0x3ef   :  { %8717 = vmatpush3.bf16.msra.mxu1 %v11151_v18  ;;  %7749 = vmatprep.subr.bf16.mxu0 %v11153_v34 }
 0x3f0   :  { %8718 = vmatprep.subr.bf16.mxu1 %v9880_v51 }
 0x3f2   :  { %7750 = vmatpush3.bf16.msra.mxu0 %v11161_v40 }
 0x3f3   :  { %8719 = vmatpush3.bf16.msra.mxu1 %v11165_v41  ;;  %7766 = vmatprep.subr.bf16.mxu0 %v11076_v21 }
 0x3f4   :  { %8724 = vmatprep.subr.bf16.mxu1 %v9880_v51 }
 0x3f5   :  { %v11375_v45 = vpop.f32.mrf.mxu0  ;;  %2468 = vmatmul.mubr.bf16.vlgmr.msra.gmra.mxu0 %v713_v46  ;;  %v11377_v28 = vpop.f32.mrf.mxu1  ;;  %v961_v46 = vmax.f32 %v956_v36, 0.0 }
 0x3f6   :  { %8721 = vmatmul.mubr.bf16.vlgmr.msra.gmra.mxu1 %v814_v60  ;;  %7767 = vmatpush3.bf16.msra.mxu0 %v11080_v25 }
 0x3f7   :  { %2549 = vmatprep.mubr.bf16.mxu0 %v861_v11  ;;  %8725 = vmatpush3.bf16.msra.mxu1 %v11084_v26  ;;  %v1765_v13 = vpop.f32.mrf.mxu0  ;;  %v1819_v23 = vpop.f32.mrf.mxu1  ;;  %v962_v37 = vpack.c.bf16 %v961_v46, %v961_v46 }
 0x3f8   :  { %7768 = vmatprep.subr.bf16.mxu0 %v11086_v27  ;;  %8726 = vmatprep.subr.bf16.mxu1 %v9880_v51 }
 0x3f9   :  { %v1766_v50 = vpop.f32.mrf.mxu0  ;;  %v1820_v48 = vpop.f32.mrf.mxu1  ;;  %8740 = vmatprep.mubr.msk.bf16.mxu1 %vm9881_vm1, %v9880_v51 }
 0x3fa   :  { %7769 = vmatpush3.bf16.msra.mxu0 %v11095_v31 }
 0x3fb   :  { %8727 = vmatpush3.bf16.msra.mxu1 %v11099_v47  ;;  %v1767_v56 = vpop.f32.mrf.mxu0  ;;  %v1821_v57 = vpop.f32.mrf.mxu1  ;;  %7770 = vmatprep.subr.bf16.mxu0 %v11101_v49 }
 0x3fc   :  { %8728 = vmatprep.subr.bf16.mxu1 %v9880_v51  ;;  %v1010_v57 = vadd.f32 %v11064_v39, %v10795_v38 }
 0x3fe   :  { %7771 = vmatpush3.bf16.msra.mxu0 %v11107_v55  ;;  %v1015_v36 = vmax.f32 %v1010_v57, 0.0 }
 0x3ff   :  { %8729 = vmatpush3.bf16.msra.mxu1 %v11111_v58  ;;  %7772 = vmatprep.subr.bf16.mxu0 %v11113_v61 }
 0x400   :  { %8730 = vmatprep.subr.bf16.mxu1 %v9880_v51  ;;  %v1016_v38 = vpack.c.bf16 %v1015_v36, %v1015_v36 }
 0x402   :  { %7773 = vmatpush3.bf16.msra.mxu0 %v11117_v1 }
 0x403   :  { %8731 = vmatpush3.bf16.msra.mxu1 %v11121_v2  ;;  %7774 = vmatprep.subr.bf16.mxu0 %v11123_v3 }
 0x404   :  { %8732 = vmatprep.subr.bf16.mxu1 %v9880_v51 }
 0x406   :  { %7775 = vmatpush3.bf16.msra.mxu0 %v11127_v4 }
 0x407   :  { %8733 = vmatpush3.bf16.msra.mxu1 %v11131_v8  ;;  %7776 = vmatprep.subr.bf16.mxu0 %v11133_v10 }
 0x408   :  { %8734 = vmatprep.subr.bf16.mxu1 %v9880_v51 }
 0x40a   :  { %7777 = vmatpush3.bf16.msra.mxu0 %v11137_v9 }
 0x40b   :  { %8735 = vmatpush3.bf16.msra.mxu1 %v11141_v15  ;;  %7778 = vmatprep.subr.bf16.mxu0 %v11143_v16 }
 0x40c   :  { %8736 = vmatprep.subr.bf16.mxu1 %v9880_v51 }
 0x40e   :  { %7779 = vmatpush3.bf16.msra.mxu0 %v11147_v17 }
 0x40f   :  { %8737 = vmatpush3.bf16.msra.mxu1 %v11151_v18  ;;  %7780 = vmatprep.subr.bf16.mxu0 %v11153_v34 }
 0x410   :  { %8738 = vmatprep.subr.bf16.mxu1 %v9880_v51 }
 0x412   :  { %7781 = vmatpush3.bf16.msra.mxu0 %v11161_v40 }
 0x413   :  { %8739 = vmatpush3.bf16.msra.mxu1 %v11165_v41  ;;  %7797 = vmatprep.subr.bf16.mxu0 %v11076_v21 }
 0x414   :  { %8744 = vmatprep.subr.bf16.mxu1 %v9880_v51 }
 0x415   :  { %v7596_v59 = vpop.f32.mrf.mxu0  ;;  %2550 = vmatmul.mubr.bf16.vlgmr.msra.gmra.mxu0 %v814_v60 }
 0x416   :  { %v2099_v63 = vpop.f32.mrf.mxu1  ;;  %8741 = vmatmul.mubr.bf16.vlgmr.msra.gmra.mxu1 %v915_v14  ;;  %7798 = vmatpush3.bf16.msra.mxu0 %v11080_v25 }
 0x417   :  { %2631 = vmatprep.mubr.bf16.mxu0 %v962_v37  ;;  %8745 = vmatpush3.bf16.msra.mxu1 %v11084_v26  ;;  %v7597_v43 = vpop.f32.mrf.mxu0 }
 0x418   :  { %v7598_v24 = vadd.f32 %v7597_v43, %v7596_v59  ;;  %v8622_v11 = vpop.f32.mrf.mxu1  ;;  %7799 = vmatprep.subr.bf16.mxu0 %v11086_v27  ;;  %8746 = vmatprep.subr.bf16.mxu1 %v9880_v51 }
 0x419   :  { %v7599_v13 = vpop.f32.mrf.mxu0  ;;  %8760 = vmatprep.mubr.msk.bf16.mxu1 %vm9881_vm1, %v9880_v51 }
 0x41a   :  { %v2060_v60 = vadd.f32 %v7598_v24, %v11419_v12  ;;  %v2102_v23 = vpop.f32.mrf.mxu1  ;;  %7800 = vmatpush3.bf16.msra.mxu0 %v11095_v31 }
 0x41b   :  { %8747 = vmatpush3.bf16.msra.mxu1 %v11099_v47  ;;  %v7600_v50 = vpop.f32.mrf.mxu0  ;;  %7801 = vmatprep.subr.bf16.mxu0 %v11101_v49 }
 0x41c   :  { %v11429_v48 = vadd.f32 %v2099_v63, %v2060_v60  ;;  %v8623_v56 = vpop.f32.mrf.mxu1  ;;  %8748 = vmatprep.subr.bf16.mxu1 %v9880_v51  ;;  %v1111_v50 = vadd.f32 %v11064_v39, %v10888_v54 }
 0x41d   :  { %v1158_v56 = vadd.f32 %v11064_v39, %v10954_v5 }
 0x41e   :  { %7802 = vmatpush3.bf16.msra.mxu0 %v11107_v55  ;;  %v1116_v57 = vmax.f32 %v1111_v50, 0.0  ;;  %v11562_v50 = vld [vmem:[#allocation5 + $0x30] sm:$0xff]  }
 0x41f   :  { %8749 = vmatpush3.bf16.msra.mxu1 %v11111_v58  ;;  %7803 = vmatprep.subr.bf16.mxu0 %v11113_v61  ;;  %v1163_v35 = vmax.f32 %v1158_v56, 0.0  ;;  %v11565_v56 = vld [vmem:[#allocation5 + $0xb0] sm:$0xff]  }
 0x420   :  { %8750 = vmatprep.subr.bf16.mxu1 %v9880_v51  ;;  %v1117_v54 = vpack.c.bf16 %v1116_v57, %v1116_v57 }
 0x421   :  { %v1164_v5 = vpack.c.bf16 %v1163_v35, %v1163_v35  ;;  %v11568_v35 = vld [vmem:[#allocation5 + $0x68] sm:$0xff]  }
 0x422   :  { %7804 = vmatpush3.bf16.msra.mxu0 %v11117_v1 }
 0x423   :  { %8751 = vmatpush3.bf16.msra.mxu1 %v11121_v2  ;;  %7805 = vmatprep.subr.bf16.mxu0 %v11123_v3 }
 0x424   :  { %8752 = vmatprep.subr.bf16.mxu1 %v9880_v51 }
 0x426   :  { %7806 = vmatpush3.bf16.msra.mxu0 %v11127_v4 }
 0x427   :  { %8753 = vmatpush3.bf16.msra.mxu1 %v11131_v8  ;;  %7807 = vmatprep.subr.bf16.mxu0 %v11133_v10 }
 0x428   :  { %8754 = vmatprep.subr.bf16.mxu1 %v9880_v51 }
 0x42a   :  { %7808 = vmatpush3.bf16.msra.mxu0 %v11137_v9 }
 0x42b   :  { %8755 = vmatpush3.bf16.msra.mxu1 %v11141_v15  ;;  %7809 = vmatprep.subr.bf16.mxu0 %v11143_v16 }
 0x42c   :  { %8756 = vmatprep.subr.bf16.mxu1 %v9880_v51 }
 0x42e   :  { %7810 = vmatpush3.bf16.msra.mxu0 %v11147_v17 }
 0x42f   :  { %8757 = vmatpush3.bf16.msra.mxu1 %v11151_v18  ;;  %7811 = vmatprep.subr.bf16.mxu0 %v11153_v34 }
 0x430   :  { %8758 = vmatprep.subr.bf16.mxu1 %v9880_v51 }
 0x432   :  { %7812 = vmatpush3.bf16.msra.mxu0 %v11161_v40 }
 0x433   :  { %8759 = vmatpush3.bf16.msra.mxu1 %v11165_v41  ;;  %7828 = vmatprep.subr.bf16.mxu0 %v11076_v21 }
 0x434   :  { %8764 = vmatprep.subr.bf16.mxu1 %v9880_v51 }
 0x435   :  { %v7627_v46 = vpop.f32.mrf.mxu0  ;;  %2632 = vmatmul.mubr.bf16.vlgmr.msra.gmra.mxu0 %v915_v14 }
 0x436   :  { %v2181_v37 = vpop.f32.mrf.mxu1  ;;  %8761 = vmatmul.mubr.bf16.vlgmr.msra.gmra.mxu1 %v1016_v38  ;;  %7829 = vmatpush3.bf16.msra.mxu0 %v11080_v25 }
 0x437   :  { %2713 = vmatprep.mubr.bf16.mxu0 %v1063_v53  ;;  %8765 = vmatpush3.bf16.msra.mxu1 %v11084_v26  ;;  %v7628_v59 = vpop.f32.mrf.mxu0 }
 0x438   :  { %v7629_v63 = vadd.f32 %v7628_v59, %v7627_v46  ;;  %v8642_v43 = vpop.f32.mrf.mxu1  ;;  %7830 = vmatprep.subr.bf16.mxu0 %v11086_v27  ;;  %8766 = vmatprep.subr.bf16.mxu1 %v9880_v51 }
 0x439   :  { %v7630_v24 = vpop.f32.mrf.mxu0  ;;  %8780 = vmatprep.mubr.msk.bf16.mxu1 %vm9881_vm1, %v9880_v51 }
 0x43a   :  { %v2142_v14 = vadd.f32 %v7629_v63, %v11419_v12  ;;  %v2184_v11 = vpop.f32.mrf.mxu1  ;;  %7831 = vmatpush3.bf16.msra.mxu0 %v11095_v31 }
 0x43b   :  { %8767 = vmatpush3.bf16.msra.mxu1 %v11099_v47  ;;  %v7631_v13 = vpop.f32.mrf.mxu0  ;;  %7832 = vmatprep.subr.bf16.mxu0 %v11101_v49 }
 0x43c   :  { %v11470_v60 = vadd.f32 %v2181_v37, %v2142_v14  ;;  %v8643_v23 = vpop.f32.mrf.mxu1  ;;  %8768 = vmatprep.subr.bf16.mxu1 %v9880_v51  ;;  %v11555_v14 = vld [vmem:[#allocation5 + $0x70] sm:$0xff]  }
 0x43e   :  { %7833 = vmatpush3.bf16.msra.mxu0 %v11107_v55 }
 0x43f   :  { %8769 = vmatpush3.bf16.msra.mxu1 %v11111_v58  ;;  %7834 = vmatprep.subr.bf16.mxu0 %v11113_v61 }
 0x440   :  { %8770 = vmatprep.subr.bf16.mxu1 %v9880_v51 }
 0x442   :  { %7835 = vmatpush3.bf16.msra.mxu0 %v11117_v1 }
 0x443   :  { %8771 = vmatpush3.bf16.msra.mxu1 %v11121_v2  ;;  %7836 = vmatprep.subr.bf16.mxu0 %v11123_v3 }
 0x444   :  { %8772 = vmatprep.subr.bf16.mxu1 %v9880_v51 }
 0x446   :  { %7837 = vmatpush3.bf16.msra.mxu0 %v11127_v4 }
 0x447   :  { %8773 = vmatpush3.bf16.msra.mxu1 %v11131_v8  ;;  %7838 = vmatprep.subr.bf16.mxu0 %v11133_v10 }
 0x448   :  { %8774 = vmatprep.subr.bf16.mxu1 %v9880_v51 }
 0x44a   :  { %7839 = vmatpush3.bf16.msra.mxu0 %v11137_v9 }
 0x44b   :  { %8775 = vmatpush3.bf16.msra.mxu1 %v11141_v15  ;;  %7840 = vmatprep.subr.bf16.mxu0 %v11143_v16 }
 0x44c   :  { %8776 = vmatprep.subr.bf16.mxu1 %v9880_v51 }
 0x44e   :  { %7841 = vmatpush3.bf16.msra.mxu0 %v11147_v17 }
 0x44f   :  { %8777 = vmatpush3.bf16.msra.mxu1 %v11151_v18  ;;  %7842 = vmatprep.subr.bf16.mxu0 %v11153_v34 }
 0x450   :  { %8778 = vmatprep.subr.bf16.mxu1 %v9880_v51 }
 0x452   :  { %7843 = vmatpush3.bf16.msra.mxu0 %v11161_v40 }
 0x453   :  { %8779 = vmatpush3.bf16.msra.mxu1 %v11165_v41  ;;  %7859 = vmatprep.subr.bf16.mxu0 %v11076_v21 }
 0x454   :  { %8784 = vmatprep.subr.bf16.mxu1 %v9880_v51 }
 0x455   :  { %v7658_v39 = vpop.f32.mrf.mxu0  ;;  %2714 = vmatmul.mubr.bf16.vlgmr.msra.gmra.mxu0 %v1016_v38 }
 0x456   :  { %v2263_v36 = vpop.f32.mrf.mxu1  ;;  %8781 = vmatmul.mubr.bf16.vlgmr.msra.gmra.mxu1 %v1117_v54  ;;  %7860 = vmatpush3.bf16.msra.mxu0 %v11080_v25 }
 0x457   :  { %2795 = vmatprep.mubr.bf16.mxu0 %v1164_v5  ;;  %8785 = vmatpush3.bf16.msra.mxu1 %v11084_v26  ;;  %v7659_v42 = vpop.f32.mrf.mxu0 }
 0x458   :  { %v7660_v53 = vadd.f32 %v7659_v42, %v7658_v39  ;;  %v8662_v46 = vpop.f32.mrf.mxu1  ;;  %7861 = vmatprep.subr.bf16.mxu0 %v11086_v27  ;;  %8786 = vmatprep.subr.bf16.mxu1 %v9880_v51  ;;  %v11529_v27 = vld [vmem:[#allocation7] ss:$0 sm:$0xff]  ;;  %v11574_v39 = vld [vmem:[#allocation5 + $0x28] sm:$0xff]  }
 0x459   :  { %v7661_v21 = vpop.f32.mrf.mxu0  ;;  %8800 = vmatprep.mubr.msk.bf16.mxu1 %vm9881_vm1, %v9880_v51  ;;  %v11580_v42 = vld [vmem:[#allocation5 + $0x60] sm:$0xff]  }
 0x45a   :  { %v2224_v38 = vadd.f32 %v7660_v53, %v11419_v12  ;;  %v2266_v37 = vpop.f32.mrf.mxu1  ;;  %7862 = vmatpush3.bf16.msra.mxu0 %v11095_v31  ;;  %v1212_v31 = vadd.f32 %v11529_v27, %v10957_v6  ;;  %v11542_v6 = vld [vmem:[#allocation5 + $0x78] sm:$0xff]   ;;  %v11584_v53 = vld [vmem:[#allocation5 + $0x20] sm:$0xff]  }
 0x45b   :  { %8787 = vmatpush3.bf16.msra.mxu1 %v11099_v47  ;;  %v7662_v25 = vpop.f32.mrf.mxu0  ;;  %7863 = vmatprep.subr.bf16.mxu0 %v11101_v49  ;;  %v1259_v47 = vadd.f32 %v11529_v27, %v11016_v19  ;;  %v11587_v46 = vld [vmem:[#allocation5 + $0xa0] sm:$0xff]   ;;  %v11590_v21 = vld [vmem:[#allocation5 + $0x58] sm:$0xff]  }
 0x45c   :  { %v11511_v26 = vadd.f32 %v2263_v36, %v2224_v38  ;;  %v8663_v59 = vpop.f32.mrf.mxu1  ;;  %8788 = vmatprep.subr.bf16.mxu1 %v9880_v51  ;;  %v1217_v49 = vmax.f32 %v1212_v31, 0.0  ;;  %v11577_v36 = vld [vmem:[#allocation5 + $0xa8] sm:$0xff]   ;;  %v1313_v38 = vadd.f32 %v11529_v27, %v11019_v33  ;;  %v11639_v31 = vld [vmem:[#allocation5 + $0x18] sm:$0xff]  }
 0x45e   :  { %7864 = vmatpush3.bf16.msra.mxu0 %v11107_v55  ;;  %v1264_v55 = vmax.f32 %v1259_v47, 0.0  ;;  %v11642_v47 = vld [vmem:[#allocation5 + $0x98] sm:$0xff]  }
 0x45f   :  { %8789 = vmatpush3.bf16.msra.mxu1 %v11111_v58  ;;  %7865 = vmatprep.subr.bf16.mxu0 %v11113_v61  ;;  %v11545_v58 = vpack.c.bf16 %v1217_v49, %v1217_v49  ;;  %v11645_v49 = vld [vmem:[#allocation5 + $0x50] sm:$0xff]  }
 0x460   :  { %8790 = vmatprep.subr.bf16.mxu1 %v9880_v51  ;;  %v1265_v19 = vpack.c.bf16 %v1264_v55, %v1264_v55  ;;  %v11649_v55 = vld [vmem:[#allocation5 + $0x10] sm:$0xff]  }
 0x462   :  { %7866 = vmatpush3.bf16.msra.mxu0 %v11117_v1 }
 0x463   :  { %8791 = vmatpush3.bf16.msra.mxu1 %v11121_v2  ;;  %7867 = vmatprep.subr.bf16.mxu0 %v11123_v3  ;;  %v11549_v2 = vld [vmem:[#allocation5 + $0x38] sm:$0xff]  }
 0x464   :  { %8792 = vmatprep.subr.bf16.mxu1 %v9880_v51  ;;  %v11552_v3 = vld [vmem:[#allocation5 + $0xb8] sm:$0xff]  }
 0x466   :  { %7868 = vmatpush3.bf16.msra.mxu0 %v11127_v4 }
 0x467   :  { %8793 = vmatpush3.bf16.msra.mxu1 %v11131_v8  ;;  %7869 = vmatprep.subr.bf16.mxu0 %v11133_v10 }
 0x468   :  { %8794 = vmatprep.subr.bf16.mxu1 %v9880_v51 }
 0x46a   :  { %7870 = vmatpush3.bf16.msra.mxu0 %v11137_v9 }
 0x46b   :  { %8795 = vmatpush3.bf16.msra.mxu1 %v11141_v15  ;;  %7871 = vmatprep.subr.bf16.mxu0 %v11143_v16 }
 0x46c   :  { %8796 = vmatprep.subr.bf16.mxu1 %v9880_v51 }
 0x46e   :  { %7872 = vmatpush3.bf16.msra.mxu0 %v11147_v17 }
 0x46f   :  { %8797 = vmatpush3.bf16.msra.mxu1 %v11151_v18  ;;  %7873 = vmatprep.subr.bf16.mxu0 %v11153_v34 }
 0x470   :  { %8798 = vmatprep.subr.bf16.mxu1 %v9880_v51 }
 0x472   :  { %7874 = vmatpush3.bf16.msra.mxu0 %v11161_v40 }
 0x473   :  { %8799 = vmatpush3.bf16.msra.mxu1 %v11165_v41  ;;  %7890 = vmatprep.subr.bf16.mxu0 %v11542_v6 }
 0x474   :  { %8804 = vmatprep.subr.bf16.mxu1 %v9880_v51 }
 0x475   :  { %v7689_v61 = vpop.f32.mrf.mxu0  ;;  %2796 = vmatmul.mubr.bf16.vlgmr.msra.gmra.mxu0 %v1117_v54 }
 0x476   :  { %v2345_v1 = vpop.f32.mrf.mxu1  ;;  %8801 = vmatmul.mubr.bf16.vlgmr.msra.gmra.mxu1 %v11545_v58  ;;  %7891 = vmatpush3.bf16.msra.mxu0 %v11549_v2 }
 0x477   :  { %2877 = vmatprep.mubr.bf16.mxu0 %v1265_v19  ;;  %8805 = vmatpush3.bf16.msra.mxu1 %v11552_v3  ;;  %v7690_v63 = vpop.f32.mrf.mxu0  ;;  %v11655_v19 = vld [vmem:[#allocation5 + $0x48] sm:$0xff]  }
 0x478   :  { %v7691_v43 = vadd.f32 %v7690_v63, %v7689_v61  ;;  %v8682_v24 = vpop.f32.mrf.mxu1  ;;  %7892 = vmatprep.subr.bf16.mxu0 %v11555_v14  ;;  %8806 = vmatprep.subr.bf16.mxu1 %v9880_v51  ;;  %v1414_v61 = vadd.f32 %v11529_v27, %v11091_v30  ;;  %v11663_v63 = vld [vmem:[#allocation5 + $0x8] sm:$0xff]  }
 0x479   :  { %v7692_v11 = vpop.f32.mrf.mxu0  ;;  %8820 = vmatprep.mubr.msk.bf16.mxu1 %vm9881_vm1, %v9880_v51  ;;  %v11669_v24 = vld [vmem:[#allocation5 + $0x40] sm:$0xff]  }
 0x47a   :  { %v2306_v13 = vadd.f32 %v7691_v43, %v11419_v12  ;;  %v2348_v23 = vpop.f32.mrf.mxu1  ;;  %7893 = vmatpush3.bf16.msra.mxu0 %v11562_v50  ;;  %v11666_v43 = vld [vmem:[#allocation5 + $0x88] sm:$0xff]   ;;  %v1419_v11 = vmax.f32 %v1414_v61, 0.0 }
 0x47b   :  { %8807 = vmatpush3.bf16.msra.mxu1 %v11565_v56  ;;  %v7693_v57 = vpop.f32.mrf.mxu0  ;;  %7894 = vmatprep.subr.bf16.mxu0 %v11568_v35 }
 0x47c   :  { %v11571_v54 = vadd.f32 %v2345_v1, %v2306_v13  ;;  %v8683_v5 = vpop.f32.mrf.mxu1  ;;  %8808 = vmatprep.subr.bf16.mxu1 %v9880_v51  ;;  %v1461_v1 = vadd.f32 %v11529_v27, %v11191_v20  ;;  %v11673_v13 = vld [vmem:[#allocation5] sm:$0xff]   ;;  %v1420_v23 = vpack.c.bf16 %v1419_v11, %v1419_v11 }
 0x47d   :  { %v11676_v20 = vld [vmem:[#allocation5 + $0x80] sm:$0xff]  }
 0x47e   :  { %7895 = vmatpush3.bf16.msra.mxu0 %v11574_v39  ;;  %v1466_v30 = vmax.f32 %v1461_v1, 0.0 }
 0x47f   :  { %8809 = vmatpush3.bf16.msra.mxu1 %v11577_v36  ;;  %7896 = vmatprep.subr.bf16.mxu0 %v11580_v42 }
 0x480   :  { %8810 = vmatprep.subr.bf16.mxu1 %v9880_v51  ;;  %v1467_v57 = vpack.c.bf16 %v1466_v30, %v1466_v30 }
 0x482   :  { %7897 = vmatpush3.bf16.msra.mxu0 %v11584_v53 }
 0x483   :  { %8811 = vmatpush3.bf16.msra.mxu1 %v11587_v46  ;;  %7898 = vmatprep.subr.bf16.mxu0 %v11590_v21 }
 0x484   :  { %8812 = vmatprep.subr.bf16.mxu1 %v9880_v51 }
 0x486   :  { %7899 = vmatpush3.bf16.msra.mxu0 %v11127_v4  ;;  %v1360_v4 = vadd.f32 %v11529_v27, %v11088_v29 }
 0x487   :  { %8813 = vmatpush3.bf16.msra.mxu1 %v11131_v8  ;;  %7900 = vmatprep.subr.bf16.mxu0 %v11133_v10  ;;  %v1318_v8 = vmax.f32 %v1313_v38, 0.0 }
 0x488   :  { %8814 = vmatprep.subr.bf16.mxu1 %v9880_v51  ;;  %v1365_v10 = vmax.f32 %v1360_v4, 0.0 }
 0x489   :  { %v11613_v33 = vpack.c.bf16 %v1318_v8, %v1318_v8 }
 0x48a   :  { %7901 = vmatpush3.bf16.msra.mxu0 %v11137_v9  ;;  %v1366_v29 = vpack.c.bf16 %v1365_v10, %v1365_v10 }
 0x48b   :  { %8815 = vmatpush3.bf16.msra.mxu1 %v11141_v15  ;;  %7902 = vmatprep.subr.bf16.mxu0 %v11143_v16 }
 0x48c   :  { %8816 = vmatprep.subr.bf16.mxu1 %v9880_v51 }
 0x48e   :  { %7903 = vmatpush3.bf16.msra.mxu0 %v11147_v17 }
 0x48f   :  { %8817 = vmatpush3.bf16.msra.mxu1 %v11151_v18  ;;  %7904 = vmatprep.subr.bf16.mxu0 %v11153_v34 }
 0x490   :  { %8818 = vmatprep.subr.bf16.mxu1 %v9880_v51 }
 0x492   :  { %7905 = vmatpush3.bf16.msra.mxu0 %v11161_v40 }
 0x493   :  { %8819 = vmatpush3.bf16.msra.mxu1 %v11165_v41  ;;  %7921 = vmatprep.subr.bf16.mxu0 %v11542_v6 }
 0x494   :  { %8824 = vmatprep.subr.bf16.mxu1 %v9880_v51 }
 0x495   :  { %v7720_v9 = vpop.f32.mrf.mxu0  ;;  %2878 = vmatmul.mubr.bf16.vlgmr.msra.gmra.mxu0 %v11545_v58  ;;  %v11652_v58 = vld [vmem:[#allocation5 + $0x90] sm:$0xff]  }
 0x496   :  { %v2427_v15 = vpop.f32.mrf.mxu1  ;;  %8821 = vmatmul.mubr.bf16.vlgmr.msra.gmra.mxu1 %v11613_v33  ;;  %7922 = vmatpush3.bf16.msra.mxu0 %v11549_v2 }
 0x497   :  { %2959 = vmatprep.mubr.bf16.mxu0 %v1366_v29  ;;  %8825 = vmatpush3.bf16.msra.mxu1 %v11552_v3  ;;  %v7721_v16 = vpop.f32.mrf.mxu0 }
 0x498   :  { %v7722_v17 = vadd.f32 %v7721_v16, %v7720_v9  ;;  %v8702_v18 = vpop.f32.mrf.mxu1  ;;  %7923 = vmatprep.subr.bf16.mxu0 %v11555_v14  ;;  %8826 = vmatprep.subr.bf16.mxu1 %v9880_v51 }
 0x499   :  { %v7723_v34 = vpop.f32.mrf.mxu0  ;;  %8840 = vmatprep.mubr.msk.bf16.mxu1 %vm9881_vm1, %v9880_v51  ;;  %v1515_v18 = vadd.f32 %v11529_v27, %v11193_v22 }
 0x49a   :  { %v2388_v40 = vadd.f32 %v7722_v17, %v11419_v12  ;;  %v2430_v41 = vpop.f32.mrf.mxu1  ;;  %7924 = vmatpush3.bf16.msra.mxu0 %v11562_v50  ;;  %v1562_v34 = vadd.f32 %v11529_v27, %v11253_v32 }
 0x49b   :  { %8827 = vmatpush3.bf16.msra.mxu1 %v11565_v56  ;;  %v7724_v37 = vpop.f32.mrf.mxu0  ;;  %7925 = vmatprep.subr.bf16.mxu0 %v11568_v35 }
 0x49c   :  { %v11628_v25 = vadd.f32 %v2427_v15, %v2388_v40  ;;  %v8703_v59 = vpop.f32.mrf.mxu1  ;;  %8828 = vmatprep.subr.bf16.mxu1 %v9880_v51  ;;  %v1520_v40 = vmax.f32 %v1515_v18, 0.0  ;;  %v1567_v41 = vmax.f32 %v1562_v34, 0.0 }
 0x49e   :  { %7926 = vmatpush3.bf16.msra.mxu0 %v11574_v39  ;;  %v1521_v22 = vpack.c.bf16 %v1520_v40, %v1520_v40  ;;  %v1568_v32 = vpack.c.bf16 %v1567_v41, %v1567_v41 }
 0x49f   :  { %8829 = vmatpush3.bf16.msra.mxu1 %v11577_v36  ;;  %7927 = vmatprep.subr.bf16.mxu0 %v11580_v42 }
 0x4a0   :  { %8830 = vmatprep.subr.bf16.mxu1 %v9880_v51 }
 0x4a2   :  { %7928 = vmatpush3.bf16.msra.mxu0 %v11584_v53 }
 0x4a3   :  { %8831 = vmatpush3.bf16.msra.mxu1 %v11587_v46  ;;  %7929 = vmatprep.subr.bf16.mxu0 %v11590_v21 }
 0x4a4   :  { %8832 = vmatprep.subr.bf16.mxu1 %v9880_v51 }
 0x4a6   :  { %7930 = vmatpush3.bf16.msra.mxu0 %v11639_v31 }
 0x4a7   :  { %8833 = vmatpush3.bf16.msra.mxu1 %v11642_v47  ;;  %7931 = vmatprep.subr.bf16.mxu0 %v11645_v49 }
 0x4a8   :  { %8834 = vmatprep.subr.bf16.mxu1 %v9880_v51 }
 0x4aa   :  { %7932 = vmatpush3.bf16.msra.mxu0 %v11649_v55 }
 0x4ab   :  { %8835 = vmatpush3.bf16.msra.mxu1 %v11652_v58  ;;  %7933 = vmatprep.subr.bf16.mxu0 %v11655_v19 }
 0x4ac   :  { %8836 = vmatprep.subr.bf16.mxu1 %v9880_v51 }
 0x4ae   :  { %7934 = vmatpush3.bf16.msra.mxu0 %v11663_v63 }
 0x4af   :  { %8837 = vmatpush3.bf16.msra.mxu1 %v11666_v43  ;;  %7935 = vmatprep.subr.bf16.mxu0 %v11669_v24 }
 0x4b0   :  { %8838 = vmatprep.subr.bf16.mxu1 %v9880_v51 }
 0x4b2   :  { %7936 = vmatpush3.bf16.msra.mxu0 %v11673_v13 }
 0x4b3   :  { %8839 = vmatpush3.bf16.msra.mxu1 %v11676_v20  ;;  %7952 = vmatprep.subr.bf16.mxu0 %v11542_v6 }
 0x4b4   :  { %8844 = vmatprep.subr.bf16.mxu1 %v9880_v51 }
 0x4b5   :  { %v7751_v5 = vpop.f32.mrf.mxu0  ;;  %2960 = vmatmul.mubr.bf16.vlgmr.msra.gmra.mxu0 %v11613_v33 }
 0x4b6   :  { %v2509_v38 = vpop.f32.mrf.mxu1  ;;  %8841 = vmatmul.mubr.bf16.vlgmr.msra.gmra.mxu1 %v1420_v23  ;;  %7953 = vmatpush3.bf16.msra.mxu0 %v11549_v2 }
 0x4b7   :  { %3041 = vmatprep.mubr.bf16.mxu0 %v1467_v57  ;;  %8845 = vmatpush3.bf16.msra.mxu1 %v11552_v3  ;;  %v7752_v4 = vpop.f32.mrf.mxu0 }
 0x4b8   :  { %v7753_v8 = vadd.f32 %v7752_v4, %v7751_v5  ;;  %v8722_v10 = vpop.f32.mrf.mxu1  ;;  %7954 = vmatprep.subr.bf16.mxu0 %v11555_v14  ;;  %8846 = vmatprep.subr.bf16.mxu1 %v9880_v51 }
 0x4b9   :  { %v7754_v29 = vpop.f32.mrf.mxu0  ;;  %8860 = vmatprep.mubr.msk.bf16.mxu1 %vm9881_vm1, %v9880_v51  ;;  %v1663_v10 = vadd.f32 %v11529_v27, %v11313_v52 }
 0x4ba   :  { %v2470_v33 = vadd.f32 %v7753_v8, %v11419_v12  ;;  %v2512_v9 = vpop.f32.mrf.mxu1  ;;  %7955 = vmatpush3.bf16.msra.mxu0 %v11562_v50  ;;  %v1616_v8 = vadd.f32 %v11529_v27, %v11255_v44 }
 0x4bb   :  { %8847 = vmatpush3.bf16.msra.mxu1 %v11565_v56  ;;  %v7755_v15 = vpop.f32.mrf.mxu0  ;;  %7956 = vmatprep.subr.bf16.mxu0 %v11568_v35 }
 0x4bc   :  { %v11692_v16 = vadd.f32 %v2509_v38, %v2470_v33  ;;  %v8723_v17 = vpop.f32.mrf.mxu1  ;;  %8848 = vmatprep.subr.bf16.mxu1 %v9880_v51  ;;  %v1621_v29 = vmax.f32 %v1616_v8, 0.0  ;;  %v1668_v33 = vmax.f32 %v1663_v10, 0.0 }
 0x4be   :  { %7957 = vmatpush3.bf16.msra.mxu0 %v11574_v39  ;;  %v1622_v44 = vpack.c.bf16 %v1621_v29, %v1621_v29  ;;  %v1669_v52 = vpack.c.bf16 %v1668_v33, %v1668_v33 }
 0x4bf   :  { %8849 = vmatpush3.bf16.msra.mxu1 %v11577_v36  ;;  %7958 = vmatprep.subr.bf16.mxu0 %v11580_v42 }
 0x4c0   :  { %8850 = vmatprep.subr.bf16.mxu1 %v9880_v51 }
 0x4c2   :  { %7959 = vmatpush3.bf16.msra.mxu0 %v11584_v53 }
 0x4c3   :  { %8851 = vmatpush3.bf16.msra.mxu1 %v11587_v46  ;;  %7960 = vmatprep.subr.bf16.mxu0 %v11590_v21 }
 0x4c4   :  { %8852 = vmatprep.subr.bf16.mxu1 %v9880_v51 }
 0x4c6   :  { %7961 = vmatpush3.bf16.msra.mxu0 %v11639_v31 }
 0x4c7   :  { %8853 = vmatpush3.bf16.msra.mxu1 %v11642_v47  ;;  %7962 = vmatprep.subr.bf16.mxu0 %v11645_v49 }
 0x4c8   :  { %8854 = vmatprep.subr.bf16.mxu1 %v9880_v51 }
 0x4ca   :  { %7963 = vmatpush3.bf16.msra.mxu0 %v11649_v55 }
 0x4cb   :  { %8855 = vmatpush3.bf16.msra.mxu1 %v11652_v58  ;;  %7964 = vmatprep.subr.bf16.mxu0 %v11655_v19 }
 0x4cc   :  { %8856 = vmatprep.subr.bf16.mxu1 %v9880_v51 }
 0x4ce   :  { %7965 = vmatpush3.bf16.msra.mxu0 %v11663_v63 }
 0x4cf   :  { %8857 = vmatpush3.bf16.msra.mxu1 %v11666_v43  ;;  %7966 = vmatprep.subr.bf16.mxu0 %v11669_v24 }
 0x4d0   :  { %8858 = vmatprep.subr.bf16.mxu1 %v9880_v51 }
 0x4d2   :  { %7967 = vmatpush3.bf16.msra.mxu0 %v11673_v13 }
 0x4d3   :  { %8859 = vmatpush3.bf16.msra.mxu1 %v11676_v20  ;;  %7983 = vmatprep.subr.bf16.mxu0 %v11542_v6 }
 0x4d4   :  { %8864 = vmatprep.subr.bf16.mxu1 %v9880_v51 }
 0x4d5   :  { %v7782_v37 = vpop.f32.mrf.mxu0  ;;  %3042 = vmatmul.mubr.bf16.vlgmr.msra.gmra.mxu0 %v1420_v23 }
 0x4d6   :  { %v2591_v59 = vpop.f32.mrf.mxu1  ;;  %8861 = vmatmul.mubr.bf16.vlgmr.msra.gmra.mxu1 %v1521_v22  ;;  %7984 = vmatpush3.bf16.msra.mxu0 %v11549_v2 }
 0x4d7   :  { %3123 = vmatprep.mubr.bf16.mxu0 %v1568_v32  ;;  %8865 = vmatpush3.bf16.msra.mxu1 %v11552_v3  ;;  %v7783_v61 = vpop.f32.mrf.mxu0 }
 0x4d8   :  { %v7784_v1 = vadd.f32 %v7783_v61, %v7782_v37  ;;  %v8742_v11 = vpop.f32.mrf.mxu1  ;;  %7985 = vmatprep.subr.bf16.mxu0 %v11555_v14  ;;  %8866 = vmatprep.subr.bf16.mxu1 %v9880_v51  ;;  %v1717_v61 = vadd.f32 %v11529_v27, %v11315_v62 }
 0x4d9   :  { %v7785_v30 = vpop.f32.mrf.mxu0  ;;  %8880 = vmatprep.mubr.msk.bf16.mxu1 %vm9881_vm1, %v9880_v51 }
 0x4da   :  { %v2552_v23 = vadd.f32 %v7784_v1, %v11419_v12  ;;  %v2594_v57 = vpop.f32.mrf.mxu1  ;;  %7986 = vmatpush3.bf16.msra.mxu0 %v11562_v50  ;;  %v1764_v1 = vadd.f32 %v11529_v27, %v11375_v45  ;;  %v1722_v11 = vmax.f32 %v1717_v61, 0.0  ;;  %v11915_v61 = vld [vmem:[#allocation5 + $0x100] sm:$0xff]  }
 0x4db   :  { %8867 = vmatpush3.bf16.msra.mxu1 %v11565_v56  ;;  %v7786_v5 = vpop.f32.mrf.mxu0  ;;  %7987 = vmatprep.subr.bf16.mxu0 %v11568_v35 }
 0x4dc   :  { %v11733_v38 = vadd.f32 %v2591_v59, %v2552_v23  ;;  %v8743_v4 = vpop.f32.mrf.mxu1  ;;  %8868 = vmatprep.subr.bf16.mxu1 %v9880_v51  ;;  %v1769_v30 = vmax.f32 %v1764_v1, 0.0  ;;  %v1723_v62 = vpack.c.bf16 %v1722_v11, %v1722_v11  ;;  %v11919_v1 = vld [vmem:[#allocation5 + $0xc0] sm:$0xff]  }
 0x4dd   :  { %v11923_v11 = vld [vmem:[#allocation5 + $0x140] sm:$0xff]  }
 0x4de   :  { %7988 = vmatpush3.bf16.msra.mxu0 %v11574_v39  ;;  %v1770_v45 = vpack.c.bf16 %v1769_v30, %v1769_v30  ;;  %v2187_v30 = vmax.f32 %v11470_v60, 0.0 }
 0x4df   :  { %8869 = vmatpush3.bf16.msra.mxu1 %v11577_v36  ;;  %7989 = vmatprep.subr.bf16.mxu0 %v11580_v42 }
 0x4e0   :  { %8870 = vmatprep.subr.bf16.mxu1 %v9880_v51 }
 0x4e2   :  { %7990 = vmatpush3.bf16.msra.mxu0 %v11584_v53 }
 0x4e3   :  { %8871 = vmatpush3.bf16.msra.mxu1 %v11587_v46  ;;  %7991 = vmatprep.subr.bf16.mxu0 %v11590_v21 }
 0x4e4   :  { %8872 = vmatprep.subr.bf16.mxu1 %v9880_v51 }
 0x4e6   :  { %7992 = vmatpush3.bf16.msra.mxu0 %v11639_v31 }
 0x4e7   :  { %8873 = vmatpush3.bf16.msra.mxu1 %v11642_v47  ;;  %7993 = vmatprep.subr.bf16.mxu0 %v11645_v49 }
 0x4e8   :  { %8874 = vmatprep.subr.bf16.mxu1 %v9880_v51 }
 0x4ea   :  { %7994 = vmatpush3.bf16.msra.mxu0 %v11649_v55 }
 0x4eb   :  { %8875 = vmatpush3.bf16.msra.mxu1 %v11652_v58  ;;  %7995 = vmatprep.subr.bf16.mxu0 %v11655_v19 }
 0x4ec   :  { %8876 = vmatprep.subr.bf16.mxu1 %v9880_v51 }
 0x4ee   :  { %7996 = vmatpush3.bf16.msra.mxu0 %v11663_v63 }
 0x4ef   :  { %8877 = vmatpush3.bf16.msra.mxu1 %v11666_v43  ;;  %7997 = vmatprep.subr.bf16.mxu0 %v11669_v24 }
 0x4f0   :  { %8878 = vmatprep.subr.bf16.mxu1 %v9880_v51 }
 0x4f2   :  { %7998 = vmatpush3.bf16.msra.mxu0 %v11673_v13 }
 0x4f3   :  { %8879 = vmatpush3.bf16.msra.mxu1 %v11676_v20  ;;  %8014 = vmatprep.subr.bf16.mxu0 %v11542_v6 }
 0x4f4   :  { %8884 = vmatprep.subr.bf16.mxu1 %v9880_v51 }
 0x4f5   :  { %v7813_v9 = vpop.f32.mrf.mxu0  ;;  %3124 = vmatmul.mubr.bf16.vlgmr.msra.gmra.mxu0 %v1521_v22 }
 0x4f6   :  { %v2673_v15 = vpop.f32.mrf.mxu1  ;;  %8881 = vmatmul.mubr.bf16.vlgmr.msra.gmra.mxu1 %v1622_v44  ;;  %8015 = vmatpush3.bf16.msra.mxu0 %v11549_v2 }
 0x4f7   :  { %3205 = vmatprep.mubr.bf16.mxu0 %v1669_v52  ;;  %8885 = vmatpush3.bf16.msra.mxu1 %v11552_v3  ;;  %v7814_v17 = vpop.f32.mrf.mxu0 }
 0x4f8   :  { %v7815_v18 = vadd.f32 %v7814_v17, %v7813_v9  ;;  %v8762_v34 = vpop.f32.mrf.mxu1  ;;  %8016 = vmatprep.subr.bf16.mxu0 %v11555_v14  ;;  %8886 = vmatprep.subr.bf16.mxu1 %v9880_v51  ;;  %v11883_v9 = vld [vmem:[#allocation5 + $0x160] sm:$0xff]   ;;  %v11889_v17 = vld [vmem:[#allocation5 + $0xd8] sm:$0xff]  }
 0x4f9   :  { %v7816_v40 = vpop.f32.mrf.mxu0  ;;  %8900 = vmatprep.mubr.msk.bf16.mxu1 %vm9881_vm1, %v9880_v51  ;;  %v11895_v34 = vld [vmem:[#allocation5 + $0x110] sm:$0xff]  }
 0x4fa   :  { %v2634_v41 = vadd.f32 %v7815_v18, %v11419_v12  ;;  %v2676_v22 = vpop.f32.mrf.mxu1  ;;  %8017 = vmatpush3.bf16.msra.mxu0 %v11562_v50  ;;  %v11893_v18 = vld [vmem:[#allocation5 + $0x158] sm:$0xff]   ;;  %v11899_v40 = vld [vmem:[#allocation5 + $0xd0] sm:$0xff]  }
 0x4fb   :  { %8887 = vmatpush3.bf16.msra.mxu1 %v11565_v56  ;;  %v7817_v32 = vpop.f32.mrf.mxu0  ;;  %8018 = vmatprep.subr.bf16.mxu0 %v11568_v35  ;;  %v11905_v22 = vld [vmem:[#allocation5 + $0x108] sm:$0xff]  }
 0x4fc   :  { %v11774_v37 = vadd.f32 %v2673_v15, %v2634_v41  ;;  %v8763_v59 = vpop.f32.mrf.mxu1  ;;  %8888 = vmatprep.subr.bf16.mxu1 %v9880_v51  ;;  %v11885_v15 = vld [vmem:[#allocation5 + $0x118] sm:$0xff]   ;;  %v11903_v41 = vld [vmem:[#allocation5 + $0x150] sm:$0xff]   ;;  %v11909_v32 = vld [vmem:[#allocation5 + $0xc8] sm:$0xff]  }
 0x4fd   :  { %v11913_v59 = vld [vmem:[#allocation5 + $0x148] sm:$0xff]  }
 0x4fe   :  { %8019 = vmatpush3.bf16.msra.mxu0 %v11574_v39 }
 0x4ff   :  { %8889 = vmatpush3.bf16.msra.mxu1 %v11577_v36  ;;  %8020 = vmatprep.subr.bf16.mxu0 %v11580_v42 }
 0x500   :  { %8890 = vmatprep.subr.bf16.mxu1 %v9880_v51 }
 0x502   :  { %8021 = vmatpush3.bf16.msra.mxu0 %v11584_v53 }
 0x503   :  { %8891 = vmatpush3.bf16.msra.mxu1 %v11587_v46  ;;  %8022 = vmatprep.subr.bf16.mxu0 %v11590_v21 }
 0x504   :  { %8892 = vmatprep.subr.bf16.mxu1 %v9880_v51 }
 0x506   :  { %8023 = vmatpush3.bf16.msra.mxu0 %v11639_v31 }
 0x507   :  { %8893 = vmatpush3.bf16.msra.mxu1 %v11642_v47  ;;  %8024 = vmatprep.subr.bf16.mxu0 %v11645_v49 }
 0x508   :  { %8894 = vmatprep.subr.bf16.mxu1 %v9880_v51 }
 0x50a   :  { %8025 = vmatpush3.bf16.msra.mxu0 %v11649_v55 }
 0x50b   :  { %8895 = vmatpush3.bf16.msra.mxu1 %v11652_v58  ;;  %8026 = vmatprep.subr.bf16.mxu0 %v11655_v19 }
 0x50c   :  { %8896 = vmatprep.subr.bf16.mxu1 %v9880_v51 }
 0x50e   :  { %8027 = vmatpush3.bf16.msra.mxu0 %v11663_v63 }
 0x50f   :  { %8897 = vmatpush3.bf16.msra.mxu1 %v11666_v43  ;;  %8028 = vmatprep.subr.bf16.mxu0 %v11669_v24 }
 0x510   :  { %8898 = vmatprep.subr.bf16.mxu1 %v9880_v51 }
 0x512   :  { %8029 = vmatpush3.bf16.msra.mxu0 %v11673_v13 }
 0x513   :  { %8899 = vmatpush3.bf16.msra.mxu1 %v11676_v20  ;;  %8045 = vmatprep.subr.bf16.mxu0 %v11542_v6 }
 0x514   :  { %8904 = vmatprep.subr.bf16.mxu1 %v9880_v51 }
 0x515   :  { %v7844_v23 = vpop.f32.mrf.mxu0  ;;  %3206 = vmatmul.mubr.bf16.vlgmr.msra.gmra.mxu0 %v1622_v44 }
 0x516   :  { %v2755_v57 = vpop.f32.mrf.mxu1  ;;  %8901 = vmatmul.mubr.bf16.vlgmr.msra.gmra.mxu1 %v1723_v62  ;;  %8046 = vmatpush3.bf16.msra.mxu0 %v11549_v2 }
 0x517   :  { %3287 = vmatprep.mubr.bf16.mxu0 %v1770_v45  ;;  %8905 = vmatpush3.bf16.msra.mxu1 %v11552_v3  ;;  %v7845_v5 = vpop.f32.mrf.mxu0  ;;  %v2188_v45 = vpack.c.bf16 %v2187_v30, %v2187_v30  ;;  %v2597_v30 = vmax.f32 %v11733_v38, 0.0 }
 0x518   :  { %v7846_v4 = vadd.f32 %v7845_v5, %v7844_v23  ;;  %v8782_v8 = vpop.f32.mrf.mxu1  ;;  %8047 = vmatprep.subr.bf16.mxu0 %v11555_v14  ;;  %8906 = vmatprep.subr.bf16.mxu1 %v9880_v51  ;;  %v1818_v14 = vadd.f32 %v11529_v27, %v11377_v28  ;;  %v11848_v28 = vld [vmem:[#allocation5 + $0x178] sm:$0xff]  }
 0x519   :  { %v7847_v6 = vpop.f32.mrf.mxu0  ;;  %8920 = vmatprep.mubr.msk.bf16.mxu1 %vm9881_vm1, %v9880_v51 }
 0x51a   :  { %v2716_v10 = vadd.f32 %v7846_v4, %v11419_v12  ;;  %v2758_v29 = vpop.f32.mrf.mxu1  ;;  %8048 = vmatpush3.bf16.msra.mxu0 %v11562_v50  ;;  %v11839_v50 = vld [vmem:[#allocation5 + $0x138] sm:$0xff]   ;;  %v11939_v6 = vld [vmem:[#allocation7 + $0x1] ss:$0 sm:$0xff] }
 0x51b   :  { %8907 = vmatpush3.bf16.msra.mxu1 %v11565_v56  ;;  %v7848_v2 = vpop.f32.mrf.mxu0  ;;  %8049 = vmatprep.subr.bf16.mxu0 %v11568_v35  ;;  %v1823_v56 = vmax.f32 %v1818_v14, 0.0  ;;  %v2105_v35 = vmax.f32 %v11429_v48, 0.0  ;;  %v11854_v48 = vld [vmem:[#allocation5 + $0xf0] sm:$0xff]  }
 0x51c   :  { %v11815_v3 = vadd.f32 %v2755_v57, %v2716_v10  ;;  %v8783_v33 = vpop.f32.mrf.mxu1  ;;  %8908 = vmatprep.subr.bf16.mxu1 %v9880_v51 }
 0x51d   :  { %v1824_v27 = vpack.c.bf16 %v1823_v56, %v1823_v56  ;;  %v2351_v56 = vmax.f32 %v11571_v54, 0.0 }
 0x51e   :  { %8050 = vmatpush3.bf16.msra.mxu0 %v11574_v39  ;;  %v11844_v39 = vld [vmem:[#allocation5 + $0xf8] sm:$0xff]  }
 0x51f   :  { %8909 = vmatpush3.bf16.msra.mxu1 %v11577_v36  ;;  %8051 = vmatprep.subr.bf16.mxu0 %v11580_v42  ;;  %v11851_v36 = vld [vmem:[#allocation5 + $0x130] sm:$0xff]  }
 0x520   :  { %8910 = vmatprep.subr.bf16.mxu1 %v9880_v51 }
 0x522   :  { %8052 = vmatpush3.bf16.msra.mxu0 %v11584_v53  ;;  %v2106_v53 = vpack.c.bf16 %v2105_v35, %v2105_v35  ;;  %v2433_v35 = vmax.f32 %v11628_v25, 0.0 }
 0x523   :  { %8911 = vmatpush3.bf16.msra.mxu1 %v11587_v46  ;;  %8053 = vmatprep.subr.bf16.mxu0 %v11590_v21 }
 0x524   :  { %8912 = vmatprep.subr.bf16.mxu1 %v9880_v51 }
 0x526   :  { %8054 = vmatpush3.bf16.msra.mxu0 %v11639_v31  ;;  %v11857_v31 = vld [vmem:[#allocation5 + $0x170] sm:$0xff]  }
 0x527   :  { %8913 = vmatpush3.bf16.msra.mxu1 %v11642_v47  ;;  %8055 = vmatprep.subr.bf16.mxu0 %v11645_v49  ;;  %v11859_v47 = vld [vmem:[#allocation5 + $0x128] sm:$0xff]  }
 0x528   :  { %8914 = vmatprep.subr.bf16.mxu1 %v9880_v51 }
 0x52a   :  { %8056 = vmatpush3.bf16.msra.mxu0 %v11649_v55 }
 0x52b   :  { %8915 = vmatpush3.bf16.msra.mxu1 %v11652_v58  ;;  %8057 = vmatprep.subr.bf16.mxu0 %v11655_v19 }
 0x52c   :  { %8916 = vmatprep.subr.bf16.mxu1 %v9880_v51 }
 0x52e   :  { %8058 = vmatpush3.bf16.msra.mxu0 %v11663_v63 }
 0x52f   :  { %8917 = vmatpush3.bf16.msra.mxu1 %v11666_v43  ;;  %8059 = vmatprep.subr.bf16.mxu0 %v11669_v24  ;;  %v11867_v43 = vld [vmem:[#allocation5 + $0xe8] sm:$0xff]  }
 0x530   :  { %8918 = vmatprep.subr.bf16.mxu1 %v9880_v51 }
 0x532   :  { %8060 = vmatpush3.bf16.msra.mxu0 %v11673_v13  ;;  %v11871_v13 = vld [vmem:[#allocation5 + $0x168] sm:$0xff]  }
 0x533   :  { %8919 = vmatpush3.bf16.msra.mxu1 %v11676_v20  ;;  %8076 = vmatprep.subr.bf16.mxu0 %v11839_v50  ;;  %v11873_v20 = vld [vmem:[#allocation5 + $0x120] sm:$0xff]  }
 0x534   :  { %8924 = vmatprep.subr.bf16.mxu1 %v9880_v51 }
 0x535   :  { %v7875_v42 = vpop.f32.mrf.mxu0  ;;  %3288 = vmatmul.mubr.bf16.vlgmr.msra.gmra.mxu0 %v1723_v62  ;;  %v2269_v62 = vmax.f32 %v11511_v26, 0.0 }
 0x536   :  { %v2837_v46 = vpop.f32.mrf.mxu1  ;;  %8921 = vmatmul.mubr.bf16.vlgmr.msra.gmra.mxu1 %v1824_v27  ;;  %8077 = vmatpush3.bf16.msra.mxu0 %v11844_v39  ;;  %v2352_v27 = vpack.c.bf16 %v2351_v56, %v2351_v56 }
 0x537   :  { %3570 = vmatprep.mubr.bf16.mxu0 %v2106_v53  ;;  %8925 = vmatpush3.bf16.msra.mxu1 %v11848_v28  ;;  %v7876_v21 = vpop.f32.mrf.mxu0  ;;  %v2270_v57 = vpack.c.bf16 %v2269_v62, %v2269_v62  ;;  %v2434_v53 = vpack.c.bf16 %v2433_v35, %v2433_v35 }
 0x538   :  { %v7877_v49 = vadd.f32 %v7876_v21, %v7875_v42  ;;  %v8802_v55 = vpop.f32.mrf.mxu1  ;;  %8078 = vmatprep.subr.bf16.mxu0 %v11851_v36  ;;  %8926 = vmatprep.subr.bf16.mxu1 %v9880_v51 }
 0x539   :  { %v7878_v58 = vpop.f32.mrf.mxu0  ;;  %8940 = vmatprep.mubr.msk.bf16.mxu1 %vm9881_vm1, %v9880_v51 }
 0x53a   :  { %v2798_v19 = vadd.f32 %v7877_v49, %v11419_v12  ;;  %v2840_v63 = vpop.f32.mrf.mxu1  ;;  %8079 = vmatpush3.bf16.msra.mxu0 %v11854_v48  ;;  %v11879_v12 = vld [vmem:[#allocation5 + $0xe0] sm:$0xff]  }
 0x53b   :  { %8927 = vmatpush3.bf16.msra.mxu1 %v11857_v31  ;;  %v7879_v24 = vpop.f32.mrf.mxu0  ;;  %8080 = vmatprep.subr.bf16.mxu0 %v11859_v47 }
 0x53c   :  { %v11875_v44 = vadd.f32 %v2837_v46, %v2798_v19  ;;  %v8803_v52 = vpop.f32.mrf.mxu1  ;;  %8928 = vmatprep.subr.bf16.mxu1 %v9880_v51 }
 0x53d   :  { %v2515_v52 = vmax.f32 %v11692_v16, 0.0 }
 0x53e   :  { %8081 = vmatpush3.bf16.msra.mxu0 %v11867_v43 }
 0x53f   :  { %8929 = vmatpush3.bf16.msra.mxu1 %v11871_v13  ;;  %8082 = vmatprep.subr.bf16.mxu0 %v11873_v20  ;;  %v2516_v62 = vpack.c.bf16 %v2515_v52, %v2515_v52 }
 0x540   :  { %8930 = vmatprep.subr.bf16.mxu1 %v9880_v51 }
 0x542   :  { %8083 = vmatpush3.bf16.msra.mxu0 %v11879_v12 }
 0x543   :  { %8931 = vmatpush3.bf16.msra.mxu1 %v11883_v9  ;;  %8084 = vmatprep.subr.bf16.mxu0 %v11885_v15 }
 0x544   :  { %8932 = vmatprep.subr.bf16.mxu1 %v9880_v51 }
 0x546   :  { %8085 = vmatpush3.bf16.msra.mxu0 %v11889_v17 }
 0x547   :  { %8933 = vmatpush3.bf16.msra.mxu1 %v11893_v18  ;;  %8086 = vmatprep.subr.bf16.mxu0 %v11895_v34 }
 0x548   :  { %8934 = vmatprep.subr.bf16.mxu1 %v9880_v51 }
 0x54a   :  { %8087 = vmatpush3.bf16.msra.mxu0 %v11899_v40 }
 0x54b   :  { %8935 = vmatpush3.bf16.msra.mxu1 %v11903_v41  ;;  %8088 = vmatprep.subr.bf16.mxu0 %v11905_v22 }
 0x54c   :  { %8936 = vmatprep.subr.bf16.mxu1 %v9880_v51 }
 0x54e   :  { %8089 = vmatpush3.bf16.msra.mxu0 %v11909_v32 }
 0x54f   :  { %8937 = vmatpush3.bf16.msra.mxu1 %v11913_v59  ;;  %8090 = vmatprep.subr.bf16.mxu0 %v11915_v61 }
 0x550   :  { %8938 = vmatprep.subr.bf16.mxu1 %v9880_v51 }
 0x552   :  { %8091 = vmatpush3.bf16.msra.mxu0 %v11919_v1 }
 0x553   :  { %8939 = vmatpush3.bf16.msra.mxu1 %v11923_v11  ;;  %8107 = vmatprep.subr.bf16.mxu0 %v11839_v50 }
 0x554   :  { %8944 = vmatprep.subr.bf16.mxu1 %v9880_v51 }
 0x555   :  { %v7906_v23 = vpop.f32.mrf.mxu0  ;;  %3571 = vmatmul.mubr.bf16.vlgmr.msra.gmra.mxu0 %v9878_v0 }
 0x556   :  { %v2919_v5 = vpop.f32.mrf.mxu1  ;;  %8941 = vmatmul.mubr.bf16.vlgmr.msra.gmra.mxu1 %v2188_v45  ;;  %8108 = vmatpush3.bf16.msra.mxu0 %v11844_v39 }
 0x557   :  { %3652 = vmatprep.mubr.bf16.mxu0 %v2270_v57  ;;  %8945 = vmatpush3.bf16.msra.mxu1 %v11848_v28  ;;  %v7907_v60 = vpop.f32.mrf.mxu0 }
 0x558   :  { %v7908_v26 = vadd.f32 %v7907_v60, %v7906_v23  ;;  %v8822_v4 = vpop.f32.mrf.mxu1  ;;  %8109 = vmatprep.subr.bf16.mxu0 %v11851_v36  ;;  %8946 = vmatprep.subr.bf16.mxu1 %v9880_v51  ;;  %v2598_v23 = vpack.c.bf16 %v2597_v30, %v2597_v30 }
 0x559   :  { %v7909_v8 = vpop.f32.mrf.mxu0  ;;  %8960 = vmatprep.mubr.msk.bf16.mxu1 %vm9881_vm1, %v9880_v51 }
 0x55a   :  { %v2880_v10 = vadd.f32 %v11939_v6, %v7908_v26  ;;  %v2922_v29 = vpop.f32.mrf.mxu1  ;;  %8110 = vmatpush3.bf16.msra.mxu0 %v11854_v48 }
 0x55b   :  { %8947 = vmatpush3.bf16.msra.mxu1 %v11857_v31  ;;  %v7910_v2 = vpop.f32.mrf.mxu0  ;;  %8111 = vmatprep.subr.bf16.mxu0 %v11859_v47 }
 0x55c   :  { %v11945_v33 = vadd.f32 %v2919_v5, %v2880_v10  ;;  %v8823_v14 = vpop.f32.mrf.mxu1  ;;  %8948 = vmatprep.subr.bf16.mxu1 %v9880_v51  ;;  %v2679_v2 = vmax.f32 %v11774_v37, 0.0 }
 0x55d   :  { %v2761_v14 = vmax.f32 %v11815_v3, 0.0 }
 0x55e   :  { %8112 = vmatpush3.bf16.msra.mxu0 %v11867_v43  ;;  %v2680_v56 = vpack.c.bf16 %v2679_v2, %v2679_v2 }
 0x55f   :  { %8949 = vmatpush3.bf16.msra.mxu1 %v11871_v13  ;;  %8113 = vmatprep.subr.bf16.mxu0 %v11873_v20 }
 0x560   :  { %8950 = vmatprep.subr.bf16.mxu1 %v9880_v51 }
 0x562   :  { %8114 = vmatpush3.bf16.msra.mxu0 %v11879_v12 }
 0x563   :  { %8951 = vmatpush3.bf16.msra.mxu1 %v11883_v9  ;;  %8115 = vmatprep.subr.bf16.mxu0 %v11885_v15 }
 0x564   :  { %8952 = vmatprep.subr.bf16.mxu1 %v9880_v51 }
 0x566   :  { %8116 = vmatpush3.bf16.msra.mxu0 %v11889_v17 }
 0x567   :  { %8953 = vmatpush3.bf16.msra.mxu1 %v11893_v18  ;;  %8117 = vmatprep.subr.bf16.mxu0 %v11895_v34 }
 0x568   :  { %8954 = vmatprep.subr.bf16.mxu1 %v9880_v51 }
 0x56a   :  { %8118 = vmatpush3.bf16.msra.mxu0 %v11899_v40 }
 0x56b   :  { %8955 = vmatpush3.bf16.msra.mxu1 %v11903_v41  ;;  %8119 = vmatprep.subr.bf16.mxu0 %v11905_v22 }
 0x56c   :  { %8956 = vmatprep.subr.bf16.mxu1 %v9880_v51 }
 0x56e   :  { %8120 = vmatpush3.bf16.msra.mxu0 %v11909_v32 }
 0x56f   :  { %8957 = vmatpush3.bf16.msra.mxu1 %v11913_v59  ;;  %8121 = vmatprep.subr.bf16.mxu0 %v11915_v61 }
 0x570   :  { %8958 = vmatprep.subr.bf16.mxu1 %v9880_v51 }
 0x572   :  { %8122 = vmatpush3.bf16.msra.mxu0 %v11919_v1 }
 0x573   :  { %8959 = vmatpush3.bf16.msra.mxu1 %v11923_v11  ;;  %8138 = vmatprep.subr.bf16.mxu0 %v11839_v50 }
 0x574   :  { %8964 = vmatprep.subr.bf16.mxu1 %v9880_v51 }
 0x575   :  { %v7937_v42 = vpop.f32.mrf.mxu0  ;;  %3653 = vmatmul.mubr.bf16.vlgmr.msra.gmra.mxu0 %v2188_v45 }
 0x576   :  { %v3001_v46 = vpop.f32.mrf.mxu1  ;;  %8961 = vmatmul.mubr.bf16.vlgmr.msra.gmra.mxu1 %v2352_v27  ;;  %8139 = vmatpush3.bf16.msra.mxu0 %v11844_v39 }
 0x577   :  { %3734 = vmatprep.mubr.bf16.mxu0 %v2434_v53  ;;  %8965 = vmatpush3.bf16.msra.mxu1 %v11848_v28  ;;  %v7938_v54 = vpop.f32.mrf.mxu0 }
 0x578   :  { %v7939_v25 = vadd.f32 %v7938_v54, %v7937_v42  ;;  %v8842_v21 = vpop.f32.mrf.mxu1  ;;  %8140 = vmatprep.subr.bf16.mxu0 %v11851_v36  ;;  %8966 = vmatprep.subr.bf16.mxu1 %v9880_v51 }
 0x579   :  { %v7940_v49 = vpop.f32.mrf.mxu0  ;;  %8980 = vmatprep.mubr.msk.bf16.mxu1 %vm9881_vm1, %v9880_v51 }
 0x57a   :  { %v2962_v55 = vadd.f32 %v11939_v6, %v7939_v25  ;;  %v3004_v58 = vpop.f32.mrf.mxu1  ;;  %8141 = vmatpush3.bf16.msra.mxu0 %v11854_v48 }
 0x57b   :  { %8967 = vmatpush3.bf16.msra.mxu1 %v11857_v31  ;;  %v7941_v19 = vpop.f32.mrf.mxu0  ;;  %8142 = vmatprep.subr.bf16.mxu0 %v11859_v47  ;;  %v2843_v58 = vmax.f32 %v11875_v44, 0.0 }
 0x57c   :  { %v11984_v63 = vadd.f32 %v3001_v46, %v2962_v55  ;;  %v8843_v24 = vpop.f32.mrf.mxu1  ;;  %8968 = vmatprep.subr.bf16.mxu1 %v9880_v51  ;;  %v2925_v19 = vmax.f32 %v11945_v33, 0.0 }
 0x57d   :  { %v2844_v24 = vpack.c.bf16 %v2843_v58, %v2843_v58 }
 0x57e   :  { %8143 = vmatpush3.bf16.msra.mxu0 %v11867_v43  ;;  %v2926_v30 = vpack.c.bf16 %v2925_v19, %v2925_v19 }
 0x57f   :  { %8969 = vmatpush3.bf16.msra.mxu1 %v11871_v13  ;;  %8144 = vmatprep.subr.bf16.mxu0 %v11873_v20 }
 0x580   :  { %8970 = vmatprep.subr.bf16.mxu1 %v9880_v51 }
 0x582   :  { %8145 = vmatpush3.bf16.msra.mxu0 %v11879_v12 }
 0x583   :  { %8971 = vmatpush3.bf16.msra.mxu1 %v11883_v9  ;;  %8146 = vmatprep.subr.bf16.mxu0 %v11885_v15 }
 0x584   :  { %8972 = vmatprep.subr.bf16.mxu1 %v9880_v51 }
 0x586   :  { %8147 = vmatpush3.bf16.msra.mxu0 %v11889_v17 }
 0x587   :  { %8973 = vmatpush3.bf16.msra.mxu1 %v11893_v18  ;;  %8148 = vmatprep.subr.bf16.mxu0 %v11895_v34 }
 0x588   :  { %8974 = vmatprep.subr.bf16.mxu1 %v9880_v51 }
 0x58a   :  { %8149 = vmatpush3.bf16.msra.mxu0 %v11899_v40 }
 0x58b   :  { %8975 = vmatpush3.bf16.msra.mxu1 %v11903_v41  ;;  %8150 = vmatprep.subr.bf16.mxu0 %v11905_v22 }
 0x58c   :  { %8976 = vmatprep.subr.bf16.mxu1 %v9880_v51 }
 0x58e   :  { %8151 = vmatpush3.bf16.msra.mxu0 %v11909_v32 }
 0x58f   :  { %8977 = vmatpush3.bf16.msra.mxu1 %v11913_v59  ;;  %8152 = vmatprep.subr.bf16.mxu0 %v11915_v61 }
 0x590   :  { %8978 = vmatprep.subr.bf16.mxu1 %v9880_v51 }
 0x592   :  { %8153 = vmatpush3.bf16.msra.mxu0 %v11919_v1 }
 0x593   :  { %8979 = vmatpush3.bf16.msra.mxu1 %v11923_v11  ;;  %8169 = vmatprep.subr.bf16.mxu0 %v11839_v50 }
 0x594   :  { %8984 = vmatprep.subr.bf16.mxu1 %v9880_v51 }
 0x595   :  { %v7968_v45 = vpop.f32.mrf.mxu0  ;;  %3735 = vmatmul.mubr.bf16.vlgmr.msra.gmra.mxu0 %v2352_v27  ;;  %v2762_v27 = vpack.c.bf16 %v2761_v14, %v2761_v14 }
 0x596   :  { %v3083_v57 = vpop.f32.mrf.mxu1  ;;  %8981 = vmatmul.mubr.bf16.vlgmr.msra.gmra.mxu1 %v2516_v62  ;;  %8170 = vmatpush3.bf16.msra.mxu0 %v11844_v39 }
 0x597   :  { %3816 = vmatprep.mubr.bf16.mxu0 %v2598_v23  ;;  %8985 = vmatpush3.bf16.msra.mxu1 %v11848_v28  ;;  %v7969_v16 = vpop.f32.mrf.mxu0 }
 0x598   :  { %v7970_v38 = vadd.f32 %v7969_v16, %v7968_v45  ;;  %v8862_v5 = vpop.f32.mrf.mxu1  ;;  %8171 = vmatprep.subr.bf16.mxu0 %v11851_v36  ;;  %8986 = vmatprep.subr.bf16.mxu1 %v9880_v51 }
 0x599   :  { %v7971_v60 = vpop.f32.mrf.mxu0  ;;  %9000 = vmatprep.mubr.msk.bf16.mxu1 %vm9881_vm1, %v9880_v51 }
 0x59a   :  { %v3044_v26 = vadd.f32 %v11939_v6, %v7970_v38  ;;  %v3086_v4 = vpop.f32.mrf.mxu1  ;;  %8172 = vmatpush3.bf16.msra.mxu0 %v11854_v48  ;;  %v3007_v38 = vmax.f32 %v11984_v63, 0.0 }
 0x59b   :  { %8987 = vmatpush3.bf16.msra.mxu1 %v11857_v31  ;;  %v7972_v8 = vpop.f32.mrf.mxu0  ;;  %8173 = vmatprep.subr.bf16.mxu0 %v11859_v47 }
 0x59c   :  { %v12023_v10 = vadd.f32 %v3083_v57, %v3044_v26  ;;  %v8863_v29 = vpop.f32.mrf.mxu1  ;;  %8988 = vmatprep.subr.bf16.mxu1 %v9880_v51  ;;  %v3008_v60 = vpack.c.bf16 %v3007_v38, %v3007_v38  ;;  %v12266_v38 = vld [vmem:[#allocation5 + $0x1d0] sm:$0xff]  }
 0x59e   :  { %8174 = vmatpush3.bf16.msra.mxu0 %v11867_v43  ;;  %v3089_v5 = vmax.f32 %v12023_v10, 0.0 }
 0x59f   :  { %8989 = vmatpush3.bf16.msra.mxu1 %v11871_v13  ;;  %8175 = vmatprep.subr.bf16.mxu0 %v11873_v20 }
 0x5a0   :  { %8990 = vmatprep.subr.bf16.mxu1 %v9880_v51  ;;  %v3090_v4 = vpack.c.bf16 %v3089_v5, %v3089_v5 }
 0x5a2   :  { %8176 = vmatpush3.bf16.msra.mxu0 %v11879_v12 }
 0x5a3   :  { %8991 = vmatpush3.bf16.msra.mxu1 %v11883_v9  ;;  %8177 = vmatprep.subr.bf16.mxu0 %v11885_v15 }
 0x5a4   :  { %8992 = vmatprep.subr.bf16.mxu1 %v9880_v51 }
 0x5a6   :  { %8178 = vmatpush3.bf16.msra.mxu0 %v11889_v17 }
 0x5a7   :  { %8993 = vmatpush3.bf16.msra.mxu1 %v11893_v18  ;;  %8179 = vmatprep.subr.bf16.mxu0 %v11895_v34 }
 0x5a8   :  { %8994 = vmatprep.subr.bf16.mxu1 %v9880_v51 }
 0x5aa   :  { %8180 = vmatpush3.bf16.msra.mxu0 %v11899_v40 }
 0x5ab   :  { %8995 = vmatpush3.bf16.msra.mxu1 %v11903_v41  ;;  %8181 = vmatprep.subr.bf16.mxu0 %v11905_v22 }
 0x5ac   :  { %8996 = vmatprep.subr.bf16.mxu1 %v9880_v51 }
 0x5ae   :  { %8182 = vmatpush3.bf16.msra.mxu0 %v11909_v32 }
 0x5af   :  { %8997 = vmatpush3.bf16.msra.mxu1 %v11913_v59  ;;  %8183 = vmatprep.subr.bf16.mxu0 %v11915_v61 }
 0x5b0   :  { %8998 = vmatprep.subr.bf16.mxu1 %v9880_v51 }
 0x5b2   :  { %8184 = vmatpush3.bf16.msra.mxu0 %v11919_v1 }
 0x5b3   :  { %8999 = vmatpush3.bf16.msra.mxu1 %v11923_v11  ;;  %8200 = vmatprep.subr.bf16.mxu0 %v11839_v50 }
 0x5b4   :  { %9004 = vmatprep.subr.bf16.mxu1 %v9880_v51 }
 0x5b5   :  { %v7999_v35 = vpop.f32.mrf.mxu0  ;;  %3817 = vmatmul.mubr.bf16.vlgmr.msra.gmra.mxu0 %v2516_v62 }
 0x5b6   :  { %v3165_v42 = vpop.f32.mrf.mxu1  ;;  %9001 = vmatmul.mubr.bf16.vlgmr.msra.gmra.mxu1 %v2680_v56  ;;  %8201 = vmatpush3.bf16.msra.mxu0 %v11844_v39 }
 0x5b7   :  { %3898 = vmatprep.mubr.bf16.mxu0 %v2762_v27  ;;  %9005 = vmatpush3.bf16.msra.mxu1 %v11848_v28  ;;  %v8000_v37 = vpop.f32.mrf.mxu0 }
 0x5b8   :  { %v8001_v3 = vadd.f32 %v8000_v37, %v7999_v35  ;;  %v8882_v53 = vpop.f32.mrf.mxu1  ;;  %8202 = vmatprep.subr.bf16.mxu0 %v11851_v36  ;;  %9006 = vmatprep.subr.bf16.mxu1 %v9880_v51 }
 0x5b9   :  { %v8002_v46 = vpop.f32.mrf.mxu0  ;;  %9020 = vmatprep.mubr.msk.bf16.mxu1 %vm9881_vm1, %v9880_v51 }
 0x5ba   :  { %v3126_v54 = vadd.f32 %v11939_v6, %v8001_v3  ;;  %v3168_v25 = vpop.f32.mrf.mxu1  ;;  %8203 = vmatpush3.bf16.msra.mxu0 %v11854_v48 }
 0x5bb   :  { %9007 = vmatpush3.bf16.msra.mxu1 %v11857_v31  ;;  %v8003_v21 = vpop.f32.mrf.mxu0  ;;  %8204 = vmatprep.subr.bf16.mxu0 %v11859_v47 }
 0x5bc   :  { %v12062_v49 = vadd.f32 %v3165_v42, %v3126_v54  ;;  %v8883_v55 = vpop.f32.mrf.mxu1  ;;  %9008 = vmatprep.subr.bf16.mxu1 %v9880_v51 }
 0x5be   :  { %8205 = vmatpush3.bf16.msra.mxu0 %v11867_v43  ;;  %v3171_v37 = vmax.f32 %v12062_v49, 0.0 }
 0x5bf   :  { %9009 = vmatpush3.bf16.msra.mxu1 %v11871_v13  ;;  %8206 = vmatprep.subr.bf16.mxu0 %v11873_v20 }
 0x5c0   :  { %9010 = vmatprep.subr.bf16.mxu1 %v9880_v51  ;;  %v3172_v53 = vpack.c.bf16 %v3171_v37, %v3171_v37 }
 0x5c2   :  { %8207 = vmatpush3.bf16.msra.mxu0 %v11879_v12 }
 0x5c3   :  { %9011 = vmatpush3.bf16.msra.mxu1 %v11883_v9  ;;  %8208 = vmatprep.subr.bf16.mxu0 %v11885_v15 }
 0x5c4   :  { %9012 = vmatprep.subr.bf16.mxu1 %v9880_v51 }
 0x5c6   :  { %8209 = vmatpush3.bf16.msra.mxu0 %v11889_v17 }
 0x5c7   :  { %9013 = vmatpush3.bf16.msra.mxu1 %v11893_v18  ;;  %8210 = vmatprep.subr.bf16.mxu0 %v11895_v34 }
 0x5c8   :  { %9014 = vmatprep.subr.bf16.mxu1 %v9880_v51 }
 0x5ca   :  { %8211 = vmatpush3.bf16.msra.mxu0 %v11899_v40 }
 0x5cb   :  { %9015 = vmatpush3.bf16.msra.mxu1 %v11903_v41  ;;  %8212 = vmatprep.subr.bf16.mxu0 %v11905_v22 }
 0x5cc   :  { %9016 = vmatprep.subr.bf16.mxu1 %v9880_v51 }
 0x5ce   :  { %8213 = vmatpush3.bf16.msra.mxu0 %v11909_v32 }
 0x5cf   :  { %9017 = vmatpush3.bf16.msra.mxu1 %v11913_v59  ;;  %8214 = vmatprep.subr.bf16.mxu0 %v11915_v61 }
 0x5d0   :  { %9018 = vmatprep.subr.bf16.mxu1 %v9880_v51 }
 0x5d2   :  { %8215 = vmatpush3.bf16.msra.mxu0 %v11919_v1 }
 0x5d3   :  { %9019 = vmatpush3.bf16.msra.mxu1 %v11923_v11  ;;  %8231 = vmatprep.subr.bf16.mxu0 %v11839_v50 }
 0x5d4   :  { %9024 = vmatprep.subr.bf16.mxu1 %v9880_v51 }
 0x5d5   :  { %v12091_v52 = vpop.f32.mrf.mxu0  ;;  %3899 = vmatmul.mubr.bf16.vlgmr.msra.gmra.mxu0 %v2680_v56 }
 0x5d6   :  { %v12093_v62 = vpop.f32.mrf.mxu1  ;;  %9021 = vmatmul.mubr.bf16.vlgmr.msra.gmra.mxu1 %v2844_v24  ;;  %8232 = vmatpush3.bf16.msra.mxu0 %v11844_v39 }
 0x5d7   :  { %3980 = vmatprep.mubr.bf16.mxu0 %v2926_v30  ;;  %9025 = vmatpush3.bf16.msra.mxu1 %v11848_v28  ;;  %v12097_v44 = vpop.f32.mrf.mxu0  ;;  %v12244_v30 = vld [vmem:[#allocation5 + $0x228] sm:$0xff]  }
 0x5d8   :  { %v8902_v33 = vpop.f32.mrf.mxu1  ;;  %8233 = vmatprep.subr.bf16.mxu0 %v11851_v36  ;;  %9026 = vmatprep.subr.bf16.mxu1 %v9880_v51  ;;  %v8032_v35 = vadd.f32 %v12097_v44, %v12091_v52 }
 0x5d9   :  { %v8033_v45 = vpop.f32.mrf.mxu0  ;;  %9040 = vmatprep.mubr.msk.bf16.mxu1 %vm9881_vm1, %v9880_v51  ;;  %v12250_v33 = vld [vmem:[#allocation5 + $0x1a0] sm:$0xff]  }
 0x5da   :  { %v3250_v23 = vpop.f32.mrf.mxu1  ;;  %8234 = vmatpush3.bf16.msra.mxu0 %v11854_v48  ;;  %v3208_v27 = vadd.f32 %v11939_v6, %v8032_v35  ;;  %v12254_v45 = vld [vmem:[#allocation5 + $0x220] sm:$0xff]  }
 0x5db   :  { %9027 = vmatpush3.bf16.msra.mxu1 %v11857_v31  ;;  %v8034_v57 = vpop.f32.mrf.mxu0  ;;  %8235 = vmatprep.subr.bf16.mxu0 %v11859_v47  ;;  %v12256_v23 = vld [vmem:[#allocation5 + $0x1d8] sm:$0xff]  }
 0x5dc   :  { %v8903_v16 = vpop.f32.mrf.mxu1  ;;  %9028 = vmatprep.subr.bf16.mxu1 %v9880_v51  ;;  %v3248_v42 = vadd.f32 %v12093_v62, %v3208_v27  ;;  %v12246_v62 = vld [vmem:[#allocation5 + $0x1e0] sm:$0xff]   ;;  %v12260_v57 = vld [vmem:[#allocation5 + $0x198] sm:$0xff]  }
 0x5dd   :  { %v12264_v16 = vld [vmem:[#allocation5 + $0x218] sm:$0xff]  }
 0x5de   :  { %8236 = vmatpush3.bf16.msra.mxu0 %v11867_v43  ;;  %v3253_v3 = vmax.f32 %v3248_v42, 0.0 }
 0x5df   :  { %9029 = vmatpush3.bf16.msra.mxu1 %v11871_v13  ;;  %8237 = vmatprep.subr.bf16.mxu0 %v11873_v20 }
 0x5e0   :  { %9030 = vmatprep.subr.bf16.mxu1 %v9880_v51  ;;  %v3254_v54 = vpack.c.bf16 %v3253_v3, %v3253_v3 }
 0x5e2   :  { %8238 = vmatpush3.bf16.msra.mxu0 %v11879_v12 }
 0x5e3   :  { %9031 = vmatpush3.bf16.msra.mxu1 %v11883_v9  ;;  %8239 = vmatprep.subr.bf16.mxu0 %v11885_v15 }
 0x5e4   :  { %9032 = vmatprep.subr.bf16.mxu1 %v9880_v51 }
 0x5e6   :  { %8240 = vmatpush3.bf16.msra.mxu0 %v11889_v17 }
 0x5e7   :  { %9033 = vmatpush3.bf16.msra.mxu1 %v11893_v18  ;;  %8241 = vmatprep.subr.bf16.mxu0 %v11895_v34 }
 0x5e8   :  { %9034 = vmatprep.subr.bf16.mxu1 %v9880_v51 }
 0x5ea   :  { %8242 = vmatpush3.bf16.msra.mxu0 %v11899_v40 }
 0x5eb   :  { %9035 = vmatpush3.bf16.msra.mxu1 %v11903_v41  ;;  %8243 = vmatprep.subr.bf16.mxu0 %v11905_v22 }
 0x5ec   :  { %9036 = vmatprep.subr.bf16.mxu1 %v9880_v51 }
 0x5ee   :  { %8244 = vmatpush3.bf16.msra.mxu0 %v11909_v32 }
 0x5ef   :  { %9037 = vmatpush3.bf16.msra.mxu1 %v11913_v59  ;;  %8245 = vmatprep.subr.bf16.mxu0 %v11915_v61 }
 0x5f0   :  { %9038 = vmatprep.subr.bf16.mxu1 %v9880_v51 }
 0x5f2   :  { %8246 = vmatpush3.bf16.msra.mxu0 %v11919_v1 }
 0x5f3   :  { %9039 = vmatpush3.bf16.msra.mxu1 %v11923_v11  ;;  %8262 = vmatprep.subr.bf16.mxu0 %v11839_v50 }
 0x5f4   :  { %9044 = vmatprep.subr.bf16.mxu1 %v9880_v51 }
 0x5f5   :  { %v12133_v26 = vpop.f32.mrf.mxu0  ;;  %3981 = vmatmul.mubr.bf16.vlgmr.msra.gmra.mxu0 %v2844_v24  ;;  %v12240_v24 = vld [vmem:[#allocation5 + $0x1a8] sm:$0xff]  }
 0x5f6   :  { %v12135_v8 = vpop.f32.mrf.mxu1  ;;  %9041 = vmatmul.mubr.bf16.vlgmr.msra.gmra.mxu1 %v3008_v60  ;;  %8263 = vmatpush3.bf16.msra.mxu0 %v11844_v39 }
 0x5f7   :  { %4062 = vmatprep.mubr.bf16.mxu0 %v3090_v4  ;;  %9045 = vmatpush3.bf16.msra.mxu1 %v11848_v28  ;;  %v12139_v63 = vpop.f32.mrf.mxu0  ;;  %v12276_v4 = vld [vmem:[#allocation5 + $0x1c8] sm:$0xff]  }
 0x5f8   :  { %v8922_v10 = vpop.f32.mrf.mxu1  ;;  %8264 = vmatprep.subr.bf16.mxu0 %v11851_v36  ;;  %9046 = vmatprep.subr.bf16.mxu1 %v9880_v51 }
 0x5f9   :  { %v8064_v29 = vpop.f32.mrf.mxu0  ;;  %9060 = vmatprep.mubr.msk.bf16.mxu1 %vm9881_vm1, %v9880_v51  ;;  %v12285_v10 = vld [vmem:[#allocation5 + $0x208] sm:$0xff]  }
 0x5fa   :  { %v3332_v2 = vpop.f32.mrf.mxu1  ;;  %8265 = vmatpush3.bf16.msra.mxu0 %v11854_v48  ;;  %v12287_v29 = vld [vmem:[#allocation5 + $0x1c0] sm:$0xff]  }
 0x5fb   :  { %9047 = vmatpush3.bf16.msra.mxu1 %v11857_v31  ;;  %v8065_v14 = vpop.f32.mrf.mxu0  ;;  %8266 = vmatprep.subr.bf16.mxu0 %v11859_v47 }
 0x5fc   :  { %v8923_v56 = vpop.f32.mrf.mxu1  ;;  %9048 = vmatprep.subr.bf16.mxu1 %v9880_v51  ;;  %v12291_v14 = vld [vmem:[#allocation5 + $0x180] sm:$0xff]  }
 0x5fd   :  { %v12295_v56 = vld [vmem:[#allocation5 + $0x200] sm:$0xff]  }
 0x5fe   :  { %8267 = vmatpush3.bf16.msra.mxu0 %v11867_v43 }
 0x5ff   :  { %9049 = vmatpush3.bf16.msra.mxu1 %v11871_v13  ;;  %8268 = vmatprep.subr.bf16.mxu0 %v11873_v20 }
 0x600   :  { %9050 = vmatprep.subr.bf16.mxu1 %v9880_v51 }
 0x602   :  { %8269 = vmatpush3.bf16.msra.mxu0 %v11879_v12 }
 0x603   :  { %9051 = vmatpush3.bf16.msra.mxu1 %v11883_v9  ;;  %8270 = vmatprep.subr.bf16.mxu0 %v11885_v15 }
 0x604   :  { %9052 = vmatprep.subr.bf16.mxu1 %v9880_v51 }
 0x606   :  { %8271 = vmatpush3.bf16.msra.mxu0 %v11889_v17 }
 0x607   :  { %9053 = vmatpush3.bf16.msra.mxu1 %v11893_v18  ;;  %8272 = vmatprep.subr.bf16.mxu0 %v11895_v34 }
 0x608   :  { %9054 = vmatprep.subr.bf16.mxu1 %v9880_v51 }
 0x60a   :  { %8273 = vmatpush3.bf16.msra.mxu0 %v11899_v40 }
 0x60b   :  { %9055 = vmatpush3.bf16.msra.mxu1 %v11903_v41  ;;  %8274 = vmatprep.subr.bf16.mxu0 %v11905_v22 }
 0x60c   :  { %9056 = vmatprep.subr.bf16.mxu1 %v9880_v51 }
 0x60e   :  { %8275 = vmatpush3.bf16.msra.mxu0 %v11909_v32 }
 0x60f   :  { %9057 = vmatpush3.bf16.msra.mxu1 %v11913_v59  ;;  %8276 = vmatprep.subr.bf16.mxu0 %v11915_v61 }
 0x610   :  { %9058 = vmatprep.subr.bf16.mxu1 %v9880_v51 }
 0x612   :  { %8277 = vmatpush3.bf16.msra.mxu0 %v11919_v1 }
 0x613   :  { %9059 = vmatpush3.bf16.msra.mxu1 %v11923_v11  ;;  %8293 = vmatprep.subr.bf16.mxu0 %v11839_v50 }
 0x614   :  { %9064 = vmatprep.subr.bf16.mxu1 %v9880_v51 }
 0x615   :  { %v8092_v46 = vpop.f32.mrf.mxu0  ;;  %4063 = vmatmul.mubr.bf16.vlgmr.msra.gmra.mxu0 %v3008_v60  ;;  %v12270_v60 = vld [vmem:[#allocation5 + $0x190] sm:$0xff]  }
 0x616   :  { %v3612_v25 = vpop.f32.mrf.mxu1  ;;  %9061 = vmatmul.mubr.bf16.vlgmr.msra.gmra.mxu1 %v3172_v53  ;;  %8294 = vmatpush3.bf16.msra.mxu0 %v11844_v39 }
 0x617   :  { %4144 = vmatprep.mubr.bf16.mxu0 %v3254_v54  ;;  %9065 = vmatpush3.bf16.msra.mxu1 %v11848_v28  ;;  %v8093_v21 = vpop.f32.mrf.mxu0  ;;  %v8063_v28 = vadd.f32 %v12139_v63, %v12133_v26  ;;  %v12274_v26 = vld [vmem:[#allocation5 + $0x210] sm:$0xff]   ;;  %v12281_v63 = vld [vmem:[#allocation5 + $0x188] sm:$0xff]  }
 0x618   :  { %v8942_v49 = vpop.f32.mrf.mxu1  ;;  %8295 = vmatprep.subr.bf16.mxu0 %v11851_v36  ;;  %9066 = vmatprep.subr.bf16.mxu1 %v9880_v51  ;;  %v8094_v36 = vadd.f32 %v8093_v21, %v8092_v46 }
 0x619   :  { %v8095_v50 = vpop.f32.mrf.mxu0  ;;  %9080 = vmatprep.mubr.msk.bf16.mxu1 %vm9881_vm1, %v9880_v51 }
 0x61a   :  { %v3615_v55 = vpop.f32.mrf.mxu1  ;;  %8296 = vmatpush3.bf16.msra.mxu0 %v11854_v48  ;;  %v12198_v48 = vld [vmem:[#allocation7 + $0x2] ss:$0 sm:$0xff] }
 0x61b   :  { %9067 = vmatpush3.bf16.msra.mxu1 %v11857_v31  ;;  %v8096_v58 = vpop.f32.mrf.mxu0  ;;  %8297 = vmatprep.subr.bf16.mxu0 %v11859_v47  ;;  %v3290_v31 = vadd.f32 %v11939_v6, %v8063_v28  ;;  %v3573_v47 = vadd.f32 %v8094_v36, %v12198_v48 }
 0x61c   :  { %v8943_v39 = vpop.f32.mrf.mxu1  ;;  %9068 = vmatprep.subr.bf16.mxu1 %v9880_v51 }
 0x61e   :  { %8298 = vmatpush3.bf16.msra.mxu0 %v11867_v43  ;;  %v3330_v43 = vadd.f32 %v12135_v8, %v3290_v31 }
 0x61f   :  { %9069 = vmatpush3.bf16.msra.mxu1 %v11871_v13  ;;  %8299 = vmatprep.subr.bf16.mxu0 %v11873_v20  ;;  %v3613_v13 = vadd.f32 %v3612_v25, %v3573_v47  ;;  %v12214_v20 = vld [vmem:[#allocation5 + $0x1f8] sm:$0xff]  }
 0x620   :  { %9070 = vmatprep.subr.bf16.mxu1 %v9880_v51 }
 0x622   :  { %8300 = vmatpush3.bf16.msra.mxu0 %v11879_v12  ;;  %v3335_v12 = vmax.f32 %v3330_v43, 0.0 }
 0x623   :  { %9071 = vmatpush3.bf16.msra.mxu1 %v11883_v9  ;;  %8301 = vmatprep.subr.bf16.mxu0 %v11885_v15  ;;  %v3618_v9 = vmax.f32 %v3613_v13, 0.0  ;;  %v12218_v15 = vld [vmem:[#allocation5 + $0x1b8] sm:$0xff]  }
 0x624   :  { %9072 = vmatprep.subr.bf16.mxu1 %v9880_v51 }
 0x626   :  { %8302 = vmatpush3.bf16.msra.mxu0 %v11889_v17  ;;  %v12222_v17 = vld [vmem:[#allocation5 + $0x238] sm:$0xff]  }
 0x627   :  { %9073 = vmatpush3.bf16.msra.mxu1 %v11893_v18  ;;  %8303 = vmatprep.subr.bf16.mxu0 %v11895_v34  ;;  %v3336_v18 = vpack.c.bf16 %v3335_v12, %v3335_v12  ;;  %v12225_v34 = vld [vmem:[#allocation5 + $0x1f0] sm:$0xff]  }
 0x628   :  { %9074 = vmatprep.subr.bf16.mxu1 %v9880_v51 }
 0x62a   :  { %8304 = vmatpush3.bf16.msra.mxu0 %v11899_v40 }
 0x62b   :  { %9075 = vmatpush3.bf16.msra.mxu1 %v11903_v41  ;;  %8305 = vmatprep.subr.bf16.mxu0 %v11905_v22  ;;  %v3619_v41 = vpack.c.bf16 %v3618_v9, %v3618_v9 }
 0x62c   :  { %9076 = vmatprep.subr.bf16.mxu1 %v9880_v51 }
 0x62e   :  { %8306 = vmatpush3.bf16.msra.mxu0 %v11909_v32  ;;  %v12228_v32 = vld [vmem:[#allocation5 + $0x1b0] sm:$0xff]  }
 0x62f   :  { %9077 = vmatpush3.bf16.msra.mxu1 %v11913_v59  ;;  %8307 = vmatprep.subr.bf16.mxu0 %v11915_v61  ;;  %v12231_v61 = vld [vmem:[#allocation5 + $0x230] sm:$0xff]  }
 0x630   :  { %9078 = vmatprep.subr.bf16.mxu1 %v9880_v51 }
 0x632   :  { %8308 = vmatpush3.bf16.msra.mxu0 %v11919_v1  ;;  %v12233_v1 = vld [vmem:[#allocation5 + $0x1e8] sm:$0xff]  }
 0x633   :  { %9079 = vmatpush3.bf16.msra.mxu1 %v11923_v11  ;;  %8324 = vmatprep.subr.bf16.mxu0 %v12214_v20 }
 0x634   :  { %9084 = vmatprep.subr.bf16.mxu1 %v9880_v51 }
 0x635   :  { %v8123_v40 = vpop.f32.mrf.mxu0  ;;  %4145 = vmatmul.mubr.bf16.vlgmr.msra.gmra.mxu0 %v3172_v53 }
 0x636   :  { %v3694_v22 = vpop.f32.mrf.mxu1  ;;  %9081 = vmatmul.mubr.bf16.vlgmr.msra.gmra.mxu1 %v3336_v18  ;;  %8325 = vmatpush3.bf16.msra.mxu0 %v12218_v15 }
 0x637   :  { %4427 = vmatprep.mubr.bf16.mxu0 %v3619_v41  ;;  %9085 = vmatpush3.bf16.msra.mxu1 %v12222_v17  ;;  %v8124_v59 = vpop.f32.mrf.mxu0 }
 0x638   :  { %v8962_v11 = vpop.f32.mrf.mxu1  ;;  %8326 = vmatprep.subr.bf16.mxu0 %v12225_v34  ;;  %9086 = vmatprep.subr.bf16.mxu1 %v9880_v51  ;;  %v8125_v5 = vadd.f32 %v8124_v59, %v8123_v40 }
 0x639   :  { %v8126_v6 = vpop.f32.mrf.mxu0  ;;  %9100 = vmatprep.mubr.msk.bf16.mxu1 %vm9881_vm1, %v9880_v51 }
 0x63a   :  { %v3697_v19 = vpop.f32.mrf.mxu1  ;;  %8327 = vmatpush3.bf16.msra.mxu0 %v12228_v32  ;;  %v3655_v8 = vadd.f32 %v8125_v5, %v12198_v48 }
 0x63b   :  { %9087 = vmatpush3.bf16.msra.mxu1 %v12231_v61  ;;  %v8127_v52 = vpop.f32.mrf.mxu0  ;;  %8328 = vmatprep.subr.bf16.mxu0 %v12233_v1 }
 0x63c   :  { %v8963_v44 = vpop.f32.mrf.mxu1  ;;  %9088 = vmatprep.subr.bf16.mxu1 %v9880_v51  ;;  %v3695_v2 = vadd.f32 %v3694_v22, %v3655_v8 }
 0x63e   :  { %8329 = vmatpush3.bf16.msra.mxu0 %v12240_v24  ;;  %v3700_v35 = vmax.f32 %v3695_v2, 0.0 }
 0x63f   :  { %9089 = vmatpush3.bf16.msra.mxu1 %v12244_v30  ;;  %8330 = vmatprep.subr.bf16.mxu0 %v12246_v62 }
 0x640   :  { %9090 = vmatprep.subr.bf16.mxu1 %v9880_v51  ;;  %v3701_v27 = vpack.c.bf16 %v3700_v35, %v3700_v35 }
 0x642   :  { %8331 = vmatpush3.bf16.msra.mxu0 %v12250_v33 }
 0x643   :  { %9091 = vmatpush3.bf16.msra.mxu1 %v12254_v45  ;;  %8332 = vmatprep.subr.bf16.mxu0 %v12256_v23 }
 0x644   :  { %9092 = vmatprep.subr.bf16.mxu1 %v9880_v51 }
 0x646   :  { %8333 = vmatpush3.bf16.msra.mxu0 %v12260_v57 }
 0x647   :  { %9093 = vmatpush3.bf16.msra.mxu1 %v12264_v16  ;;  %8334 = vmatprep.subr.bf16.mxu0 %v12266_v38 }
 0x648   :  { %9094 = vmatprep.subr.bf16.mxu1 %v9880_v51 }
 0x64a   :  { %8335 = vmatpush3.bf16.msra.mxu0 %v12270_v60 }
 0x64b   :  { %9095 = vmatpush3.bf16.msra.mxu1 %v12274_v26  ;;  %8336 = vmatprep.subr.bf16.mxu0 %v12276_v4 }
 0x64c   :  { %9096 = vmatprep.subr.bf16.mxu1 %v9880_v51 }
 0x64e   :  { %8337 = vmatpush3.bf16.msra.mxu0 %v12281_v63 }
 0x64f   :  { %9097 = vmatpush3.bf16.msra.mxu1 %v12285_v10  ;;  %8338 = vmatprep.subr.bf16.mxu0 %v12287_v29 }
 0x650   :  { %9098 = vmatprep.subr.bf16.mxu1 %v9880_v51 }
 0x652   :  { %8339 = vmatpush3.bf16.msra.mxu0 %v12291_v14 }
 0x653   :  { %9099 = vmatpush3.bf16.msra.mxu1 %v12295_v56  ;;  %8355 = vmatprep.subr.bf16.mxu0 %v12214_v20 }
 0x654   :  { %9104 = vmatprep.subr.bf16.mxu1 %v9880_v51 }
 0x655   :  { %v8154_v42 = vpop.f32.mrf.mxu0  ;;  %4428 = vmatmul.mubr.bf16.vlgmr.msra.gmra.mxu0 %v9878_v0 }
 0x656   :  { %v3776_v37 = vpop.f32.mrf.mxu1  ;;  %9101 = vmatmul.mubr.bf16.vlgmr.msra.gmra.mxu1 %v3701_v27  ;;  %8356 = vmatpush3.bf16.msra.mxu0 %v12218_v15 }
 0x657   :  { %v8155_v3 = vpop.f32.mrf.mxu0  ;;  %8357 = vmatprep.subr.bf16.mxu0 %v12225_v34  ;;  %9105 = vmatpush3.bf16.msra.mxu1 %v12222_v17 }
 0x658   :  { %v8156_v53 = vadd.f32 %v8155_v3, %v8154_v42  ;;  %v8982_v46 = vpop.f32.mrf.mxu1  ;;  %9106 = vmatprep.subr.bf16.mxu1 %v9880_v51  ;;  %9120 = vmatprep.mubr.msk.bf16.mxu1 %vm9881_vm1, %v9880_v51 }
 0x659   :  { %v8157_v54 = vpop.f32.mrf.mxu0 }
 0x65a   :  { %v3737_v25 = vadd.f32 %v8156_v53, %v12198_v48  ;;  %v3779_v21 = vpop.f32.mrf.mxu1  ;;  %8358 = vmatpush3.bf16.msra.mxu0 %v12228_v32 }
 0x65b   :  { %v8158_v49 = vpop.f32.mrf.mxu0  ;;  %8359 = vmatprep.subr.bf16.mxu0 %v12233_v1  ;;  %9107 = vmatpush3.bf16.msra.mxu1 %v12231_v61 }
 0x65c   :  { %v3777_v50 = vadd.f32 %v3776_v37, %v3737_v25  ;;  %v8983_v55 = vpop.f32.mrf.mxu1  ;;  %9108 = vmatprep.subr.bf16.mxu1 %v9880_v51 }
 0x65d   :  { %v12417_v55 = vld [vmem:[#allocation5 + $0x270] sm:$0xff]  }
 0x65e   :  { %8360 = vmatpush3.bf16.msra.mxu0 %v12240_v24  ;;  %v3782_v58 = vmax.f32 %v3777_v50, 0.0  ;;  %v12414_v50 = vld [vmem:[#allocation5 + $0x2b0] sm:$0xff]  }
 0x65f   :  { %8361 = vmatprep.subr.bf16.mxu0 %v12246_v62  ;;  %9109 = vmatpush3.bf16.msra.mxu1 %v12244_v30 }
 0x660   :  { %v3783_v39 = vpack.c.bf16 %v3782_v58, %v3782_v58  ;;  %9110 = vmatprep.subr.bf16.mxu1 %v9880_v51  ;;  %v12426_v58 = vld [vmem:[#allocation5 + $0x2a0] sm:$0xff]  }
 0x662   :  { %8362 = vmatpush3.bf16.msra.mxu0 %v12250_v33  ;;  %4509 = vmatprep.mubr.bf16.mxu0 %v3783_v39  ;;  %v12429_v39 = vld [vmem:[#allocation5 + $0x260] sm:$0xff]  }
 0x663   :  { %8363 = vmatprep.subr.bf16.mxu0 %v12256_v23  ;;  %9111 = vmatpush3.bf16.msra.mxu1 %v12254_v45 }
 0x664   :  { %9112 = vmatprep.subr.bf16.mxu1 %v9880_v51 }
 0x666   :  { %8364 = vmatpush3.bf16.msra.mxu0 %v12260_v57 }
 0x667   :  { %8365 = vmatprep.subr.bf16.mxu0 %v12266_v38  ;;  %9113 = vmatpush3.bf16.msra.mxu1 %v12264_v16 }
 0x668   :  { %9114 = vmatprep.subr.bf16.mxu1 %v9880_v51 }
 0x66a   :  { %8366 = vmatpush3.bf16.msra.mxu0 %v12270_v60 }
 0x66b   :  { %8367 = vmatprep.subr.bf16.mxu0 %v12276_v4  ;;  %9115 = vmatpush3.bf16.msra.mxu1 %v12274_v26 }
 0x66c   :  { %9116 = vmatprep.subr.bf16.mxu1 %v9880_v51 }
 0x66e   :  { %8368 = vmatpush3.bf16.msra.mxu0 %v12281_v63 }
 0x66f   :  { %8369 = vmatprep.subr.bf16.mxu0 %v12287_v29  ;;  %9117 = vmatpush3.bf16.msra.mxu1 %v12285_v10 }
 0x670   :  { %9118 = vmatprep.subr.bf16.mxu1 %v9880_v51 }
 0x672   :  { %8370 = vmatpush3.bf16.msra.mxu0 %v12291_v14 }
 0x673   :  { %9119 = vmatpush3.bf16.msra.mxu1 %v12295_v56  ;;  %8386 = vmatprep.subr.bf16.mxu0 %v12214_v20 }
 0x674   :  { %9124 = vmatprep.subr.bf16.mxu1 %v9880_v51 }
 0x675   :  { %v8185_v28 = vpop.f32.mrf.mxu0  ;;  %4510 = vmatmul.mubr.bf16.vlgmr.msra.gmra.mxu0 %v3701_v27 }
 0x676   :  { %v3858_v36 = vpop.f32.mrf.mxu1  ;;  %8387 = vmatpush3.bf16.msra.mxu0 %v12218_v15 }
 0x677   :  { %v8186_v31 = vpop.f32.mrf.mxu0  ;;  %8388 = vmatprep.subr.bf16.mxu0 %v12225_v34 }
 0x678   :  { %v8187_v47 = vadd.f32 %v8186_v31, %v8185_v28  ;;  %v9002_v43 = vpop.f32.mrf.mxu1  ;;  %v12432_v28 = vld [vmem:[#allocation5 + $0x298] sm:$0xff]   ;;  %v12438_v31 = vld [vmem:[#allocation5 + $0x290] sm:$0xff]  }
 0x679   :  { %v8188_v13 = vpop.f32.mrf.mxu0 }
 0x67a   :  { %v3819_v12 = vadd.f32 %v8187_v47, %v12198_v48  ;;  %v3861_v9 = vpop.f32.mrf.mxu1  ;;  %8389 = vmatpush3.bf16.msra.mxu0 %v12228_v32  ;;  %v12441_v47 = vld [vmem:[#allocation5 + $0x250] sm:$0xff]   ;;  %v12444_v13 = vld [vmem:[#allocation5 + $0x288] sm:$0xff]  }
 0x67b   :  { %v8189_v18 = vpop.f32.mrf.mxu0  ;;  %8390 = vmatprep.subr.bf16.mxu0 %v12233_v1 }
 0x67c   :  { %v3859_v40 = vadd.f32 %v3858_v36, %v3819_v12  ;;  %v9003_v41 = vpop.f32.mrf.mxu1  ;;  %v12435_v36 = vld [vmem:[#allocation5 + $0x258] sm:$0xff]  }
 0x67d   :  { %v12447_v41 = vld [vmem:[#allocation5 + $0x248] sm:$0xff]  }
 0x67e   :  { %v3864_v22 = vmax.f32 %v3859_v40, 0.0  ;;  %8391 = vmatpush3.bf16.msra.mxu0 %v12240_v24 }
 0x67f   :  { %8392 = vmatprep.subr.bf16.mxu0 %v12246_v62 }
 0x680   :  { %v3865_v59 = vpack.c.bf16 %v3864_v22, %v3864_v22 }
 0x682   :  { %9121 = vmatmul.mubr.bf16.vlgmr.msra.gmra.mxu1 %v3865_v59  ;;  %8393 = vmatpush3.bf16.msra.mxu0 %v12250_v33 }
 0x683   :  { %8394 = vmatprep.subr.bf16.mxu0 %v12256_v23  ;;  %9125 = vmatpush3.bf16.msra.mxu1 %v12222_v17 }
 0x684   :  { %9126 = vmatprep.subr.bf16.mxu1 %v9880_v51  ;;  %9140 = vmatprep.mubr.msk.bf16.mxu1 %vm9881_vm1, %v9880_v51 }
 0x686   :  { %8395 = vmatpush3.bf16.msra.mxu0 %v12260_v57 }
 0x687   :  { %8396 = vmatprep.subr.bf16.mxu0 %v12266_v38  ;;  %9127 = vmatpush3.bf16.msra.mxu1 %v12231_v61 }
 0x688   :  { %9128 = vmatprep.subr.bf16.mxu1 %v9880_v51 }
 0x68a   :  { %8397 = vmatpush3.bf16.msra.mxu0 %v12270_v60 }
 0x68b   :  { %8398 = vmatprep.subr.bf16.mxu0 %v12276_v4  ;;  %9129 = vmatpush3.bf16.msra.mxu1 %v12244_v30 }
 0x68c   :  { %9130 = vmatprep.subr.bf16.mxu1 %v9880_v51 }
 0x68e   :  { %8399 = vmatpush3.bf16.msra.mxu0 %v12281_v63 }
 0x68f   :  { %8400 = vmatprep.subr.bf16.mxu0 %v12287_v29  ;;  %9131 = vmatpush3.bf16.msra.mxu1 %v12254_v45 }
 0x690   :  { %9132 = vmatprep.subr.bf16.mxu1 %v9880_v51 }
 0x692   :  { %8401 = vmatpush3.bf16.msra.mxu0 %v12291_v14 }
 0x693   :  { %9133 = vmatpush3.bf16.msra.mxu1 %v12264_v16  ;;  %8417 = vmatprep.subr.bf16.mxu0 %v12214_v20 }
 0x694   :  { %9134 = vmatprep.subr.bf16.mxu1 %v9880_v51 }
 0x695   :  { %v8216_v11 = vpop.f32.mrf.mxu0 }
 0x696   :  { %v3940_v6 = vpop.f32.mrf.mxu1 }
 0x697   :  { %v8217_v19 = vpop.f32.mrf.mxu0  ;;  %9135 = vmatpush3.bf16.msra.mxu1 %v12274_v26 }
 0x698   :  { %v8218_v52 = vadd.f32 %v8217_v19, %v8216_v11  ;;  %v9022_v44 = vpop.f32.mrf.mxu1  ;;  %9136 = vmatprep.subr.bf16.mxu1 %v9880_v51 }
 0x699   :  { %v8219_v5 = vpop.f32.mrf.mxu0 }
 0x69a   :  { %v3901_v8 = vadd.f32 %v8218_v52, %v12198_v48  ;;  %v3943_v2 = vpop.f32.mrf.mxu1  ;;  %v12454_v5 = vld [vmem:[#allocation5 + $0x240] sm:$0xff]  }
 0x69b   :  { %v8220_v35 = vpop.f32.mrf.mxu0  ;;  %9137 = vmatpush3.bf16.msra.mxu1 %v12285_v10  ;;  %v12457_v2 = vld [vmem:[#allocation5 + $0x2f8] sm:$0xff]  }
 0x69c   :  { %v3941_v27 = vadd.f32 %v3940_v6, %v3901_v8  ;;  %v9023_v20 = vpop.f32.mrf.mxu1  ;;  %9138 = vmatprep.subr.bf16.mxu1 %v9880_v51 }
 0x69d   :  { %v12472_v20 = vld [vmem:[#allocation5 + $0x2e0] sm:$0xff]  }
 0x69e   :  { %v3946_v42 = vmax.f32 %v3941_v27, 0.0  ;;  %v12468_v27 = vld [vmem:[#allocation5 + $0x2e8] sm:$0xff]  }
 0x69f   :  { %9139 = vmatpush3.bf16.msra.mxu1 %v12295_v56 }
 0x6a0   :  { %v3947_v37 = vpack.c.bf16 %v3946_v42, %v3946_v42  ;;  %9144 = vmatprep.subr.bf16.mxu1 %v9880_v51  ;;  %v12476_v42 = vld [vmem:[#allocation5 + $0x2d8] sm:$0xff]  }
 0x6a2   :  { %4591 = vmatprep.mubr.bf16.mxu0 %v3947_v37  ;;  %v12480_v37 = vld [vmem:[#allocation5 + $0x2d0] sm:$0xff]  }
 0x6a3   :  { %4592 = vmatmul.mubr.bf16.vlgmr.msra.gmra.mxu0 %v3865_v59  ;;  %v12450_v59 = vld [vmem:[#allocation5 + $0x280] sm:$0xff]  }
 0x6a4   :  { %8418 = vmatpush3.bf16.msra.mxu0 %v12218_v15 }
 0x6a5   :  { %8419 = vmatprep.subr.bf16.mxu0 %v12225_v34 }
 0x6a8   :  { %8420 = vmatpush3.bf16.msra.mxu0 %v12228_v32 }
 0x6a9   :  { %8421 = vmatprep.subr.bf16.mxu0 %v12233_v1 }
 0x6ac   :  { %8422 = vmatpush3.bf16.msra.mxu0 %v12240_v24 }
 0x6ad   :  { %8423 = vmatprep.subr.bf16.mxu0 %v12246_v62 }
 0x6b0   :  { %8424 = vmatpush3.bf16.msra.mxu0 %v12250_v33 }
 0x6b1   :  { %8425 = vmatprep.subr.bf16.mxu0 %v12256_v23 }
 0x6b4   :  { %8426 = vmatpush3.bf16.msra.mxu0 %v12260_v57  ;;  %v12389_v57 = vld [vmem:[#allocation5 + $0x2b8] sm:$0xff]  }
 0x6b5   :  { %v8247_v3 = vpop.f32.mrf.mxu0  ;;  %8427 = vmatprep.subr.bf16.mxu0 %v12266_v38 }
 0x6b6   :  { %v4022_v15 = vpop.f32.mrf.mxu1 }
 0x6b7   :  { %v8248_v53 = vpop.f32.mrf.mxu0 }
 0x6b8   :  { %v8249_v34 = vadd.f32 %v8248_v53, %v8247_v3  ;;  %v9042_v46 = vpop.f32.mrf.mxu1  ;;  %8428 = vmatpush3.bf16.msra.mxu0 %v12270_v60  ;;  %v12483_v53 = vld [vmem:[#allocation7 + $0x3] ss:$0 sm:$0xff] }
 0x6b9   :  { %v8250_v32 = vpop.f32.mrf.mxu0  ;;  %8429 = vmatprep.subr.bf16.mxu0 %v12276_v4  ;;  %v9491_v46 = vld [vmem:[#allocation5 + $0x2c8] sm:$0xff]  }
 0x6ba   :  { %v3983_v1 = vadd.f32 %v8249_v34, %v12198_v48  ;;  %v4025_v24 = vpop.f32.mrf.mxu1 }
 0x6bb   :  { %v8251_v62 = vpop.f32.mrf.mxu0 }
 0x6bc   :  { %v4023_v33 = vadd.f32 %v4022_v15, %v3983_v1  ;;  %v9043_v23 = vpop.f32.mrf.mxu1  ;;  %8430 = vmatpush3.bf16.msra.mxu0 %v12281_v63 }
 0x6bd   :  { %8431 = vmatprep.subr.bf16.mxu0 %v12287_v29 }
 0x6be   :  { %v4028_v38 = vmax.f32 %v4023_v33, 0.0 }
 0x6c0   :  { %v4029_v54 = vpack.c.bf16 %v4028_v38, %v4028_v38  ;;  %8432 = vmatpush3.bf16.msra.mxu0 %v12291_v14 }
 0x6c1   :  { %8448 = vmatprep.subr.bf16.mxu0 %v12389_v57 }
 0x6c2   :  { %9141 = vmatmul.mubr.bf16.vlgmr.msra.gmra.mxu1 %v4029_v54 }
 0x6c3   :  { %9145 = vmatpush3.bf16.msra.mxu1 %v12222_v17  ;;  %9160 = vmatprep.mubr.msk.bf16.mxu1 %vm9881_vm1, %v9880_v51 }
 0x6c4   :  { %9146 = vmatprep.subr.bf16.mxu1 %v9880_v51 }
 0x6c7   :  { %9147 = vmatpush3.bf16.msra.mxu1 %v12231_v61 }
 0x6c8   :  { %9148 = vmatprep.subr.bf16.mxu1 %v9880_v51 }
 0x6cb   :  { %9149 = vmatpush3.bf16.msra.mxu1 %v12244_v30 }
 0x6cc   :  { %9150 = vmatprep.subr.bf16.mxu1 %v9880_v51 }
 0x6cf   :  { %9151 = vmatpush3.bf16.msra.mxu1 %v12254_v45 }
 0x6d0   :  { %9152 = vmatprep.subr.bf16.mxu1 %v9880_v51 }
 0x6d3   :  { %9153 = vmatpush3.bf16.msra.mxu1 %v12264_v16 }
 0x6d4   :  { %9154 = vmatprep.subr.bf16.mxu1 %v9880_v51 }
 0x6d5   :  { %v8278_v17 = vpop.f32.mrf.mxu0 }
 0x6d6   :  { %v4104_v60 = vpop.f32.mrf.mxu1 }
 0x6d7   :  { %v8279_v4 = vpop.f32.mrf.mxu0  ;;  %9155 = vmatpush3.bf16.msra.mxu1 %v12274_v26  ;;  %v12411_v26 = vld [vmem:[#allocation5 + $0x278] sm:$0xff]  }
 0x6d8   :  { %v8280_v61 = vadd.f32 %v8279_v4, %v8278_v17  ;;  %v9062_v63 = vpop.f32.mrf.mxu1  ;;  %9156 = vmatprep.subr.bf16.mxu1 %v9880_v51 }
 0x6d9   :  { %v8281_v30 = vpop.f32.mrf.mxu0 }
 0x6da   :  { %v4065_v29 = vadd.f32 %v8280_v61, %v12198_v48  ;;  %v4107_v14 = vpop.f32.mrf.mxu1 }
 0x6db   :  { %v8282_v45 = vpop.f32.mrf.mxu0  ;;  %9157 = vmatpush3.bf16.msra.mxu1 %v12285_v10  ;;  %v12420_v10 = vld [vmem:[#allocation5 + $0x2a8] sm:$0xff]  }
 0x6dc   :  { %v4105_v25 = vadd.f32 %v4104_v60, %v4065_v29  ;;  %v9063_v16 = vpop.f32.mrf.mxu1  ;;  %9158 = vmatprep.subr.bf16.mxu1 %v9880_v51 }
 0x6de   :  { %v4110_v21 = vmax.f32 %v4105_v25, 0.0 }
 0x6df   :  { %9159 = vmatpush3.bf16.msra.mxu1 %v12295_v56  ;;  %v12423_v56 = vld [vmem:[#allocation5 + $0x268] sm:$0xff]  }
 0x6e0   :  { %v4111_v49 = vpack.c.bf16 %v4110_v21, %v4110_v21  ;;  %9164 = vmatprep.subr.bf16.mxu1 %v9880_v51 }
 0x6e2   :  { %4673 = vmatprep.mubr.bf16.mxu0 %v4111_v49 }
 0x6e3   :  { %4674 = vmatmul.mubr.bf16.vlgmr.msra.gmra.mxu0 %v4029_v54 }
 0x6e4   :  { %8449 = vmatpush3.bf16.msra.mxu0 %v12411_v26 }
 0x6e5   :  { %8450 = vmatprep.subr.bf16.mxu0 %v12414_v50 }
 0x6e8   :  { %8451 = vmatpush3.bf16.msra.mxu0 %v12417_v55 }
 0x6e9   :  { %8452 = vmatprep.subr.bf16.mxu0 %v12420_v10 }
 0x6ec   :  { %8453 = vmatpush3.bf16.msra.mxu0 %v12423_v56 }
 0x6ed   :  { %8454 = vmatprep.subr.bf16.mxu0 %v12426_v58 }
 0x6f0   :  { %8455 = vmatpush3.bf16.msra.mxu0 %v12429_v39 }
 0x6f1   :  { %8456 = vmatprep.subr.bf16.mxu0 %v12432_v28 }
 0x6f4   :  { %8457 = vmatpush3.bf16.msra.mxu0 %v12435_v36 }
 0x6f5   :  { %v8309_v43 = vpop.f32.mrf.mxu0  ;;  %8458 = vmatprep.subr.bf16.mxu0 %v12438_v31 }
 0x6f6   :  { %v4186_v12 = vpop.f32.mrf.mxu1 }
 0x6f7   :  { %v8310_v9 = vpop.f32.mrf.mxu0 }
 0x6f8   :  { %v8311_v18 = vadd.f32 %v8310_v9, %v8309_v43  ;;  %v9082_v40 = vpop.f32.mrf.mxu1  ;;  %8459 = vmatpush3.bf16.msra.mxu0 %v12441_v47 }
 0x6f9   :  { %v8312_v22 = vpop.f32.mrf.mxu0  ;;  %8460 = vmatprep.subr.bf16.mxu0 %v12444_v13 }
 0x6fa   :  { %v4147_v11 = vadd.f32 %v8311_v18, %v12198_v48  ;;  %v4189_v6 = vpop.f32.mrf.mxu1  ;;  %v12462_v48 = vld [vmem:[#allocation5 + $0x2f0] sm:$0xff]  }
 0x6fb   :  { %v8313_v19 = vpop.f32.mrf.mxu0 }
 0x6fc   :  { %v4187_v52 = vadd.f32 %v4186_v12, %v4147_v11  ;;  %v9083_v44 = vpop.f32.mrf.mxu1  ;;  %8461 = vmatpush3.bf16.msra.mxu0 %v12447_v41 }
 0x6fd   :  { %8462 = vmatprep.subr.bf16.mxu0 %v12450_v59 }
 0x6fe   :  { %v4192_v8 = vmax.f32 %v4187_v52, 0.0 }
 0x700   :  { %v4193_v35 = vpack.c.bf16 %v4192_v8, %v4192_v8  ;;  %8463 = vmatpush3.bf16.msra.mxu0 %v12454_v5 }
 0x701   :  { %8479 = vmatprep.subr.bf16.mxu0 %v12389_v57  ;;  %v9492_v57 = vld [vmem:[#allocation5 + $0x2c0] sm:$0xff]  }
 0x702   :  { %9161 = vmatmul.mubr.bf16.vlgmr.msra.gmra.mxu1 %v4193_v35  ;;  %v9493_v35 = vld [vmem:[#allocation5 + $0x378] sm:$0xff]  }
 0x703   :  { %9165 = vmatpush3.bf16.msra.mxu1 %v12457_v2  ;;  %9180 = vmatprep.mubr.msk.bf16.mxu1 %vm9881_vm1, %v9880_v51 }
 0x704   :  { %9166 = vmatprep.subr.bf16.mxu1 %v9880_v51 }
 0x707   :  { %9167 = vmatpush3.bf16.msra.mxu1 %v12462_v48 }
 0x708   :  { %9168 = vmatprep.subr.bf16.mxu1 %v9880_v51 }
 0x70b   :  { %9169 = vmatpush3.bf16.msra.mxu1 %v12468_v27 }
 0x70c   :  { %9170 = vmatprep.subr.bf16.mxu1 %v9880_v51 }
 0x70f   :  { %9171 = vmatpush3.bf16.msra.mxu1 %v12472_v20 }
 0x710   :  { %9172 = vmatprep.subr.bf16.mxu1 %v9880_v51 }
 0x713   :  { %9173 = vmatpush3.bf16.msra.mxu1 %v12476_v42 }
 0x714   :  { %9174 = vmatprep.subr.bf16.mxu1 %v9880_v51 }
 0x715   :  { %v8340_v3 = vpop.f32.mrf.mxu0 }
 0x716   :  { %v4469_v15 = vpop.f32.mrf.mxu1 }
 0x717   :  { %v8341_v34 = vpop.f32.mrf.mxu0  ;;  %9175 = vmatpush3.bf16.msra.mxu1 %v12480_v37 }
 0x718   :  { %v8342_v32 = vadd.f32 %v8341_v34, %v8340_v3  ;;  %v9102_v1 = vpop.f32.mrf.mxu1  ;;  %9176 = vmatprep.subr.bf16.mxu1 %v9880_v51  ;;  %v9504_v3 = vld [vmem:[#allocation5 + $0x3b0] sm:$0xff]   ;;  %v9507_v34 = vld [vmem:[#allocation5 + $0x3a8] sm:$0xff]  }
 0x719   :  { %v8343_v24 = vpop.f32.mrf.mxu0  ;;  %v9510_v1 = vld [vmem:[#allocation5 + $0x3a0] sm:$0xff]  }
 0x71a   :  { %v4430_v62 = vadd.f32 %v8342_v32, %v12483_v53  ;;  %v4472_v33 = vpop.f32.mrf.mxu1  ;;  %v9502_v32 = vld [vmem:[#allocation5 + $0x358] sm:$0xff]  }
 0x71b   :  { %v8344_v23 = vpop.f32.mrf.mxu0  ;;  %9177 = vmatpush3.bf16.msra.mxu1 %v9491_v46  ;;  %v9503_v24 = vld [vmem:[#allocation5 + $0x318] sm:$0xff]  }
 0x71c   :  { %v4470_v38 = vadd.f32 %v4469_v15, %v4430_v62  ;;  %v9103_v54 = vpop.f32.mrf.mxu1  ;;  %9178 = vmatprep.subr.bf16.mxu1 %v9880_v51  ;;  %v9498_v15 = vld [vmem:[#allocation5 + $0x328] sm:$0xff]   ;;  %v9505_v62 = vld [vmem:[#allocation5 + $0x350] sm:$0xff]   ;;  %v9513_v33 = vld [vmem:[#allocation5 + $0x398] sm:$0xff]  }
 0x71d   :  { %v9514_v54 = vld [vmem:[#allocation5 + $0x390] sm:$0xff]  }
 0x71e   :  { %v4475_v17 = vmax.f32 %v4470_v38, 0.0  ;;  %v9508_v38 = vld [vmem:[#allocation5 + $0x348] sm:$0xff]  }
 0x71f   :  { %9179 = vmatpush3.bf16.msra.mxu1 %v9492_v57 }
 0x720   :  { %v4476_v60 = vpack.c.bf16 %v4475_v17, %v4475_v17  ;;  %9184 = vmatprep.subr.bf16.mxu1 %v9880_v51 }
 0x722   :  { %4956 = vmatprep.mubr.bf16.mxu0 %v4476_v60 }
 0x723   :  { %4957 = vmatmul.mubr.bf16.vlgmr.msra.gmra.mxu0 %v9878_v0 }
 0x724   :  { %8480 = vmatpush3.bf16.msra.mxu0 %v12411_v26 }
 0x725   :  { %8481 = vmatprep.subr.bf16.mxu0 %v12414_v50 }
 0x728   :  { %8482 = vmatpush3.bf16.msra.mxu0 %v12417_v55 }
 0x729   :  { %8483 = vmatprep.subr.bf16.mxu0 %v12420_v10 }
 0x72c   :  { %8484 = vmatpush3.bf16.msra.mxu0 %v12423_v56 }
 0x72d   :  { %8485 = vmatprep.subr.bf16.mxu0 %v12426_v58 }
 0x730   :  { %8486 = vmatpush3.bf16.msra.mxu0 %v12429_v39 }
 0x731   :  { %8487 = vmatprep.subr.bf16.mxu0 %v12432_v28 }
 0x734   :  { %8488 = vmatpush3.bf16.msra.mxu0 %v12435_v36 }
 0x735   :  { %v8371_v4 = vpop.f32.mrf.mxu0  ;;  %8489 = vmatprep.subr.bf16.mxu0 %v12438_v31 }
 0x737   :  { %v8372_v61 = vpop.f32.mrf.mxu0 }
 0x738   :  { %8490 = vmatpush3.bf16.msra.mxu0 %v12441_v47  ;;  %v8373_v29 = vadd.f32 %v8372_v61, %v8371_v4  ;;  %v9509_v4 = vld [vmem:[#allocation5 + $0x308] sm:$0xff]   ;;  %v9511_v61 = vld [vmem:[#allocation5 + $0x340] sm:$0xff]  }
 0x739   :  { %v8374_v63 = vpop.f32.mrf.mxu0  ;;  %8491 = vmatprep.subr.bf16.mxu0 %v12444_v13 }
 0x73a   :  { %v4512_v14 = vadd.f32 %v8373_v29, %v12483_v53 }
 0x73b   :  { %v8375_v30 = vpop.f32.mrf.mxu0 }
 0x73c   :  { %8492 = vmatpush3.bf16.msra.mxu0 %v12447_v41  ;;  %v9512_v30 = vld [vmem:[#allocation5 + $0x300] sm:$0xff]  }
 0x73d   :  { %8493 = vmatprep.subr.bf16.mxu0 %v12450_v59 }
 0x740   :  { %8494 = vmatpush3.bf16.msra.mxu0 %v12454_v5 }
 0x741   :  { %8510 = vmatprep.subr.bf16.mxu0 %v9493_v35 }
 0x742   :  { %v4551_v45 = vpop.f32.mrf.mxu1 }
 0x743   :  { %v4552_v25 = vadd.f32 %v4551_v45, %v4512_v14  ;;  %v7289_v14 = vld [vmem:[#allocation7 + $0x4] ss:$0 sm:$0xff] }
 0x744   :  { %v9122_v16 = vpop.f32.mrf.mxu1 }
 0x745   :  { %v4557_v21 = vmax.f32 %v4552_v25, 0.0  ;;  %v9515_v25 = vld [vmem:[#allocation5 + $0x388] sm:$0xff]  }
 0x746   :  { %v4554_v49 = vpop.f32.mrf.mxu1 }
 0x747   :  { %v4558_v26 = vpack.c.bf16 %v4557_v21, %v4557_v21 }
 0x748   :  { %v9123_v50 = vpop.f32.mrf.mxu1 }
 0x749   :  { %9181 = vmatmul.mubr.bf16.vlgmr.msra.gmra.mxu1 %v4558_v26  ;;  %v9516_v50 = vld [vmem:[#allocation5 + $0x380] sm:$0xff]  }
 0x74a   :  { %9185 = vmatpush3.bf16.msra.mxu1 %v12457_v2  ;;  %9200 = vmatprep.mubr.msk.bf16.mxu1 %vm9881_vm1, %v9880_v51 }
 0x74b   :  { %9186 = vmatprep.subr.bf16.mxu1 %v9880_v51 }
 0x74e   :  { %9187 = vmatpush3.bf16.msra.mxu1 %v12462_v48  ;;  %v9494_v48 = vld [vmem:[#allocation5 + $0x338] sm:$0xff]  }
 0x74f   :  { %9188 = vmatprep.subr.bf16.mxu1 %v9880_v51 }
 0x752   :  { %9189 = vmatpush3.bf16.msra.mxu1 %v12468_v27  ;;  %v9495_v27 = vld [vmem:[#allocation5 + $0x370] sm:$0xff]  }
 0x753   :  { %9190 = vmatprep.subr.bf16.mxu1 %v9880_v51 }
 0x756   :  { %9191 = vmatpush3.bf16.msra.mxu1 %v12472_v20  ;;  %v9501_v20 = vld [vmem:[#allocation5 + $0x3b8] sm:$0xff]  }
 0x757   :  { %9192 = vmatprep.subr.bf16.mxu1 %v9880_v51 }
 0x75a   :  { %9193 = vmatpush3.bf16.msra.mxu1 %v12476_v42  ;;  %v9496_v42 = vld [vmem:[#allocation5 + $0x330] sm:$0xff]  }
 0x75b   :  { %9194 = vmatprep.subr.bf16.mxu1 %v9880_v51 }
 0x75e   :  { %9195 = vmatpush3.bf16.msra.mxu1 %v12480_v37  ;;  %v9497_v37 = vld [vmem:[#allocation5 + $0x368] sm:$0xff]  }
 0x75f   :  { %9196 = vmatprep.subr.bf16.mxu1 %v9880_v51 }
 0x762   :  { %9197 = vmatpush3.bf16.msra.mxu1 %v9491_v46  ;;  %v9500_v46 = vld [vmem:[#allocation5 + $0x320] sm:$0xff]  }
 0x763   :  { %v8402_v55 = vpop.f32.mrf.mxu0  ;;  %9198 = vmatprep.subr.bf16.mxu1 %v9880_v51 }
 0x765   :  { %v8403_v10 = vpop.f32.mrf.mxu0 }
 0x766   :  { %9199 = vmatpush3.bf16.msra.mxu1 %v9492_v57  ;;  %v8404_v39 = vadd.f32 %v8403_v10, %v8402_v55  ;;  %v9506_v57 = vld [vmem:[#allocation5 + $0x310] sm:$0xff]  }
 0x767   :  { %v8405_v56 = vpop.f32.mrf.mxu0  ;;  %9204 = vmatprep.subr.bf16.mxu1 %v9880_v51 }
 0x768   :  { %v4594_v28 = vadd.f32 %v8404_v39, %v12483_v53  ;;  %v9518_v39 = vld [vmem:[%s13144_s4 + $0x30] sm:$0xff]  }
 0x769   :  { %v8406_v58 = vpop.f32.mrf.mxu0 }
 0x76a   :  { %v9517_v58 = vld [vmem:[%s13144_s4 + $0x38] sm:$0xff]  }
 0x782   :  { %v4633_v36 = vpop.f32.mrf.mxu1 }
 0x783   :  { %v4634_v31 = vadd.f32 %v4633_v36, %v4594_v28  ;;  %v9519_v28 = vld [vmem:[%s13144_s4 + $0x28] sm:$0xff]  }
 0x784   :  { %v9142_v47 = vpop.f32.mrf.mxu1 }
 0x785   :  { %v4639_v43 = vmax.f32 %v4634_v31, 0.0 }
 0x786   :  { %v4636_v13 = vpop.f32.mrf.mxu1 }
 0x787   :  { %v4640_v12 = vpack.c.bf16 %v4639_v43, %v4639_v43  ;;  %v9520_v13 = vld [vmem:[%s13144_s4 + $0x20] sm:$0xff]  }
 0x788   :  { %v9143_v9 = vpop.f32.mrf.mxu1 }
 0x789   :  { %5038 = vmatprep.mubr.bf16.mxu0 %v4640_v12  ;;  %v9521_v12 = vld [vmem:[%s13144_s4 + $0x18] sm:$0xff]   ;;  %v9522_v9 = vld [vmem:[%s13144_s4 + $0x10] sm:$0xff]  }
 0x78a   :  { %5039 = vmatmul.mubr.bf16.vlgmr.msra.gmra.mxu0 %v4558_v26 }
 0x78b   :  { %8511 = vmatpush3.bf16.msra.mxu0 %v9494_v48 }
 0x78c   :  { %8512 = vmatprep.subr.bf16.mxu0 %v9495_v27 }
 0x78f   :  { %8513 = vmatpush3.bf16.msra.mxu0 %v9496_v42  ;;  %v9526_v42 = vld [vmem:[%s13144_s4 + $0x70] sm:$0xff]  }
 0x790   :  { %8514 = vmatprep.subr.bf16.mxu0 %v9497_v37  ;;  %v9527_v37 = vld [vmem:[%s13144_s4 + $0x68] sm:$0xff]  }
 0x793   :  { %8515 = vmatpush3.bf16.msra.mxu0 %v9498_v15  ;;  %v9529_v15 = vld [vmem:[%s13144_s4 + $0x58] sm:$0xff]  }
 0x7a3   :  { %v8433_v18 = vpop.f32.mrf.mxu0 }
 0x7a5   :  { %v8434_v40 = vpop.f32.mrf.mxu0 }
 0x7a6   :  { %v8435_v59 = vadd.f32 %v8434_v40, %v8433_v18 }
 0x7a7   :  { %v8436_v41 = vpop.f32.mrf.mxu0 }
 0x7a8   :  { %v4676_v11 = vadd.f32 %v8435_v59, %v12483_v53  ;;  %v9499_v53 = vld [vmem:[#allocation5 + $0x360] sm:$0xff]  }
 0x7a9   :  { %v8437_v22 = vpop.f32.mrf.mxu0  ;;  %8516 = vmatprep.subr.bf16.mxu0 %v9499_v53  ;;  %v9530_v53 = vld [vmem:[%s13144_s4 + $0x50] sm:$0xff]  }
 0x7aa   :  { %8517 = vmatpush3.bf16.msra.mxu0 %v9500_v46  ;;  %v7314_v46 = vld [vmem:[#allocation7 + $0x5] ss:$0 sm:$0xff] }
 0x7ab   :  { %8518 = vmatprep.subr.bf16.mxu0 %v9502_v32 }
 0x7ae   :  { %8519 = vmatpush3.bf16.msra.mxu0 %v9503_v24 }
 0x7af   :  { %8520 = vmatprep.subr.bf16.mxu0 %v9505_v62 }
 0x7b2   :  { %8521 = vmatpush3.bf16.msra.mxu0 %v9506_v57 }
 0x7b3   :  { %8522 = vmatprep.subr.bf16.mxu0 %v9508_v38 }
 0x7b6   :  { %8523 = vmatpush3.bf16.msra.mxu0 %v9509_v4  ;;  %v9535_v4 = vld [vmem:[%s13144_s4 + $0xa8] sm:$0xff]  }
 0x7b7   :  { %8524 = vmatprep.subr.bf16.mxu0 %v9511_v61  ;;  %v9536_v61 = vld [vmem:[%s13144_s4 + $0xa0] sm:$0xff]  }
 0x7ba   :  { %8525 = vmatpush3.bf16.msra.mxu0 %v9512_v30  ;;  %v9538_v30 = vld [vmem:[%s13144_s4 + $0x90] sm:$0xff]  }
 0x7bb   :  { %9224 = vmatprep.subr.bf16.mxu0 %v9880_v51 }
 0x7c2   :  { %v4715_v6 = vpop.f32.mrf.mxu1 }
 0x7c3   :  { %v4716_v19 = vadd.f32 %v4715_v6, %v4676_v11 }
 0x7c4   :  { %v9162_v52 = vpop.f32.mrf.mxu1 }
 0x7c5   :  { %v4721_v44 = vmax.f32 %v4716_v19, 0.0 }
 0x7c6   :  { %v4718_v5 = vpop.f32.mrf.mxu1 }
 0x7c7   :  { %v4722_v8 = vpack.c.bf16 %v4721_v44, %v4721_v44  ;;  %v9523_v44 = vld [vmem:[%s13144_s4 + $0x8] sm:$0xff]  }
 0x7c8   :  { %v9163_v2 = vpop.f32.mrf.mxu1 }
 0x7c9   :  { %9201 = vmatmul.mubr.bf16.vlgmr.msra.gmra.mxu1 %v4722_v8  ;;  %v9524_v2 = vld [vmem:[%s13144_s4] sm:$0xff]  }
 0x7ca   :  { %9220 = vmatprep.mubr.msk.bf16.mxu1 %vm9881_vm1, %v9880_v51  ;;  %9205 = vmatpush3.bf16.msra.mxu1 %v9501_v20  ;;  %v9525_v20 = vld [vmem:[%s13144_s4 + $0x78] sm:$0xff]  }
 0x7cb   :  { %9206 = vmatprep.subr.bf16.mxu1 %v9880_v51 }
 0x7ce   :  { %9207 = vmatpush3.bf16.msra.mxu1 %v9504_v3  ;;  %v9528_v3 = vld [vmem:[%s13144_s4 + $0x60] sm:$0xff]  }
 0x7cf   :  { %9208 = vmatprep.subr.bf16.mxu1 %v9880_v51 }
 0x7d2   :  { %9209 = vmatpush3.bf16.msra.mxu1 %v9507_v34  ;;  %v9531_v34 = vld [vmem:[%s13144_s4 + $0x48] sm:$0xff]  }
 0x7d3   :  { %9210 = vmatprep.subr.bf16.mxu1 %v9880_v51 }
 0x7d6   :  { %9211 = vmatpush3.bf16.msra.mxu1 %v9510_v1 }
 0x7d7   :  { %9212 = vmatprep.subr.bf16.mxu1 %v9880_v51 }
 0x7da   :  { %9213 = vmatpush3.bf16.msra.mxu1 %v9513_v33 }
 0x7db   :  { %9214 = vmatprep.subr.bf16.mxu1 %v9880_v51 }
 0x7de   :  { %9215 = vmatpush3.bf16.msra.mxu1 %v9514_v54  ;;  %v9532_v54 = vld [vmem:[%s13144_s4 + $0x40] sm:$0xff]  }
 0x7df   :  { %9216 = vmatprep.subr.bf16.mxu1 %v9880_v51 }
 0x7e2   :  { %9217 = vmatpush3.bf16.msra.mxu1 %v9515_v25 }
 0x7e3   :  { %v8464_v23 = vpop.f32.mrf.mxu0  ;;  %9218 = vmatprep.subr.bf16.mxu1 %v9880_v51 }
 0x7e5   :  { %v8465_v17 = vpop.f32.mrf.mxu0 }
 0x7e6   :  { %v8466_v29 = vadd.f32 %v8465_v17, %v8464_v23  ;;  %9219 = vmatpush3.bf16.msra.mxu1 %v9516_v50  ;;  %v9533_v17 = vld [vmem:[%s13144_s4 + $0xb8] sm:$0xff]   ;;  %v9540_v50 = vld [vmem:[%s13144_s4 + $0x80] sm:$0xff]  }
 0x7e7   :  { %v8467_v60 = vpop.f32.mrf.mxu0  ;;  %9244 = vmatprep.subr.bf16.mxu1 %v9880_v51 }
 0x7e8   :  { %v4959_v45 = vadd.f32 %v8466_v29, %v7289_v14  ;;  %v9534_v60 = vld [vmem:[%s13144_s4 + $0xb0] sm:$0xff]   ;;  %v7339_v29 = vld [vmem:[%s13145_s5] ss:$0 sm:$0xff] }
 0x7e9   :  { %v8468_v63 = vpop.f32.mrf.mxu0 }
 0x7ea   :  { %v9537_v63 = vld [vmem:[%s13144_s4 + $0x98] sm:$0xff]  }
 0x809   :  { %v4998_v16 = vpop.f32.mrf.mxu1 }
 0x80a   :  { %v4999_v21 = vadd.f32 %v4998_v16, %v4959_v45 }
 0x80b   :  { %v9182_v49 = vpop.f32.mrf.mxu1 }
 0x80c   :  { %v5004_v26 = vmax.f32 %v4999_v21, 0.0 }
 0x80d   :  { %v5001_v55 = vpop.f32.mrf.mxu1 }
 0x80e   :  { %v5005_v10 = vpack.c.bf16 %v5004_v26, %v5004_v26  ;;  %v9539_v26 = vld [vmem:[%s13144_s4 + $0x88] sm:$0xff]   ;;  %v9541_v55 = vld [vmem:[%s13144_s4 + $0xf8] sm:$0xff]  }
 0x80f   :  { %v9183_v56 = vpop.f32.mrf.mxu1 }
 0x810   :  { %5321 = vmatprep.mubr.bf16.mxu0 %v5005_v10  ;;  %v9542_v10 = vld [vmem:[%s13144_s4 + $0xf0] sm:$0xff]   ;;  %v9543_v56 = vld [vmem:[%s13144_s4 + $0xe8] sm:$0xff]  }
 0x811   :  { %5322 = vmatmul.mubr.bf16.vlgmr.msra.gmra.mxu0 %v9878_v0 }
 0x812   :  { %9225 = vmatpush3.bf16.msra.mxu0 %v9517_v58  ;;  %9240 = vmatprep.mubr.msk.bf16.mxu0 %vm9881_vm1, %v9880_v51  ;;  %v9544_v58 = vld [vmem:[%s13144_s4 + $0xe0] sm:$0xff]  }
 0x813   :  { %9226 = vmatprep.subr.bf16.mxu0 %v9880_v51 }
 0x816   :  { %9227 = vmatpush3.bf16.msra.mxu0 %v9518_v39  ;;  %v9545_v39 = vld [vmem:[%s13144_s4 + $0xd8] sm:$0xff]  }
 0x817   :  { %9228 = vmatprep.subr.bf16.mxu0 %v9880_v51 }
 0x81a   :  { %9229 = vmatpush3.bf16.msra.mxu0 %v9519_v28  ;;  %v9546_v28 = vld [vmem:[%s13144_s4 + $0xd0] sm:$0xff]  }
 0x81b   :  { %9230 = vmatprep.subr.bf16.mxu0 %v9880_v51 }
 0x81e   :  { %9231 = vmatpush3.bf16.msra.mxu0 %v9520_v13 }
 0x81f   :  { %9232 = vmatprep.subr.bf16.mxu0 %v9880_v51 }
 0x822   :  { %9233 = vmatpush3.bf16.msra.mxu0 %v9521_v12 }
 0x823   :  { %9234 = vmatprep.subr.bf16.mxu0 %v9880_v51 }
 0x826   :  { %9235 = vmatpush3.bf16.msra.mxu0 %v9522_v9 }
 0x827   :  { %9236 = vmatprep.subr.bf16.mxu0 %v9880_v51 }
 0x82a   :  { %9237 = vmatpush3.bf16.msra.mxu0 %v9523_v44  ;;  %v9561_v44 = vld [vmem:[%s13146_s6 + $0xa0] ss:$16 sps:$4 sm:$0xff]  }
 0x82b   :  { %9238 = vmatprep.subr.bf16.mxu0 %v9880_v51 }
 0x82e   :  { %9239 = vmatpush3.bf16.msra.mxu0 %v9524_v2  ;;  %v9575_v2 = vld [vmem:[%s13146_s6 + $0x64] ss:$16 sps:$4 sm:$0xff]  }
 0x82f   :  { %9264 = vmatprep.subr.bf16.mxu0 %v9880_v51 }
 0x84a   :  { %v8495_v36 = vpop.f32.mrf.mxu0 }
 0x84c   :  { %v8496_v31 = vpop.f32.mrf.mxu0 }
 0x84d   :  { %v8497_v18 = vadd.f32 %v8496_v31, %v8495_v36  ;;  %v7365_v36 = vld [vmem:[%s13145_s5 + $0x1] ss:$0 sm:$0xff] }
 0x84e   :  { %v8498_v47 = vpop.f32.mrf.mxu0 }
 0x84f   :  { %v5041_v40 = vadd.f32 %v8497_v18, %v7289_v14 }
 0x850   :  { %v8499_v43 = vpop.f32.mrf.mxu0 }
 0x889   :  { %v5080_v41 = vpop.f32.mrf.mxu1 }
 0x88a   :  { %v5081_v22 = vadd.f32 %v5080_v41, %v5041_v40  ;;  %v9547_v40 = vld [vmem:[%s13144_s4 + $0xc8] sm:$0xff]   ;;  %v9548_v41 = vld [vmem:[%s13144_s4 + $0xc0] sm:$0xff]  }
 0x88b   :  { %v9202_v59 = vpop.f32.mrf.mxu1 }
 0x88c   :  { %v5086_v11 = vmax.f32 %v5081_v22, 0.0  ;;  %v9549_v22 = vld [vmem:[%s13146_s6 + $0xe0] ss:$16 sps:$4 sm:$0xff]   ;;  %v9551_v59 = vld [vmem:[%s13146_s6 + $0xe4] ss:$16 sps:$4 sm:$0xff]  }
 0x88d   :  { %v5083_v6 = vpop.f32.mrf.mxu1 }
 0x88e   :  { %v5087_v19 = vpack.c.bf16 %v5086_v11, %v5086_v11  ;;  %v9554_v11 = vld [vmem:[%s13146_s6 + $0xec] ss:$16 sps:$4 sm:$0xff]   ;;  %v9557_v6 = vld [vmem:[%s13146_s6 + $0xc4] ss:$16 sps:$4 sm:$0xff]  }
 0x88f   :  { %v9203_v52 = vpop.f32.mrf.mxu1 }
 0x890   :  { %9221 = vmatmul.mubr.bf16.vlgmr.msra.gmra.mxu1 %v5087_v19  ;;  %v9555_v19 = vld [vmem:[%s13146_s6 + $0xc0] ss:$16 sps:$4 sm:$0xff]   ;;  %v9563_v52 = vld [vmem:[%s13146_s6 + $0xa4] ss:$16 sps:$4 sm:$0xff]  }
 0x891   :  { %9260 = vmatprep.mubr.msk.bf16.mxu1 %vm9881_vm1, %v9880_v51  ;;  %9245 = vmatpush3.bf16.msra.mxu1 %v9525_v20  ;;  %v9587_v20 = vld [vmem:[%s13146_s6 + $0x24] ss:$16 sps:$4 sm:$0xff]  }
 0x892   :  { %9246 = vmatprep.subr.bf16.mxu1 %v9880_v51 }
 0x895   :  { %9247 = vmatpush3.bf16.msra.mxu1 %v9526_v42  ;;  %v9585_v42 = vld [vmem:[%s13146_s6 + $0x20] ss:$16 sps:$4 sm:$0xff]  }
 0x896   :  { %9248 = vmatprep.subr.bf16.mxu1 %v9880_v51 }
 0x899   :  { %9249 = vmatpush3.bf16.msra.mxu1 %v9527_v37  ;;  %v7391_v37 = vld [vmem:[%s13145_s5 + $0x2] ss:$0 sm:$0xff] }
 0x89a   :  { %9250 = vmatprep.subr.bf16.mxu1 %v9880_v51 }
 0x89d   :  { %9251 = vmatpush3.bf16.msra.mxu1 %v9528_v3 }
 0x89e   :  { %9252 = vmatprep.subr.bf16.mxu1 %v9880_v51 }
 0x8a1   :  { %9253 = vmatpush3.bf16.msra.mxu1 %v9529_v15 }
 0x8a2   :  { %9254 = vmatprep.subr.bf16.mxu1 %v9880_v51 }
 0x8a5   :  { %9255 = vmatpush3.bf16.msra.mxu1 %v9530_v53 }
 0x8a6   :  { %9256 = vmatprep.subr.bf16.mxu1 %v9880_v51 }
 0x8a9   :  { %9257 = vmatpush3.bf16.msra.mxu1 %v9531_v34 }
 0x8aa   :  { %9258 = vmatprep.subr.bf16.mxu1 %v9880_v51 }
 0x8ad   :  { %9259 = vmatpush3.bf16.msra.mxu1 %v9532_v54  ;;  %v9570_v54 = vld [vmem:[%s13146_s6 + $0x88] ss:$16 sps:$4 sm:$0xff]  }
 0x8ae   :  { %9284 = vmatprep.subr.bf16.mxu1 %v9880_v51 }
 0x8d1   :  { %v8526_v5 = vpop.f32.mrf.mxu0 }
 0x8d3   :  { %v8527_v8 = vpop.f32.mrf.mxu0 }
 0x8d4   :  { %v8528_v35 = vadd.f32 %v8527_v8, %v8526_v5  ;;  %v9569_v5 = vld [vmem:[%s13146_s6 + $0x84] ss:$16 sps:$4 sm:$0xff]   ;;  %v9567_v8 = vld [vmem:[%s13146_s6 + $0x80] ss:$16 sps:$4 sm:$0xff]  }
 0x8d5   :  { %v8529_v48 = vpop.f32.mrf.mxu0 }
 0x8d6   :  { %v5324_v32 = vadd.f32 %v8528_v35, %v7314_v46  ;;  %v9573_v35 = vld [vmem:[%s13146_s6 + $0x60] ss:$16 sps:$4 sm:$0xff]   ;;  %v9581_v48 = vld [vmem:[%s13146_s6 + $0x44] ss:$16 sps:$4 sm:$0xff]  }
 0x8d7   :  { %v8530_v27 = vpop.f32.mrf.mxu0 }
 0x8d8   :  { %v9579_v27 = vld [vmem:[%s13146_s6 + $0x40] ss:$16 sps:$4 sm:$0xff]  }
 0x950   :  { %v5363_v1 = vpop.f32.mrf.mxu1 }
 0x951   :  { %v5364_v24 = vadd.f32 %v5363_v1, %v5324_v32  ;;  %v9552_v32 = vld [vmem:[%s13146_s6 + $0xe8] ss:$16 sps:$4 sm:$0xff]  }
 0x952   :  { %v9222_v62 = vpop.f32.mrf.mxu1 }
 0x953   :  { %v5369_v33 = vmax.f32 %v5364_v24, 0.0  ;;  %v9560_v24 = vld [vmem:[%s13146_s6 + $0xcc] ss:$16 sps:$4 sm:$0xff]  }
 0x954   :  { %v5366_v23 = vpop.f32.mrf.mxu1 }
 0x955   :  { %v5370_v57 = vpack.c.bf16 %v5369_v33, %v5369_v33  ;;  %v9558_v33 = vld [vmem:[%s13146_s6 + $0xc8] ss:$16 sps:$4 sm:$0xff]   ;;  %v9566_v23 = vld [vmem:[%s13146_s6 + $0xac] ss:$16 sps:$4 sm:$0xff]  }
 0x956   :  { %v9223_v38 = vpop.f32.mrf.mxu1 }
 0x957   :  { %9241 = vmatmul.mubr.bf16.vlgmr.msra.gmra.mxu0 %v5370_v57  ;;  %v9564_v57 = vld [vmem:[%s13146_s6 + $0xa8] ss:$16 sps:$4 sm:$0xff]   ;;  %v9572_v38 = vld [vmem:[%s13146_s6 + $0x8c] ss:$16 sps:$4 sm:$0xff]  }
 0x958   :  { %9280 = vmatprep.mubr.msk.bf16.mxu0 %vm9881_vm1, %v9880_v51  ;;  %9265 = vmatpush3.bf16.msra.mxu0 %v9533_v17  ;;  %v9578_v17 = vld [vmem:[%s13146_s6 + $0x6c] ss:$16 sps:$4 sm:$0xff]  }
 0x959   :  { %9266 = vmatprep.subr.bf16.mxu0 %v9880_v51 }
 0x95c   :  { %9267 = vmatpush3.bf16.msra.mxu0 %v9534_v60  ;;  %v9576_v60 = vld [vmem:[%s13146_s6 + $0x68] ss:$16 sps:$4 sm:$0xff]  }
 0x95d   :  { %9268 = vmatprep.subr.bf16.mxu0 %v9880_v51 }
 0x960   :  { %9269 = vmatpush3.bf16.msra.mxu0 %v9535_v4  ;;  %v9584_v4 = vld [vmem:[%s13146_s6 + $0x4c] ss:$16 sps:$4 sm:$0xff]  }
 0x961   :  { %9270 = vmatprep.subr.bf16.mxu0 %v9880_v51 }
 0x964   :  { %9271 = vmatpush3.bf16.msra.mxu0 %v9536_v61  ;;  %v9582_v61 = vld [vmem:[%s13146_s6 + $0x48] ss:$16 sps:$4 sm:$0xff]  }
 0x965   :  { %9272 = vmatprep.subr.bf16.mxu0 %v9880_v51 }
 0x968   :  { %9273 = vmatpush3.bf16.msra.mxu0 %v9537_v63  ;;  %v9590_v63 = vld [vmem:[%s13146_s6 + $0x2c] ss:$16 sps:$4 sm:$0xff]  }
 0x969   :  { %9274 = vmatprep.subr.bf16.mxu0 %v9880_v51 }
 0x96c   :  { %9275 = vmatpush3.bf16.msra.mxu0 %v9538_v30  ;;  %v9588_v30 = vld [vmem:[%s13146_s6 + $0x28] ss:$16 sps:$4 sm:$0xff]  }
 0x96d   :  { %9276 = vmatprep.subr.bf16.mxu0 %v9880_v51 }
 0x970   :  { %9277 = vmatpush3.bf16.msra.mxu0 %v9539_v26 }
 0x971   :  { %9278 = vmatprep.subr.bf16.mxu0 %v9880_v51 }
 0x974   :  { %9279 = vmatpush3.bf16.msra.mxu0 %v9540_v50 }
 0x975   :  { %6041 = vmatprep.subr.bf16.mxu0 %v9551_v59  ;;  %v12825_v59 = vld [vmem:[#allocation8 + $0x88] ss:$16 sps:$4 sm:$0xff]  }
 0xa17   :  { %v5476_v14 = vpop.f32.mrf.mxu0 }
 0xa18   :  { %v5477_v45 = vadd.f32 %v7339_v29, %v5476_v14  ;;  %v9593_v29 = vld [vmem:[%s13146_s6 + $0x4] ss:$16 sps:$4 sm:$0xff]   ;;  %v9596_v14 = vld [vmem:[%s13146_s6 + $0xc] ss:$16 sps:$4 sm:$0xff]  }
 0xa19   :  { %v9242_v25 = vpop.f32.mrf.mxu0 }
 0xa1a   :  { %v5482_v16 = vpack.c.bf16 %v5477_v45, %v5477_v45  ;;  %v9591_v45 = vld [vmem:[%s13146_s6] ss:$16 sps:$4 sm:$0xff]   ;;  %v9594_v25 = vld [vmem:[%s13146_s6 + $0x8] ss:$16 sps:$4 sm:$0xff]  }
 0xa1b   :  { %v5479_v21 = vpop.f32.mrf.mxu0 }
 0xa1c   :  { %9261 = vmatmul.mubr.bf16.vlgmr.msra.gmra.mxu1 %v5482_v16  ;;  %v12778_v16 = vld [vmem:[#allocation8 + $0xe4] ss:$16 sps:$4 sm:$0xff]   ;;  %v12780_v21 = vld [vmem:[#allocation8 + $0xec] ss:$16 sps:$4 sm:$0xff]  }
 0xa1d   :  { %v9243_v49 = vpop.f32.mrf.mxu0  ;;  %9300 = vmatprep.mubr.msk.bf16.mxu1 %vm9881_vm1, %v9880_v51  ;;  %9285 = vmatpush3.bf16.msra.mxu1 %v9541_v55 }
 0xa1e   :  { %9286 = vmatprep.subr.bf16.mxu1 %v9880_v51  ;;  %v7417_v49 = vld [vmem:[%s13145_s5 + $0x3] ss:$0 sm:$0xff] }
 0xa21   :  { %9287 = vmatpush3.bf16.msra.mxu1 %v9542_v10  ;;  %v12787_v10 = vld [vmem:[#allocation8 + $0xe0] ss:$16 sps:$4 sm:$0xff]  }
 0xa22   :  { %9288 = vmatprep.subr.bf16.mxu1 %v9880_v51 }
 0xa25   :  { %9289 = vmatpush3.bf16.msra.mxu1 %v9543_v56  ;;  %v12789_v56 = vld [vmem:[#allocation8 + $0xe8] ss:$16 sps:$4 sm:$0xff]  }
 0xa26   :  { %9290 = vmatprep.subr.bf16.mxu1 %v9880_v51 }
 0xa29   :  { %9291 = vmatpush3.bf16.msra.mxu1 %v9544_v58 }
 0xa2a   :  { %9292 = vmatprep.subr.bf16.mxu1 %v9880_v51 }
 0xa2d   :  { %9293 = vmatpush3.bf16.msra.mxu1 %v9545_v39  ;;  %v12791_v39 = vld [vmem:[#allocation8 + $0xc4] ss:$16 sps:$4 sm:$0xff]  }
 0xa2e   :  { %9294 = vmatprep.subr.bf16.mxu1 %v9880_v51 }
 0xa31   :  { %9295 = vmatpush3.bf16.msra.mxu1 %v9546_v28  ;;  %v12793_v28 = vld [vmem:[#allocation8 + $0xcc] ss:$16 sps:$4 sm:$0xff]  }
 0xa32   :  { %9296 = vmatprep.subr.bf16.mxu1 %v9880_v51 }
 0xa35   :  { %9297 = vmatpush3.bf16.msra.mxu1 %v9547_v40  ;;  %v12817_v40 = vld [vmem:[#allocation8 + $0x84] ss:$16 sps:$4 sm:$0xff]  }
 0xa36   :  { %9298 = vmatprep.subr.bf16.mxu1 %v9880_v51 }
 0xa39   :  { %9299 = vmatpush3.bf16.msra.mxu1 %v9548_v41  ;;  %v12819_v41 = vld [vmem:[#allocation8 + $0x8c] ss:$16 sps:$4 sm:$0xff]  }
 0xa3a   :  { %6082 = vmatprep.subr.bf16.mxu1 %v9554_v11  ;;  %v12829_v11 = vld [vmem:[#allocation8 + $0x64] ss:$16 sps:$4 sm:$0xff]  }
 0xadc   :  { %v5590_v31 = vpop.f32.mrf.mxu1 }
 0xadd   :  { %v5591_v47 = vadd.f32 %v7365_v36, %v5590_v31 }
 0xade   :  { %v9262_v43 = vpop.f32.mrf.mxu1 }
 0xadf   :  { %v5596_v13 = vmax.f32 %v5591_v47, 0.0  ;;  %v12797_v47 = vld [vmem:[#allocation8 + $0xc0] ss:$16 sps:$4 sm:$0xff]   ;;  %v12799_v43 = vld [vmem:[#allocation8 + $0xc8] ss:$16 sps:$4 sm:$0xff]  }
 0xae0   :  { %v5593_v12 = vpop.f32.mrf.mxu1 }
 0xae1   :  { %v5597_v9 = vpack.c.bf16 %v5596_v13, %v5596_v13  ;;  %v12803_v13 = vld [vmem:[#allocation8 + $0xa4] ss:$16 sps:$4 sm:$0xff]   ;;  %v12805_v12 = vld [vmem:[#allocation8 + $0xac] ss:$16 sps:$4 sm:$0xff]  }
 0xae2   :  { %v9263_v18 = vpop.f32.mrf.mxu1 }
 0xae3   :  { %9281 = vmatmul.mubr.bf16.vlgmr.msra.gmra.mxu0 %v5597_v9  ;;  %v12811_v9 = vld [vmem:[#allocation8 + $0xa0] ss:$16 sps:$4 sm:$0xff]   ;;  %v12813_v18 = vld [vmem:[#allocation8 + $0xa8] ss:$16 sps:$4 sm:$0xff]  }
 0xae4   :  { %6073 = vmatprep.mubr.bf16.mxu0 %v9878_v0  ;;  %6042 = vmatpush1.bf16.msra.mxu0 %v9549_v22  ;;  %v12823_v22 = vld [vmem:[#allocation8 + $0x80] ss:$16 sps:$4 sm:$0xff]  }
 0xae5   :  { %6043 = vmatprep.subr.bf16.mxu0 %v9557_v6  ;;  %v12831_v6 = vld [vmem:[#allocation8 + $0x6c] ss:$16 sps:$4 sm:$0xff]  }
 0xae8   :  { %6044 = vmatpush1.bf16.msra.mxu0 %v9555_v19  ;;  %v12835_v19 = vld [vmem:[#allocation8 + $0x60] ss:$16 sps:$4 sm:$0xff]  }
 0xae9   :  { %6045 = vmatprep.subr.bf16.mxu0 %v9563_v52  ;;  %v12837_v52 = vld [vmem:[#allocation8 + $0x68] ss:$16 sps:$4 sm:$0xff]  }
 0xaec   :  { %6046 = vmatpush1.bf16.msra.mxu0 %v9561_v44  ;;  %v12841_v44 = vld [vmem:[#allocation8 + $0x44] ss:$16 sps:$4 sm:$0xff]  }
 0xaed   :  { %6047 = vmatprep.subr.bf16.mxu0 %v9569_v5  ;;  %v12843_v5 = vld [vmem:[#allocation8 + $0x4c] ss:$16 sps:$4 sm:$0xff]  }
 0xaf0   :  { %6048 = vmatpush1.bf16.msra.mxu0 %v9567_v8  ;;  %v12847_v8 = vld [vmem:[#allocation8 + $0x40] ss:$16 sps:$4 sm:$0xff]  }
 0xaf1   :  { %6049 = vmatprep.subr.bf16.mxu0 %v9575_v2  ;;  %v12849_v2 = vld [vmem:[#allocation8 + $0x48] ss:$16 sps:$4 sm:$0xff]  }
 0xaf4   :  { %6050 = vmatpush1.bf16.msra.mxu0 %v9573_v35  ;;  %v12853_v35 = vld [vmem:[#allocation8 + $0x24] ss:$16 sps:$4 sm:$0xff]  }
 0xaf5   :  { %6051 = vmatprep.subr.bf16.mxu0 %v9581_v48  ;;  %v12855_v48 = vld [vmem:[#allocation8 + $0x2c] ss:$16 sps:$4 sm:$0xff]  }
 0xaf8   :  { %6052 = vmatpush1.bf16.msra.mxu0 %v9579_v27  ;;  %v12859_v27 = vld [vmem:[#allocation8 + $0x20] ss:$16 sps:$4 sm:$0xff]  }
 0xaf9   :  { %6053 = vmatprep.subr.bf16.mxu0 %v9587_v20  ;;  %v12861_v20 = vld [vmem:[#allocation8 + $0x28] ss:$16 sps:$4 sm:$0xff]  }
 0xafc   :  { %6054 = vmatpush1.bf16.msra.mxu0 %v9585_v42  ;;  %v12865_v42 = vld [vmem:[#allocation8 + $0x4] ss:$16 sps:$4 sm:$0xff]  }
 0xafd   :  { %6055 = vmatprep.subr.bf16.mxu0 %v9593_v29  ;;  %v5875_v29 = vsub.s32 3, %v9954_v7 }
 0xb00   :  { %6056 = vmatpush1.bf16.msra.mxu0 %v9591_v45 }
 0xb01   :  { %6315 = vmatprep.subr.bf16.mxu0 %v12778_v16 }
 0xba3   :  { %v5705_v3 = vpop.f32.mrf.mxu0 }
 0xba4   :  { %v5706_v15 = vadd.f32 %v7391_v37, %v5705_v3  ;;  %v12867_v37 = vld [vmem:[#allocation8 + $0xc] ss:$16 sps:$4 sm:$0xff]   ;;  %v12871_v3 = vld [vmem:[#allocation8] ss:$16 sps:$4 sm:$0xff]  }
 0xba5   :  { %v9282_v53 = vpop.f32.mrf.mxu0 }
 0xba6   :  { %v5711_v34 = vmax.f32 %v5706_v15, 0.0  ;;  %v12873_v15 = vld [vmem:[#allocation8 + $0x8] ss:$16 sps:$4 sm:$0xff]  }
 0xba7   :  { %v5708_v46 = vpop.f32.mrf.mxu0 }
 0xba8   :  { %v5712_v1 = vpack.c.bf16 %v5711_v34, %v5711_v34 }
 0xba9   :  { %v9283_v62 = vpop.f32.mrf.mxu0 }
 0xbaa   :  { %9301 = vmatmul.mubr.bf16.vlgmr.msra.gmra.mxu1 %v5712_v1 }
 0xbab   :  { %6083 = vmatpush1.bf16.msra.mxu1 %v9552_v32  ;;  %6114 = vmatprep.mubr.bf16.mxu1 %v9878_v0 }
 0xbac   :  { %6084 = vmatprep.subr.bf16.mxu1 %v9560_v24 }
 0xbaf   :  { %6085 = vmatpush1.bf16.msra.mxu1 %v9558_v33 }
 0xbb0   :  { %6086 = vmatprep.subr.bf16.mxu1 %v9566_v23  ;;  %v5863_v23 = vsub.s32 0, %v9954_v7 }
 0xbb3   :  { %6087 = vmatpush1.bf16.msra.mxu1 %v9564_v57  ;;  %v5859_v57 = vld [vmem:[%s13148_s8] sm:$0xf] }
 0xbb4   :  { %6088 = vmatprep.subr.bf16.mxu1 %v9572_v38  ;;  %v5867_v38 = vsub.s32 1, %v9954_v7 }
 0xbb7   :  { %6089 = vmatpush1.bf16.msra.mxu1 %v9570_v54  ;;  %v5864_v54 = vrot.slane %v5859_v57, %v5863_v23 }
 0xbb8   :  { %6090 = vmatprep.subr.bf16.mxu1 %v9578_v17  ;;  %v5868_v17 = vrot.slane %v5859_v57, %v5867_v38 }
 0xbbb   :  { %6091 = vmatpush1.bf16.msra.mxu1 %v9576_v60 }
 0xbbc   :  { %6092 = vmatprep.subr.bf16.mxu1 %v9584_v4 }
 0xbbf   :  { %6093 = vmatpush1.bf16.msra.mxu1 %v9582_v61 }
 0xbc0   :  { %6094 = vmatprep.subr.bf16.mxu1 %v9590_v63 }
 0xbc3   :  { %6095 = vmatpush1.bf16.msra.mxu1 %v9588_v30 }
 0xbc4   :  { %6096 = vmatprep.subr.bf16.mxu1 %v9596_v14 }
 0xbc7   :  { %6097 = vmatpush1.bf16.msra.mxu1 %v9594_v25 }
 0xbc8   :  { %6356 = vmatprep.subr.bf16.mxu1 %v12780_v21 }
 0xc6a   :  { %v5820_v26 = vpop.f32.mrf.mxu1 }
 0xc6b   :  { %v5821_v50 = vadd.f32 %v7417_v49, %v5820_v26 }
 0xc6c   :  { %v9302_v55 = vpop.f32.mrf.mxu1 }
 0xc6d   :  { %v5826_v58 = vpack.c.bf16 %v5821_v50, %v5821_v50 }
 0xc6e   :  { %v5823_v36 = vpop.f32.mrf.mxu1 }
 0xc6f   :  { %6074 = vmatmul.mubr.bf16.vlgmr.msra.gmra.mxu0 %v5826_v58  ;;  %6115 = vmatmul.mubr.bf16.vlgmr.msra.gmra.mxu1 %v5826_v58  ;;  %v5876_v58 = vrot.slane %v5859_v57, %v5875_v29 }
 0xc70   :  { %6316 = vmatpush1.bf16.msra.mxu0 %v12787_v10  ;;  %6357 = vmatpush1.bf16.msra.mxu1 %v12789_v56  ;;  %v9303_v31 = vpop.f32.mrf.mxu1 }
 0xc71   :  { %6317 = vmatprep.subr.bf16.mxu0 %v12791_v39  ;;  %6358 = vmatprep.subr.bf16.mxu1 %v12793_v28 }
 0xc72   :  { %6347 = vmatprep.mubr.bf16.mxu0 %v9878_v0  ;;  %6388 = vmatprep.mubr.bf16.mxu1 %v9878_v0 }
 0xc74   :  { %6318 = vmatpush1.bf16.msra.mxu0 %v12797_v47  ;;  %6359 = vmatpush1.bf16.msra.mxu1 %v12799_v43 }
 0xc75   :  { %6319 = vmatprep.subr.bf16.mxu0 %v12803_v13  ;;  %6360 = vmatprep.subr.bf16.mxu1 %v12805_v12 }
 0xc78   :  { %6320 = vmatpush1.bf16.msra.mxu0 %v12811_v9  ;;  %6361 = vmatpush1.bf16.msra.mxu1 %v12813_v18 }
 0xc79   :  { %6321 = vmatprep.subr.bf16.mxu0 %v12817_v40  ;;  %6362 = vmatprep.subr.bf16.mxu1 %v12819_v41 }
 0xc7c   :  { %6322 = vmatpush1.bf16.msra.mxu0 %v12823_v22  ;;  %6363 = vmatpush1.bf16.msra.mxu1 %v12825_v59 }
 0xc7d   :  { %6323 = vmatprep.subr.bf16.mxu0 %v12829_v11  ;;  %6364 = vmatprep.subr.bf16.mxu1 %v12831_v6 }
 0xc80   :  { %6324 = vmatpush1.bf16.msra.mxu0 %v12835_v19  ;;  %6365 = vmatpush1.bf16.msra.mxu1 %v12837_v52 }
 0xc81   :  { %6325 = vmatprep.subr.bf16.mxu0 %v12841_v44  ;;  %6366 = vmatprep.subr.bf16.mxu1 %v12843_v5 }
 0xc84   :  { %6326 = vmatpush1.bf16.msra.mxu0 %v12847_v8  ;;  %6367 = vmatpush1.bf16.msra.mxu1 %v12849_v2 }
 0xc85   :  { %6327 = vmatprep.subr.bf16.mxu0 %v12853_v35  ;;  %6368 = vmatprep.subr.bf16.mxu1 %v12855_v48 }
 0xc88   :  { %6328 = vmatpush1.bf16.msra.mxu0 %v12859_v27  ;;  %6369 = vmatpush1.bf16.msra.mxu1 %v12861_v20 }
 0xc89   :  { %6329 = vmatprep.subr.bf16.mxu0 %v12865_v42  ;;  %6370 = vmatprep.subr.bf16.mxu1 %v12867_v37 }
 0xc8c   :  { %6330 = vmatpush1.bf16.msra.mxu0 %v12871_v3  ;;  %6371 = vmatpush1.bf16.msra.mxu1 %v12873_v15 }
 0xc8d   :  { %6427 = vmatprep.subr.bf16.mxu0 %v12778_v16  ;;  %6468 = vmatprep.subr.bf16.mxu1 %v12780_v21 }
 0xc8f   :  { %6348 = vmatmul.mubr.bf16.vlgmr.msra.gmra.mxu0 %v9878_v0  ;;  %6389 = vmatmul.mubr.bf16.vlgmr.msra.gmra.mxu1 %v9878_v0 }
 0xc90   :  { %6428 = vmatpush1.bf16.msra.mxu0 %v12787_v10  ;;  %6469 = vmatpush1.bf16.msra.mxu1 %v12789_v56 }
 0xc91   :  { %6429 = vmatprep.subr.bf16.mxu0 %v12791_v39  ;;  %6470 = vmatprep.subr.bf16.mxu1 %v12793_v28 }
 0xc92   :  { %6459 = vmatprep.mubr.bf16.mxu0 %v9878_v0  ;;  %6500 = vmatprep.mubr.bf16.mxu1 %v9878_v0 }
 0xc94   :  { %6430 = vmatpush1.bf16.msra.mxu0 %v12797_v47  ;;  %6471 = vmatpush1.bf16.msra.mxu1 %v12799_v43 }
 0xc95   :  { %6431 = vmatprep.subr.bf16.mxu0 %v12803_v13  ;;  %6472 = vmatprep.subr.bf16.mxu1 %v12805_v12 }
 0xc98   :  { %6432 = vmatpush1.bf16.msra.mxu0 %v12811_v9  ;;  %6473 = vmatpush1.bf16.msra.mxu1 %v12813_v18 }
 0xc99   :  { %6433 = vmatprep.subr.bf16.mxu0 %v12817_v40  ;;  %6474 = vmatprep.subr.bf16.mxu1 %v12819_v41 }
 0xc9c   :  { %6434 = vmatpush1.bf16.msra.mxu0 %v12823_v22  ;;  %6475 = vmatpush1.bf16.msra.mxu1 %v12825_v59 }
 0xc9d   :  { %6435 = vmatprep.subr.bf16.mxu0 %v12829_v11  ;;  %6476 = vmatprep.subr.bf16.mxu1 %v12831_v6 }
 0xca0   :  { %6436 = vmatpush1.bf16.msra.mxu0 %v12835_v19  ;;  %6477 = vmatpush1.bf16.msra.mxu1 %v12837_v52 }
 0xca1   :  { %6437 = vmatprep.subr.bf16.mxu0 %v12841_v44  ;;  %6478 = vmatprep.subr.bf16.mxu1 %v12843_v5 }
 0xca4   :  { %6438 = vmatpush1.bf16.msra.mxu0 %v12847_v8  ;;  %6479 = vmatpush1.bf16.msra.mxu1 %v12849_v2 }
 0xca5   :  { %6439 = vmatprep.subr.bf16.mxu0 %v12853_v35  ;;  %6480 = vmatprep.subr.bf16.mxu1 %v12855_v48 }
 0xca8   :  { %6440 = vmatpush1.bf16.msra.mxu0 %v12859_v27  ;;  %6481 = vmatpush1.bf16.msra.mxu1 %v12861_v20 }
 0xca9   :  { %6441 = vmatprep.subr.bf16.mxu0 %v12865_v42  ;;  %6482 = vmatprep.subr.bf16.mxu1 %v12867_v37 }
 0xcac   :  { %6442 = vmatpush1.bf16.msra.mxu0 %v12871_v3  ;;  %6483 = vmatpush1.bf16.msra.mxu1 %v12873_v15 }
 0xcad   :  { %6558 = vmatprep.subr.bf16.mxu0 %v12778_v16  ;;  %6599 = vmatprep.subr.bf16.mxu1 %v12780_v21 }
 0xd2f   :  { %v6075_v53 = vpop.f32.mrf.mxu0  ;;  %v6116_v34 = vpop.f32.mrf.mxu1 }
 0xd30   :  { %v12922_v60 = vadd.f32 %v6075_v53, %v5864_v54  ;;  %v5871_v53 = vsub.s32 2, %v9954_v7 }
 0xd31   :  { %v6077_v46 = vpop.f32.mrf.mxu0  ;;  %v6118_v32 = vpop.f32.mrf.mxu1 }
 0xd32   :  { %v12924_v63 = vadd.f32 %v6077_v46, %v5868_v17  ;;  %v12930_v46 = vadd.f32 %v6118_v32, %v5876_v58 }
 0xd33   :  { %v6079_v1 = vpop.f32.mrf.mxu0  ;;  %v6120_v24 = vpop.f32.mrf.mxu1 }
 0xd34   :  { %v5872_v1 = vrot.slane %v5859_v57, %v5871_v53 }
 0xd35   :  { %v6080_v62 = vpop.f32.mrf.mxu0  ;;  %v6121_v33 = vpop.f32.mrf.mxu1 }
 0xd36   :  { %v12933_v62 = vadd.f32 %v6116_v34, %v5872_v1 }
 0xd4f   :  { %v6349_v4 = vpop.f32.mrf.mxu0  ;;  %v6390_v61 = vpop.f32.mrf.mxu1 }
 0xd50   :  { %v6397_v30 = vadd.f32 %v6349_v4, %v12922_v60  ;;  %v6399_v38 = vadd.f32 %v6390_v61, %v12933_v62 }
 0xd51   :  { %v6351_v14 = vpop.f32.mrf.mxu0  ;;  %v6392_v45 = vpop.f32.mrf.mxu1 }
 0xd52   :  { %v7490_v25 = vmul.f32 -1.442695, %v6397_v30  ;;  %v6398_v49 = vadd.f32 %v6351_v14, %v12924_v63  ;;  %v6400_v24 = vadd.f32 %v6392_v45, %v12930_v46 }
 0xd53   :  { %v6353_v26 = vpop.f32.mrf.mxu0  ;;  %v6394_v50 = vpop.f32.mrf.mxu1 }
 0xd54   :  { %9669 = vpow2.f32 %v7490_v25  ;;  %v7491_v55 = vmul.f32 -1.442695, %v6398_v49  ;;  %v7492_v33 = vmul.f32 -1.442695, %v6400_v24 }
 0xd55   :  { %v6354_v36 = vpop.f32.mrf.mxu0  ;;  %v6395_v31 = vpop.f32.mrf.mxu1 }
 0xd56   :  { %9671 = vpow2.f32 %v7491_v55 }
 0xd57   :  { %9673 = vpow2.f32 %v7492_v33 }
 0xd61   :  { %v9670_v23 = vpop.eup %9669 }
 0xd62   :  { %v6404_v54 = vadd.f32 1.0, %v9670_v23 }
 0xd63   :  { %v9672_v17 = vpop.eup %9671 }
 0xd64   :  { %9675 = vrcp.f32 %v6404_v54  ;;  %v6410_v4 = vadd.f32 1.0, %v9672_v17  ;;  %v9674_v30 = vpop.eup %9673 }
 0xd65   :  { %9677 = vtanh.f32 %v6399_v38  ;;  %v6417_v57 = vadd.f32 1.0, %v9674_v30 }
 0xd66   :  { %9679 = vrcp.f32 %v6410_v4 }
 0xd67   :  { %9681 = vrcp.f32 %v6417_v57 }
 0xd71   :  { %v9676_v7 = vpop.eup %9675 }
 0xd72   :  { %v9678_v32 = vpop.eup %9677 }
 0xd73   :  { %v9680_v29 = vpop.eup %9679  ;;  %v6421_v45 = vmul.f32 %v9678_v32, %v9676_v7 }
 0xd74   :  { %v6420_v14 = vmul.f32 0.0, %v9680_v29  ;;  %v9682_v61 = vpop.eup %9681 }
 0xd76   :  { %v12936_v34 = vadd.f32 %v6421_v45, %v6420_v14 }
 0xd78   :  { %9683 = vtanh.f32 %v12936_v34 }
 0xd85   :  { %v9684_v25 = vpop.eup %9683 }
 0xd86   :  { %v6424_v49 = vmul.f32 %v9684_v25, %v9682_v61 }
 0xd88   :  { %6425 = vst [vmem:[#allocation2] sm:$0x1] %v6424_v49  ;;  %v6426_v26 = vpack.c.bf16 %v6424_v49, %v6424_v49 }
 0xd8a   :  { %6460 = vmatmul.mubr.bf16.vlgmr.msra.gmra.mxu0 %v6426_v26  ;;  %6501 = vmatmul.mubr.bf16.vlgmr.msra.gmra.mxu1 %v6426_v26  ;;  %v6545_v26 = vrot.slane %v12936_v34, 7 }
 0xd8b   :  { %6559 = vmatpush1.bf16.msra.mxu0 %v12787_v10  ;;  %6600 = vmatpush1.bf16.msra.mxu1 %v12789_v56 }
 0xd8c   :  { %6560 = vmatprep.subr.bf16.mxu0 %v12791_v39  ;;  %6601 = vmatprep.subr.bf16.mxu1 %v12793_v28 }
 0xd8d   :  { %6590 = vmatprep.mubr.bf16.mxu0 %v9878_v0  ;;  %6631 = vmatprep.mubr.bf16.mxu1 %v9878_v0 }
 0xd8f   :  { %6561 = vmatpush1.bf16.msra.mxu0 %v12797_v47  ;;  %6602 = vmatpush1.bf16.msra.mxu1 %v12799_v43 }
 0xd90   :  { %6562 = vmatprep.subr.bf16.mxu0 %v12803_v13  ;;  %6603 = vmatprep.subr.bf16.mxu1 %v12805_v12 }
 0xd93   :  { %6563 = vmatpush1.bf16.msra.mxu0 %v12811_v9  ;;  %6604 = vmatpush1.bf16.msra.mxu1 %v12813_v18 }
 0xd94   :  { %6564 = vmatprep.subr.bf16.mxu0 %v12817_v40  ;;  %6605 = vmatprep.subr.bf16.mxu1 %v12819_v41 }
 0xd97   :  { %6565 = vmatpush1.bf16.msra.mxu0 %v12823_v22  ;;  %6606 = vmatpush1.bf16.msra.mxu1 %v12825_v59 }
 0xd98   :  { %6566 = vmatprep.subr.bf16.mxu0 %v12829_v11  ;;  %6607 = vmatprep.subr.bf16.mxu1 %v12831_v6 }
 0xd9b   :  { %6567 = vmatpush1.bf16.msra.mxu0 %v12835_v19  ;;  %6608 = vmatpush1.bf16.msra.mxu1 %v12837_v52 }
 0xd9c   :  { %6568 = vmatprep.subr.bf16.mxu0 %v12841_v44  ;;  %6609 = vmatprep.subr.bf16.mxu1 %v12843_v5 }
 0xd9f   :  { %6569 = vmatpush1.bf16.msra.mxu0 %v12847_v8  ;;  %6610 = vmatpush1.bf16.msra.mxu1 %v12849_v2 }
 0xda0   :  { %6570 = vmatprep.subr.bf16.mxu0 %v12853_v35  ;;  %6611 = vmatprep.subr.bf16.mxu1 %v12855_v48 }
 0xda3   :  { %6571 = vmatpush1.bf16.msra.mxu0 %v12859_v27  ;;  %6612 = vmatpush1.bf16.msra.mxu1 %v12861_v20 }
 0xda4   :  { %6572 = vmatprep.subr.bf16.mxu0 %v12865_v42  ;;  %6613 = vmatprep.subr.bf16.mxu1 %v12867_v37 }
 0xda7   :  { %6573 = vmatpush1.bf16.msra.mxu0 %v12871_v3  ;;  %6614 = vmatpush1.bf16.msra.mxu1 %v12873_v15 }
 0xda8   :  { %6688 = vmatprep.subr.bf16.mxu0 %v12778_v16  ;;  %6729 = vmatprep.subr.bf16.mxu1 %v12780_v21 }
 0xe4a   :  { %v6461_v50 = vpop.f32.mrf.mxu0  ;;  %v6502_v55 = vpop.f32.mrf.mxu1 }
 0xe4b   :  { %v6513_v58 = vrot.slane %v6461_v50, 7  ;;  %v6515_v30 = vrot.slane %v6502_v55, 7 }
 0xe4c   :  { %v6463_v36 = vpop.f32.mrf.mxu0  ;;  %v6504_v31 = vpop.f32.mrf.mxu1 }
 0xe4d   :  { %v6521_v53 = vadd.f32 %v6513_v58, %v12922_v60  ;;  %v6514_v1 = vrot.slane %v6463_v36, 7  ;;  %v6516_v16 = vrot.slane %v6504_v31, 7  ;;  %v6523_v29 = vadd.f32 %v6515_v30, %v12933_v62  ;;  %v9646_v30 = vld [vmem:[%s13144_s4 + $0x130] sm:$0xff]  }
 0xe4e   :  { %v6465_v24 = vpop.f32.mrf.mxu0  ;;  %v6506_v33 = vpop.f32.mrf.mxu1 }
 0xe4f   :  { %v7493_v23 = vmul.f32 -1.442695, %v6521_v53  ;;  %v6522_v38 = vadd.f32 %v6514_v1, %v12924_v63  ;;  %v6524_v21 = vadd.f32 %v6516_v16, %v12930_v46 }
 0xe50   :  { %v6466_v54 = vpop.f32.mrf.mxu0  ;;  %v6507_v17 = vpop.f32.mrf.mxu1 }
 0xe51   :  { %9685 = vpow2.f32 %v7493_v23  ;;  %v7494_v4 = vmul.f32 -1.442695, %v6522_v38  ;;  %v7495_v7 = vmul.f32 -1.442695, %v6524_v21  ;;  %v9645_v21 = vld [vmem:[%s13144_s4 + $0x138] sm:$0xff]  }
 0xe53   :  { %9687 = vpow2.f32 %v7494_v4 }
 0xe54   :  { %9689 = vpow2.f32 %v7495_v7  ;;  %v9647_v7 = vld [vmem:[%s13144_s4 + $0x128] sm:$0xff]  }
 0xe5e   :  { %v9686_v32 = vpop.eup %9685 }
 0xe5f   :  { %v6528_v57 = vadd.f32 1.0, %v9686_v32  ;;  %v9648_v32 = vld [vmem:[%s13144_s4 + $0x120] sm:$0xff]  }
 0xe60   :  { %v9688_v14 = vpop.eup %9687 }
 0xe61   :  { %9691 = vrcp.f32 %v6528_v57  ;;  %v6534_v45 = vadd.f32 1.0, %v9688_v14  ;;  %v9690_v61 = vpop.eup %9689  ;;  %v9650_v57 = vld [vmem:[%s13144_s4 + $0x110] sm:$0xff]   ;;  %v9651_v14 = vld [vmem:[%s13144_s4 + $0x108] sm:$0xff]  }
 0xe62   :  { %9693 = vtanh.f32 %v6523_v29  ;;  %v6541_v58 = vadd.f32 1.0, %v9690_v61  ;;  %v9649_v29 = vld [vmem:[%s13144_s4 + $0x118] sm:$0xff]  }
 0xe63   :  { %9695 = vrcp.f32 %v6534_v45  ;;  %v9652_v45 = vld [vmem:[%s13144_s4 + $0x100] sm:$0xff]   ;;  %v9653_v61 = vld [vmem:[%s13144_s4 + $0x178] sm:$0xff]  }
 0xe64   :  { %9697 = vrcp.f32 %v6541_v58  ;;  %v9658_v58 = vld [vmem:[%s13144_s4 + $0x150] sm:$0xff]  }
 0xe6e   :  { %v9692_v25 = vpop.eup %9691 }
 0xe6f   :  { %v9694_v49 = vpop.eup %9693 }
 0xe70   :  { %v9696_v50 = vpop.eup %9695  ;;  %v6548_v36 = vmul.f32 %v9694_v49, %v9692_v25  ;;  %v9654_v25 = vld [vmem:[%s13144_s4 + $0x170] sm:$0xff]   ;;  %v9655_v49 = vld [vmem:[%s13144_s4 + $0x168] sm:$0xff]  }
 0xe71   :  { %v6547_v55 = vmul.f32 %v9696_v50, %v6545_v26  ;;  %v9698_v53 = vpop.eup %9697  ;;  %v9656_v26 = vld [vmem:[%s13144_s4 + $0x160] sm:$0xff]   ;;  %v9657_v50 = vld [vmem:[%s13144_s4 + $0x158] sm:$0xff]  }
 0xe73   :  { %v12978_v31 = vadd.f32 %v6548_v36, %v6547_v55 }
 0xe75   :  { %9699 = vtanh.f32 %v12978_v31 }
 0xe82   :  { %v9700_v1 = vpop.eup %9699 }
 0xe83   :  { %v6551_v24 = vmul.f32 %v9700_v1, %v9698_v53 }
 0xe85   :  { %6552 = vst [vmem:[#allocation2] sm:$0x2] %v6551_v24  ;;  %v6553_v33 = vpack.c.bf16 %v6551_v24, %v6551_v24 }
 0xe87   :  { %v6555_v23 = vshrl.u32 %v6553_v33, 16 }
 0xe89   :  { %6591 = vmatmul.mubr.bf16.vlgmr.msra.gmra.mxu0 %v6555_v23  ;;  %6632 = vmatmul.mubr.bf16.vlgmr.msra.gmra.mxu1 %v6555_v23 }
 0xe8a   :  { %6689 = vmatpush1.bf16.msra.mxu0 %v12787_v10  ;;  %6730 = vmatpush1.bf16.msra.mxu1 %v12789_v56 }
 0xe8b   :  { %6690 = vmatprep.subr.bf16.mxu0 %v12791_v39  ;;  %6731 = vmatprep.subr.bf16.mxu1 %v12793_v28 }
 0xe8c   :  { %6720 = vmatprep.mubr.bf16.mxu0 %v9878_v0  ;;  %6761 = vmatprep.mubr.bf16.mxu1 %v9878_v0 }
 0xe8e   :  { %6691 = vmatpush1.bf16.msra.mxu0 %v12797_v47  ;;  %6732 = vmatpush1.bf16.msra.mxu1 %v12799_v43 }
 0xe8f   :  { %6692 = vmatprep.subr.bf16.mxu0 %v12803_v13  ;;  %6733 = vmatprep.subr.bf16.mxu1 %v12805_v12 }
 0xe92   :  { %6693 = vmatpush1.bf16.msra.mxu0 %v12811_v9  ;;  %6734 = vmatpush1.bf16.msra.mxu1 %v12813_v18 }
 0xe93   :  { %6694 = vmatprep.subr.bf16.mxu0 %v12817_v40  ;;  %6735 = vmatprep.subr.bf16.mxu1 %v12819_v41 }
 0xe96   :  { %6695 = vmatpush1.bf16.msra.mxu0 %v12823_v22  ;;  %6736 = vmatpush1.bf16.msra.mxu1 %v12825_v59 }
 0xe97   :  { %6696 = vmatprep.subr.bf16.mxu0 %v12829_v11  ;;  %6737 = vmatprep.subr.bf16.mxu1 %v12831_v6 }
 0xe9a   :  { %6697 = vmatpush1.bf16.msra.mxu0 %v12835_v19  ;;  %6738 = vmatpush1.bf16.msra.mxu1 %v12837_v52 }
 0xe9b   :  { %6698 = vmatprep.subr.bf16.mxu0 %v12841_v44  ;;  %6739 = vmatprep.subr.bf16.mxu1 %v12843_v5 }
 0xe9e   :  { %6699 = vmatpush1.bf16.msra.mxu0 %v12847_v8  ;;  %6740 = vmatpush1.bf16.msra.mxu1 %v12849_v2 }
 0xe9f   :  { %6700 = vmatprep.subr.bf16.mxu0 %v12853_v35  ;;  %6741 = vmatprep.subr.bf16.mxu1 %v12855_v48 }
 0xea2   :  { %6701 = vmatpush1.bf16.msra.mxu0 %v12859_v27  ;;  %6742 = vmatpush1.bf16.msra.mxu1 %v12861_v20  ;;  %v6676_v20 = vrot.slane %v12978_v31, 7 }
 0xea3   :  { %6702 = vmatprep.subr.bf16.mxu0 %v12865_v42  ;;  %6743 = vmatprep.subr.bf16.mxu1 %v12867_v37 }
 0xea6   :  { %6703 = vmatpush1.bf16.msra.mxu0 %v12871_v3  ;;  %6744 = vmatpush1.bf16.msra.mxu1 %v12873_v15 }
 0xea7   :  { %9304 = vmatprep.subr.bf16.mxu0 %v9880_v51  ;;  %9324 = vmatprep.subr.bf16.mxu1 %v9880_v51 }
 0xf49   :  { %v6592_v0 = vpop.f32.mrf.mxu0  ;;  %v6633_v10 = vpop.f32.mrf.mxu1 }
 0xf4a   :  { %v6644_v56 = vrot.slane %v6592_v0, 6  ;;  %v6646_v6 = vrot.slane %v6633_v10, 6 }
 0xf4b   :  { %v6594_v39 = vpop.f32.mrf.mxu0  ;;  %v6635_v28 = vpop.f32.mrf.mxu1 }
 0xf4c   :  { %v6652_v47 = vadd.f32 %v6644_v56, %v12922_v60  ;;  %v6645_v43 = vrot.slane %v6594_v39, 6  ;;  %v6647_v59 = vrot.slane %v6635_v28, 6  ;;  %v6654_v44 = vadd.f32 %v6646_v6, %v12933_v62 }
 0xf4d   :  { %v6596_v13 = vpop.f32.mrf.mxu0  ;;  %v6637_v12 = vpop.f32.mrf.mxu1 }
 0xf4e   :  { %v7496_v9 = vmul.f32 -1.442695, %v6652_v47  ;;  %v6653_v18 = vadd.f32 %v6645_v43, %v12924_v63  ;;  %v6655_v11 = vadd.f32 %v6647_v59, %v12930_v46 }
 0xf4f   :  { %v6597_v40 = vpop.f32.mrf.mxu0  ;;  %v6638_v41 = vpop.f32.mrf.mxu1 }
 0xf50   :  { %9701 = vpow2.f32 %v7496_v9  ;;  %v7497_v22 = vmul.f32 -1.442695, %v6653_v18  ;;  %v7498_v19 = vmul.f32 -1.442695, %v6655_v11 }
 0xf52   :  { %9703 = vpow2.f32 %v7497_v22 }
 0xf53   :  { %9705 = vpow2.f32 %v7498_v19 }
 0xf5d   :  { %v9702_v52 = vpop.eup %9701 }
 0xf5e   :  { %v6659_v5 = vadd.f32 1.0, %v9702_v52 }
 0xf5f   :  { %v9704_v8 = vpop.eup %9703 }
 0xf60   :  { %9707 = vrcp.f32 %v6659_v5  ;;  %v6665_v2 = vadd.f32 1.0, %v9704_v8  ;;  %v9706_v35 = vpop.eup %9705 }
 0xf61   :  { %9709 = vtanh.f32 %v6654_v44  ;;  %v6672_v37 = vadd.f32 1.0, %v9706_v35 }
 0xf62   :  { %9711 = vrcp.f32 %v6665_v2 }
 0xf63   :  { %9713 = vrcp.f32 %v6672_v37  ;;  %v9662_v37 = vld [vmem:[%s13144_s4 + $0x1b0] sm:$0xff]  }
 0xf6d   :  { %v9708_v48 = vpop.eup %9707 }
 0xf6e   :  { %v9710_v27 = vpop.eup %9709 }
 0xf6f   :  { %v9712_v42 = vpop.eup %9711  ;;  %v6679_v3 = vmul.f32 %v9710_v27, %v9708_v48  ;;  %v9659_v27 = vld [vmem:[%s13144_s4 + $0x148] sm:$0xff]  }
 0xf70   :  { %v6678_v15 = vmul.f32 %v9712_v42, %v6676_v20  ;;  %v9714_v38 = vpop.eup %9713  ;;  %v9660_v20 = vld [vmem:[%s13144_s4 + $0x140] sm:$0xff]   ;;  %v9661_v42 = vld [vmem:[%s13144_s4 + $0x1b8] sm:$0xff]  }
 0xf72   :  { %v13020_v34 = vadd.f32 %v6679_v3, %v6678_v15  ;;  %v9663_v3 = vld [vmem:[%s13144_s4 + $0x1a8] sm:$0xff]   ;;  %v9664_v15 = vld [vmem:[%s13144_s4 + $0x1a0] sm:$0xff]  }
 0xf74   :  { %9715 = vtanh.f32 %v13020_v34  ;;  %v6806_v6 = vrot.slane %v13020_v34, 7  ;;  %v9665_v34 = vld [vmem:[%s13144_s4 + $0x198] sm:$0xff]  }
 0xf81   :  { %v9716_v54 = vpop.eup %9715 }
 0xf82   :  { %v6682_v17 = vmul.f32 %v9716_v54, %v9714_v38  ;;  %v9666_v38 = vld [vmem:[%s13144_s4 + $0x190] sm:$0xff]   ;;  %v7519_v54 = vld [vmem:[%s13145_s5 + $0x4] ss:$0 sm:$0xff] }
 0xf84   :  { %6683 = vst [vmem:[#allocation2] sm:$0x4] %v6682_v17  ;;  %v6684_v4 = vpack.c.bf16 %v6682_v17, %v6682_v17 }
 0xf86   :  { %v6686_v16 = vrot.slane %v6684_v4, 1 }
 0xf88   :  { %6721 = vmatmul.mubr.bf16.vlgmr.msra.gmra.mxu0 %v6686_v16  ;;  %6762 = vmatmul.mubr.bf16.vlgmr.msra.gmra.mxu1 %v6686_v16 }
 0xf89   :  { %9320 = vmatprep.mubr.msk.bf16.mxu0 %vm9881_vm1, %v9880_v51  ;;  %9340 = vmatprep.mubr.msk.bf16.mxu1 %vm9881_vm1, %v9880_v51 }
 0xf8a   :  { %9305 = vmatpush3.bf16.msra.mxu0 %v9645_v21  ;;  %9325 = vmatpush3.bf16.msra.mxu1 %v9653_v61 }
 0xf8b   :  { %9306 = vmatprep.subr.bf16.mxu0 %v9880_v51  ;;  %9326 = vmatprep.subr.bf16.mxu1 %v9880_v51 }
 0xf8e   :  { %9307 = vmatpush3.bf16.msra.mxu0 %v9646_v30  ;;  %9327 = vmatpush3.bf16.msra.mxu1 %v9654_v25 }
 0xf8f   :  { %9308 = vmatprep.subr.bf16.mxu0 %v9880_v51  ;;  %9328 = vmatprep.subr.bf16.mxu1 %v9880_v51 }
 0xf92   :  { %9309 = vmatpush3.bf16.msra.mxu0 %v9647_v7  ;;  %9329 = vmatpush3.bf16.msra.mxu1 %v9655_v49 }
 0xf93   :  { %9310 = vmatprep.subr.bf16.mxu0 %v9880_v51  ;;  %9330 = vmatprep.subr.bf16.mxu1 %v9880_v51 }
 0xf96   :  { %9311 = vmatpush3.bf16.msra.mxu0 %v9648_v32  ;;  %9331 = vmatpush3.bf16.msra.mxu1 %v9656_v26 }
 0xf97   :  { %9312 = vmatprep.subr.bf16.mxu0 %v9880_v51  ;;  %9332 = vmatprep.subr.bf16.mxu1 %v9880_v51 }
 0xf9a   :  { %9313 = vmatpush3.bf16.msra.mxu0 %v9649_v29  ;;  %9333 = vmatpush3.bf16.msra.mxu1 %v9657_v50  ;;  %v9667_v29 = vld [vmem:[%s13144_s4 + $0x188] sm:$0xff]  }
 0xf9b   :  { %9314 = vmatprep.subr.bf16.mxu0 %v9880_v51  ;;  %9334 = vmatprep.subr.bf16.mxu1 %v9880_v51 }
 0xf9e   :  { %9315 = vmatpush3.bf16.msra.mxu0 %v9650_v57  ;;  %9335 = vmatpush3.bf16.msra.mxu1 %v9658_v58  ;;  %v9668_v57 = vld [vmem:[%s13144_s4 + $0x180] sm:$0xff]  }
 0xf9f   :  { %9316 = vmatprep.subr.bf16.mxu0 %v9880_v51  ;;  %9336 = vmatprep.subr.bf16.mxu1 %v9880_v51 }
 0xfa2   :  { %9317 = vmatpush3.bf16.msra.mxu0 %v9651_v14  ;;  %9337 = vmatpush3.bf16.msra.mxu1 %v9659_v27  ;;  %v7545_v14 = vld [vmem:[%s13145_s5 + $0x5] ss:$0 sm:$0xff] }
 0xfa3   :  { %9318 = vmatprep.subr.bf16.mxu0 %v9880_v51  ;;  %9338 = vmatprep.subr.bf16.mxu1 %v9880_v51 }
 0xfa6   :  { %9319 = vmatpush3.bf16.msra.mxu0 %v9652_v45  ;;  %9339 = vmatpush3.bf16.msra.mxu1 %v9660_v20 }
 0xfa7   :  { %9344 = vmatprep.subr.bf16.mxu0 %v9880_v51 }
0x1048   :  { %v6722_v36 = vpop.f32.mrf.mxu0  ;;  %v6763_v55 = vpop.f32.mrf.mxu1 }
0x1049   :  { %v6774_v31 = vrot.slane %v6722_v36, 5  ;;  %v6776_v12 = vrot.slane %v6763_v55, 5 }
0x104a   :  { %v6724_v53 = vpop.f32.mrf.mxu0  ;;  %v6765_v1 = vpop.f32.mrf.mxu1 }
0x104b   :  { %v6782_v24 = vadd.f32 %v6774_v31, %v12922_v60  ;;  %v6775_v33 = vrot.slane %v6724_v53, 5  ;;  %v6777_v43 = vrot.slane %v6765_v1, 5  ;;  %v6784_v40 = vadd.f32 %v6776_v12, %v12933_v62 }
0x104c   :  { %v6726_v23 = vpop.f32.mrf.mxu0  ;;  %v6767_v0 = vpop.f32.mrf.mxu1 }
0x104d   :  { %v7499_v10 = vmul.f32 -1.442695, %v6782_v24  ;;  %v6783_v56 = vadd.f32 %v6775_v33, %v12924_v63  ;;  %v6785_v13 = vadd.f32 %v6777_v43, %v12930_v46 }
0x104e   :  { %v6727_v39 = vpop.f32.mrf.mxu0  ;;  %v6768_v28 = vpop.f32.mrf.mxu1 }
0x104f   :  { %9717 = vpow2.f32 %v7499_v10  ;;  %v7500_v47 = vmul.f32 -1.442695, %v6783_v56  ;;  %v7501_v9 = vmul.f32 -1.442695, %v6785_v13 }
0x1051   :  { %9719 = vpow2.f32 %v7500_v47 }
0x1052   :  { %9721 = vpow2.f32 %v7501_v9 }
0x105c   :  { %v9718_v18 = vpop.eup %9717 }
0x105d   :  { %v6789_v60 = vadd.f32 1.0, %v9718_v18 }
0x105e   :  { %v9720_v41 = vpop.eup %9719 }
0x105f   :  { %9723 = vrcp.f32 %v6789_v60  ;;  %v6795_v22 = vadd.f32 1.0, %v9720_v41  ;;  %v9722_v63 = vpop.eup %9721 }
0x1060   :  { %9725 = vtanh.f32 %v6784_v40  ;;  %v6802_v52 = vadd.f32 1.0, %v9722_v63 }
0x1061   :  { %9727 = vrcp.f32 %v6795_v22 }
0x1062   :  { %9729 = vrcp.f32 %v6802_v52 }
0x106c   :  { %v9724_v59 = vpop.eup %9723 }
0x106d   :  { %v9726_v11 = vpop.eup %9725 }
0x106e   :  { %v9728_v19 = vpop.eup %9727  ;;  %v6809_v46 = vmul.f32 %v9726_v11, %v9724_v59 }
0x106f   :  { %v6808_v44 = vmul.f32 %v9728_v19, %v6806_v6  ;;  %v9730_v62 = vpop.eup %9729 }
0x1071   :  { %v6810_v5 = vadd.f32 %v6809_v46, %v6808_v44 }
0x1073   :  { %9731 = vtanh.f32 %v6810_v5 }
0x1080   :  { %v9732_v8 = vpop.eup %9731 }
0x1081   :  { %v6812_v2 = vmul.f32 %v9732_v8, %v9730_v62 }
0x1083   :  { %6813 = vst [vmem:[#allocation2] sm:$0x8] %v6812_v2 }
0x108a   :  { %v6814_v35 = vld [vmem:[#allocation2] sm:$0xf] }
0x108b   :  { %v6815_v48 = vpack.c.bf16 %v6814_v35, %v6814_v35 }
0x108d   :  { %9321 = vmatmul.mubr.bf16.vlgmr.msra.gmra.mxu0 %v6815_v48 }
0x108e   :  { %9360 = vmatprep.mubr.msk.bf16.mxu0 %vm9881_vm1, %v9880_v51  ;;  %9345 = vmatpush3.bf16.msra.mxu0 %v9661_v42 }
0x108f   :  { %9346 = vmatprep.subr.bf16.mxu0 %v9880_v51 }
0x1092   :  { %9347 = vmatpush3.bf16.msra.mxu0 %v9662_v37 }
0x1093   :  { %9348 = vmatprep.subr.bf16.mxu0 %v9880_v51 }
0x1096   :  { %9349 = vmatpush3.bf16.msra.mxu0 %v9663_v3 }
0x1097   :  { %9350 = vmatprep.subr.bf16.mxu0 %v9880_v51 }
0x109a   :  { %9351 = vmatpush3.bf16.msra.mxu0 %v9664_v15 }
0x109b   :  { %9352 = vmatprep.subr.bf16.mxu0 %v9880_v51 }
0x109e   :  { %9353 = vmatpush3.bf16.msra.mxu0 %v9665_v34 }
0x109f   :  { %9354 = vmatprep.subr.bf16.mxu0 %v9880_v51 }
0x10a2   :  { %9355 = vmatpush3.bf16.msra.mxu0 %v9666_v38 }
0x10a3   :  { %9356 = vmatprep.subr.bf16.mxu0 %v9880_v51 }
0x10a6   :  { %9357 = vmatpush3.bf16.msra.mxu0 %v9667_v29 }
0x10a7   :  { %9358 = vmatprep.subr.bf16.mxu0 %v9880_v51  ;;  %v7571_v51 = vld [vmem:[%s13145_s5 + $0x6] ss:$0 sm:$0xff] }
0x10aa   :  { %9359 = vmatpush3.bf16.msra.mxu0 %v9668_v57 }
0x114d   :  { %v6923_v17 = vpop.f32.mrf.mxu0 }
0x114e   :  { %v6924_v4 = vadd.f32 %v7519_v54, %v6923_v17 }
0x114f   :  { %v9322_v16 = vpop.f32.mrf.mxu0 }
0x1150   :  { %v6929_v21 = vmax.f32 %v6924_v4, 0.0 }
0x1151   :  { %v6926_v30 = vpop.f32.mrf.mxu0 }
0x1152   :  { %v6930_v7 = vpack.c.bf16 %v6929_v21, %v6929_v21 }
0x1153   :  { %v9323_v32 = vpop.f32.mrf.mxu0 }
0x1154   :  { %9341 = vmatmul.mubr.bf16.vlgmr.msra.gmra.mxu1 %v6930_v7 }
0x1214   :  { %v7038_v45 = vpop.f32.mrf.mxu1 }
0x1215   :  { %v7039_v61 = vadd.f32 %v7545_v14, %v7038_v45 }
0x1216   :  { %v9342_v25 = vpop.f32.mrf.mxu1 }
0x1217   :  { %v7044_v49 = vmax.f32 %v7039_v61, 0.0 }
0x1218   :  { %v7041_v26 = vpop.f32.mrf.mxu1 }
0x1219   :  { %v7045_v50 = vpack.c.bf16 %v7044_v49, %v7044_v49 }
0x121a   :  { %v9343_v58 = vpop.f32.mrf.mxu1 }
0x121b   :  { %9361 = vmatmul.mubr.bf16.vlgmr.msra.gmra.mxu0 %v7045_v50 }
0x12db   :  { %v7153_v36 = vpop.f32.mrf.mxu0 }
0x12dc   :  { %v7154_v55 = vadd.f32 %v7571_v51, %v7153_v36 }
0x12dd   :  { %v9362_v31 = vpop.f32.mrf.mxu0 }
0x12de   :  { %7160 = vst.msk [vmem:[%s13149_s9] sm:$0xf] %vm7159_vm2, %v7154_v55 }
0x12df   :  { %v7156_v53 = vpop.f32.mrf.mxu0 }
0x12e1   :  { %v9363_v1 = vpop.f32.mrf.mxu0 }
0x12e2   :  { %7165 = vsyncpa [#allocation4], 1 }
0x12e3   :  { %7166 = vsyncpa [#allocation6], 1 }
0x12e4   :  { %7167 = vsyncpa [#allocation9], 1 }

</bundles_post_ra>
